<compile_context>
chip_gen: v5e
topology: v5e:2x2
jax: 0.10.0
libtpu: 0.0.40
codegen_flags: <defaults>
</compile_context>

<pallas_src>
import math

import jax
import jax.numpy as jnp
import numpy as np
from jax.experimental import pallas as pl
from jax.experimental.pallas import tpu as pltpu

EMB = 128            # embedding dim
HID = 64             # LSTM hidden per direction
HH = 2 * HID         # 128 = fused (fwd|bwd) hidden width
NUM_LAYERS = 2
NUM_DIRS = 2
LANE = 128


# ----------------------------------------------------------------------------
# Fully fused forward kernel
# ----------------------------------------------------------------------------
def fused_forward_kernel(tok_ref, emb_ref,
                         w0_ref, bias0_ref, hh0_ref,
                         w1_hbm, bias1_ref, hh1_hbm, wp_hbm, bp_ref,
                         out_ref,
                         wxfull, wxs, yc, obf, w1_v, hh1_v, wp_v, sems):
    # tok   : [S*B, 1] int32 time-major flattened token ids
    # emb   : [VPAD, EMB]    zero-padded embedding table
    # wX    : [Din, 8*HH]    fused (a|b) gate-interleaved input projections
    # biasX : [1, 8*HH]      combined bias in the first 4*HH columns, 0 after
    # hhX   : [HH, 4*HH]     gate-interleaved block-diag recurrent weights
    # wp    : [HH, OPAD], bp : [1, OPAD]
    # out   : [B, OPAD]
    SB, HH_ = yc.shape
    B = out_ref.shape[0]
    S = SB // B
    H_ = HH_ // 2
    G = 4 * HH_
    f32 = jnp.float32

    # (0) kick off layer-1 / predict weight DMAs; overlapped with layer-0 work.
    cp_w1 = pltpu.make_async_copy(w1_hbm, w1_v, sems.at[0])
    cp_hh1 = pltpu.make_async_copy(hh1_hbm, hh1_v, sems.at[1])
    cp_wp = pltpu.make_async_copy(wp_hbm, wp_v, sems.at[2])
    cp_w1.start()
    cp_hh1.start()
    cp_wp.start()

    # (1) in-kernel embedding lookup as one-hot @ table (exact in f32).
    # TODO(synk): for a large vocab switch to a DMA row-gather driven by
    #             scalar-prefetched token ids instead of the one-hot matmul.
    tok = tok_ref[...]                                          # [SB, 1] int32
    vpad = emb_ref.shape[0]
    lane_ids = jax.lax.broadcasted_iota(jnp.int32, (SB, vpad), 1)
    onehot = (lane_ids == tok).astype(f32)                      # [SB, VPAD]
    x0 = jnp.dot(onehot, emb_ref[...], preferred_element_type=f32)  # [SB, EMB]

    def run_layer(x, w_ref, bias_ref, hh_ref):
        # (a) ONE batched projection matmul for all timesteps & both directions:
        #     columns 0:G   = fwd-time ("a") projection (+bias),
        #     columns G:2G  = reversed-time ("b") projection.
        wxfull[...] = (jnp.dot(x, w_ref[...], preferred_element_type=f32)
                       + bias_ref[...])
        # (b) pre-combine per-step gate pre-activations so the serial chain
        #     below only contains h @ W_hh.
        for s in range(S):
            wxs[pl.ds(s * B, B), :] = (
                wxfull[pl.ds(s * B, B), 0:G]
                + wxfull[pl.ds((S - 1 - s) * B, B), G:2 * G])
        # (c) fused bidirectional recurrence (statically unrolled; S is small).
        #     Gate columns interleaved [i_f i_b | f_f f_b | g_f g_b | o_f o_b];
        #     every gate slice is 128-lane wide and 128-aligned.
        h = jnp.zeros((B, HH_), f32)
        c = jnp.zeros((B, HH_), f32)
        for s in range(S):
            gates = wxs[pl.ds(s * B, B), :] + jnp.dot(
                h, hh_ref[...], preferred_element_type=f32)
            i_g = jax.nn.sigmoid(gates[:, 0 * HH_:1 * HH_])
            f_g = jax.nn.sigmoid(gates[:, 1 * HH_:2 * HH_])
            g_g = jnp.tanh(gates[:, 2 * HH_:3 * HH_])
            o_g = jax.nn.sigmoid(gates[:, 3 * HH_:4 * HH_])
            c = f_g * c + i_g * g_g
            h = o_g * jnp.tanh(c)
            yc[pl.ds(s * B, B), :] = h                          # [B, 128] store

    # ---- layer 0: input = embedded tokens ----
    run_layer(x0, w0_ref, bias0_ref, hh0_ref)

    # ---- layer 1: input = layer-0 step outputs (the bidirectional time
    #      re-alignment is folded into the w1 columns on the host) ----
    cp_w1.wait()
    cp_hh1.wait()
    run_layer(yc[...], w1_v, bias1_ref, hh1_v)

    # ---- re-assemble bidirectional output in original time order ----
    # O[:, t, :] = [h_fwd(t) | h_bwd(orig t)] = [yc[t][:, :H] | yc[S-1-t][:, H:]]
    # TODO(synk): a time-major [S,B,HH] layout would densify these stores; the
    #             batch-leading layout is kept because the einsums below are
    #             the proven Mosaic form and the cost is negligible at B=2,S=8.
    for t in range(S):
        obf[:, t, :] = jnp.concatenate(
            [yc[pl.ds(t * B, B), 0:H_],
             yc[pl.ds((S - 1 - t) * B, B), H_:HH_]], axis=-1)

    # ---- self-attention (softmax over keys) + sum over queries + predict ----
    o = obf[...]                                               # [B, S, 2H]
    oq = o * (1.0 / math.sqrt(float(HH_)))                     # fold 1/sqrt(d_k)
    scores = jnp.einsum('bqd,bkd->bqk', oq, o,
                        preferred_element_type=f32)            # [B, S, S]
    m = jnp.max(scores, axis=-1, keepdims=True)
    e = jnp.exp(scores - m)
    denom = jnp.sum(e, axis=-1, keepdims=True)
    alpha = e * pl.reciprocal(denom, approx=True)
    # sum_q (alpha @ O) == (sum_q alpha) @ O : reduce alpha first.
    w = jnp.sum(alpha, axis=1, keepdims=True)                  # [B, 1, S]
    ctx = jnp.einsum('bqk,bkd->bqd', w, o,
                     preferred_element_type=f32)               # [B, 1, 2H]
    ctx = jnp.sum(ctx, axis=1)                                 # [B, 2H]
    cp_wp.wait()
    out_ref[...] = (jnp.dot(ctx, wp_v[...],
                            preferred_element_type=f32) + bp_ref[...])


# ----------------------------------------------------------------------------
# Wrapper
# ----------------------------------------------------------------------------
def model_forward(tokens, kp, outputs_size):
    Bsz, S_len = tokens.shape
    SB = S_len * Bsz
    vpad = kp['emb'].shape[0]
    opad = kp['wp'].shape[1]
    # Only host-side prep: tiny int32 time-major flatten of the token ids.
    tok_tm = tokens.T.reshape(SB, 1).astype(jnp.int32)

    out_pad = pl.pallas_call(
        fused_forward_kernel,
        out_shape=jax.ShapeDtypeStruct((Bsz, opad), jnp.float32),
        grid=(1,),
        in_specs=[
            pl.BlockSpec((SB, 1), lambda i: (0, 0)),           # tokens
            pl.BlockSpec((vpad, EMB), lambda i: (0, 0)),       # emb table
            pl.BlockSpec((EMB, 8 * HH), lambda i: (0, 0)),     # w0 (a|b fused)
            pl.BlockSpec((1, 8 * HH), lambda i: (0, 0)),       # bias0
            pl.BlockSpec((HH, 4 * HH), lambda i: (0, 0)),      # hh0
            pl.BlockSpec(memory_space=pl.ANY),                 # w1 (HBM)
            pl.BlockSpec((1, 8 * HH), lambda i: (0, 0)),       # bias1
            pl.BlockSpec(memory_space=pl.ANY),                 # hh1 (HBM)
            pl.BlockSpec(memory_space=pl.ANY),                 # wp (HBM)
            pl.BlockSpec((1, opad), lambda i: (0, 0)),         # bp
        ],
        out_specs=pl.BlockSpec((Bsz, opad), lambda i: (0, 0)),
        scratch_shapes=[
            pltpu.VMEM((SB, 8 * HH), jnp.float32),             # wxfull
            pltpu.VMEM((SB, 4 * HH), jnp.float32),             # wxs
            pltpu.VMEM((SB, HH), jnp.float32),                 # yc
            pltpu.VMEM((Bsz, S_len, HH), jnp.float32),         # obf
            pltpu.VMEM((HH, 8 * HH), jnp.float32),             # w1 staging
            pltpu.VMEM((HH, 4 * HH), jnp.float32),             # hh1 staging
            pltpu.VMEM((HH, opad), jnp.float32),               # wp staging
            pltpu.SemaphoreType.DMA((3,)),
        ],
        compiler_params=pltpu.CompilerParams(
            dimension_semantics=("arbitrary",)),
    )(tok_tm, kp['emb'], kp['w0'], kp['bias0'], kp['hh0'],
      kp['w1'], kp['bias1'], kp['hh1'], kp['wp'], kp['bp'])
    return out_pad[:, :outputs_size]


# ----------------------------------------------------------------------------
# Parameters (PyTorch layout) and host-side layout transform for the kernel
# ----------------------------------------------------------------------------
def init_params(key, vocab_size, outputs_size):
    keys = iter(jax.random.split(key, 64))
    params = {}
    emb = jax.random.normal(next(keys), (vocab_size, EMB), jnp.float32) * 0.1
    emb = emb.at[0].set(0.0)                 # padding_idx=0
    params['emb'] = emb

    params['lstm'] = []
    for layer in range(NUM_LAYERS):
        d_in = EMB if layer == 0 else NUM_DIRS * HID
        s = 1.0 / math.sqrt(HID)
        layer_ps = []
        for _ in range(NUM_DIRS):
            wih = jax.random.uniform(next(keys), (4 * HID, d_in),
                                     jnp.float32, -s, s)
            whh = jax.random.uniform(next(keys), (4 * HID, HID),
                                     jnp.float32, -s, s)
            bih = jax.random.uniform(next(keys), (4 * HID,), jnp.float32, -s, s)
            bhh = jax.random.uniform(next(keys), (4 * HID,), jnp.float32, -s, s)
            layer_ps.append(dict(wih=wih, whh=whh, b=bih + bhh))
        params['lstm'].append(layer_ps)

    s = 1.0 / math.sqrt(NUM_DIRS * HID)
    params['wp'] = jax.random.uniform(next(keys), (outputs_size, NUM_DIRS * HID),
                                      jnp.float32, -s, s)
    params['bp'] = jax.random.uniform(next(keys), (outputs_size,),
                                      jnp.float32, -s, s)
    return params


def _scatter_gate_cols(w_t, off):
    """w_t: [Din, 4H] -> [Din, 4*HH] with gate g placed at lanes
    [g*HH+off : g*HH+off+H] (off=0 fwd, off=H bwd)."""
    d_in = w_t.shape[0]
    out = jnp.zeros((d_in, 4 * HH), jnp.float32)
    for g in range(4):
        out = out.at[:, g * HH + off: g * HH + off + HID].set(
            w_t[:, g * HID:(g + 1) * HID])
    return out


def _scatter_gate_bias(b_f, b_b):
    out = jnp.zeros((4 * HH,), jnp.float32)
    for g in range(4):
        out = out.at[g * HH: g * HH + HID].set(b_f[g * HID:(g + 1) * HID])
        out = out.at[g * HH + HID: (g + 1) * HH].set(b_b[g * HID:(g + 1) * HID])
    return out.reshape(1, -1)


def prepare_kernel_params(params, outputs_size):
    emb = params['emb']
    vocab = emb.shape[0]
    vpad = ((vocab + LANE - 1) // LANE) * LANE
    kp = {'emb': jnp.zeros((vpad, EMB), jnp.float32).at[:vocab].set(emb)}

    for layer in range(NUM_LAYERS):
        pf, pb = params['lstm'][layer]
        wf = _scatter_gate_cols(pf['wih'].T, 0)       # fwd-direction columns
        wb = _scatter_gate_cols(pb['wih'].T, HID)     # bwd-direction columns
        if layer == 0:
            a_mat, b_mat = wf, wb
        else:
            # Fold the time re-alignment of the bidirectional layer-0 output:
            # wx(s) = O[s] @ W1f + O[S-1-s] @ W1b == yc0[s] @ A + yc0[S-1-s] @ B
            a_mat = jnp.concatenate([wf[:HID], wb[HID:]], axis=0)
            b_mat = jnp.concatenate([wb[:HID], wf[HID:]], axis=0)
        # Fuse a|b column-wise so the whole projection is one matmul.
        kp[f'w{layer}'] = jnp.concatenate([a_mat, b_mat], axis=1)   # [Din,8*HH]
        bias = _scatter_gate_bias(pf['b'], pb['b'])                 # [1, 4*HH]
        kp[f'bias{layer}'] = jnp.concatenate(
            [bias, jnp.zeros_like(bias)], axis=1)                   # [1, 8*HH]
        hh = jnp.zeros((HH, 4 * HH), jnp.float32)
        hh = hh.at[:HID].set(_scatter_gate_cols(pf['whh'].T, 0))
        hh = hh.at[HID:].set(_scatter_gate_cols(pb['whh'].T, HID))
        kp[f'hh{layer}'] = hh

    opad = ((outputs_size + LANE - 1) // LANE) * LANE
    kp['wp'] = jnp.zeros((HH, opad), jnp.float32).at[:, :outputs_size].set(
        params['wp'].T)
    kp['bp'] = jnp.zeros((1, opad), jnp.float32).at[:, :outputs_size].set(
        params['bp'])
    return kp


# ----------------------------------------------------------------------------
# Pure-JAX reference (PyTorch semantics) for correctness check
# ----------------------------------------------------------------------------
def ref_lstm_dir(x, wih, whh, b):
    B, S, _ = x.shape
    H = whh.shape[1]
    h = jnp.zeros((B, H), jnp.float32)
    c = jnp.zeros((B, H), jnp.float32)
    ys = []
    for t in range(S):
        gates = x[:, t] @ wih.T + h @ whh.T + b
        i = jax.nn.sigmoid(gates[:, 0:H])
        f = jax.nn.sigmoid(gates[:, H:2 * H])
        g = jnp.tanh(gates[:, 2 * H:3 * H])
        o = jax.nn.sigmoid(gates[:, 3 * H:4 * H])
        c = f * c + i * g
        h = o * jnp.tanh(c)
        ys.append(h)
    return jnp.stack(ys, axis=1)


def ref_forward(tokens, params):
    x = jnp.take(params['emb'], tokens, axis=0)
    layer_in = x
    for layer in range(NUM_LAYERS):
        outs = []
        for direction in range(NUM_DIRS):
            p = params['lstm'][layer][direction]
            xi = layer_in if direction == 0 else jnp.flip(layer_in, axis=1)
            y = ref_lstm_dir(xi, p['wih'], p['whh'], p['b'])
            if direction == 1:
                y = jnp.flip(y, axis=1)
            outs.append(y)
        layer_in = jnp.concatenate(outs, axis=-1)
    o = layer_in
    d_k = o.shape[-1]
    scores = jnp.einsum('bqd,bkd->bqk', o, o) / math.sqrt(d_k)
    alpha = jax.nn.softmax(scores, axis=-1)
    ctx = jnp.einsum('bqk,bkd->bqd', alpha, o).sum(axis=1)
    return ctx @ params['wp'].T + params['bp']


if __name__ == "__main__":
    B, S = 2, 8
    VOCAB, OUT = 50, 10

    key = jax.random.PRNGKey(0)
    k_tok, k_par = jax.random.split(key)
    tokens = jax.random.randint(k_tok, (B, S), 0, VOCAB, dtype=jnp.int32)
    params = init_params(k_par, VOCAB, OUT)
    kparams = prepare_kernel_params(params, OUT)

    out = model_forward(tokens, kparams, OUT)
    out = jax.block_until_ready(out)

    ref = jax.block_until_ready(ref_forward(tokens, params))
    np.testing.assert_allclose(np.asarray(out), np.asarray(ref),
                               rtol=2e-3, atol=2e-3)
    assert out.shape == (B, OUT)
    print("KERNEL_OK")
</pallas_src>

<mosaic_0001>
module attributes {stable_mosaic.version = 11 : i64} {
  func.func @fused_forward_kernel(%arg0: i32, %arg1: memref<16x1xi32, #tpu.memory_space<vmem>>, %arg2: memref<128x128xf32, #tpu.memory_space<vmem>>, %arg3: memref<128x1024xf32, #tpu.memory_space<vmem>>, %arg4: memref<1x1024xf32, #tpu.memory_space<vmem>>, %arg5: memref<128x512xf32, #tpu.memory_space<vmem>>, %arg6: memref<128x1024xf32, #tpu.memory_space<any>>, %arg7: memref<1x1024xf32, #tpu.memory_space<vmem>>, %arg8: memref<128x512xf32, #tpu.memory_space<any>>, %arg9: memref<128x128xf32, #tpu.memory_space<any>>, %arg10: memref<1x128xf32, #tpu.memory_space<vmem>>, %arg11: memref<2x128xf32, #tpu.memory_space<vmem>>, %arg12: memref<16x1024xf32, #tpu.memory_space<vmem>>, %arg13: memref<16x512xf32, #tpu.memory_space<vmem>>, %arg14: memref<16x128xf32, #tpu.memory_space<vmem>>, %arg15: memref<2x8x128xf32, #tpu.memory_space<vmem>>, %arg16: memref<128x1024xf32, #tpu.memory_space<vmem>>, %arg17: memref<128x512xf32, #tpu.memory_space<vmem>>, %arg18: memref<128x128xf32, #tpu.memory_space<vmem>>, %arg19: memref<3x!tpu.dma_semaphore, #tpu.memory_space<semaphore_mem>>) attributes {dimension_semantics = [#tpu.dimension_semantics<arbitrary>], iteration_bounds = array<i64: 1>, scalar_prefetch = 0 : i64, scratch_operands = 8 : i64, tpu.core_type = #tpu.core_type<tc>, window_params = [{pipeline_mode = #tpu.pipeline_mode<synchronous>, transform_indices = @transform_0, window_bounds = array<i64: 16, 1>}, {pipeline_mode = #tpu.pipeline_mode<synchronous>, transform_indices = @transform_1, window_bounds = array<i64: 128, 128>}, {pipeline_mode = #tpu.pipeline_mode<synchronous>, transform_indices = @transform_2, window_bounds = array<i64: 128, 1024>}, {pipeline_mode = #tpu.pipeline_mode<synchronous>, transform_indices = @transform_3, window_bounds = array<i64: 1, 1024>}, {pipeline_mode = #tpu.pipeline_mode<synchronous>, transform_indices = @transform_4, window_bounds = array<i64: 128, 512>}, {}, {pipeline_mode = #tpu.pipeline_mode<synchronous>, transform_indices = @transform_6, window_bounds = array<i64: 1, 1024>}, {}, {}, {pipeline_mode = #tpu.pipeline_mode<synchronous>, transform_indices = @transform_9, window_bounds = array<i64: 1, 128>}, {pipeline_mode = #tpu.pipeline_mode<synchronous>, transform_indices = @transform_10, window_bounds = array<i64: 2, 128>}]} {
    %c0_i32 = arith.constant 0 : i32
    %0 = tpu.memref_slice %arg19[%c0_i32] : memref<3x!tpu.dma_semaphore, #tpu.memory_space<semaphore_mem>> -> memref<1x!tpu.dma_semaphore, #tpu.memory_space<semaphore_mem>>
    %1 = tpu.memref_squeeze %0 : memref<1x!tpu.dma_semaphore, #tpu.memory_space<semaphore_mem>> -> memref<!tpu.dma_semaphore, #tpu.memory_space<semaphore_mem>>
    tpu.enqueue_dma source(%arg6 : memref<128x1024xf32, #tpu.memory_space<any>>) target(%arg16 : memref<128x1024xf32, #tpu.memory_space<vmem>>) target_semaphore(%1 : memref<!tpu.dma_semaphore, #tpu.memory_space<semaphore_mem>>)
    %c1_i32 = arith.constant 1 : i32
    %2 = tpu.memref_slice %arg19[%c1_i32] : memref<3x!tpu.dma_semaphore, #tpu.memory_space<semaphore_mem>> -> memref<1x!tpu.dma_semaphore, #tpu.memory_space<semaphore_mem>>
    %3 = tpu.memref_squeeze %2 : memref<1x!tpu.dma_semaphore, #tpu.memory_space<semaphore_mem>> -> memref<!tpu.dma_semaphore, #tpu.memory_space<semaphore_mem>>
    tpu.enqueue_dma source(%arg8 : memref<128x512xf32, #tpu.memory_space<any>>) target(%arg17 : memref<128x512xf32, #tpu.memory_space<vmem>>) target_semaphore(%3 : memref<!tpu.dma_semaphore, #tpu.memory_space<semaphore_mem>>)
    %c2_i32 = arith.constant 2 : i32
    %4 = tpu.memref_slice %arg19[%c2_i32] : memref<3x!tpu.dma_semaphore, #tpu.memory_space<semaphore_mem>> -> memref<1x!tpu.dma_semaphore, #tpu.memory_space<semaphore_mem>>
    %5 = tpu.memref_squeeze %4 : memref<1x!tpu.dma_semaphore, #tpu.memory_space<semaphore_mem>> -> memref<!tpu.dma_semaphore, #tpu.memory_space<semaphore_mem>>
    tpu.enqueue_dma source(%arg9 : memref<128x128xf32, #tpu.memory_space<any>>) target(%arg18 : memref<128x128xf32, #tpu.memory_space<vmem>>) target_semaphore(%5 : memref<!tpu.dma_semaphore, #tpu.memory_space<semaphore_mem>>)
    %c0 = arith.constant 0 : index
    %c0_0 = arith.constant 0 : index
    %6 = vector.load %arg1[%c0, %c0_0] : memref<16x1xi32, #tpu.memory_space<vmem>>, vector<16x1xi32>
    %7 = tpu.iota {dimensions = array<i32: 1>} : vector<16x128xi32>
    %8 = vector.broadcast %6 : vector<16x1xi32> to vector<16x128xi32>
    %9 = arith.cmpi eq, %7, %8 : vector<16x128xi32>
    %10 = arith.extui %9 : vector<16x128xi1> to vector<16x128xi32>
    %11 = arith.sitofp %10 : vector<16x128xi32> to vector<16x128xf32>
    %c0_1 = arith.constant 0 : index
    %c0_2 = arith.constant 0 : index
    %12 = vector.load %arg2[%c0_1, %c0_2] : memref<128x128xf32, #tpu.memory_space<vmem>>, vector<128x128xf32>
    %cst = arith.constant dense<0.000000e+00> : vector<16x128xf32>
    %13 = tpu.matmul %11, %12, %cst {dimension_numbers = #tpu.dot_dimension_numbers<[1], [0], [0], [1], [0, 0, 1, 1], [], []>} : vector<16x128xf32>, vector<128x128xf32>, vector<16x128xf32> -> vector<16x128xf32>
    %c0_3 = arith.constant 0 : index
    %c0_4 = arith.constant 0 : index
    %14 = vector.load %arg3[%c0_3, %c0_4] : memref<128x1024xf32, #tpu.memory_space<vmem>>, vector<128x1024xf32>
    %cst_5 = arith.constant dense<0.000000e+00> : vector<16x1024xf32>
    %15 = tpu.matmul %13, %14, %cst_5 {dimension_numbers = #tpu.dot_dimension_numbers<[1], [0], [0], [1], [0, 0, 1, 1], [], []>} : vector<16x128xf32>, vector<128x1024xf32>, vector<16x1024xf32> -> vector<16x1024xf32>
    %c0_6 = arith.constant 0 : index
    %c0_7 = arith.constant 0 : index
    %16 = vector.load %arg4[%c0_6, %c0_7] : memref<1x1024xf32, #tpu.memory_space<vmem>>, vector<1x1024xf32>
    %17 = vector.broadcast %16 : vector<1x1024xf32> to vector<16x1024xf32>
    %18 = arith.addf %15, %17 : vector<16x1024xf32>
    %c0_8 = arith.constant 0 : index
    %c0_9 = arith.constant 0 : index
    %19 = vector.load %arg12[%c0_8, %c0_9] : memref<16x1024xf32, #tpu.memory_space<vmem>>, vector<16x1024xf32>
    tpu.vector_store %arg12[%c0_8, %c0_9], %18 {strides = array<i32>} : memref<16x1024xf32, #tpu.memory_space<vmem>>, vector<16x1024xf32>,
    %c0_10 = arith.constant 0 : index
    %c0_11 = arith.constant 0 : index
    %20 = vector.load %arg12[%c0_10, %c0_11] : memref<16x1024xf32, #tpu.memory_space<vmem>>, vector<2x512xf32>
    %c14 = arith.constant 14 : index
    %c512 = arith.constant 512 : index
    %21 = vector.load %arg12[%c14, %c512] : memref<16x1024xf32, #tpu.memory_space<vmem>>, vector<2x512xf32>
    %22 = arith.addf %20, %21 : vector<2x512xf32>
    %c0_12 = arith.constant 0 : index
    %c0_13 = arith.constant 0 : index
    %23 = vector.load %arg13[%c0_12, %c0_13] : memref<16x512xf32, #tpu.memory_space<vmem>>, vector<2x512xf32>
    tpu.vector_store %arg13[%c0_12, %c0_13], %22 {strides = array<i32>} : memref<16x512xf32, #tpu.memory_space<vmem>>, vector<2x512xf32>,
    %c2 = arith.constant 2 : index
    %c0_14 = arith.constant 0 : index
    %24 = vector.load %arg12[%c2, %c0_14] : memref<16x1024xf32, #tpu.memory_space<vmem>>, vector<2x512xf32>
    %c12 = arith.constant 12 : index
    %c512_15 = arith.constant 512 : index
    %25 = vector.load %arg12[%c12, %c512_15] : memref<16x1024xf32, #tpu.memory_space<vmem>>, vector<2x512xf32>
    %26 = arith.addf %24, %25 : vector<2x512xf32>
    %c2_16 = arith.constant 2 : index
    %c0_17 = arith.constant 0 : index
    %27 = vector.load %arg13[%c2_16, %c0_17] : memref<16x512xf32, #tpu.memory_space<vmem>>, vector<2x512xf32>
    tpu.vector_store %arg13[%c2_16, %c0_17], %26 {strides = array<i32>} : memref<16x512xf32, #tpu.memory_space<vmem>>, vector<2x512xf32>,
    %c4 = arith.constant 4 : index
    %c0_18 = arith.constant 0 : index
    %28 = vector.load %arg12[%c4, %c0_18] : memref<16x1024xf32, #tpu.memory_space<vmem>>, vector<2x512xf32>
    %c10 = arith.constant 10 : index
    %c512_19 = arith.constant 512 : index
    %29 = vector.load %arg12[%c10, %c512_19] : memref<16x1024xf32, #tpu.memory_space<vmem>>, vector<2x512xf32>
    %30 = arith.addf %28, %29 : vector<2x512xf32>
    %c4_20 = arith.constant 4 : index
    %c0_21 = arith.constant 0 : index
    %31 = vector.load %arg13[%c4_20, %c0_21] : memref<16x512xf32, #tpu.memory_space<vmem>>, vector<2x512xf32>
    tpu.vector_store %arg13[%c4_20, %c0_21], %30 {strides = array<i32>} : memref<16x512xf32, #tpu.memory_space<vmem>>, vector<2x512xf32>,
    %c6 = arith.constant 6 : index
    %c0_22 = arith.constant 0 : index
    %32 = vector.load %arg12[%c6, %c0_22] : memref<16x1024xf32, #tpu.memory_space<vmem>>, vector<2x512xf32>
    %c8 = arith.constant 8 : index
    %c512_23 = arith.constant 512 : index
    %33 = vector.load %arg12[%c8, %c512_23] : memref<16x1024xf32, #tpu.memory_space<vmem>>, vector<2x512xf32>
    %34 = arith.addf %32, %33 : vector<2x512xf32>
    %c6_24 = arith.constant 6 : index
    %c0_25 = arith.constant 0 : index
    %35 = vector.load %arg13[%c6_24, %c0_25] : memref<16x512xf32, #tpu.memory_space<vmem>>, vector<2x512xf32>
    tpu.vector_store %arg13[%c6_24, %c0_25], %34 {strides = array<i32>} : memref<16x512xf32, #tpu.memory_space<vmem>>, vector<2x512xf32>,
    %c8_26 = arith.constant 8 : index
    %c0_27 = arith.constant 0 : index
    %36 = vector.load %arg12[%c8_26, %c0_27] : memref<16x1024xf32, #tpu.memory_space<vmem>>, vector<2x512xf32>
    %c6_28 = arith.constant 6 : index
    %c512_29 = arith.constant 512 : index
    %37 = vector.load %arg12[%c6_28, %c512_29] : memref<16x1024xf32, #tpu.memory_space<vmem>>, vector<2x512xf32>
    %38 = arith.addf %36, %37 : vector<2x512xf32>
    %c8_30 = arith.constant 8 : index
    %c0_31 = arith.constant 0 : index
    %39 = vector.load %arg13[%c8_30, %c0_31] : memref<16x512xf32, #tpu.memory_space<vmem>>, vector<2x512xf32>
    tpu.vector_store %arg13[%c8_30, %c0_31], %38 {strides = array<i32>} : memref<16x512xf32, #tpu.memory_space<vmem>>, vector<2x512xf32>,
    %c10_32 = arith.constant 10 : index
    %c0_33 = arith.constant 0 : index
    %40 = vector.load %arg12[%c10_32, %c0_33] : memref<16x1024xf32, #tpu.memory_space<vmem>>, vector<2x512xf32>
    %c4_34 = arith.constant 4 : index
    %c512_35 = arith.constant 512 : index
    %41 = vector.load %arg12[%c4_34, %c512_35] : memref<16x1024xf32, #tpu.memory_space<vmem>>, vector<2x512xf32>
    %42 = arith.addf %40, %41 : vector<2x512xf32>
    %c10_36 = arith.constant 10 : index
    %c0_37 = arith.constant 0 : index
    %43 = vector.load %arg13[%c10_36, %c0_37] : memref<16x512xf32, #tpu.memory_space<vmem>>, vector<2x512xf32>
    tpu.vector_store %arg13[%c10_36, %c0_37], %42 {strides = array<i32>} : memref<16x512xf32, #tpu.memory_space<vmem>>, vector<2x512xf32>,
    %c12_38 = arith.constant 12 : index
    %c0_39 = arith.constant 0 : index
    %44 = vector.load %arg12[%c12_38, %c0_39] : memref<16x1024xf32, #tpu.memory_space<vmem>>, vector<2x512xf32>
    %c2_40 = arith.constant 2 : index
    %c512_41 = arith.constant 512 : index
    %45 = vector.load %arg12[%c2_40, %c512_41] : memref<16x1024xf32, #tpu.memory_space<vmem>>, vector<2x512xf32>
    %46 = arith.addf %44, %45 : vector<2x512xf32>
    %c12_42 = arith.constant 12 : index
    %c0_43 = arith.constant 0 : index
    %47 = vector.load %arg13[%c12_42, %c0_43] : memref<16x512xf32, #tpu.memory_space<vmem>>, vector<2x512xf32>
    tpu.vector_store %arg13[%c12_42, %c0_43], %46 {strides = array<i32>} : memref<16x512xf32, #tpu.memory_space<vmem>>, vector<2x512xf32>,
    %c14_44 = arith.constant 14 : index
    %c0_45 = arith.constant 0 : index
    %48 = vector.load %arg12[%c14_44, %c0_45] : memref<16x1024xf32, #tpu.memory_space<vmem>>, vector<2x512xf32>
    %c0_46 = arith.constant 0 : index
    %c512_47 = arith.constant 512 : index
    %49 = vector.load %arg12[%c0_46, %c512_47] : memref<16x1024xf32, #tpu.memory_space<vmem>>, vector<2x512xf32>
    %50 = arith.addf %48, %49 : vector<2x512xf32>
    %c14_48 = arith.constant 14 : index
    %c0_49 = arith.constant 0 : index
    %51 = vector.load %arg13[%c14_48, %c0_49] : memref<16x512xf32, #tpu.memory_space<vmem>>, vector<2x512xf32>
    tpu.vector_store %arg13[%c14_48, %c0_49], %50 {strides = array<i32>} : memref<16x512xf32, #tpu.memory_space<vmem>>, vector<2x512xf32>,
    %cst_50 = arith.constant 0.000000e+00 : f32
    %52 = vector.broadcast %cst_50 : f32 to vector<2x128xf32>
    %cst_51 = arith.constant 0.000000e+00 : f32
    %53 = vector.broadcast %cst_51 : f32 to vector<2x128xf32>
    %c0_52 = arith.constant 0 : index
    %c0_53 = arith.constant 0 : index
    %54 = vector.load %arg13[%c0_52, %c0_53] : memref<16x512xf32, #tpu.memory_space<vmem>>, vector<2x512xf32>
    %c0_54 = arith.constant 0 : index
    %c0_55 = arith.constant 0 : index
    %55 = vector.load %arg5[%c0_54, %c0_55] : memref<128x512xf32, #tpu.memory_space<vmem>>, vector<128x512xf32>
    %cst_56 = arith.constant dense<0.000000e+00> : vector<2x512xf32>
    %56 = tpu.matmul %52, %55, %cst_56 {dimension_numbers = #tpu.dot_dimension_numbers<[1], [0], [0], [1], [0, 0, 1, 1], [], []>} : vector<2x128xf32>, vector<128x512xf32>, vector<2x512xf32> -> vector<2x512xf32>
    %57 = arith.addf %54, %56 : vector<2x512xf32>
    %58 = vector.extract_strided_slice %57 {offsets = [0, 0], sizes = [2, 128], strides = [1, 1]} : vector<2x512xf32> to vector<2x128xf32>
    %59 = arith.negf %58 : vector<2x128xf32>
    %60 = math.exp %59 : vector<2x128xf32>
    %cst_57 = arith.constant 1.000000e+00 : f32
    %61 = vector.broadcast %cst_57 : f32 to vector<2x128xf32>
    %62 = arith.addf %61, %60 : vector<2x128xf32>
    %63 = arith.divf %61, %62 : vector<2x128xf32>
    %64 = vector.extract_strided_slice %57 {offsets = [0, 128], sizes = [2, 128], strides = [1, 1]} : vector<2x512xf32> to vector<2x128xf32>
    %65 = arith.negf %64 : vector<2x128xf32>
    %66 = math.exp %65 : vector<2x128xf32>
    %cst_58 = arith.constant 1.000000e+00 : f32
    %67 = vector.broadcast %cst_58 : f32 to vector<2x128xf32>
    %68 = arith.addf %67, %66 : vector<2x128xf32>
    %69 = arith.divf %67, %68 : vector<2x128xf32>
    %70 = vector.extract_strided_slice %57 {offsets = [0, 256], sizes = [2, 128], strides = [1, 1]} : vector<2x512xf32> to vector<2x128xf32>
    %71 = math.tanh %70 : vector<2x128xf32>
    %72 = vector.extract_strided_slice %57 {offsets = [0, 384], sizes = [2, 128], strides = [1, 1]} : vector<2x512xf32> to vector<2x128xf32>
    %73 = arith.negf %72 : vector<2x128xf32>
    %74 = math.exp %73 : vector<2x128xf32>
    %cst_59 = arith.constant 1.000000e+00 : f32
    %75 = vector.broadcast %cst_59 : f32 to vector<2x128xf32>
    %76 = arith.addf %75, %74 : vector<2x128xf32>
    %77 = arith.divf %75, %76 : vector<2x128xf32>
    %78 = arith.mulf %69, %53 : vector<2x128xf32>
    %79 = arith.mulf %63, %71 : vector<2x128xf32>
    %80 = arith.addf %78, %79 : vector<2x128xf32>
    %81 = math.tanh %80 : vector<2x128xf32>
    %82 = arith.mulf %77, %81 : vector<2x128xf32>
    %c0_60 = arith.constant 0 : index
    %c0_61 = arith.constant 0 : index
    %83 = vector.load %arg14[%c0_60, %c0_61] : memref<16x128xf32, #tpu.memory_space<vmem>>, vector<2x128xf32>
    tpu.vector_store %arg14[%c0_60, %c0_61], %82 {strides = array<i32>} : memref<16x128xf32, #tpu.memory_space<vmem>>, vector<2x128xf32>,
    %c2_62 = arith.constant 2 : index
    %c0_63 = arith.constant 0 : index
    %84 = vector.load %arg13[%c2_62, %c0_63] : memref<16x512xf32, #tpu.memory_space<vmem>>, vector<2x512xf32>
    %c0_64 = arith.constant 0 : index
    %c0_65 = arith.constant 0 : index
    %85 = vector.load %arg5[%c0_64, %c0_65] : memref<128x512xf32, #tpu.memory_space<vmem>>, vector<128x512xf32>
    %cst_66 = arith.constant dense<0.000000e+00> : vector<2x512xf32>
    %86 = tpu.matmul %82, %85, %cst_66 {dimension_numbers = #tpu.dot_dimension_numbers<[1], [0], [0], [1], [0, 0, 1, 1], [], []>} : vector<2x128xf32>, vector<128x512xf32>, vector<2x512xf32> -> vector<2x512xf32>
    %87 = arith.addf %84, %86 : vector<2x512xf32>
    %88 = vector.extract_strided_slice %87 {offsets = [0, 0], sizes = [2, 128], strides = [1, 1]} : vector<2x512xf32> to vector<2x128xf32>
    %89 = arith.negf %88 : vector<2x128xf32>
    %90 = math.exp %89 : vector<2x128xf32>
    %cst_67 = arith.constant 1.000000e+00 : f32
    %91 = vector.broadcast %cst_67 : f32 to vector<2x128xf32>
    %92 = arith.addf %91, %90 : vector<2x128xf32>
    %93 = arith.divf %91, %92 : vector<2x128xf32>
    %94 = vector.extract_strided_slice %87 {offsets = [0, 128], sizes = [2, 128], strides = [1, 1]} : vector<2x512xf32> to vector<2x128xf32>
    %95 = arith.negf %94 : vector<2x128xf32>
    %96 = math.exp %95 : vector<2x128xf32>
    %cst_68 = arith.constant 1.000000e+00 : f32
    %97 = vector.broadcast %cst_68 : f32 to vector<2x128xf32>
    %98 = arith.addf %97, %96 : vector<2x128xf32>
    %99 = arith.divf %97, %98 : vector<2x128xf32>
    %100 = vector.extract_strided_slice %87 {offsets = [0, 256], sizes = [2, 128], strides = [1, 1]} : vector<2x512xf32> to vector<2x128xf32>
    %101 = math.tanh %100 : vector<2x128xf32>
    %102 = vector.extract_strided_slice %87 {offsets = [0, 384], sizes = [2, 128], strides = [1, 1]} : vector<2x512xf32> to vector<2x128xf32>
    %103 = arith.negf %102 : vector<2x128xf32>
    %104 = math.exp %103 : vector<2x128xf32>
    %cst_69 = arith.constant 1.000000e+00 : f32
    %105 = vector.broadcast %cst_69 : f32 to vector<2x128xf32>
    %106 = arith.addf %105, %104 : vector<2x128xf32>
    %107 = arith.divf %105, %106 : vector<2x128xf32>
    %108 = arith.mulf %99, %80 : vector<2x128xf32>
    %109 = arith.mulf %93, %101 : vector<2x128xf32>
    %110 = arith.addf %108, %109 : vector<2x128xf32>
    %111 = math.tanh %110 : vector<2x128xf32>
    %112 = arith.mulf %107, %111 : vector<2x128xf32>
    %c2_70 = arith.constant 2 : index
    %c0_71 = arith.constant 0 : index
    %113 = vector.load %arg14[%c2_70, %c0_71] : memref<16x128xf32, #tpu.memory_space<vmem>>, vector<2x128xf32>
    tpu.vector_store %arg14[%c2_70, %c0_71], %112 {strides = array<i32>} : memref<16x128xf32, #tpu.memory_space<vmem>>, vector<2x128xf32>,
    %c4_72 = arith.constant 4 : index
    %c0_73 = arith.constant 0 : index
    %114 = vector.load %arg13[%c4_72, %c0_73] : memref<16x512xf32, #tpu.memory_space<vmem>>, vector<2x512xf32>
    %c0_74 = arith.constant 0 : index
    %c0_75 = arith.constant 0 : index
    %115 = vector.load %arg5[%c0_74, %c0_75] : memref<128x512xf32, #tpu.memory_space<vmem>>, vector<128x512xf32>
    %cst_76 = arith.constant dense<0.000000e+00> : vector<2x512xf32>
    %116 = tpu.matmul %112, %115, %cst_76 {dimension_numbers = #tpu.dot_dimension_numbers<[1], [0], [0], [1], [0, 0, 1, 1], [], []>} : vector<2x128xf32>, vector<128x512xf32>, vector<2x512xf32> -> vector<2x512xf32>
    %117 = arith.addf %114, %116 : vector<2x512xf32>
    %118 = vector.extract_strided_slice %117 {offsets = [0, 0], sizes = [2, 128], strides = [1, 1]} : vector<2x512xf32> to vector<2x128xf32>
    %119 = arith.negf %118 : vector<2x128xf32>
    %120 = math.exp %119 : vector<2x128xf32>
    %cst_77 = arith.constant 1.000000e+00 : f32
    %121 = vector.broadcast %cst_77 : f32 to vector<2x128xf32>
    %122 = arith.addf %121, %120 : vector<2x128xf32>
    %123 = arith.divf %121, %122 : vector<2x128xf32>
    %124 = vector.extract_strided_slice %117 {offsets = [0, 128], sizes = [2, 128], strides = [1, 1]} : vector<2x512xf32> to vector<2x128xf32>
    %125 = arith.negf %124 : vector<2x128xf32>
    %126 = math.exp %125 : vector<2x128xf32>
    %cst_78 = arith.constant 1.000000e+00 : f32
    %127 = vector.broadcast %cst_78 : f32 to vector<2x128xf32>
    %128 = arith.addf %127, %126 : vector<2x128xf32>
    %129 = arith.divf %127, %128 : vector<2x128xf32>
    %130 = vector.extract_strided_slice %117 {offsets = [0, 256], sizes = [2, 128], strides = [1, 1]} : vector<2x512xf32> to vector<2x128xf32>
    %131 = math.tanh %130 : vector<2x128xf32>
    %132 = vector.extract_strided_slice %117 {offsets = [0, 384], sizes = [2, 128], strides = [1, 1]} : vector<2x512xf32> to vector<2x128xf32>
    %133 = arith.negf %132 : vector<2x128xf32>
    %134 = math.exp %133 : vector<2x128xf32>
    %cst_79 = arith.constant 1.000000e+00 : f32
    %135 = vector.broadcast %cst_79 : f32 to vector<2x128xf32>
    %136 = arith.addf %135, %134 : vector<2x128xf32>
    %137 = arith.divf %135, %136 : vector<2x128xf32>
    %138 = arith.mulf %129, %110 : vector<2x128xf32>
    %139 = arith.mulf %123, %131 : vector<2x128xf32>
    %140 = arith.addf %138, %139 : vector<2x128xf32>
    %141 = math.tanh %140 : vector<2x128xf32>
    %142 = arith.mulf %137, %141 : vector<2x128xf32>
    %c4_80 = arith.constant 4 : index
    %c0_81 = arith.constant 0 : index
    %143 = vector.load %arg14[%c4_80, %c0_81] : memref<16x128xf32, #tpu.memory_space<vmem>>, vector<2x128xf32>
    tpu.vector_store %arg14[%c4_80, %c0_81], %142 {strides = array<i32>} : memref<16x128xf32, #tpu.memory_space<vmem>>, vector<2x128xf32>,
    %c6_82 = arith.constant 6 : index
    %c0_83 = arith.constant 0 : index
    %144 = vector.load %arg13[%c6_82, %c0_83] : memref<16x512xf32, #tpu.memory_space<vmem>>, vector<2x512xf32>
    %c0_84 = arith.constant 0 : index
    %c0_85 = arith.constant 0 : index
    %145 = vector.load %arg5[%c0_84, %c0_85] : memref<128x512xf32, #tpu.memory_space<vmem>>, vector<128x512xf32>
    %cst_86 = arith.constant dense<0.000000e+00> : vector<2x512xf32>
    %146 = tpu.matmul %142, %145, %cst_86 {dimension_numbers = #tpu.dot_dimension_numbers<[1], [0], [0], [1], [0, 0, 1, 1], [], []>} : vector<2x128xf32>, vector<128x512xf32>, vector<2x512xf32> -> vector<2x512xf32>
    %147 = arith.addf %144, %146 : vector<2x512xf32>
    %148 = vector.extract_strided_slice %147 {offsets = [0, 0], sizes = [2, 128], strides = [1, 1]} : vector<2x512xf32> to vector<2x128xf32>
    %149 = arith.negf %148 : vector<2x128xf32>
    %150 = math.exp %149 : vector<2x128xf32>
    %cst_87 = arith.constant 1.000000e+00 : f32
    %151 = vector.broadcast %cst_87 : f32 to vector<2x128xf32>
    %152 = arith.addf %151, %150 : vector<2x128xf32>
    %153 = arith.divf %151, %152 : vector<2x128xf32>
    %154 = vector.extract_strided_slice %147 {offsets = [0, 128], sizes = [2, 128], strides = [1, 1]} : vector<2x512xf32> to vector<2x128xf32>
    %155 = arith.negf %154 : vector<2x128xf32>
    %156 = math.exp %155 : vector<2x128xf32>
    %cst_88 = arith.constant 1.000000e+00 : f32
    %157 = vector.broadcast %cst_88 : f32 to vector<2x128xf32>
    %158 = arith.addf %157, %156 : vector<2x128xf32>
    %159 = arith.divf %157, %158 : vector<2x128xf32>
    %160 = vector.extract_strided_slice %147 {offsets = [0, 256], sizes = [2, 128], strides = [1, 1]} : vector<2x512xf32> to vector<2x128xf32>
    %161 = math.tanh %160 : vector<2x128xf32>
    %162 = vector.extract_strided_slice %147 {offsets = [0, 384], sizes = [2, 128], strides = [1, 1]} : vector<2x512xf32> to vector<2x128xf32>
    %163 = arith.negf %162 : vector<2x128xf32>
    %164 = math.exp %163 : vector<2x128xf32>
    %cst_89 = arith.constant 1.000000e+00 : f32
    %165 = vector.broadcast %cst_89 : f32 to vector<2x128xf32>
    %166 = arith.addf %165, %164 : vector<2x128xf32>
    %167 = arith.divf %165, %166 : vector<2x128xf32>
    %168 = arith.mulf %159, %140 : vector<2x128xf32>
    %169 = arith.mulf %153, %161 : vector<2x128xf32>
    %170 = arith.addf %168, %169 : vector<2x128xf32>
    %171 = math.tanh %170 : vector<2x128xf32>
    %172 = arith.mulf %167, %171 : vector<2x128xf32>
    %c6_90 = arith.constant 6 : index
    %c0_91 = arith.constant 0 : index
    %173 = vector.load %arg14[%c6_90, %c0_91] : memref<16x128xf32, #tpu.memory_space<vmem>>, vector<2x128xf32>
    tpu.vector_store %arg14[%c6_90, %c0_91], %172 {strides = array<i32>} : memref<16x128xf32, #tpu.memory_space<vmem>>, vector<2x128xf32>,
    %c8_92 = arith.constant 8 : index
    %c0_93 = arith.constant 0 : index
    %174 = vector.load %arg13[%c8_92, %c0_93] : memref<16x512xf32, #tpu.memory_space<vmem>>, vector<2x512xf32>
    %c0_94 = arith.constant 0 : index
    %c0_95 = arith.constant 0 : index
    %175 = vector.load %arg5[%c0_94, %c0_95] : memref<128x512xf32, #tpu.memory_space<vmem>>, vector<128x512xf32>
    %cst_96 = arith.constant dense<0.000000e+00> : vector<2x512xf32>
    %176 = tpu.matmul %172, %175, %cst_96 {dimension_numbers = #tpu.dot_dimension_numbers<[1], [0], [0], [1], [0, 0, 1, 1], [], []>} : vector<2x128xf32>, vector<128x512xf32>, vector<2x512xf32> -> vector<2x512xf32>
    %177 = arith.addf %174, %176 : vector<2x512xf32>
    %178 = vector.extract_strided_slice %177 {offsets = [0, 0], sizes = [2, 128], strides = [1, 1]} : vector<2x512xf32> to vector<2x128xf32>
    %179 = arith.negf %178 : vector<2x128xf32>
    %180 = math.exp %179 : vector<2x128xf32>
    %cst_97 = arith.constant 1.000000e+00 : f32
    %181 = vector.broadcast %cst_97 : f32 to vector<2x128xf32>
    %182 = arith.addf %181, %180 : vector<2x128xf32>
    %183 = arith.divf %181, %182 : vector<2x128xf32>
    %184 = vector.extract_strided_slice %177 {offsets = [0, 128], sizes = [2, 128], strides = [1, 1]} : vector<2x512xf32> to vector<2x128xf32>
    %185 = arith.negf %184 : vector<2x128xf32>
    %186 = math.exp %185 : vector<2x128xf32>
    %cst_98 = arith.constant 1.000000e+00 : f32
    %187 = vector.broadcast %cst_98 : f32 to vector<2x128xf32>
    %188 = arith.addf %187, %186 : vector<2x128xf32>
    %189 = arith.divf %187, %188 : vector<2x128xf32>
    %190 = vector.extract_strided_slice %177 {offsets = [0, 256], sizes = [2, 128], strides = [1, 1]} : vector<2x512xf32> to vector<2x128xf32>
    %191 = math.tanh %190 : vector<2x128xf32>
    %192 = vector.extract_strided_slice %177 {offsets = [0, 384], sizes = [2, 128], strides = [1, 1]} : vector<2x512xf32> to vector<2x128xf32>
    %193 = arith.negf %192 : vector<2x128xf32>
    %194 = math.exp %193 : vector<2x128xf32>
    %cst_99 = arith.constant 1.000000e+00 : f32
    %195 = vector.broadcast %cst_99 : f32 to vector<2x128xf32>
    %196 = arith.addf %195, %194 : vector<2x128xf32>
    %197 = arith.divf %195, %196 : vector<2x128xf32>
    %198 = arith.mulf %189, %170 : vector<2x128xf32>
    %199 = arith.mulf %183, %191 : vector<2x128xf32>
    %200 = arith.addf %198, %199 : vector<2x128xf32>
    %201 = math.tanh %200 : vector<2x128xf32>
    %202 = arith.mulf %197, %201 : vector<2x128xf32>
    %c8_100 = arith.constant 8 : index
    %c0_101 = arith.constant 0 : index
    %203 = vector.load %arg14[%c8_100, %c0_101] : memref<16x128xf32, #tpu.memory_space<vmem>>, vector<2x128xf32>
    tpu.vector_store %arg14[%c8_100, %c0_101], %202 {strides = array<i32>} : memref<16x128xf32, #tpu.memory_space<vmem>>, vector<2x128xf32>,
    %c10_102 = arith.constant 10 : index
    %c0_103 = arith.constant 0 : index
    %204 = vector.load %arg13[%c10_102, %c0_103] : memref<16x512xf32, #tpu.memory_space<vmem>>, vector<2x512xf32>
    %c0_104 = arith.constant 0 : index
    %c0_105 = arith.constant 0 : index
    %205 = vector.load %arg5[%c0_104, %c0_105] : memref<128x512xf32, #tpu.memory_space<vmem>>, vector<128x512xf32>
    %cst_106 = arith.constant dense<0.000000e+00> : vector<2x512xf32>
    %206 = tpu.matmul %202, %205, %cst_106 {dimension_numbers = #tpu.dot_dimension_numbers<[1], [0], [0], [1], [0, 0, 1, 1], [], []>} : vector<2x128xf32>, vector<128x512xf32>, vector<2x512xf32> -> vector<2x512xf32>
    %207 = arith.addf %204, %206 : vector<2x512xf32>
    %208 = vector.extract_strided_slice %207 {offsets = [0, 0], sizes = [2, 128], strides = [1, 1]} : vector<2x512xf32> to vector<2x128xf32>
    %209 = arith.negf %208 : vector<2x128xf32>
    %210 = math.exp %209 : vector<2x128xf32>
    %cst_107 = arith.constant 1.000000e+00 : f32
    %211 = vector.broadcast %cst_107 : f32 to vector<2x128xf32>
    %212 = arith.addf %211, %210 : vector<2x128xf32>
    %213 = arith.divf %211, %212 : vector<2x128xf32>
    %214 = vector.extract_strided_slice %207 {offsets = [0, 128], sizes = [2, 128], strides = [1, 1]} : vector<2x512xf32> to vector<2x128xf32>
    %215 = arith.negf %214 : vector<2x128xf32>
    %216 = math.exp %215 : vector<2x128xf32>
    %cst_108 = arith.constant 1.000000e+00 : f32
    %217 = vector.broadcast %cst_108 : f32 to vector<2x128xf32>
    %218 = arith.addf %217, %216 : vector<2x128xf32>
    %219 = arith.divf %217, %218 : vector<2x128xf32>
    %220 = vector.extract_strided_slice %207 {offsets = [0, 256], sizes = [2, 128], strides = [1, 1]} : vector<2x512xf32> to vector<2x128xf32>
    %221 = math.tanh %220 : vector<2x128xf32>
    %222 = vector.extract_strided_slice %207 {offsets = [0, 384], sizes = [2, 128], strides = [1, 1]} : vector<2x512xf32> to vector<2x128xf32>
    %223 = arith.negf %222 : vector<2x128xf32>
    %224 = math.exp %223 : vector<2x128xf32>
    %cst_109 = arith.constant 1.000000e+00 : f32
    %225 = vector.broadcast %cst_109 : f32 to vector<2x128xf32>
    %226 = arith.addf %225, %224 : vector<2x128xf32>
    %227 = arith.divf %225, %226 : vector<2x128xf32>
    %228 = arith.mulf %219, %200 : vector<2x128xf32>
    %229 = arith.mulf %213, %221 : vector<2x128xf32>
    %230 = arith.addf %228, %229 : vector<2x128xf32>
    %231 = math.tanh %230 : vector<2x128xf32>
    %232 = arith.mulf %227, %231 : vector<2x128xf32>
    %c10_110 = arith.constant 10 : index
    %c0_111 = arith.constant 0 : index
    %233 = vector.load %arg14[%c10_110, %c0_111] : memref<16x128xf32, #tpu.memory_space<vmem>>, vector<2x128xf32>
    tpu.vector_store %arg14[%c10_110, %c0_111], %232 {strides = array<i32>} : memref<16x128xf32, #tpu.memory_space<vmem>>, vector<2x128xf32>,
    %c12_112 = arith.constant 12 : index
    %c0_113 = arith.constant 0 : index
    %234 = vector.load %arg13[%c12_112, %c0_113] : memref<16x512xf32, #tpu.memory_space<vmem>>, vector<2x512xf32>
    %c0_114 = arith.constant 0 : index
    %c0_115 = arith.constant 0 : index
    %235 = vector.load %arg5[%c0_114, %c0_115] : memref<128x512xf32, #tpu.memory_space<vmem>>, vector<128x512xf32>
    %cst_116 = arith.constant dense<0.000000e+00> : vector<2x512xf32>
    %236 = tpu.matmul %232, %235, %cst_116 {dimension_numbers = #tpu.dot_dimension_numbers<[1], [0], [0], [1], [0, 0, 1, 1], [], []>} : vector<2x128xf32>, vector<128x512xf32>, vector<2x512xf32> -> vector<2x512xf32>
    %237 = arith.addf %234, %236 : vector<2x512xf32>
    %238 = vector.extract_strided_slice %237 {offsets = [0, 0], sizes = [2, 128], strides = [1, 1]} : vector<2x512xf32> to vector<2x128xf32>
    %239 = arith.negf %238 : vector<2x128xf32>
    %240 = math.exp %239 : vector<2x128xf32>
    %cst_117 = arith.constant 1.000000e+00 : f32
    %241 = vector.broadcast %cst_117 : f32 to vector<2x128xf32>
    %242 = arith.addf %241, %240 : vector<2x128xf32>
    %243 = arith.divf %241, %242 : vector<2x128xf32>
    %244 = vector.extract_strided_slice %237 {offsets = [0, 128], sizes = [2, 128], strides = [1, 1]} : vector<2x512xf32> to vector<2x128xf32>
    %245 = arith.negf %244 : vector<2x128xf32>
    %246 = math.exp %245 : vector<2x128xf32>
    %cst_118 = arith.constant 1.000000e+00 : f32
    %247 = vector.broadcast %cst_118 : f32 to vector<2x128xf32>
    %248 = arith.addf %247, %246 : vector<2x128xf32>
    %249 = arith.divf %247, %248 : vector<2x128xf32>
    %250 = vector.extract_strided_slice %237 {offsets = [0, 256], sizes = [2, 128], strides = [1, 1]} : vector<2x512xf32> to vector<2x128xf32>
    %251 = math.tanh %250 : vector<2x128xf32>
    %252 = vector.extract_strided_slice %237 {offsets = [0, 384], sizes = [2, 128], strides = [1, 1]} : vector<2x512xf32> to vector<2x128xf32>
    %253 = arith.negf %252 : vector<2x128xf32>
    %254 = math.exp %253 : vector<2x128xf32>
    %cst_119 = arith.constant 1.000000e+00 : f32
    %255 = vector.broadcast %cst_119 : f32 to vector<2x128xf32>
    %256 = arith.addf %255, %254 : vector<2x128xf32>
    %257 = arith.divf %255, %256 : vector<2x128xf32>
    %258 = arith.mulf %249, %230 : vector<2x128xf32>
    %259 = arith.mulf %243, %251 : vector<2x128xf32>
    %260 = arith.addf %258, %259 : vector<2x128xf32>
    %261 = math.tanh %260 : vector<2x128xf32>
    %262 = arith.mulf %257, %261 : vector<2x128xf32>
    %c12_120 = arith.constant 12 : index
    %c0_121 = arith.constant 0 : index
    %263 = vector.load %arg14[%c12_120, %c0_121] : memref<16x128xf32, #tpu.memory_space<vmem>>, vector<2x128xf32>
    tpu.vector_store %arg14[%c12_120, %c0_121], %262 {strides = array<i32>} : memref<16x128xf32, #tpu.memory_space<vmem>>, vector<2x128xf32>,
    %c14_122 = arith.constant 14 : index
    %c0_123 = arith.constant 0 : index
    %264 = vector.load %arg13[%c14_122, %c0_123] : memref<16x512xf32, #tpu.memory_space<vmem>>, vector<2x512xf32>
    %c0_124 = arith.constant 0 : index
    %c0_125 = arith.constant 0 : index
    %265 = vector.load %arg5[%c0_124, %c0_125] : memref<128x512xf32, #tpu.memory_space<vmem>>, vector<128x512xf32>
    %cst_126 = arith.constant dense<0.000000e+00> : vector<2x512xf32>
    %266 = tpu.matmul %262, %265, %cst_126 {dimension_numbers = #tpu.dot_dimension_numbers<[1], [0], [0], [1], [0, 0, 1, 1], [], []>} : vector<2x128xf32>, vector<128x512xf32>, vector<2x512xf32> -> vector<2x512xf32>
    %267 = arith.addf %264, %266 : vector<2x512xf32>
    %268 = vector.extract_strided_slice %267 {offsets = [0, 0], sizes = [2, 128], strides = [1, 1]} : vector<2x512xf32> to vector<2x128xf32>
    %269 = arith.negf %268 : vector<2x128xf32>
    %270 = math.exp %269 : vector<2x128xf32>
    %cst_127 = arith.constant 1.000000e+00 : f32
    %271 = vector.broadcast %cst_127 : f32 to vector<2x128xf32>
    %272 = arith.addf %271, %270 : vector<2x128xf32>
    %273 = arith.divf %271, %272 : vector<2x128xf32>
    %274 = vector.extract_strided_slice %267 {offsets = [0, 128], sizes = [2, 128], strides = [1, 1]} : vector<2x512xf32> to vector<2x128xf32>
    %275 = arith.negf %274 : vector<2x128xf32>
    %276 = math.exp %275 : vector<2x128xf32>
    %cst_128 = arith.constant 1.000000e+00 : f32
    %277 = vector.broadcast %cst_128 : f32 to vector<2x128xf32>
    %278 = arith.addf %277, %276 : vector<2x128xf32>
    %279 = arith.divf %277, %278 : vector<2x128xf32>
    %280 = vector.extract_strided_slice %267 {offsets = [0, 256], sizes = [2, 128], strides = [1, 1]} : vector<2x512xf32> to vector<2x128xf32>
    %281 = math.tanh %280 : vector<2x128xf32>
    %282 = vector.extract_strided_slice %267 {offsets = [0, 384], sizes = [2, 128], strides = [1, 1]} : vector<2x512xf32> to vector<2x128xf32>
    %283 = arith.negf %282 : vector<2x128xf32>
    %284 = math.exp %283 : vector<2x128xf32>
    %cst_129 = arith.constant 1.000000e+00 : f32
    %285 = vector.broadcast %cst_129 : f32 to vector<2x128xf32>
    %286 = arith.addf %285, %284 : vector<2x128xf32>
    %287 = arith.divf %285, %286 : vector<2x128xf32>
    %288 = arith.mulf %279, %260 : vector<2x128xf32>
    %289 = arith.mulf %273, %281 : vector<2x128xf32>
    %290 = arith.addf %288, %289 : vector<2x128xf32>
    %291 = math.tanh %290 : vector<2x128xf32>
    %292 = arith.mulf %287, %291 : vector<2x128xf32>
    %c14_130 = arith.constant 14 : index
    %c0_131 = arith.constant 0 : index
    %293 = vector.load %arg14[%c14_130, %c0_131] : memref<16x128xf32, #tpu.memory_space<vmem>>, vector<2x128xf32>
    tpu.vector_store %arg14[%c14_130, %c0_131], %292 {strides = array<i32>} : memref<16x128xf32, #tpu.memory_space<vmem>>, vector<2x128xf32>,
    %c0_i32_132 = arith.constant 0 : i32
    %294 = tpu.memref_slice %arg19[%c0_i32_132] : memref<3x!tpu.dma_semaphore, #tpu.memory_space<semaphore_mem>> -> memref<1x!tpu.dma_semaphore, #tpu.memory_space<semaphore_mem>>
    %295 = tpu.memref_squeeze %294 : memref<1x!tpu.dma_semaphore, #tpu.memory_space<semaphore_mem>> -> memref<!tpu.dma_semaphore, #tpu.memory_space<semaphore_mem>>
    tpu.wait_dma2 semaphore(%295 : memref<!tpu.dma_semaphore, #tpu.memory_space<semaphore_mem>>) src(%arg6 : memref<128x1024xf32, #tpu.memory_space<any>>) dst(%arg16 : memref<128x1024xf32, #tpu.memory_space<vmem>>)
    %c1_i32_133 = arith.constant 1 : i32
    %296 = tpu.memref_slice %arg19[%c1_i32_133] : memref<3x!tpu.dma_semaphore, #tpu.memory_space<semaphore_mem>> -> memref<1x!tpu.dma_semaphore, #tpu.memory_space<semaphore_mem>>
    %297 = tpu.memref_squeeze %296 : memref<1x!tpu.dma_semaphore, #tpu.memory_space<semaphore_mem>> -> memref<!tpu.dma_semaphore, #tpu.memory_space<semaphore_mem>>
    tpu.wait_dma2 semaphore(%297 : memref<!tpu.dma_semaphore, #tpu.memory_space<semaphore_mem>>) src(%arg8 : memref<128x512xf32, #tpu.memory_space<any>>) dst(%arg17 : memref<128x512xf32, #tpu.memory_space<vmem>>)
    %c0_134 = arith.constant 0 : index
    %c0_135 = arith.constant 0 : index
    %298 = vector.load %arg14[%c0_134, %c0_135] : memref<16x128xf32, #tpu.memory_space<vmem>>, vector<16x128xf32>
    %c0_136 = arith.constant 0 : index
    %c0_137 = arith.constant 0 : index
    %299 = vector.load %arg16[%c0_136, %c0_137] : memref<128x1024xf32, #tpu.memory_space<vmem>>, vector<128x1024xf32>
    %cst_138 = arith.constant dense<0.000000e+00> : vector<16x1024xf32>
    %300 = tpu.matmul %298, %299, %cst_138 {dimension_numbers = #tpu.dot_dimension_numbers<[1], [0], [0], [1], [0, 0, 1, 1], [], []>} : vector<16x128xf32>, vector<128x1024xf32>, vector<16x1024xf32> -> vector<16x1024xf32>
    %c0_139 = arith.constant 0 : index
    %c0_140 = arith.constant 0 : index
    %301 = vector.load %arg7[%c0_139, %c0_140] : memref<1x1024xf32, #tpu.memory_space<vmem>>, vector<1x1024xf32>
    %302 = vector.broadcast %301 : vector<1x1024xf32> to vector<16x1024xf32>
    %303 = arith.addf %300, %302 : vector<16x1024xf32>
    %c0_141 = arith.constant 0 : index
    %c0_142 = arith.constant 0 : index
    %304 = vector.load %arg12[%c0_141, %c0_142] : memref<16x1024xf32, #tpu.memory_space<vmem>>, vector<16x1024xf32>
    tpu.vector_store %arg12[%c0_141, %c0_142], %303 {strides = array<i32>} : memref<16x1024xf32, #tpu.memory_space<vmem>>, vector<16x1024xf32>,
    %c0_143 = arith.constant 0 : index
    %c0_144 = arith.constant 0 : index
    %305 = vector.load %arg12[%c0_143, %c0_144] : memref<16x1024xf32, #tpu.memory_space<vmem>>, vector<2x512xf32>
    %c14_145 = arith.constant 14 : index
    %c512_146 = arith.constant 512 : index
    %306 = vector.load %arg12[%c14_145, %c512_146] : memref<16x1024xf32, #tpu.memory_space<vmem>>, vector<2x512xf32>
    %307 = arith.addf %305, %306 : vector<2x512xf32>
    %c0_147 = arith.constant 0 : index
    %c0_148 = arith.constant 0 : index
    %308 = vector.load %arg13[%c0_147, %c0_148] : memref<16x512xf32, #tpu.memory_space<vmem>>, vector<2x512xf32>
    tpu.vector_store %arg13[%c0_147, %c0_148], %307 {strides = array<i32>} : memref<16x512xf32, #tpu.memory_space<vmem>>, vector<2x512xf32>,
    %c2_149 = arith.constant 2 : index
    %c0_150 = arith.constant 0 : index
    %309 = vector.load %arg12[%c2_149, %c0_150] : memref<16x1024xf32, #tpu.memory_space<vmem>>, vector<2x512xf32>
    %c12_151 = arith.constant 12 : index
    %c512_152 = arith.constant 512 : index
    %310 = vector.load %arg12[%c12_151, %c512_152] : memref<16x1024xf32, #tpu.memory_space<vmem>>, vector<2x512xf32>
    %311 = arith.addf %309, %310 : vector<2x512xf32>
    %c2_153 = arith.constant 2 : index
    %c0_154 = arith.constant 0 : index
    %312 = vector.load %arg13[%c2_153, %c0_154] : memref<16x512xf32, #tpu.memory_space<vmem>>, vector<2x512xf32>
    tpu.vector_store %arg13[%c2_153, %c0_154], %311 {strides = array<i32>} : memref<16x512xf32, #tpu.memory_space<vmem>>, vector<2x512xf32>,
    %c4_155 = arith.constant 4 : index
    %c0_156 = arith.constant 0 : index
    %313 = vector.load %arg12[%c4_155, %c0_156] : memref<16x1024xf32, #tpu.memory_space<vmem>>, vector<2x512xf32>
    %c10_157 = arith.constant 10 : index
    %c512_158 = arith.constant 512 : index
    %314 = vector.load %arg12[%c10_157, %c512_158] : memref<16x1024xf32, #tpu.memory_space<vmem>>, vector<2x512xf32>
    %315 = arith.addf %313, %314 : vector<2x512xf32>
    %c4_159 = arith.constant 4 : index
    %c0_160 = arith.constant 0 : index
    %316 = vector.load %arg13[%c4_159, %c0_160] : memref<16x512xf32, #tpu.memory_space<vmem>>, vector<2x512xf32>
    tpu.vector_store %arg13[%c4_159, %c0_160], %315 {strides = array<i32>} : memref<16x512xf32, #tpu.memory_space<vmem>>, vector<2x512xf32>,
    %c6_161 = arith.constant 6 : index
    %c0_162 = arith.constant 0 : index
    %317 = vector.load %arg12[%c6_161, %c0_162] : memref<16x1024xf32, #tpu.memory_space<vmem>>, vector<2x512xf32>
    %c8_163 = arith.constant 8 : index
    %c512_164 = arith.constant 512 : index
    %318 = vector.load %arg12[%c8_163, %c512_164] : memref<16x1024xf32, #tpu.memory_space<vmem>>, vector<2x512xf32>
    %319 = arith.addf %317, %318 : vector<2x512xf32>
    %c6_165 = arith.constant 6 : index
    %c0_166 = arith.constant 0 : index
    %320 = vector.load %arg13[%c6_165, %c0_166] : memref<16x512xf32, #tpu.memory_space<vmem>>, vector<2x512xf32>
    tpu.vector_store %arg13[%c6_165, %c0_166], %319 {strides = array<i32>} : memref<16x512xf32, #tpu.memory_space<vmem>>, vector<2x512xf32>,
    %c8_167 = arith.constant 8 : index
    %c0_168 = arith.constant 0 : index
    %321 = vector.load %arg12[%c8_167, %c0_168] : memref<16x1024xf32, #tpu.memory_space<vmem>>, vector<2x512xf32>
    %c6_169 = arith.constant 6 : index
    %c512_170 = arith.constant 512 : index
    %322 = vector.load %arg12[%c6_169, %c512_170] : memref<16x1024xf32, #tpu.memory_space<vmem>>, vector<2x512xf32>
    %323 = arith.addf %321, %322 : vector<2x512xf32>
    %c8_171 = arith.constant 8 : index
    %c0_172 = arith.constant 0 : index
    %324 = vector.load %arg13[%c8_171, %c0_172] : memref<16x512xf32, #tpu.memory_space<vmem>>, vector<2x512xf32>
    tpu.vector_store %arg13[%c8_171, %c0_172], %323 {strides = array<i32>} : memref<16x512xf32, #tpu.memory_space<vmem>>, vector<2x512xf32>,
    %c10_173 = arith.constant 10 : index
    %c0_174 = arith.constant 0 : index
    %325 = vector.load %arg12[%c10_173, %c0_174] : memref<16x1024xf32, #tpu.memory_space<vmem>>, vector<2x512xf32>
    %c4_175 = arith.constant 4 : index
    %c512_176 = arith.constant 512 : index
    %326 = vector.load %arg12[%c4_175, %c512_176] : memref<16x1024xf32, #tpu.memory_space<vmem>>, vector<2x512xf32>
    %327 = arith.addf %325, %326 : vector<2x512xf32>
    %c10_177 = arith.constant 10 : index
    %c0_178 = arith.constant 0 : index
    %328 = vector.load %arg13[%c10_177, %c0_178] : memref<16x512xf32, #tpu.memory_space<vmem>>, vector<2x512xf32>
    tpu.vector_store %arg13[%c10_177, %c0_178], %327 {strides = array<i32>} : memref<16x512xf32, #tpu.memory_space<vmem>>, vector<2x512xf32>,
    %c12_179 = arith.constant 12 : index
    %c0_180 = arith.constant 0 : index
    %329 = vector.load %arg12[%c12_179, %c0_180] : memref<16x1024xf32, #tpu.memory_space<vmem>>, vector<2x512xf32>
    %c2_181 = arith.constant 2 : index
    %c512_182 = arith.constant 512 : index
    %330 = vector.load %arg12[%c2_181, %c512_182] : memref<16x1024xf32, #tpu.memory_space<vmem>>, vector<2x512xf32>
    %331 = arith.addf %329, %330 : vector<2x512xf32>
    %c12_183 = arith.constant 12 : index
    %c0_184 = arith.constant 0 : index
    %332 = vector.load %arg13[%c12_183, %c0_184] : memref<16x512xf32, #tpu.memory_space<vmem>>, vector<2x512xf32>
    tpu.vector_store %arg13[%c12_183, %c0_184], %331 {strides = array<i32>} : memref<16x512xf32, #tpu.memory_space<vmem>>, vector<2x512xf32>,
    %c14_185 = arith.constant 14 : index
    %c0_186 = arith.constant 0 : index
    %333 = vector.load %arg12[%c14_185, %c0_186] : memref<16x1024xf32, #tpu.memory_space<vmem>>, vector<2x512xf32>
    %c0_187 = arith.constant 0 : index
    %c512_188 = arith.constant 512 : index
    %334 = vector.load %arg12[%c0_187, %c512_188] : memref<16x1024xf32, #tpu.memory_space<vmem>>, vector<2x512xf32>
    %335 = arith.addf %333, %334 : vector<2x512xf32>
    %c14_189 = arith.constant 14 : index
    %c0_190 = arith.constant 0 : index
    %336 = vector.load %arg13[%c14_189, %c0_190] : memref<16x512xf32, #tpu.memory_space<vmem>>, vector<2x512xf32>
    tpu.vector_store %arg13[%c14_189, %c0_190], %335 {strides = array<i32>} : memref<16x512xf32, #tpu.memory_space<vmem>>, vector<2x512xf32>,
    %cst_191 = arith.constant 0.000000e+00 : f32
    %337 = vector.broadcast %cst_191 : f32 to vector<2x128xf32>
    %cst_192 = arith.constant 0.000000e+00 : f32
    %338 = vector.broadcast %cst_192 : f32 to vector<2x128xf32>
    %c0_193 = arith.constant 0 : index
    %c0_194 = arith.constant 0 : index
    %339 = vector.load %arg13[%c0_193, %c0_194] : memref<16x512xf32, #tpu.memory_space<vmem>>, vector<2x512xf32>
    %c0_195 = arith.constant 0 : index
    %c0_196 = arith.constant 0 : index
    %340 = vector.load %arg17[%c0_195, %c0_196] : memref<128x512xf32, #tpu.memory_space<vmem>>, vector<128x512xf32>
    %cst_197 = arith.constant dense<0.000000e+00> : vector<2x512xf32>
    %341 = tpu.matmul %337, %340, %cst_197 {dimension_numbers = #tpu.dot_dimension_numbers<[1], [0], [0], [1], [0, 0, 1, 1], [], []>} : vector<2x128xf32>, vector<128x512xf32>, vector<2x512xf32> -> vector<2x512xf32>
    %342 = arith.addf %339, %341 : vector<2x512xf32>
    %343 = vector.extract_strided_slice %342 {offsets = [0, 0], sizes = [2, 128], strides = [1, 1]} : vector<2x512xf32> to vector<2x128xf32>
    %344 = arith.negf %343 : vector<2x128xf32>
    %345 = math.exp %344 : vector<2x128xf32>
    %cst_198 = arith.constant 1.000000e+00 : f32
    %346 = vector.broadcast %cst_198 : f32 to vector<2x128xf32>
    %347 = arith.addf %346, %345 : vector<2x128xf32>
    %348 = arith.divf %346, %347 : vector<2x128xf32>
    %349 = vector.extract_strided_slice %342 {offsets = [0, 128], sizes = [2, 128], strides = [1, 1]} : vector<2x512xf32> to vector<2x128xf32>
    %350 = arith.negf %349 : vector<2x128xf32>
    %351 = math.exp %350 : vector<2x128xf32>
    %cst_199 = arith.constant 1.000000e+00 : f32
    %352 = vector.broadcast %cst_199 : f32 to vector<2x128xf32>
    %353 = arith.addf %352, %351 : vector<2x128xf32>
    %354 = arith.divf %352, %353 : vector<2x128xf32>
    %355 = vector.extract_strided_slice %342 {offsets = [0, 256], sizes = [2, 128], strides = [1, 1]} : vector<2x512xf32> to vector<2x128xf32>
    %356 = math.tanh %355 : vector<2x128xf32>
    %357 = vector.extract_strided_slice %342 {offsets = [0, 384], sizes = [2, 128], strides = [1, 1]} : vector<2x512xf32> to vector<2x128xf32>
    %358 = arith.negf %357 : vector<2x128xf32>
    %359 = math.exp %358 : vector<2x128xf32>
    %cst_200 = arith.constant 1.000000e+00 : f32
    %360 = vector.broadcast %cst_200 : f32 to vector<2x128xf32>
    %361 = arith.addf %360, %359 : vector<2x128xf32>
    %362 = arith.divf %360, %361 : vector<2x128xf32>
    %363 = arith.mulf %354, %338 : vector<2x128xf32>
    %364 = arith.mulf %348, %356 : vector<2x128xf32>
    %365 = arith.addf %363, %364 : vector<2x128xf32>
    %366 = math.tanh %365 : vector<2x128xf32>
    %367 = arith.mulf %362, %366 : vector<2x128xf32>
    %c0_201 = arith.constant 0 : index
    %c0_202 = arith.constant 0 : index
    %368 = vector.load %arg14[%c0_201, %c0_202] : memref<16x128xf32, #tpu.memory_space<vmem>>, vector<2x128xf32>
    tpu.vector_store %arg14[%c0_201, %c0_202], %367 {strides = array<i32>} : memref<16x128xf32, #tpu.memory_space<vmem>>, vector<2x128xf32>,
    %c2_203 = arith.constant 2 : index
    %c0_204 = arith.constant 0 : index
    %369 = vector.load %arg13[%c2_203, %c0_204] : memref<16x512xf32, #tpu.memory_space<vmem>>, vector<2x512xf32>
    %c0_205 = arith.constant 0 : index
    %c0_206 = arith.constant 0 : index
    %370 = vector.load %arg17[%c0_205, %c0_206] : memref<128x512xf32, #tpu.memory_space<vmem>>, vector<128x512xf32>
    %cst_207 = arith.constant dense<0.000000e+00> : vector<2x512xf32>
    %371 = tpu.matmul %367, %370, %cst_207 {dimension_numbers = #tpu.dot_dimension_numbers<[1], [0], [0], [1], [0, 0, 1, 1], [], []>} : vector<2x128xf32>, vector<128x512xf32>, vector<2x512xf32> -> vector<2x512xf32>
    %372 = arith.addf %369, %371 : vector<2x512xf32>
    %373 = vector.extract_strided_slice %372 {offsets = [0, 0], sizes = [2, 128], strides = [1, 1]} : vector<2x512xf32> to vector<2x128xf32>
    %374 = arith.negf %373 : vector<2x128xf32>
    %375 = math.exp %374 : vector<2x128xf32>
    %cst_208 = arith.constant 1.000000e+00 : f32
    %376 = vector.broadcast %cst_208 : f32 to vector<2x128xf32>
    %377 = arith.addf %376, %375 : vector<2x128xf32>
    %378 = arith.divf %376, %377 : vector<2x128xf32>
    %379 = vector.extract_strided_slice %372 {offsets = [0, 128], sizes = [2, 128], strides = [1, 1]} : vector<2x512xf32> to vector<2x128xf32>
    %380 = arith.negf %379 : vector<2x128xf32>
    %381 = math.exp %380 : vector<2x128xf32>
    %cst_209 = arith.constant 1.000000e+00 : f32
    %382 = vector.broadcast %cst_209 : f32 to vector<2x128xf32>
    %383 = arith.addf %382, %381 : vector<2x128xf32>
    %384 = arith.divf %382, %383 : vector<2x128xf32>
    %385 = vector.extract_strided_slice %372 {offsets = [0, 256], sizes = [2, 128], strides = [1, 1]} : vector<2x512xf32> to vector<2x128xf32>
    %386 = math.tanh %385 : vector<2x128xf32>
    %387 = vector.extract_strided_slice %372 {offsets = [0, 384], sizes = [2, 128], strides = [1, 1]} : vector<2x512xf32> to vector<2x128xf32>
    %388 = arith.negf %387 : vector<2x128xf32>
    %389 = math.exp %388 : vector<2x128xf32>
    %cst_210 = arith.constant 1.000000e+00 : f32
    %390 = vector.broadcast %cst_210 : f32 to vector<2x128xf32>
    %391 = arith.addf %390, %389 : vector<2x128xf32>
    %392 = arith.divf %390, %391 : vector<2x128xf32>
    %393 = arith.mulf %384, %365 : vector<2x128xf32>
    %394 = arith.mulf %378, %386 : vector<2x128xf32>
    %395 = arith.addf %393, %394 : vector<2x128xf32>
    %396 = math.tanh %395 : vector<2x128xf32>
    %397 = arith.mulf %392, %396 : vector<2x128xf32>
    %c2_211 = arith.constant 2 : index
    %c0_212 = arith.constant 0 : index
    %398 = vector.load %arg14[%c2_211, %c0_212] : memref<16x128xf32, #tpu.memory_space<vmem>>, vector<2x128xf32>
    tpu.vector_store %arg14[%c2_211, %c0_212], %397 {strides = array<i32>} : memref<16x128xf32, #tpu.memory_space<vmem>>, vector<2x128xf32>,
    %c4_213 = arith.constant 4 : index
    %c0_214 = arith.constant 0 : index
    %399 = vector.load %arg13[%c4_213, %c0_214] : memref<16x512xf32, #tpu.memory_space<vmem>>, vector<2x512xf32>
    %c0_215 = arith.constant 0 : index
    %c0_216 = arith.constant 0 : index
    %400 = vector.load %arg17[%c0_215, %c0_216] : memref<128x512xf32, #tpu.memory_space<vmem>>, vector<128x512xf32>
    %cst_217 = arith.constant dense<0.000000e+00> : vector<2x512xf32>
    %401 = tpu.matmul %397, %400, %cst_217 {dimension_numbers = #tpu.dot_dimension_numbers<[1], [0], [0], [1], [0, 0, 1, 1], [], []>} : vector<2x128xf32>, vector<128x512xf32>, vector<2x512xf32> -> vector<2x512xf32>
    %402 = arith.addf %399, %401 : vector<2x512xf32>
    %403 = vector.extract_strided_slice %402 {offsets = [0, 0], sizes = [2, 128], strides = [1, 1]} : vector<2x512xf32> to vector<2x128xf32>
    %404 = arith.negf %403 : vector<2x128xf32>
    %405 = math.exp %404 : vector<2x128xf32>
    %cst_218 = arith.constant 1.000000e+00 : f32
    %406 = vector.broadcast %cst_218 : f32 to vector<2x128xf32>
    %407 = arith.addf %406, %405 : vector<2x128xf32>
    %408 = arith.divf %406, %407 : vector<2x128xf32>
    %409 = vector.extract_strided_slice %402 {offsets = [0, 128], sizes = [2, 128], strides = [1, 1]} : vector<2x512xf32> to vector<2x128xf32>
    %410 = arith.negf %409 : vector<2x128xf32>
    %411 = math.exp %410 : vector<2x128xf32>
    %cst_219 = arith.constant 1.000000e+00 : f32
    %412 = vector.broadcast %cst_219 : f32 to vector<2x128xf32>
    %413 = arith.addf %412, %411 : vector<2x128xf32>
    %414 = arith.divf %412, %413 : vector<2x128xf32>
    %415 = vector.extract_strided_slice %402 {offsets = [0, 256], sizes = [2, 128], strides = [1, 1]} : vector<2x512xf32> to vector<2x128xf32>
    %416 = math.tanh %415 : vector<2x128xf32>
    %417 = vector.extract_strided_slice %402 {offsets = [0, 384], sizes = [2, 128], strides = [1, 1]} : vector<2x512xf32> to vector<2x128xf32>
    %418 = arith.negf %417 : vector<2x128xf32>
    %419 = math.exp %418 : vector<2x128xf32>
    %cst_220 = arith.constant 1.000000e+00 : f32
    %420 = vector.broadcast %cst_220 : f32 to vector<2x128xf32>
    %421 = arith.addf %420, %419 : vector<2x128xf32>
    %422 = arith.divf %420, %421 : vector<2x128xf32>
    %423 = arith.mulf %414, %395 : vector<2x128xf32>
    %424 = arith.mulf %408, %416 : vector<2x128xf32>
    %425 = arith.addf %423, %424 : vector<2x128xf32>
    %426 = math.tanh %425 : vector<2x128xf32>
    %427 = arith.mulf %422, %426 : vector<2x128xf32>
    %c4_221 = arith.constant 4 : index
    %c0_222 = arith.constant 0 : index
    %428 = vector.load %arg14[%c4_221, %c0_222] : memref<16x128xf32, #tpu.memory_space<vmem>>, vector<2x128xf32>
    tpu.vector_store %arg14[%c4_221, %c0_222], %427 {strides = array<i32>} : memref<16x128xf32, #tpu.memory_space<vmem>>, vector<2x128xf32>,
    %c6_223 = arith.constant 6 : index
    %c0_224 = arith.constant 0 : index
    %429 = vector.load %arg13[%c6_223, %c0_224] : memref<16x512xf32, #tpu.memory_space<vmem>>, vector<2x512xf32>
    %c0_225 = arith.constant 0 : index
    %c0_226 = arith.constant 0 : index
    %430 = vector.load %arg17[%c0_225, %c0_226] : memref<128x512xf32, #tpu.memory_space<vmem>>, vector<128x512xf32>
    %cst_227 = arith.constant dense<0.000000e+00> : vector<2x512xf32>
    %431 = tpu.matmul %427, %430, %cst_227 {dimension_numbers = #tpu.dot_dimension_numbers<[1], [0], [0], [1], [0, 0, 1, 1], [], []>} : vector<2x128xf32>, vector<128x512xf32>, vector<2x512xf32> -> vector<2x512xf32>
    %432 = arith.addf %429, %431 : vector<2x512xf32>
    %433 = vector.extract_strided_slice %432 {offsets = [0, 0], sizes = [2, 128], strides = [1, 1]} : vector<2x512xf32> to vector<2x128xf32>
    %434 = arith.negf %433 : vector<2x128xf32>
    %435 = math.exp %434 : vector<2x128xf32>
    %cst_228 = arith.constant 1.000000e+00 : f32
    %436 = vector.broadcast %cst_228 : f32 to vector<2x128xf32>
    %437 = arith.addf %436, %435 : vector<2x128xf32>
    %438 = arith.divf %436, %437 : vector<2x128xf32>
    %439 = vector.extract_strided_slice %432 {offsets = [0, 128], sizes = [2, 128], strides = [1, 1]} : vector<2x512xf32> to vector<2x128xf32>
    %440 = arith.negf %439 : vector<2x128xf32>
    %441 = math.exp %440 : vector<2x128xf32>
    %cst_229 = arith.constant 1.000000e+00 : f32
    %442 = vector.broadcast %cst_229 : f32 to vector<2x128xf32>
    %443 = arith.addf %442, %441 : vector<2x128xf32>
    %444 = arith.divf %442, %443 : vector<2x128xf32>
    %445 = vector.extract_strided_slice %432 {offsets = [0, 256], sizes = [2, 128], strides = [1, 1]} : vector<2x512xf32> to vector<2x128xf32>
    %446 = math.tanh %445 : vector<2x128xf32>
    %447 = vector.extract_strided_slice %432 {offsets = [0, 384], sizes = [2, 128], strides = [1, 1]} : vector<2x512xf32> to vector<2x128xf32>
    %448 = arith.negf %447 : vector<2x128xf32>
    %449 = math.exp %448 : vector<2x128xf32>
    %cst_230 = arith.constant 1.000000e+00 : f32
    %450 = vector.broadcast %cst_230 : f32 to vector<2x128xf32>
    %451 = arith.addf %450, %449 : vector<2x128xf32>
    %452 = arith.divf %450, %451 : vector<2x128xf32>
    %453 = arith.mulf %444, %425 : vector<2x128xf32>
    %454 = arith.mulf %438, %446 : vector<2x128xf32>
    %455 = arith.addf %453, %454 : vector<2x128xf32>
    %456 = math.tanh %455 : vector<2x128xf32>
    %457 = arith.mulf %452, %456 : vector<2x128xf32>
    %c6_231 = arith.constant 6 : index
    %c0_232 = arith.constant 0 : index
    %458 = vector.load %arg14[%c6_231, %c0_232] : memref<16x128xf32, #tpu.memory_space<vmem>>, vector<2x128xf32>
    tpu.vector_store %arg14[%c6_231, %c0_232], %457 {strides = array<i32>} : memref<16x128xf32, #tpu.memory_space<vmem>>, vector<2x128xf32>,
    %c8_233 = arith.constant 8 : index
    %c0_234 = arith.constant 0 : index
    %459 = vector.load %arg13[%c8_233, %c0_234] : memref<16x512xf32, #tpu.memory_space<vmem>>, vector<2x512xf32>
    %c0_235 = arith.constant 0 : index
    %c0_236 = arith.constant 0 : index
    %460 = vector.load %arg17[%c0_235, %c0_236] : memref<128x512xf32, #tpu.memory_space<vmem>>, vector<128x512xf32>
    %cst_237 = arith.constant dense<0.000000e+00> : vector<2x512xf32>
    %461 = tpu.matmul %457, %460, %cst_237 {dimension_numbers = #tpu.dot_dimension_numbers<[1], [0], [0], [1], [0, 0, 1, 1], [], []>} : vector<2x128xf32>, vector<128x512xf32>, vector<2x512xf32> -> vector<2x512xf32>
    %462 = arith.addf %459, %461 : vector<2x512xf32>
    %463 = vector.extract_strided_slice %462 {offsets = [0, 0], sizes = [2, 128], strides = [1, 1]} : vector<2x512xf32> to vector<2x128xf32>
    %464 = arith.negf %463 : vector<2x128xf32>
    %465 = math.exp %464 : vector<2x128xf32>
    %cst_238 = arith.constant 1.000000e+00 : f32
    %466 = vector.broadcast %cst_238 : f32 to vector<2x128xf32>
    %467 = arith.addf %466, %465 : vector<2x128xf32>
    %468 = arith.divf %466, %467 : vector<2x128xf32>
    %469 = vector.extract_strided_slice %462 {offsets = [0, 128], sizes = [2, 128], strides = [1, 1]} : vector<2x512xf32> to vector<2x128xf32>
    %470 = arith.negf %469 : vector<2x128xf32>
    %471 = math.exp %470 : vector<2x128xf32>
    %cst_239 = arith.constant 1.000000e+00 : f32
    %472 = vector.broadcast %cst_239 : f32 to vector<2x128xf32>
    %473 = arith.addf %472, %471 : vector<2x128xf32>
    %474 = arith.divf %472, %473 : vector<2x128xf32>
    %475 = vector.extract_strided_slice %462 {offsets = [0, 256], sizes = [2, 128], strides = [1, 1]} : vector<2x512xf32> to vector<2x128xf32>
    %476 = math.tanh %475 : vector<2x128xf32>
    %477 = vector.extract_strided_slice %462 {offsets = [0, 384], sizes = [2, 128], strides = [1, 1]} : vector<2x512xf32> to vector<2x128xf32>
    %478 = arith.negf %477 : vector<2x128xf32>
    %479 = math.exp %478 : vector<2x128xf32>
    %cst_240 = arith.constant 1.000000e+00 : f32
    %480 = vector.broadcast %cst_240 : f32 to vector<2x128xf32>
    %481 = arith.addf %480, %479 : vector<2x128xf32>
    %482 = arith.divf %480, %481 : vector<2x128xf32>
    %483 = arith.mulf %474, %455 : vector<2x128xf32>
    %484 = arith.mulf %468, %476 : vector<2x128xf32>
    %485 = arith.addf %483, %484 : vector<2x128xf32>
    %486 = math.tanh %485 : vector<2x128xf32>
    %487 = arith.mulf %482, %486 : vector<2x128xf32>
    %c8_241 = arith.constant 8 : index
    %c0_242 = arith.constant 0 : index
    %488 = vector.load %arg14[%c8_241, %c0_242] : memref<16x128xf32, #tpu.memory_space<vmem>>, vector<2x128xf32>
    tpu.vector_store %arg14[%c8_241, %c0_242], %487 {strides = array<i32>} : memref<16x128xf32, #tpu.memory_space<vmem>>, vector<2x128xf32>,
    %c10_243 = arith.constant 10 : index
    %c0_244 = arith.constant 0 : index
    %489 = vector.load %arg13[%c10_243, %c0_244] : memref<16x512xf32, #tpu.memory_space<vmem>>, vector<2x512xf32>
    %c0_245 = arith.constant 0 : index
    %c0_246 = arith.constant 0 : index
    %490 = vector.load %arg17[%c0_245, %c0_246] : memref<128x512xf32, #tpu.memory_space<vmem>>, vector<128x512xf32>
    %cst_247 = arith.constant dense<0.000000e+00> : vector<2x512xf32>
    %491 = tpu.matmul %487, %490, %cst_247 {dimension_numbers = #tpu.dot_dimension_numbers<[1], [0], [0], [1], [0, 0, 1, 1], [], []>} : vector<2x128xf32>, vector<128x512xf32>, vector<2x512xf32> -> vector<2x512xf32>
    %492 = arith.addf %489, %491 : vector<2x512xf32>
    %493 = vector.extract_strided_slice %492 {offsets = [0, 0], sizes = [2, 128], strides = [1, 1]} : vector<2x512xf32> to vector<2x128xf32>
    %494 = arith.negf %493 : vector<2x128xf32>
    %495 = math.exp %494 : vector<2x128xf32>
    %cst_248 = arith.constant 1.000000e+00 : f32
    %496 = vector.broadcast %cst_248 : f32 to vector<2x128xf32>
    %497 = arith.addf %496, %495 : vector<2x128xf32>
    %498 = arith.divf %496, %497 : vector<2x128xf32>
    %499 = vector.extract_strided_slice %492 {offsets = [0, 128], sizes = [2, 128], strides = [1, 1]} : vector<2x512xf32> to vector<2x128xf32>
    %500 = arith.negf %499 : vector<2x128xf32>
    %501 = math.exp %500 : vector<2x128xf32>
    %cst_249 = arith.constant 1.000000e+00 : f32
    %502 = vector.broadcast %cst_249 : f32 to vector<2x128xf32>
    %503 = arith.addf %502, %501 : vector<2x128xf32>
    %504 = arith.divf %502, %503 : vector<2x128xf32>
    %505 = vector.extract_strided_slice %492 {offsets = [0, 256], sizes = [2, 128], strides = [1, 1]} : vector<2x512xf32> to vector<2x128xf32>
    %506 = math.tanh %505 : vector<2x128xf32>
    %507 = vector.extract_strided_slice %492 {offsets = [0, 384], sizes = [2, 128], strides = [1, 1]} : vector<2x512xf32> to vector<2x128xf32>
    %508 = arith.negf %507 : vector<2x128xf32>
    %509 = math.exp %508 : vector<2x128xf32>
    %cst_250 = arith.constant 1.000000e+00 : f32
    %510 = vector.broadcast %cst_250 : f32 to vector<2x128xf32>
    %511 = arith.addf %510, %509 : vector<2x128xf32>
    %512 = arith.divf %510, %511 : vector<2x128xf32>
    %513 = arith.mulf %504, %485 : vector<2x128xf32>
    %514 = arith.mulf %498, %506 : vector<2x128xf32>
    %515 = arith.addf %513, %514 : vector<2x128xf32>
    %516 = math.tanh %515 : vector<2x128xf32>
    %517 = arith.mulf %512, %516 : vector<2x128xf32>
    %c10_251 = arith.constant 10 : index
    %c0_252 = arith.constant 0 : index
    %518 = vector.load %arg14[%c10_251, %c0_252] : memref<16x128xf32, #tpu.memory_space<vmem>>, vector<2x128xf32>
    tpu.vector_store %arg14[%c10_251, %c0_252], %517 {strides = array<i32>} : memref<16x128xf32, #tpu.memory_space<vmem>>, vector<2x128xf32>,
    %c12_253 = arith.constant 12 : index
    %c0_254 = arith.constant 0 : index
    %519 = vector.load %arg13[%c12_253, %c0_254] : memref<16x512xf32, #tpu.memory_space<vmem>>, vector<2x512xf32>
    %c0_255 = arith.constant 0 : index
    %c0_256 = arith.constant 0 : index
    %520 = vector.load %arg17[%c0_255, %c0_256] : memref<128x512xf32, #tpu.memory_space<vmem>>, vector<128x512xf32>
    %cst_257 = arith.constant dense<0.000000e+00> : vector<2x512xf32>
    %521 = tpu.matmul %517, %520, %cst_257 {dimension_numbers = #tpu.dot_dimension_numbers<[1], [0], [0], [1], [0, 0, 1, 1], [], []>} : vector<2x128xf32>, vector<128x512xf32>, vector<2x512xf32> -> vector<2x512xf32>
    %522 = arith.addf %519, %521 : vector<2x512xf32>
    %523 = vector.extract_strided_slice %522 {offsets = [0, 0], sizes = [2, 128], strides = [1, 1]} : vector<2x512xf32> to vector<2x128xf32>
    %524 = arith.negf %523 : vector<2x128xf32>
    %525 = math.exp %524 : vector<2x128xf32>
    %cst_258 = arith.constant 1.000000e+00 : f32
    %526 = vector.broadcast %cst_258 : f32 to vector<2x128xf32>
    %527 = arith.addf %526, %525 : vector<2x128xf32>
    %528 = arith.divf %526, %527 : vector<2x128xf32>
    %529 = vector.extract_strided_slice %522 {offsets = [0, 128], sizes = [2, 128], strides = [1, 1]} : vector<2x512xf32> to vector<2x128xf32>
    %530 = arith.negf %529 : vector<2x128xf32>
    %531 = math.exp %530 : vector<2x128xf32>
    %cst_259 = arith.constant 1.000000e+00 : f32
    %532 = vector.broadcast %cst_259 : f32 to vector<2x128xf32>
    %533 = arith.addf %532, %531 : vector<2x128xf32>
    %534 = arith.divf %532, %533 : vector<2x128xf32>
    %535 = vector.extract_strided_slice %522 {offsets = [0, 256], sizes = [2, 128], strides = [1, 1]} : vector<2x512xf32> to vector<2x128xf32>
    %536 = math.tanh %535 : vector<2x128xf32>
    %537 = vector.extract_strided_slice %522 {offsets = [0, 384], sizes = [2, 128], strides = [1, 1]} : vector<2x512xf32> to vector<2x128xf32>
    %538 = arith.negf %537 : vector<2x128xf32>
    %539 = math.exp %538 : vector<2x128xf32>
    %cst_260 = arith.constant 1.000000e+00 : f32
    %540 = vector.broadcast %cst_260 : f32 to vector<2x128xf32>
    %541 = arith.addf %540, %539 : vector<2x128xf32>
    %542 = arith.divf %540, %541 : vector<2x128xf32>
    %543 = arith.mulf %534, %515 : vector<2x128xf32>
    %544 = arith.mulf %528, %536 : vector<2x128xf32>
    %545 = arith.addf %543, %544 : vector<2x128xf32>
    %546 = math.tanh %545 : vector<2x128xf32>
    %547 = arith.mulf %542, %546 : vector<2x128xf32>
    %c12_261 = arith.constant 12 : index
    %c0_262 = arith.constant 0 : index
    %548 = vector.load %arg14[%c12_261, %c0_262] : memref<16x128xf32, #tpu.memory_space<vmem>>, vector<2x128xf32>
    tpu.vector_store %arg14[%c12_261, %c0_262], %547 {strides = array<i32>} : memref<16x128xf32, #tpu.memory_space<vmem>>, vector<2x128xf32>,
    %c14_263 = arith.constant 14 : index
    %c0_264 = arith.constant 0 : index
    %549 = vector.load %arg13[%c14_263, %c0_264] : memref<16x512xf32, #tpu.memory_space<vmem>>, vector<2x512xf32>
    %c0_265 = arith.constant 0 : index
    %c0_266 = arith.constant 0 : index
    %550 = vector.load %arg17[%c0_265, %c0_266] : memref<128x512xf32, #tpu.memory_space<vmem>>, vector<128x512xf32>
    %cst_267 = arith.constant dense<0.000000e+00> : vector<2x512xf32>
    %551 = tpu.matmul %547, %550, %cst_267 {dimension_numbers = #tpu.dot_dimension_numbers<[1], [0], [0], [1], [0, 0, 1, 1], [], []>} : vector<2x128xf32>, vector<128x512xf32>, vector<2x512xf32> -> vector<2x512xf32>
    %552 = arith.addf %549, %551 : vector<2x512xf32>
    %553 = vector.extract_strided_slice %552 {offsets = [0, 0], sizes = [2, 128], strides = [1, 1]} : vector<2x512xf32> to vector<2x128xf32>
    %554 = arith.negf %553 : vector<2x128xf32>
    %555 = math.exp %554 : vector<2x128xf32>
    %cst_268 = arith.constant 1.000000e+00 : f32
    %556 = vector.broadcast %cst_268 : f32 to vector<2x128xf32>
    %557 = arith.addf %556, %555 : vector<2x128xf32>
    %558 = arith.divf %556, %557 : vector<2x128xf32>
    %559 = vector.extract_strided_slice %552 {offsets = [0, 128], sizes = [2, 128], strides = [1, 1]} : vector<2x512xf32> to vector<2x128xf32>
    %560 = arith.negf %559 : vector<2x128xf32>
    %561 = math.exp %560 : vector<2x128xf32>
    %cst_269 = arith.constant 1.000000e+00 : f32
    %562 = vector.broadcast %cst_269 : f32 to vector<2x128xf32>
    %563 = arith.addf %562, %561 : vector<2x128xf32>
    %564 = arith.divf %562, %563 : vector<2x128xf32>
    %565 = vector.extract_strided_slice %552 {offsets = [0, 256], sizes = [2, 128], strides = [1, 1]} : vector<2x512xf32> to vector<2x128xf32>
    %566 = math.tanh %565 : vector<2x128xf32>
    %567 = vector.extract_strided_slice %552 {offsets = [0, 384], sizes = [2, 128], strides = [1, 1]} : vector<2x512xf32> to vector<2x128xf32>
    %568 = arith.negf %567 : vector<2x128xf32>
    %569 = math.exp %568 : vector<2x128xf32>
    %cst_270 = arith.constant 1.000000e+00 : f32
    %570 = vector.broadcast %cst_270 : f32 to vector<2x128xf32>
    %571 = arith.addf %570, %569 : vector<2x128xf32>
    %572 = arith.divf %570, %571 : vector<2x128xf32>
    %573 = arith.mulf %564, %545 : vector<2x128xf32>
    %574 = arith.mulf %558, %566 : vector<2x128xf32>
    %575 = arith.addf %573, %574 : vector<2x128xf32>
    %576 = math.tanh %575 : vector<2x128xf32>
    %577 = arith.mulf %572, %576 : vector<2x128xf32>
    %c14_271 = arith.constant 14 : index
    %c0_272 = arith.constant 0 : index
    %578 = vector.load %arg14[%c14_271, %c0_272] : memref<16x128xf32, #tpu.memory_space<vmem>>, vector<2x128xf32>
    tpu.vector_store %arg14[%c14_271, %c0_272], %577 {strides = array<i32>} : memref<16x128xf32, #tpu.memory_space<vmem>>, vector<2x128xf32>,
    %c0_273 = arith.constant 0 : index
    %c0_274 = arith.constant 0 : index
    %579 = vector.load %arg14[%c0_273, %c0_274] : memref<16x128xf32, #tpu.memory_space<vmem>>, vector<2x64xf32>
    %c14_275 = arith.constant 14 : index
    %c64 = arith.constant 64 : index
    %580 = vector.load %arg14[%c14_275, %c64] : memref<16x128xf32, #tpu.memory_space<vmem>>, vector<2x64xf32>
    %581 = tpu.concatenate %579, %580 in 1 : vector<2x64xf32>, vector<2x64xf32> -> vector<2x128xf32>
    %c0_276 = arith.constant 0 : index
    %c0_277 = arith.constant 0 : index
    %c0_278 = arith.constant 0 : index
    %582 = vector.load %arg15[%c0_276, %c0_277, %c0_278] : memref<2x8x128xf32, #tpu.memory_space<vmem>>, vector<2x1x128xf32>
    %583 = vector.shape_cast %582 : vector<2x1x128xf32> to vector<2x128xf32>
    %584 = vector.shape_cast %581 : vector<2x128xf32> to vector<2x1x128xf32>
    tpu.vector_store %arg15[%c0_276, %c0_277, %c0_278], %584 {strides = array<i32>} : memref<2x8x128xf32, #tpu.memory_space<vmem>>, vector<2x1x128xf32>,
    %c2_279 = arith.constant 2 : index
    %c0_280 = arith.constant 0 : index
    %585 = vector.load %arg14[%c2_279, %c0_280] : memref<16x128xf32, #tpu.memory_space<vmem>>, vector<2x64xf32>
    %c12_281 = arith.constant 12 : index
    %c64_282 = arith.constant 64 : index
    %586 = vector.load %arg14[%c12_281, %c64_282] : memref<16x128xf32, #tpu.memory_space<vmem>>, vector<2x64xf32>
    %587 = tpu.concatenate %585, %586 in 1 : vector<2x64xf32>, vector<2x64xf32> -> vector<2x128xf32>
    %c0_283 = arith.constant 0 : index
    %c1 = arith.constant 1 : index
    %c0_284 = arith.constant 0 : index
    %588 = vector.load %arg15[%c0_283, %c1, %c0_284] : memref<2x8x128xf32, #tpu.memory_space<vmem>>, vector<2x1x128xf32>
    %589 = vector.shape_cast %588 : vector<2x1x128xf32> to vector<2x128xf32>
    %590 = vector.shape_cast %587 : vector<2x128xf32> to vector<2x1x128xf32>
    tpu.vector_store %arg15[%c0_283, %c1, %c0_284], %590 {strides = array<i32>} : memref<2x8x128xf32, #tpu.memory_space<vmem>>, vector<2x1x128xf32>,
    %c4_285 = arith.constant 4 : index
    %c0_286 = arith.constant 0 : index
    %591 = vector.load %arg14[%c4_285, %c0_286] : memref<16x128xf32, #tpu.memory_space<vmem>>, vector<2x64xf32>
    %c10_287 = arith.constant 10 : index
    %c64_288 = arith.constant 64 : index
    %592 = vector.load %arg14[%c10_287, %c64_288] : memref<16x128xf32, #tpu.memory_space<vmem>>, vector<2x64xf32>
    %593 = tpu.concatenate %591, %592 in 1 : vector<2x64xf32>, vector<2x64xf32> -> vector<2x128xf32>
    %c0_289 = arith.constant 0 : index
    %c2_290 = arith.constant 2 : index
    %c0_291 = arith.constant 0 : index
    %594 = vector.load %arg15[%c0_289, %c2_290, %c0_291] : memref<2x8x128xf32, #tpu.memory_space<vmem>>, vector<2x1x128xf32>
    %595 = vector.shape_cast %594 : vector<2x1x128xf32> to vector<2x128xf32>
    %596 = vector.shape_cast %593 : vector<2x128xf32> to vector<2x1x128xf32>
    tpu.vector_store %arg15[%c0_289, %c2_290, %c0_291], %596 {strides = array<i32>} : memref<2x8x128xf32, #tpu.memory_space<vmem>>, vector<2x1x128xf32>,
    %c6_292 = arith.constant 6 : index
    %c0_293 = arith.constant 0 : index
    %597 = vector.load %arg14[%c6_292, %c0_293] : memref<16x128xf32, #tpu.memory_space<vmem>>, vector<2x64xf32>
    %c8_294 = arith.constant 8 : index
    %c64_295 = arith.constant 64 : index
    %598 = vector.load %arg14[%c8_294, %c64_295] : memref<16x128xf32, #tpu.memory_space<vmem>>, vector<2x64xf32>
    %599 = tpu.concatenate %597, %598 in 1 : vector<2x64xf32>, vector<2x64xf32> -> vector<2x128xf32>
    %c0_296 = arith.constant 0 : index
    %c3 = arith.constant 3 : index
    %c0_297 = arith.constant 0 : index
    %600 = vector.load %arg15[%c0_296, %c3, %c0_297] : memref<2x8x128xf32, #tpu.memory_space<vmem>>, vector<2x1x128xf32>
    %601 = vector.shape_cast %600 : vector<2x1x128xf32> to vector<2x128xf32>
    %602 = vector.shape_cast %599 : vector<2x128xf32> to vector<2x1x128xf32>
    tpu.vector_store %arg15[%c0_296, %c3, %c0_297], %602 {strides = array<i32>} : memref<2x8x128xf32, #tpu.memory_space<vmem>>, vector<2x1x128xf32>,
    %c8_298 = arith.constant 8 : index
    %c0_299 = arith.constant 0 : index
    %603 = vector.load %arg14[%c8_298, %c0_299] : memref<16x128xf32, #tpu.memory_space<vmem>>, vector<2x64xf32>
    %c6_300 = arith.constant 6 : index
    %c64_301 = arith.constant 64 : index
    %604 = vector.load %arg14[%c6_300, %c64_301] : memref<16x128xf32, #tpu.memory_space<vmem>>, vector<2x64xf32>
    %605 = tpu.concatenate %603, %604 in 1 : vector<2x64xf32>, vector<2x64xf32> -> vector<2x128xf32>
    %c0_302 = arith.constant 0 : index
    %c4_303 = arith.constant 4 : index
    %c0_304 = arith.constant 0 : index
    %606 = vector.load %arg15[%c0_302, %c4_303, %c0_304] : memref<2x8x128xf32, #tpu.memory_space<vmem>>, vector<2x1x128xf32>
    %607 = vector.shape_cast %606 : vector<2x1x128xf32> to vector<2x128xf32>
    %608 = vector.shape_cast %605 : vector<2x128xf32> to vector<2x1x128xf32>
    tpu.vector_store %arg15[%c0_302, %c4_303, %c0_304], %608 {strides = array<i32>} : memref<2x8x128xf32, #tpu.memory_space<vmem>>, vector<2x1x128xf32>,
    %c10_305 = arith.constant 10 : index
    %c0_306 = arith.constant 0 : index
    %609 = vector.load %arg14[%c10_305, %c0_306] : memref<16x128xf32, #tpu.memory_space<vmem>>, vector<2x64xf32>
    %c4_307 = arith.constant 4 : index
    %c64_308 = arith.constant 64 : index
    %610 = vector.load %arg14[%c4_307, %c64_308] : memref<16x128xf32, #tpu.memory_space<vmem>>, vector<2x64xf32>
    %611 = tpu.concatenate %609, %610 in 1 : vector<2x64xf32>, vector<2x64xf32> -> vector<2x128xf32>
    %c0_309 = arith.constant 0 : index
    %c5 = arith.constant 5 : index
    %c0_310 = arith.constant 0 : index
    %612 = vector.load %arg15[%c0_309, %c5, %c0_310] : memref<2x8x128xf32, #tpu.memory_space<vmem>>, vector<2x1x128xf32>
    %613 = vector.shape_cast %612 : vector<2x1x128xf32> to vector<2x128xf32>
    %614 = vector.shape_cast %611 : vector<2x128xf32> to vector<2x1x128xf32>
    tpu.vector_store %arg15[%c0_309, %c5, %c0_310], %614 {strides = array<i32>} : memref<2x8x128xf32, #tpu.memory_space<vmem>>, vector<2x1x128xf32>,
    %c12_311 = arith.constant 12 : index
    %c0_312 = arith.constant 0 : index
    %615 = vector.load %arg14[%c12_311, %c0_312] : memref<16x128xf32, #tpu.memory_space<vmem>>, vector<2x64xf32>
    %c2_313 = arith.constant 2 : index
    %c64_314 = arith.constant 64 : index
    %616 = vector.load %arg14[%c2_313, %c64_314] : memref<16x128xf32, #tpu.memory_space<vmem>>, vector<2x64xf32>
    %617 = tpu.concatenate %615, %616 in 1 : vector<2x64xf32>, vector<2x64xf32> -> vector<2x128xf32>
    %c0_315 = arith.constant 0 : index
    %c6_316 = arith.constant 6 : index
    %c0_317 = arith.constant 0 : index
    %618 = vector.load %arg15[%c0_315, %c6_316, %c0_317] : memref<2x8x128xf32, #tpu.memory_space<vmem>>, vector<2x1x128xf32>
    %619 = vector.shape_cast %618 : vector<2x1x128xf32> to vector<2x128xf32>
    %620 = vector.shape_cast %617 : vector<2x128xf32> to vector<2x1x128xf32>
    tpu.vector_store %arg15[%c0_315, %c6_316, %c0_317], %620 {strides = array<i32>} : memref<2x8x128xf32, #tpu.memory_space<vmem>>, vector<2x1x128xf32>,
    %c14_318 = arith.constant 14 : index
    %c0_319 = arith.constant 0 : index
    %621 = vector.load %arg14[%c14_318, %c0_319] : memref<16x128xf32, #tpu.memory_space<vmem>>, vector<2x64xf32>
    %c0_320 = arith.constant 0 : index
    %c64_321 = arith.constant 64 : index
    %622 = vector.load %arg14[%c0_320, %c64_321] : memref<16x128xf32, #tpu.memory_space<vmem>>, vector<2x64xf32>
    %623 = tpu.concatenate %621, %622 in 1 : vector<2x64xf32>, vector<2x64xf32> -> vector<2x128xf32>
    %c0_322 = arith.constant 0 : index
    %c7 = arith.constant 7 : index
    %c0_323 = arith.constant 0 : index
    %624 = vector.load %arg15[%c0_322, %c7, %c0_323] : memref<2x8x128xf32, #tpu.memory_space<vmem>>, vector<2x1x128xf32>
    %625 = vector.shape_cast %624 : vector<2x1x128xf32> to vector<2x128xf32>
    %626 = vector.shape_cast %623 : vector<2x128xf32> to vector<2x1x128xf32>
    tpu.vector_store %arg15[%c0_322, %c7, %c0_323], %626 {strides = array<i32>} : memref<2x8x128xf32, #tpu.memory_space<vmem>>, vector<2x1x128xf32>,
    %c0_324 = arith.constant 0 : index
    %c0_325 = arith.constant 0 : index
    %c0_326 = arith.constant 0 : index
    %627 = vector.load %arg15[%c0_324, %c0_325, %c0_326] : memref<2x8x128xf32, #tpu.memory_space<vmem>>, vector<2x8x128xf32>
    %cst_327 = arith.constant 0.0883883461 : f32
    %628 = vector.broadcast %cst_327 : f32 to vector<2x8x128xf32>
    %629 = arith.mulf %627, %628 : vector<2x8x128xf32>
    "tpu.trace_start"() <{level = 10 : i32, message = "bqd,bkd->bqk"}> : () -> ()
    %cst_328 = arith.constant dense<0.000000e+00> : vector<2x8x8xf32>
    %630 = tpu.matmul %629, %627, %cst_328 {dimension_numbers = #tpu.dot_dimension_numbers<[2], [2], [1], [1], [0, 0, 0, 1, 1, 1], [0], [0]>} : vector<2x8x128xf32>, vector<2x8x128xf32>, vector<2x8x8xf32> -> vector<2x8x8xf32>
    "tpu.trace_stop"() : () -> ()
    %cst_329 = arith.constant dense<0xFF800000> : vector<2x8xf32>
    %631 = vector.multi_reduction <maximumf>, %630, %cst_329 [2] : vector<2x8x8xf32> to vector<2x8xf32>
    %632 = vector.shape_cast %631 : vector<2x8xf32> to vector<2x8x1xf32>
    %633 = vector.broadcast %632 : vector<2x8x1xf32> to vector<2x8x8xf32>
    %634 = arith.subf %630, %633 : vector<2x8x8xf32>
    %635 = math.exp %634 : vector<2x8x8xf32>
    %cst_330 = arith.constant dense<0.000000e+00> : vector<2x8xf32>
    %636 = vector.multi_reduction <add>, %635, %cst_330 [2] : vector<2x8x8xf32> to vector<2x8xf32>
    %637 = vector.shape_cast %636 : vector<2x8xf32> to vector<2x8x1xf32>
    %638 = tpu.reciprocal %637 {approx = true} : vector<2x8x1xf32> -> vector<2x8x1xf32>
    %639 = vector.broadcast %638 : vector<2x8x1xf32> to vector<2x8x8xf32>
    %640 = arith.mulf %635, %639 : vector<2x8x8xf32>
    %cst_331 = arith.constant dense<0.000000e+00> : vector<2x8xf32>
    %641 = vector.multi_reduction <add>, %640, %cst_331 [1] : vector<2x8x8xf32> to vector<2x8xf32>
    %642 = vector.shape_cast %641 : vector<2x8xf32> to vector<2x1x8xf32>
    "tpu.trace_start"() <{level = 10 : i32, message = "bqk,bkd->bqd"}> : () -> ()
    %cst_332 = arith.constant dense<0.000000e+00> : vector<2x1x128xf32>
    %643 = tpu.matmul %642, %627, %cst_332 {dimension_numbers = #tpu.dot_dimension_numbers<[2], [1], [1], [2], [0, 0, 0, 1, 1, 2], [0], [0]>} : vector<2x1x8xf32>, vector<2x8x128xf32>, vector<2x1x128xf32> -> vector<2x1x128xf32>
    "tpu.trace_stop"() : () -> ()
    %cst_333 = arith.constant dense<0.000000e+00> : vector<2x128xf32>
    %644 = vector.multi_reduction <add>, %643, %cst_333 [1] : vector<2x1x128xf32> to vector<2x128xf32>
    %c2_i32_334 = arith.constant 2 : i32
    %645 = tpu.memref_slice %arg19[%c2_i32_334] : memref<3x!tpu.dma_semaphore, #tpu.memory_space<semaphore_mem>> -> memref<1x!tpu.dma_semaphore, #tpu.memory_space<semaphore_mem>>
    %646 = tpu.memref_squeeze %645 : memref<1x!tpu.dma_semaphore, #tpu.memory_space<semaphore_mem>> -> memref<!tpu.dma_semaphore, #tpu.memory_space<semaphore_mem>>
    tpu.wait_dma2 semaphore(%646 : memref<!tpu.dma_semaphore, #tpu.memory_space<semaphore_mem>>) src(%arg9 : memref<128x128xf32, #tpu.memory_space<any>>) dst(%arg18 : memref<128x128xf32, #tpu.memory_space<vmem>>)
    %c0_335 = arith.constant 0 : index
    %c0_336 = arith.constant 0 : index
    %647 = vector.load %arg18[%c0_335, %c0_336] : memref<128x128xf32, #tpu.memory_space<vmem>>, vector<128x128xf32>
    %cst_337 = arith.constant dense<0.000000e+00> : vector<2x128xf32>
    %648 = tpu.matmul %644, %647, %cst_337 {dimension_numbers = #tpu.dot_dimension_numbers<[1], [0], [0], [1], [0, 0, 1, 1], [], []>} : vector<2x128xf32>, vector<128x128xf32>, vector<2x128xf32> -> vector<2x128xf32>
    %c0_338 = arith.constant 0 : index
    %c0_339 = arith.constant 0 : index
    %649 = vector.load %arg10[%c0_338, %c0_339] : memref<1x128xf32, #tpu.memory_space<vmem>>, vector<1x128xf32>
    %650 = vector.broadcast %649 : vector<1x128xf32> to vector<2x128xf32>
    %651 = arith.addf %648, %650 : vector<2x128xf32>
    %c0_340 = arith.constant 0 : index
    %c0_341 = arith.constant 0 : index
    %652 = vector.load %arg11[%c0_340, %c0_341] : memref<2x128xf32, #tpu.memory_space<vmem>>, vector<2x128xf32>
    tpu.vector_store %arg11[%c0_340, %c0_341], %651 {strides = array<i32>} : memref<2x128xf32, #tpu.memory_space<vmem>>, vector<2x128xf32>,
    return
  }
  func.func @transform_0(%arg0: i32) -> (i32, i32) {
    %c0_i32 = arith.constant 0 : i32
    %c0_i32_0 = arith.constant 0 : i32
    %c0_i32_1 = arith.constant 0 : i32
    return %c0_i32, %c0_i32_0 : i32, i32
  }
  func.func @transform_1(%arg0: i32) -> (i32, i32) {
    %c0_i32 = arith.constant 0 : i32
    %c0_i32_0 = arith.constant 0 : i32
    %c0_i32_1 = arith.constant 0 : i32
    return %c0_i32, %c0_i32_0 : i32, i32
  }
  func.func @transform_2(%arg0: i32) -> (i32, i32) {
    %c0_i32 = arith.constant 0 : i32
    %c0_i32_0 = arith.constant 0 : i32
    %c0_i32_1 = arith.constant 0 : i32
    return %c0_i32, %c0_i32_0 : i32, i32
  }
  func.func @transform_3(%arg0: i32) -> (i32, i32) {
    %c0_i32 = arith.constant 0 : i32
    %c0_i32_0 = arith.constant 0 : i32
    %c0_i32_1 = arith.constant 0 : i32
    return %c0_i32, %c0_i32_0 : i32, i32
  }
  func.func @transform_4(%arg0: i32) -> (i32, i32) {
    %c0_i32 = arith.constant 0 : i32
    %c0_i32_0 = arith.constant 0 : i32
    %c0_i32_1 = arith.constant 0 : i32
    return %c0_i32, %c0_i32_0 : i32, i32
  }
  func.func @transform_6(%arg0: i32) -> (i32, i32) {
    %c0_i32 = arith.constant 0 : i32
    %c0_i32_0 = arith.constant 0 : i32
    %c0_i32_1 = arith.constant 0 : i32
    return %c0_i32, %c0_i32_0 : i32, i32
  }
  func.func @transform_9(%arg0: i32) -> (i32, i32) {
    %c0_i32 = arith.constant 0 : i32
    %c0_i32_0 = arith.constant 0 : i32
    %c0_i32_1 = arith.constant 0 : i32
    return %c0_i32, %c0_i32_0 : i32, i32
  }
  func.func @transform_10(%arg0: i32) -> (i32, i32) {
    %c0_i32 = arith.constant 0 : i32
    %c0_i32_0 = arith.constant 0 : i32
    %c0_i32_1 = arith.constant 0 : i32
    return %c0_i32, %c0_i32_0 : i32, i32
  }
}

</mosaic_0001>

<bundles_post_ra>
// kernel: tpu_custom_call.1
= control target key start
LH: loop header
LB: loop body
LE: loop exit
PB: predicated region body
PF: predicated region fallthrough
CT: control target
= control target key end

     0   :  { %15 = vsyncpa [#allocation11], 0  ;;  %s8025_s0 = inlined_call_operand.vmem [shape: s32[16,1], index: 0, kind: input, shape index: {}]   ;;  %s8026_s1 = inlined_call_operand.hbm [shape: f32[128,128], index: 1, kind: input, shape index: {}]   ;;  %s8027_s2 = inlined_call_operand.hbm [shape: f32[128,1024], index: 2, kind: input, shape index: {}]   ;;  %s8028_s3 = inlined_call_operand.vmem [shape: f32[1,1024], index: 3, kind: input, shape index: {}]   ;;  %s8029_s4 = inlined_call_operand.hbm [shape: f32[128,512], index: 4, kind: input, shape index: {}]   ;;  %s8030_s5 = inlined_call_operand.hbm [shape: f32[128,1024], index: 5, kind: input, shape index: {}]   ;;  %s8031_s6 = inlined_call_operand.vmem [shape: f32[1,1024], index: 6, kind: input, shape index: {}]   ;;  %s8032_s7 = inlined_call_operand.hbm [shape: f32[128,512], index: 7, kind: input, shape index: {}]   ;;  %s8033_s8 = inlined_call_operand.hbm [shape: f32[128,128], index: 8, kind: input, shape index: {}]   ;;  %s8034_s9 = inlined_call_operand.vmem [shape: f32[1,128], index: 9, kind: input, shape index: {}]   ;;  %s8035_s10 = inlined_call_operand.hbm [shape: f32[2,128], index: 10, kind: output, shape index: {}]  }
   0x1   :  { %16 = vsyncpa [#allocation14], 0  ;;  %s37_s15 = sshll.u32 %s8027_s2, 4  ;;  %s38_s15 = int_to_ptr.hbm [resolvable:$true] %s37_s15 }
   0x2   :  { %17 = vsyncpa [#allocation12], 0  ;;  %s5795_s16 = smov [#allocation13]   ;;  %s24_s20 = sshll.u32 %s8026_s1, 4  ;;  %s25_s20 = int_to_ptr.hbm [resolvable:$true] %s24_s20 }
   0x3   :  { %s39_s17 = sshll.u32 %s5795_s16, 4  ;;  %s5796_s21 = smov 1024   ;;  %s40_s17 = int_to_ptr.vmem [resolvable:$true] %s39_s17 }
   0x4   :  { %s5797_s22 = smov 64   ;;  %s5798_s23 = smov [#allocation10]  }
   0x5   :  { %45 = dma.hbm_to_vmem [thread:$0]  %s38_s15, 16384, %s40_s17, [#allocation14], %s5796_s21, %s5796_s21, %s5797_s22  }
   0x6   :  { %s26_s24 = sshll.u32 %s5798_s23, 4  ;;  %s5799_s25 = smov 128   ;;  %s27_s24 = int_to_ptr.vmem [resolvable:$true] %s26_s24 }
   0x7   :  { %s5800_s26 = smov 8   ;;  %s52_s28 = sshll.u32 %s8029_s4, 4  ;;  %s53_s28 = int_to_ptr.hbm [resolvable:$true] %s52_s28 }
   0x8   :  { %32 = dma.hbm_to_vmem [thread:$0]  %s25_s20, 2048, %s27_s24, [#allocation11], %s5799_s25, %s5799_s25, %s5800_s26  }
   0x9   :  { %s5801_s29 = smov [#allocation15]   ;;  %s5802_s11 = smov 512  }
   0xa   :  { %s54_s30 = sshll.u32 %s5801_s29, 4  ;;  %s5803_s1 = smov 32   ;;  %s55_s30 = int_to_ptr.vmem [resolvable:$true] %s54_s30 }
   0xb   :  { %60 = dma.hbm_to_vmem [thread:$0]  %s53_s28, 8192, %s55_s30, [#allocation14], %s5802_s11, %s5802_s11, %s5803_s1  }
   0xc   :  { %5783 = dma.done.wait [#allocation11], 2048  }
   0xd   :  { %5784 = vsyncadd [#allocation11], 4294965248 }
   0xe   :  { %5785 = dma.done.wait [#allocation14], 24576  }
   0xf   :  { %5786 = vsyncadd [#allocation14], 4294942720  ;;  %v5804_v0 = vmov 0   ;;  %v118_v1 = vld [vmem:[%s8025_s0] sm:$0xff]  ;;  %v149_v2 = vld [vmem:[#allocation10 + $0x78] sm:$0xff]  ;;  %v120_v53 = vlaneseq  ;;  %s84_s17 = sshll.u32 %s8030_s5, 4  ;;  %s85_s17 = int_to_ptr.hbm [resolvable:$true] %s84_s17 }
  0x10   :  { %5349 = vset.pattern.permute.xlu0 %v5804_v0  ;;  %150 = vmatpush.msra.mxu0 %v149_v2  ;;  %v148_v3 = vld [vmem:[#allocation10 + $0x70] sm:$0xff]  ;;  %v147_v4 = vld [vmem:[#allocation10 + $0x68] sm:$0xff]  ;;  %v146_v5 = vld [vmem:[#allocation10 + $0x60] sm:$0xff]  ;;  %s5807_s18 = smov [#allocation6]   ;;  %s98_s22 = sshll.u32 %s8032_s7, 4  ;;  %s99_s22 = int_to_ptr.hbm [resolvable:$true] %s98_s22 }
  0x11   :  { %123 = vperm.xlu0 %5349, %v118_v1   ;;  %v119_v6 = vld [vmem:[%s8025_s0 + $0x8] sm:$0xff]  ;;  %v145_v7 = vld [vmem:[#allocation10 + $0x58] sm:$0xff]  ;;  %v144_v8 = vld [vmem:[#allocation10 + $0x50] sm:$0xff]  ;;  %v121_v62 = vand.u32 127, %v120_v53  ;;  %s86_s19 = sshll.u32 %s5807_s18, 4  ;;  %s5808_s23 = smov [#allocation7]   ;;  %s87_s19 = int_to_ptr.vmem [resolvable:$true] %s86_s19 }
  0x12   :  { %151 = vmatpush.msra.mxu0 %v148_v3  ;;  %v143_v9 = vld [vmem:[#allocation10 + $0x48] sm:$0xff]  ;;  %v142_v10 = vld [vmem:[#allocation10 + $0x40] sm:$0xff]  ;;  %v141_v11 = vld [vmem:[#allocation10 + $0x38] sm:$0xff]  ;;  %89 = dma.hbm_to_vmem [thread:$0]  %s85_s17, 16384, %s87_s19, [#allocation9] }
  0x13   :  { %v140_v12 = vld [vmem:[#allocation10 + $0x30] sm:$0xff]  ;;  %v139_v13 = vld [vmem:[#allocation10 + $0x28] sm:$0xff]  ;;  %v138_v14 = vld [vmem:[#allocation10 + $0x20] sm:$0xff]  ;;  %s100_s24 = sshll.u32 %s5808_s23, 4  ;;  %s112_s2 = sshll.u32 %s8033_s8, 4  ;;  %s101_s24 = int_to_ptr.vmem [resolvable:$true] %s100_s24  ;;  %s113_s2 = int_to_ptr.hbm [resolvable:$true] %s112_s2 }
  0x14   :  { %152 = vmatpush.msra.mxu0 %v147_v4  ;;  %v137_v15 = vld [vmem:[#allocation10 + $0x18] sm:$0xff]  ;;  %v136_v16 = vld [vmem:[#allocation10 + $0x10] sm:$0xff]  ;;  %v135_v17 = vld [vmem:[#allocation10 + $0x8] sm:$0xff]  ;;  %103 = dma.hbm_to_vmem [thread:$0]  %s99_s22, 8192, %s101_s24, [#allocation9 + $0x1] }
  0x15   :  { %v134_v18 = vld [vmem:[#allocation10] sm:$0xff]  ;;  %v294_v20 = vld [vmem:[#allocation13 + $0x3c8] sm:$0xff]  ;;  %v295_v21 = vld [vmem:[#allocation13 + $0x3d0] sm:$0xff]  ;;  %s5809_s5 = smov [#allocation8]  }
  0x16   :  { %153 = vmatpush.msra.mxu0 %v146_v5  ;;  %v293_v19 = vld [vmem:[#allocation13 + $0x3c0] sm:$0xff]  ;;  %342 = vmatpush.msra.mxu2 %v294_v20  ;;  %v296_v22 = vld [vmem:[#allocation13 + $0x3d8] sm:$0xff]  ;;  %v286_v24 = vld [vmem:[#allocation13 + $0x388] sm:$0xff]  ;;  %s114_s27 = sshll.u32 %s5809_s5, 4  ;;  %s115_s27 = int_to_ptr.vmem [resolvable:$true] %s114_s27 }
  0x17   :  { %319 = vmatpush.msra.mxu1 %v293_v19  ;;  %v285_v23 = vld [vmem:[#allocation13 + $0x380] sm:$0xff]  ;;  %365 = vmatpush.msra.mxu3 %v295_v21  ;;  %v287_v25 = vld [vmem:[#allocation13 + $0x390] sm:$0xff]  ;;  %v288_v26 = vld [vmem:[#allocation13 + $0x398] sm:$0xff]  ;;  %117 = dma.hbm_to_vmem [thread:$0]  %s113_s2, 2048, %s115_s27, [#allocation9 + $0x2] }
  0x18   :  { %154 = vmatpush.msra.mxu0 %v145_v7  ;;  %v277_v27 = vld [vmem:[#allocation13 + $0x340] sm:$0xff]  ;;  %343 = vmatpush.msra.mxu2 %v286_v24  ;;  %v278_v28 = vld [vmem:[#allocation13 + $0x348] sm:$0xff]  ;;  %v279_v29 = vld [vmem:[#allocation13 + $0x350] sm:$0xff] }
  0x19   :  { %126 = vperm.xlu0 %5349, %v119_v6   ;;  %320 = vmatpush.msra.mxu1 %v285_v23  ;;  %v280_v30 = vld [vmem:[#allocation13 + $0x358] sm:$0xff]  ;;  %v269_v31 = vld [vmem:[#allocation13 + $0x300] sm:$0xff]  ;;  %v270_v32 = vld [vmem:[#allocation13 + $0x308] sm:$0xff] }
  0x1a   :  { %155 = vmatpush.msra.mxu0 %v144_v8  ;;  %366 = vmatpush.msra.mxu3 %v287_v25  ;;  %v271_v33 = vld [vmem:[#allocation13 + $0x310] sm:$0xff]  ;;  %v272_v34 = vld [vmem:[#allocation13 + $0x318] sm:$0xff]  ;;  %v261_v35 = vld [vmem:[#allocation13 + $0x2c0] sm:$0xff] }
  0x1b   :  { %321 = vmatpush.msra.mxu1 %v277_v27  ;;  %344 = vmatpush.msra.mxu2 %v278_v28  ;;  %v262_v36 = vld [vmem:[#allocation13 + $0x2c8] sm:$0xff]  ;;  %v263_v37 = vld [vmem:[#allocation13 + $0x2d0] sm:$0xff]  ;;  %v264_v38 = vld [vmem:[#allocation13 + $0x2d8] sm:$0xff] }
  0x1c   :  { %156 = vmatpush.msra.mxu0 %v143_v9  ;;  %367 = vmatpush.msra.mxu3 %v279_v29  ;;  %v253_v39 = vld [vmem:[#allocation13 + $0x280] sm:$0xff]  ;;  %v254_v40 = vld [vmem:[#allocation13 + $0x288] sm:$0xff]  ;;  %v255_v41 = vld [vmem:[#allocation13 + $0x290] sm:$0xff]  ;;  %v5805_v9 = vmov 1.0  }
  0x1d   :  { %322 = vmatpush.msra.mxu1 %v269_v31  ;;  %345 = vmatpush.msra.mxu2 %v270_v32  ;;  %v256_v42 = vld [vmem:[#allocation13 + $0x298] sm:$0xff]  ;;  %v245_v43 = vld [vmem:[#allocation13 + $0x240] sm:$0xff]  ;;  %v246_v44 = vld [vmem:[#allocation13 + $0x248] sm:$0xff] }
  0x1e   :  { %157 = vmatpush.msra.mxu0 %v142_v10  ;;  %368 = vmatpush.msra.mxu3 %v271_v33  ;;  %v247_v45 = vld [vmem:[#allocation13 + $0x250] sm:$0xff]  ;;  %v248_v46 = vld [vmem:[#allocation13 + $0x258] sm:$0xff]  ;;  %v237_v47 = vld [vmem:[#allocation13 + $0x200] sm:$0xff] }
  0x1f   :  { %323 = vmatpush.msra.mxu1 %v261_v35  ;;  %346 = vmatpush.msra.mxu2 %v262_v36  ;;  %v238_v48 = vld [vmem:[#allocation13 + $0x208] sm:$0xff]  ;;  %v239_v49 = vld [vmem:[#allocation13 + $0x210] sm:$0xff]  ;;  %v240_v50 = vld [vmem:[#allocation13 + $0x218] sm:$0xff] }
  0x20   :  { %158 = vmatpush.msra.mxu0 %v141_v11  ;;  %369 = vmatpush.msra.mxu3 %v263_v37  ;;  %v229_v51 = vld [vmem:[#allocation13 + $0x1c0] sm:$0xff]  ;;  %v230_v52 = vld [vmem:[#allocation13 + $0x1c8] sm:$0xff]  ;;  %v231_v54 = vld [vmem:[#allocation13 + $0x1d0] sm:$0xff] }
  0x21   :  { %324 = vmatpush.msra.mxu1 %v253_v39  ;;  %347 = vmatpush.msra.mxu2 %v254_v40  ;;  %v232_v55 = vld [vmem:[#allocation13 + $0x1d8] sm:$0xff]  ;;  %v221_v56 = vld [vmem:[#allocation13 + $0x180] sm:$0xff]  ;;  %v222_v57 = vld [vmem:[#allocation13 + $0x188] sm:$0xff] }
  0x22   :  { %159 = vmatpush.msra.mxu0 %v140_v12  ;;  %370 = vmatpush.msra.mxu3 %v255_v41  ;;  %v223_v58 = vld [vmem:[#allocation13 + $0x190] sm:$0xff]  ;;  %v224_v59 = vld [vmem:[#allocation13 + $0x198] sm:$0xff]  ;;  %v213_v60 = vld [vmem:[#allocation13 + $0x140] sm:$0xff] }
  0x23   :  { %325 = vmatpush.msra.mxu1 %v245_v43  ;;  %348 = vmatpush.msra.mxu2 %v246_v44  ;;  %v214_v61 = vld [vmem:[#allocation13 + $0x148] sm:$0xff]  ;;  %v215_v63 = vld [vmem:[#allocation13 + $0x150] sm:$0xff]  ;;  %v216_v0 = vld [vmem:[#allocation13 + $0x158] sm:$0xff] }
  0x24   :  { %160 = vmatpush.msra.mxu0 %v139_v13  ;;  %371 = vmatpush.msra.mxu3 %v247_v45  ;;  %v205_v1 = vld [vmem:[#allocation13 + $0x100] sm:$0xff]  ;;  %v206_v2 = vld [vmem:[#allocation13 + $0x108] sm:$0xff]  ;;  %v207_v3 = vld [vmem:[#allocation13 + $0x110] sm:$0xff] }
  0x25   :  { %326 = vmatpush.msra.mxu1 %v237_v47  ;;  %349 = vmatpush.msra.mxu2 %v238_v48  ;;  %v208_v5 = vld [vmem:[#allocation13 + $0x118] sm:$0xff]  ;;  %v197_v6 = vld [vmem:[#allocation13 + $0xc0] sm:$0xff]  ;;  %v198_v7 = vld [vmem:[#allocation13 + $0xc8] sm:$0xff] }
  0x26   :  { %161 = vmatpush.msra.mxu0 %v138_v14  ;;  %372 = vmatpush.msra.mxu3 %v239_v49  ;;  %v199_v8 = vld [vmem:[#allocation13 + $0xd0] sm:$0xff]  ;;  %v200_v10 = vld [vmem:[#allocation13 + $0xd8] sm:$0xff]  ;;  %v189_v11 = vld [vmem:[#allocation13 + $0x80] sm:$0xff] }
  0x27   :  { %327 = vmatpush.msra.mxu1 %v229_v51  ;;  %350 = vmatpush.msra.mxu2 %v230_v52  ;;  %v190_v12 = vld [vmem:[#allocation13 + $0x88] sm:$0xff]  ;;  %v191_v13 = vld [vmem:[#allocation13 + $0x90] sm:$0xff]  ;;  %v192_v14 = vld [vmem:[#allocation13 + $0x98] sm:$0xff] }
  0x28   :  { %162 = vmatpush.msra.mxu0 %v137_v15  ;;  %373 = vmatpush.msra.mxu3 %v231_v54  ;;  %v181_v15 = vld [vmem:[#allocation13 + $0x40] sm:$0xff]  ;;  %v174_v20 = vld [vmem:[#allocation13 + $0x8] sm:$0xff]  ;;  %v176_v23 = vld [vmem:[#allocation13 + $0x18] sm:$0xff] }
  0x29   :  { %328 = vmatpush.msra.mxu1 %v221_v56  ;;  %351 = vmatpush.msra.mxu2 %v222_v57  ;;  %v173_v19 = vld [vmem:[#allocation13] sm:$0xff]  ;;  %v298_v25 = vld [vmem:[#allocation13 + $0x3e8] sm:$0xff]  ;;  %v300_v27 = vld [vmem:[#allocation13 + $0x3f8] sm:$0xff] }
  0x2a   :  { %163 = vmatpush.msra.mxu0 %v136_v16  ;;  %374 = vmatpush.msra.mxu3 %v223_v58  ;;  %v182_v16 = vld [vmem:[#allocation13 + $0x48] sm:$0xff]  ;;  %v297_v24 = vld [vmem:[#allocation13 + $0x3e0] sm:$0xff]  ;;  %v292_v31 = vld [vmem:[#allocation13 + $0x3b8] sm:$0xff] }
  0x2b   :  { %329 = vmatpush.msra.mxu1 %v213_v60  ;;  %352 = vmatpush.msra.mxu2 %v214_v61  ;;  %v289_v28 = vld [vmem:[#allocation13 + $0x3a0] sm:$0xff]  ;;  %v290_v29 = vld [vmem:[#allocation13 + $0x3a8] sm:$0xff]  ;;  %v284_v35 = vld [vmem:[#allocation13 + $0x378] sm:$0xff] }
  0x2c   :  { %164 = vmatpush.msra.mxu0 %v135_v17  ;;  %375 = vmatpush.msra.mxu3 %v215_v63  ;;  %v183_v17 = vld [vmem:[#allocation13 + $0x50] sm:$0xff]  ;;  %v281_v32 = vld [vmem:[#allocation13 + $0x360] sm:$0xff]  ;;  %v282_v33 = vld [vmem:[#allocation13 + $0x368] sm:$0xff] }
  0x2d   :  { %330 = vmatpush.msra.mxu1 %v205_v1  ;;  %353 = vmatpush.msra.mxu2 %v206_v2  ;;  %v273_v36 = vld [vmem:[#allocation13 + $0x320] sm:$0xff]  ;;  %v274_v37 = vld [vmem:[#allocation13 + $0x328] sm:$0xff]  ;;  %v276_v39 = vld [vmem:[#allocation13 + $0x338] sm:$0xff] }
  0x2e   :  { %165 = vmatpush.msra.mxu0 %v134_v18  ;;  %376 = vmatpush.msra.mxu3 %v207_v3  ;;  %v184_v18 = vld [vmem:[#allocation13 + $0x58] sm:$0xff]  ;;  %v265_v40 = vld [vmem:[#allocation13 + $0x2e0] sm:$0xff]  ;;  %v266_v41 = vld [vmem:[#allocation13 + $0x2e8] sm:$0xff] }
  0x2f   :  { %331 = vmatpush.msra.mxu1 %v197_v6  ;;  %354 = vmatpush.msra.mxu2 %v198_v7  ;;  %v268_v43 = vld [vmem:[#allocation13 + $0x2f8] sm:$0xff]  ;;  %v257_v44 = vld [vmem:[#allocation13 + $0x2a0] sm:$0xff]  ;;  %v258_v45 = vld [vmem:[#allocation13 + $0x2a8] sm:$0xff] }
  0x30   :  { %388 = vmatpush.msrb.mxu0 %v296_v22  ;;  %377 = vmatpush.msra.mxu3 %v199_v8  ;;  %v175_v22 = vld [vmem:[#allocation13 + $0x10] sm:$0xff]  ;;  %v260_v47 = vld [vmem:[#allocation13 + $0x2b8] sm:$0xff]  ;;  %v249_v48 = vld [vmem:[#allocation13 + $0x260] sm:$0xff] }
  0x31   :  { %332 = vmatpush.msra.mxu1 %v189_v11  ;;  %355 = vmatpush.msra.mxu2 %v190_v12  ;;  %v250_v49 = vld [vmem:[#allocation13 + $0x268] sm:$0xff]  ;;  %v252_v51 = vld [vmem:[#allocation13 + $0x278] sm:$0xff]  ;;  %v241_v52 = vld [vmem:[#allocation13 + $0x220] sm:$0xff] }
  0x32   :  { %389 = vmatpush.msrb.mxu0 %v288_v26  ;;  %378 = vmatpush.msra.mxu3 %v191_v13  ;;  %v299_v26 = vld [vmem:[#allocation13 + $0x3f0] sm:$0xff]  ;;  %v242_v53 = vld [vmem:[#allocation13 + $0x228] sm:$0xff]  ;;  %v233_v56 = vld [vmem:[#allocation13 + $0x1e0] sm:$0xff] }
  0x33   :  { %333 = vmatpush.msra.mxu1 %v181_v15  ;;  %356 = vmatpush.msra.mxu2 %v182_v16  ;;  %v243_v54 = vld [vmem:[#allocation13 + $0x230] sm:$0xff]  ;;  %v234_v57 = vld [vmem:[#allocation13 + $0x1e8] sm:$0xff]  ;;  %v225_v60 = vld [vmem:[#allocation13 + $0x1a0] sm:$0xff] }
  0x34   :  { %390 = vmatpush.msrb.mxu0 %v280_v30  ;;  %379 = vmatpush.msra.mxu3 %v183_v17  ;;  %v291_v30 = vld [vmem:[#allocation13 + $0x3b0] sm:$0xff]  ;;  %v226_v61 = vld [vmem:[#allocation13 + $0x1a8] sm:$0xff]  ;;  %v228_v63 = vld [vmem:[#allocation13 + $0x1b8] sm:$0xff] }
  0x35   :  { %334 = vmatpush.msra.mxu1 %v173_v19  ;;  %357 = vmatpush.msra.mxu2 %v174_v20  ;;  %v235_v58 = vld [vmem:[#allocation13 + $0x1f0] sm:$0xff]  ;;  %v218_v1 = vld [vmem:[#allocation13 + $0x168] sm:$0xff]  ;;  %v220_v3 = vld [vmem:[#allocation13 + $0x178] sm:$0xff] }
  0x36   :  { %391 = vmatpush.msrb.mxu0 %v272_v34  ;;  %380 = vmatpush.msra.mxu3 %v175_v22  ;;  %v283_v34 = vld [vmem:[#allocation13 + $0x370] sm:$0xff]  ;;  %v212_v7 = vld [vmem:[#allocation13 + $0x138] sm:$0xff]  ;;  %v201_v8 = vld [vmem:[#allocation13 + $0xe0] sm:$0xff] }
  0x37   :  { %411 = vmatpush.msrb.mxu1 %v297_v24  ;;  %434 = vmatpush.msrb.mxu2 %v298_v25  ;;  %v219_v2 = vld [vmem:[#allocation13 + $0x170] sm:$0xff]  ;;  %v204_v11 = vld [vmem:[#allocation13 + $0xf8] sm:$0xff]  ;;  %v193_v12 = vld [vmem:[#allocation13 + $0xa0] sm:$0xff] }
  0x38   :  { %392 = vmatpush.msrb.mxu0 %v264_v38  ;;  %457 = vmatpush.msrb.mxu3 %v299_v26  ;;  %v275_v38 = vld [vmem:[#allocation13 + $0x330] sm:$0xff]  ;;  %v194_v13 = vld [vmem:[#allocation13 + $0xa8] sm:$0xff]  ;;  %v196_v15 = vld [vmem:[#allocation13 + $0xb8] sm:$0xff] }
  0x39   :  { %412 = vmatpush.msrb.mxu1 %v289_v28  ;;  %435 = vmatpush.msrb.mxu2 %v290_v29  ;;  %v211_v6 = vld [vmem:[#allocation13 + $0x130] sm:$0xff]  ;;  %v185_v16 = vld [vmem:[#allocation13 + $0x60] sm:$0xff]  ;;  %v186_v17 = vld [vmem:[#allocation13 + $0x68] sm:$0xff] }
  0x3a   :  { %393 = vmatpush.msrb.mxu0 %v256_v42  ;;  %458 = vmatpush.msrb.mxu3 %v291_v30  ;;  %v267_v42 = vld [vmem:[#allocation13 + $0x2f0] sm:$0xff]  ;;  %v188_v19 = vld [vmem:[#allocation13 + $0x78] sm:$0xff]  ;;  %v177_v20 = vld [vmem:[#allocation13 + $0x20] sm:$0xff] }
  0x3b   :  { %413 = vmatpush.msrb.mxu1 %v281_v32  ;;  %436 = vmatpush.msrb.mxu2 %v282_v33  ;;  %v179_v22 = vld [vmem:[#allocation13 + $0x30] sm:$0xff]  ;;  %v5883_v25 = vld [vmem:[#allocation15 + $0x1e0] sm:$0xff]  ;;  %v5885_v26 = vld [vmem:[#allocation15 + $0x1e8] sm:$0xff] }
  0x3c   :  { %394 = vmatpush.msrb.mxu0 %v248_v46  ;;  %459 = vmatpush.msrb.mxu3 %v283_v34  ;;  %v259_v46 = vld [vmem:[#allocation13 + $0x2b0] sm:$0xff]  ;;  %v5891_v28 = vld [vmem:[#allocation15 + $0x1f8] sm:$0xff]  ;;  %v5895_v29 = vld [vmem:[#allocation15 + $0x1c0] sm:$0xff] }
  0x3d   :  { %414 = vmatpush.msrb.mxu1 %v273_v36  ;;  %437 = vmatpush.msrb.mxu2 %v274_v37  ;;  %v5897_v30 = vld [vmem:[#allocation15 + $0x1c8] sm:$0xff]  ;;  %v5903_v32 = vld [vmem:[#allocation15 + $0x1d8] sm:$0xff]  ;;  %v5907_v33 = vld [vmem:[#allocation15 + $0x1a0] sm:$0xff] }
  0x3e   :  { %395 = vmatpush.msrb.mxu0 %v240_v50  ;;  %460 = vmatpush.msrb.mxu3 %v275_v38  ;;  %v251_v50 = vld [vmem:[#allocation13 + $0x270] sm:$0xff]  ;;  %v5909_v34 = vld [vmem:[#allocation15 + $0x1a8] sm:$0xff]  ;;  %v5915_v36 = vld [vmem:[#allocation15 + $0x1b8] sm:$0xff] }
  0x3f   :  { %415 = vmatpush.msrb.mxu1 %v265_v40  ;;  %438 = vmatpush.msrb.mxu2 %v266_v41  ;;  %v5925_v38 = vld [vmem:[#allocation15 + $0x180] sm:$0xff]  ;;  %v5931_v40 = vld [vmem:[#allocation15 + $0x190] sm:$0xff]  ;;  %v5933_v41 = vld [vmem:[#allocation15 + $0x198] sm:$0xff] }
  0x40   :  { %396 = vmatpush.msrb.mxu0 %v232_v55  ;;  %461 = vmatpush.msrb.mxu3 %v267_v42  ;;  %v244_v55 = vld [vmem:[#allocation13 + $0x238] sm:$0xff]  ;;  %v5937_v42 = vld [vmem:[#allocation15 + $0x160] sm:$0xff] }
  0x41   :  { %416 = vmatpush.msrb.mxu1 %v257_v44  ;;  %439 = vmatpush.msrb.mxu2 %v258_v45  ;;  %v5943_v44 = vld [vmem:[#allocation15 + $0x170] sm:$0xff]  ;;  %v5945_v45 = vld [vmem:[#allocation15 + $0x178] sm:$0xff] }
  0x42   :  { %397 = vmatpush.msrb.mxu0 %v224_v59  ;;  %462 = vmatpush.msrb.mxu3 %v259_v46  ;;  %v236_v59 = vld [vmem:[#allocation13 + $0x1f8] sm:$0xff]  ;;  %v5949_v46 = vld [vmem:[#allocation15 + $0x140] sm:$0xff] }
  0x43   :  { %417 = vmatpush.msrb.mxu1 %v249_v48  ;;  %440 = vmatpush.msrb.mxu2 %v250_v49  ;;  %v5955_v48 = vld [vmem:[#allocation15 + $0x150] sm:$0xff]  ;;  %v5957_v49 = vld [vmem:[#allocation15 + $0x158] sm:$0xff] }
  0x44   :  { %398 = vmatpush.msrb.mxu0 %v216_v0  ;;  %463 = vmatpush.msrb.mxu3 %v251_v50  ;;  %v217_v0 = vld [vmem:[#allocation13 + $0x160] sm:$0xff] }
  0x45   :  { %418 = vmatpush.msrb.mxu1 %v241_v52  ;;  %441 = vmatpush.msrb.mxu2 %v242_v53  ;;  %v5965_v50 = vld [vmem:[#allocation15 + $0x120] sm:$0xff]  ;;  %v5971_v52 = vld [vmem:[#allocation15 + $0x130] sm:$0xff]  ;;  %v5973_v53 = vld [vmem:[#allocation15 + $0x138] sm:$0xff] }
  0x46   :  { %399 = vmatpush.msrb.mxu0 %v208_v5  ;;  %464 = vmatpush.msrb.mxu3 %v243_v54  ;;  %v210_v5 = vld [vmem:[#allocation13 + $0x128] sm:$0xff]  ;;  %v5977_v54 = vld [vmem:[#allocation15 + $0x100] sm:$0xff] }
  0x47   :  { %419 = vmatpush.msrb.mxu1 %v233_v56  ;;  %442 = vmatpush.msrb.mxu2 %v234_v57  ;;  %v5983_v56 = vld [vmem:[#allocation15 + $0x110] sm:$0xff]  ;;  %v5985_v57 = vld [vmem:[#allocation15 + $0x118] sm:$0xff] }
  0x48   :  { %400 = vmatpush.msrb.mxu0 %v200_v10  ;;  %465 = vmatpush.msrb.mxu3 %v235_v58  ;;  %v203_v10 = vld [vmem:[#allocation13 + $0xf0] sm:$0xff]  ;;  %v5989_v58 = vld [vmem:[#allocation15 + $0xe0] sm:$0xff] }
  0x49   :  { %420 = vmatpush.msrb.mxu1 %v225_v60  ;;  %443 = vmatpush.msrb.mxu2 %v226_v61  ;;  %v5995_v60 = vld [vmem:[#allocation15 + $0xf0] sm:$0xff]  ;;  %v5997_v61 = vld [vmem:[#allocation15 + $0xf8] sm:$0xff] }
  0x4a   :  { %401 = vmatpush.msrb.mxu0 %v192_v14  ;;  %v195_v14 = vld [vmem:[#allocation13 + $0xb0] sm:$0xff] }
  0x4b   :  { %421 = vmatpush.msrb.mxu1 %v217_v0  ;;  %444 = vmatpush.msrb.mxu2 %v218_v1  ;;  %v6011_v0 = vld [vmem:[#allocation15 + $0xd0] sm:$0xff]  ;;  %v6013_v1 = vld [vmem:[#allocation15 + $0xd8] sm:$0xff] }
  0x4c   :  { %402 = vmatpush.msrb.mxu0 %v184_v18  ;;  %v187_v18 = vld [vmem:[#allocation13 + $0x70] sm:$0xff] }
  0x4d   :  { %445 = vmatpush.msrb.mxu2 %v210_v5  ;;  %v6025_v5 = vld [vmem:[#allocation15 + $0xb8] sm:$0xff] }
  0x4e   :  { %403 = vmatpush.msrb.mxu0 %v176_v23  ;;  %v180_v23 = vld [vmem:[#allocation13 + $0x38] sm:$0xff] }
  0x83   :  { %v124_v4 = vpop.permute.xlu0 %123 }
  0x84   :  { %vm128_vm0 = vcmp.eq.s32.totalorder %v121_v62, %v124_v4  ;;  %v209_v4 = vld [vmem:[#allocation13 + $0x120] sm:$0xff] }
  0x85   :  { %5278 = vmatmul.msk.f32.vlgmr.msra.gmra.mxu0 %vm128_vm0, %v5805_v9  ;;  %422 = vmatpush.msrb.mxu1 %v209_v4  ;;  %v6023_v4 = vld [vmem:[#allocation15 + $0xb0] sm:$0xff] }
  0x86   :  { %480 = vmatpush.msra.mxu0 %v300_v27  ;;  %v5889_v27 = vld [vmem:[#allocation15 + $0x1f0] sm:$0xff] }
  0x87   :  { %423 = vmatpush.msrb.mxu1 %v201_v8  ;;  %v6035_v8 = vld [vmem:[#allocation15 + $0x90] sm:$0xff] }
  0x88   :  { %481 = vmatpush.msra.mxu0 %v292_v31  ;;  %v5901_v31 = vld [vmem:[#allocation15 + $0x1d0] sm:$0xff] }
  0x89   :  { %424 = vmatpush.msrb.mxu1 %v193_v12  ;;  %v6047_v12 = vld [vmem:[#allocation15 + $0x70] sm:$0xff] }
  0x8a   :  { %482 = vmatpush.msra.mxu0 %v284_v35  ;;  %v5913_v35 = vld [vmem:[#allocation15 + $0x1b0] sm:$0xff] }
  0x8b   :  { %v127_v21 = vpop.permute.xlu0 %126  ;;  %425 = vmatpush.msrb.mxu1 %v185_v16  ;;  %v6059_v16 = vld [vmem:[#allocation15 + $0x50] sm:$0xff] }
  0x8c   :  { %vm129_vm1 = vcmp.eq.s32.totalorder %v121_v62, %v127_v21  ;;  %483 = vmatpush.msra.mxu0 %v276_v39  ;;  %v227_v62 = vld [vmem:[#allocation13 + $0x1b0] sm:$0xff]  ;;  %v178_v21 = vld [vmem:[#allocation13 + $0x28] sm:$0xff] }
  0x8d   :  { %5279 = vmatmul.msk.f32.gmra.mxu0 %vm129_vm1, %v5805_v9  ;;  %466 = vmatpush.msrb.mxu3 %v227_v62  ;;  %v202_v9 = vld [vmem:[#allocation13 + $0xe8] sm:$0xff]  ;;  %v6005_v62 = vld [vmem:[#allocation15 + $0xc0] sm:$0xff] }
  0x8e   :  { %484 = vmatpush.msra.mxu0 %v268_v43  ;;  %446 = vmatpush.msrb.mxu2 %v202_v9  ;;  %v5927_v39 = vld [vmem:[#allocation15 + $0x188] sm:$0xff]  ;;  %v6037_v9 = vld [vmem:[#allocation15 + $0x98] sm:$0xff] }
  0x8f   :  { %467 = vmatpush.msrb.mxu3 %v219_v2  ;;  %426 = vmatpush.msrb.mxu1 %v177_v20  ;;  %v5939_v43 = vld [vmem:[#allocation15 + $0x168] sm:$0xff]  ;;  %v6017_v2 = vld [vmem:[#allocation15 + $0xa0] sm:$0xff]  ;;  %v6071_v20 = vld [vmem:[#allocation15 + $0x30] sm:$0xff] }
  0x90   :  { %485 = vmatpush.msra.mxu0 %v260_v47  ;;  %447 = vmatpush.msrb.mxu2 %v194_v13  ;;  %v5951_v47 = vld [vmem:[#allocation15 + $0x148] sm:$0xff]  ;;  %v6049_v13 = vld [vmem:[#allocation15 + $0x78] sm:$0xff] }
  0x91   :  { %468 = vmatpush.msrb.mxu3 %v211_v6  ;;  %v6029_v6 = vld [vmem:[#allocation15 + $0x80] sm:$0xff] }
  0x92   :  { %486 = vmatpush.msra.mxu0 %v252_v51  ;;  %448 = vmatpush.msrb.mxu2 %v186_v17  ;;  %v5967_v51 = vld [vmem:[#allocation15 + $0x128] sm:$0xff]  ;;  %v6061_v17 = vld [vmem:[#allocation15 + $0x58] sm:$0xff] }
  0x93   :  { %469 = vmatpush.msrb.mxu3 %v203_v10  ;;  %v6041_v10 = vld [vmem:[#allocation15 + $0x60] sm:$0xff]  ;;  %8182 = vst [vmem:[#allocation31_spill] sm:$0xff] %v6061_v17 }
  0x94   :  { %487 = vmatpush.msra.mxu0 %v244_v55  ;;  %449 = vmatpush.msrb.mxu2 %v178_v21  ;;  %v5979_v55 = vld [vmem:[#allocation15 + $0x108] sm:$0xff]  ;;  %v6073_v21 = vld [vmem:[#allocation15 + $0x38] sm:$0xff] }
  0x95   :  { %470 = vmatpush.msrb.mxu3 %v195_v14  ;;  %v6053_v14 = vld [vmem:[#allocation15 + $0x40] sm:$0xff] }
  0x96   :  { %488 = vmatpush.msra.mxu0 %v236_v59  ;;  %v5991_v59 = vld [vmem:[#allocation15 + $0xe8] sm:$0xff] }
  0x97   :  { %471 = vmatpush.msrb.mxu3 %v187_v18  ;;  %v6065_v18 = vld [vmem:[#allocation15 + $0x20] sm:$0xff] }
  0x98   :  { %489 = vmatpush.msra.mxu0 %v228_v63  ;;  %v6007_v63 = vld [vmem:[#allocation15 + $0xc8] sm:$0xff] }
  0x99   :  { %472 = vmatpush.msrb.mxu3 %v179_v22  ;;  %v6077_v22 = vld [vmem:[#allocation15] sm:$0xff] }
  0x9a   :  { %490 = vmatpush.msra.mxu0 %v220_v3  ;;  %v6019_v3 = vld [vmem:[#allocation15 + $0xa8] sm:$0xff] }
  0x9c   :  { %491 = vmatpush.msra.mxu0 %v212_v7  ;;  %v6031_v7 = vld [vmem:[#allocation15 + $0x88] sm:$0xff] }
  0x9e   :  { %492 = vmatpush.msra.mxu0 %v204_v11  ;;  %v6043_v11 = vld [vmem:[#allocation15 + $0x68] sm:$0xff] }
  0xa0   :  { %493 = vmatpush.msra.mxu0 %v196_v15  ;;  %v6055_v15 = vld [vmem:[#allocation15 + $0x48] sm:$0xff] }
  0xa2   :  { %494 = vmatpush.msra.mxu0 %v188_v19  ;;  %v6067_v19 = vld [vmem:[#allocation15 + $0x28] sm:$0xff] }
  0xa4   :  { %495 = vmatpush.msra.mxu0 %v180_v23  ;;  %v6079_v23 = vld [vmem:[#allocation15 + $0x8] sm:$0xff] }
 0x102   :  { %v5881_v24 = vpop.f32.mrf.mxu0 }
 0x103   :  { %335 = vmatmul.f32.vlgmr.msra.gmra.mxu1 %v5881_v24  ;;  %358 = vmatmul.f32.vlgmr.msra.gmra.mxu2 %v5881_v24 }
 0x104   :  { %381 = vmatmul.f32.vlgmr.msra.gmra.mxu3 %v5881_v24  ;;  %404 = vmatmul.f32.vlgmr.msrb.gmra.mxu0 %v5881_v24 }
 0x105   :  { %811 = vmatpush.msra.mxu1 %v5883_v25  ;;  %831 = vmatpush.msra.mxu2 %v5885_v26 }
 0x106   :  { %851 = vmatpush.msra.mxu3 %v5889_v27  ;;  %871 = vmatpush.msrb.mxu0 %v5891_v28 }
 0x107   :  { %812 = vmatpush.msra.mxu1 %v5895_v29  ;;  %832 = vmatpush.msra.mxu2 %v5897_v30 }
 0x108   :  { %852 = vmatpush.msra.mxu3 %v5901_v31  ;;  %872 = vmatpush.msrb.mxu0 %v5903_v32 }
 0x109   :  { %813 = vmatpush.msra.mxu1 %v5907_v33  ;;  %833 = vmatpush.msra.mxu2 %v5909_v34 }
 0x10a   :  { %v5921_v37 = vpop.f32.mrf.mxu0  ;;  %853 = vmatpush.msra.mxu3 %v5913_v35  ;;  %873 = vmatpush.msrb.mxu0 %v5915_v36 }
 0x10b   :  { %338 = vmatmul.f32.gmra.mxu1 %v5921_v37  ;;  %361 = vmatmul.f32.gmra.mxu2 %v5921_v37 }
 0x10c   :  { %384 = vmatmul.f32.gmra.mxu3 %v5921_v37  ;;  %407 = vmatmul.f32.gmra.mxu0 %v5921_v37 }
 0x10d   :  { %814 = vmatpush.msra.mxu1 %v5925_v38  ;;  %834 = vmatpush.msra.mxu2 %v5927_v39 }
 0x10e   :  { %854 = vmatpush.msra.mxu3 %v5931_v40  ;;  %874 = vmatpush.msrb.mxu0 %v5933_v41 }
 0x10f   :  { %815 = vmatpush.msra.mxu1 %v5937_v42  ;;  %835 = vmatpush.msra.mxu2 %v5939_v43 }
 0x110   :  { %855 = vmatpush.msra.mxu3 %v5943_v44  ;;  %875 = vmatpush.msrb.mxu0 %v5945_v45 }
 0x111   :  { %816 = vmatpush.msra.mxu1 %v5949_v46  ;;  %836 = vmatpush.msra.mxu2 %v5951_v47 }
 0x112   :  { %856 = vmatpush.msra.mxu3 %v5955_v48  ;;  %876 = vmatpush.msrb.mxu0 %v5957_v49 }
 0x113   :  { %427 = vmatmul.f32.vlgmr.msrb.gmra.mxu1 %v5881_v24  ;;  %450 = vmatmul.f32.vlgmr.msrb.gmra.mxu2 %v5881_v24 }
 0x114   :  { %473 = vmatmul.f32.vlgmr.msrb.gmra.mxu3 %v5881_v24  ;;  %496 = vmatmul.f32.vlgmr.msra.gmra.mxu0 %v5881_v24  ;;  %v6083_v24 = vld [vmem:[#allocation15 + $0x10] sm:$0xff] }
 0x115   :  { %817 = vmatpush.msra.mxu1 %v5965_v50  ;;  %837 = vmatpush.msra.mxu2 %v5967_v51 }
 0x116   :  { %857 = vmatpush.msra.mxu3 %v5971_v52  ;;  %877 = vmatpush.msrb.mxu0 %v5973_v53 }
 0x117   :  { %818 = vmatpush.msra.mxu1 %v5977_v54  ;;  %838 = vmatpush.msra.mxu2 %v5979_v55 }
 0x118   :  { %858 = vmatpush.msra.mxu3 %v5983_v56  ;;  %878 = vmatpush.msrb.mxu0 %v5985_v57 }
 0x119   :  { %819 = vmatpush.msra.mxu1 %v5989_v58  ;;  %839 = vmatpush.msra.mxu2 %v5991_v59 }
 0x11a   :  { %859 = vmatpush.msra.mxu3 %v5995_v60  ;;  %879 = vmatpush.msrb.mxu0 %v5997_v61 }
 0x11b   :  { %430 = vmatmul.f32.gmra.mxu1 %v5921_v37  ;;  %453 = vmatmul.f32.gmra.mxu2 %v5921_v37 }
 0x11c   :  { %476 = vmatmul.f32.gmra.mxu3 %v5921_v37  ;;  %499 = vmatmul.f32.gmra.mxu0 %v5921_v37  ;;  %v6085_v37 = vld [vmem:[#allocation15 + $0x18] sm:$0xff] }
 0x11d   :  { %820 = vmatpush.msra.mxu1 %v6005_v62  ;;  %840 = vmatpush.msra.mxu2 %v6007_v63 }
 0x11e   :  { %860 = vmatpush.msra.mxu3 %v6011_v0  ;;  %880 = vmatpush.msrb.mxu0 %v6013_v1 }
 0x11f   :  { %821 = vmatpush.msra.mxu1 %v6017_v2  ;;  %841 = vmatpush.msra.mxu2 %v6019_v3 }
 0x120   :  { %861 = vmatpush.msra.mxu3 %v6023_v4  ;;  %881 = vmatpush.msrb.mxu0 %v6025_v5 }
 0x121   :  { %822 = vmatpush.msra.mxu1 %v6029_v6  ;;  %842 = vmatpush.msra.mxu2 %v6031_v7 }
 0x122   :  { %862 = vmatpush.msra.mxu3 %v6035_v8  ;;  %882 = vmatpush.msrb.mxu0 %v6037_v9 }
 0x123   :  { %823 = vmatpush.msra.mxu1 %v6041_v10  ;;  %843 = vmatpush.msra.mxu2 %v6043_v11 }
 0x124   :  { %863 = vmatpush.msra.mxu3 %v6047_v12  ;;  %883 = vmatpush.msrb.mxu0 %v6049_v13 }
 0x125   :  { %824 = vmatpush.msra.mxu1 %v6053_v14  ;;  %844 = vmatpush.msra.mxu2 %v6055_v15 }
 0x126   :  { %864 = vmatpush.msra.mxu3 %v6059_v16  ;;  %884 = vmatpush.msrb.mxu0 %v6061_v17  ;;  %v8037_v17 = vmov 0.0  }
 0x127   :  { %825 = vmatpush.msra.mxu1 %v6065_v18  ;;  %845 = vmatpush.msra.mxu2 %v6067_v19 }
 0x128   :  { %865 = vmatpush.msra.mxu3 %v6071_v20  ;;  %885 = vmatpush.msrb.mxu0 %v6073_v21 }
 0x129   :  { %826 = vmatpush.msra.mxu1 %v6077_v22  ;;  %846 = vmatpush.msra.mxu2 %v6079_v23 }
 0x12a   :  { %866 = vmatpush.msra.mxu3 %v6083_v24  ;;  %886 = vmatpush.msrb.mxu0 %v6085_v37 }
 0x12b   :  { %827 = vmatmul.f32.vlgmr.msra.gmra.mxu1 %v8037_v17  ;;  %847 = vmatmul.f32.vlgmr.msra.gmra.mxu2 %v8037_v17 }
 0x12c   :  { %867 = vmatmul.f32.vlgmr.msra.gmra.mxu3 %v8037_v17  ;;  %887 = vmatmul.f32.vlgmr.msrb.gmra.mxu0 %v8037_v17  ;;  %v6351_v17 = vld [vmem:[#allocation15 + $0x28] sm:$0xff] }
 0x12d   :  { %1027 = vmatpush.msrb.mxu1 %v5883_v25  ;;  %1047 = vmatpush.msrb.mxu2 %v5885_v26  ;;  %v8183_v25 = vld [vmem:[#allocation31_spill] sm:$0xff]  ;;  %8200 = vst [vmem:[#allocation47_spill] sm:$0xff] %v6351_v17 }
 0x12e   :  { %1067 = vmatpush.msrb.mxu3 %v5889_v27  ;;  %1087 = vmatpush.msra.mxu0 %v5891_v28  ;;  %v6164_v26 = vld [vmem:[%s8028_s3] sm:$0xff] }
 0x12f   :  { %1028 = vmatpush.msrb.mxu1 %v5895_v29  ;;  %1048 = vmatpush.msrb.mxu2 %v5897_v30  ;;  %v303_v27 = vperm.slane %v6164_v26, 0  ;;  %v306_v28 = vperm.slane %v6164_v26, 3 }
 0x130   :  { %1068 = vmatpush.msrb.mxu3 %v5901_v31  ;;  %1088 = vmatpush.msra.mxu0 %v5903_v32 }
 0x131   :  { %1029 = vmatpush.msrb.mxu1 %v5907_v33  ;;  %1049 = vmatpush.msrb.mxu2 %v5909_v34  ;;  %v304_v33 = vperm.slane %v6164_v26, 1  ;;  %v305_v34 = vperm.slane %v6164_v26, 2 }
 0x132   :  { %1069 = vmatpush.msrb.mxu3 %v5913_v35  ;;  %1089 = vmatpush.msra.mxu0 %v5915_v36 }
 0x133   :  { %1030 = vmatpush.msrb.mxu1 %v5925_v38  ;;  %1050 = vmatpush.msrb.mxu2 %v5927_v39 }
 0x134   :  { %1070 = vmatpush.msrb.mxu3 %v5931_v40  ;;  %1090 = vmatpush.msra.mxu0 %v5933_v41 }
 0x135   :  { %1031 = vmatpush.msrb.mxu1 %v5937_v42  ;;  %1051 = vmatpush.msrb.mxu2 %v5939_v43 }
 0x136   :  { %1071 = vmatpush.msrb.mxu3 %v5943_v44  ;;  %1091 = vmatpush.msra.mxu0 %v5945_v45 }
 0x137   :  { %1032 = vmatpush.msrb.mxu1 %v5949_v46  ;;  %1052 = vmatpush.msrb.mxu2 %v5951_v47  ;;  %v307_v47 = vperm.slane %v6164_v26, 4 }
 0x138   :  { %1072 = vmatpush.msrb.mxu3 %v5955_v48  ;;  %1092 = vmatpush.msra.mxu0 %v5957_v49 }
 0x139   :  { %1033 = vmatpush.msrb.mxu1 %v5965_v50  ;;  %1053 = vmatpush.msrb.mxu2 %v5967_v51  ;;  %v310_v51 = vperm.slane %v6164_v26, 7 }
 0x13a   :  { %1073 = vmatpush.msrb.mxu3 %v5971_v52  ;;  %1093 = vmatpush.msra.mxu0 %v5973_v53  ;;  %v308_v53 = vperm.slane %v6164_v26, 5 }
 0x13b   :  { %1034 = vmatpush.msrb.mxu1 %v5977_v54  ;;  %1054 = vmatpush.msrb.mxu2 %v5979_v55  ;;  %v309_v54 = vperm.slane %v6164_v26, 6 }
 0x13c   :  { %1074 = vmatpush.msrb.mxu3 %v5983_v56  ;;  %1094 = vmatpush.msra.mxu0 %v5985_v57 }
 0x13d   :  { %1035 = vmatpush.msrb.mxu1 %v5989_v58  ;;  %1055 = vmatpush.msrb.mxu2 %v5991_v59 }
 0x13e   :  { %1075 = vmatpush.msrb.mxu3 %v5995_v60  ;;  %1095 = vmatpush.msra.mxu0 %v5997_v61 }
 0x13f   :  { %1036 = vmatpush.msrb.mxu1 %v6005_v62  ;;  %1056 = vmatpush.msrb.mxu2 %v6007_v63 }
 0x140   :  { %1076 = vmatpush.msrb.mxu3 %v6011_v0  ;;  %1096 = vmatpush.msra.mxu0 %v6013_v1 }
 0x141   :  { %1037 = vmatpush.msrb.mxu1 %v6017_v2  ;;  %1057 = vmatpush.msrb.mxu2 %v6019_v3 }
 0x142   :  { %1077 = vmatpush.msrb.mxu3 %v6023_v4  ;;  %1097 = vmatpush.msra.mxu0 %v6025_v5 }
 0x143   :  { %1038 = vmatpush.msrb.mxu1 %v6029_v6  ;;  %1058 = vmatpush.msrb.mxu2 %v6031_v7 }
 0x144   :  { %1078 = vmatpush.msrb.mxu3 %v6035_v8  ;;  %1098 = vmatpush.msra.mxu0 %v6037_v9 }
 0x145   :  { %1039 = vmatpush.msrb.mxu1 %v6041_v10  ;;  %1059 = vmatpush.msrb.mxu2 %v6043_v11 }
 0x146   :  { %1079 = vmatpush.msrb.mxu3 %v6047_v12  ;;  %1099 = vmatpush.msra.mxu0 %v6049_v13 }
 0x147   :  { %1040 = vmatpush.msrb.mxu1 %v6053_v14  ;;  %1060 = vmatpush.msrb.mxu2 %v6055_v15 }
 0x148   :  { %1080 = vmatpush.msrb.mxu3 %v6059_v16  ;;  %1100 = vmatpush.msra.mxu0 %v8183_v25 }
 0x149   :  { %1041 = vmatpush.msrb.mxu1 %v6065_v18  ;;  %1061 = vmatpush.msrb.mxu2 %v6067_v19 }
 0x14a   :  { %1081 = vmatpush.msrb.mxu3 %v6071_v20  ;;  %1101 = vmatpush.msra.mxu0 %v6073_v21 }
 0x14b   :  { %1042 = vmatpush.msrb.mxu1 %v6077_v22  ;;  %1062 = vmatpush.msrb.mxu2 %v6079_v23 }
 0x14c   :  { %1082 = vmatpush.msrb.mxu3 %v6083_v24  ;;  %1102 = vmatpush.msra.mxu0 %v6085_v37 }
 0x180   :  { %v336_v29 = vpop.f32.mrf.mxu1 }
 0x181   :  { %v337_v30 = vadd.f32 %v336_v29, %v303_v27  ;;  %v405_v31 = vpop.f32.mrf.mxu0 }
 0x182   :  { %v406_v32 = vadd.f32 %v405_v31, %v306_v28 }
 0x183   :  { %503 = vst [vmem:[#allocation2 + $0x30] sm:$0xff] %v337_v30 }
 0x184   :  { %506 = vst [vmem:[#allocation2 + $0x18] sm:$0xff] %v406_v32 }
 0x186   :  { %v359_v35 = vpop.f32.mrf.mxu2 }
 0x187   :  { %v360_v36 = vadd.f32 %v359_v35, %v304_v33  ;;  %v382_v38 = vpop.f32.mrf.mxu3 }
 0x188   :  { %v383_v39 = vadd.f32 %v382_v38, %v305_v34  ;;  %v339_v40 = vpop.f32.mrf.mxu1 }
 0x189   :  { %504 = vst [vmem:[#allocation2] sm:$0xff] %v360_v36  ;;  %v340_v41 = vadd.f32 %v339_v40, %v303_v27  ;;  %v408_v42 = vpop.f32.mrf.mxu0 }
 0x18a   :  { %v409_v43 = vadd.f32 %v408_v42, %v306_v28  ;;  %505 = vst [vmem:[#allocation2 + $0x58] sm:$0xff] %v383_v39  ;;  %v575_v39 = vld [vmem:[#allocation2 + $0x30] sm:$0x30] }
 0x18b   :  { %511 = vst [vmem:[#allocation2 + $0x40] sm:$0xff] %v340_v41 }
 0x18c   :  { %514 = vst [vmem:[#allocation2 + $0x38] sm:$0xff] %v409_v43 }
 0x18e   :  { %v362_v44 = vpop.f32.mrf.mxu2 }
 0x18f   :  { %v363_v45 = vadd.f32 %v362_v44, %v304_v33  ;;  %v385_v46 = vpop.f32.mrf.mxu3  ;;  %v603_v44 = vld [vmem:[#allocation2 + $0x30] sm:$0xc0] }
 0x190   :  { %v386_v48 = vadd.f32 %v385_v46, %v305_v34  ;;  %v428_v49 = vpop.f32.mrf.mxu1  ;;  %v547_v34 = vld [vmem:[#allocation2 + $0x30] sm:$0xc] }
 0x191   :  { %512 = vst [vmem:[#allocation2 + $0x20] sm:$0xff] %v363_v45  ;;  %v497_v50 = vpop.f32.mrf.mxu0  ;;  %v429_v52 = vadd.f32 %v428_v49, %v307_v47 }
 0x192   :  { %513 = vst [vmem:[#allocation2 + $0x10] sm:$0xff] %v386_v48  ;;  %v498_v55 = vadd.f32 %v497_v50, %v310_v51  ;;  %v659_v7 = vld [vmem:[#allocation2 + $0x40] sm:$0xc]  ;;  %v687_v8 = vld [vmem:[#allocation2 + $0x40] sm:$0x30] }
 0x193   :  { %507 = vst [vmem:[#allocation2 + $0x50] sm:$0xff] %v429_v52  ;;  %v662_v16 = vld [vmem:[#allocation2 + $0x38] sm:$0xc]  ;;  %v690_v18 = vld [vmem:[#allocation2 + $0x38] sm:$0x30] }
 0x194   :  { %510 = vst [vmem:[#allocation2 + $0x48] sm:$0xff] %v498_v55  ;;  %v578_v50 = vld [vmem:[#allocation2 + $0x18] sm:$0x30] }
 0x196   :  { %v451_v56 = vpop.f32.mrf.mxu2 }
 0x197   :  { %v452_v57 = vadd.f32 %v451_v56, %v308_v53  ;;  %v474_v58 = vpop.f32.mrf.mxu3 }
 0x198   :  { %v475_v59 = vadd.f32 %v474_v58, %v309_v54  ;;  %v431_v60 = vpop.f32.mrf.mxu1  ;;  %v660_v24 = vld [vmem:[#allocation2 + $0x20] sm:$0xc]  ;;  %v688_v25 = vld [vmem:[#allocation2 + $0x20] sm:$0x30] }
 0x199   :  { %v432_v61 = vadd.f32 %v431_v60, %v307_v47  ;;  %v500_v62 = vpop.f32.mrf.mxu0  ;;  %508 = vst [vmem:[#allocation2 + $0x68] sm:$0xff] %v452_v57  ;;  %v661_v28 = vld [vmem:[#allocation2 + $0x10] sm:$0xc]  ;;  %v689_v32 = vld [vmem:[#allocation2 + $0x10] sm:$0x30] }
 0x19a   :  { %v501_v63 = vadd.f32 %v500_v62, %v310_v51  ;;  %509 = vst [vmem:[#allocation2 + $0x8] sm:$0xff] %v475_v59  ;;  %v663_v0 = vld [vmem:[#allocation2 + $0x50] sm:$0x30]  ;;  %v691_v1 = vld [vmem:[#allocation2 + $0x50] sm:$0xc] }
 0x19b   :  { %515 = vst [vmem:[#allocation2 + $0x60] sm:$0xff] %v432_v61  ;;  %v671_v3 = vrot.slane %v663_v0, 2  ;;  %v699_v4 = vrot.slane %v691_v1, 6  ;;  %v666_v11 = vld [vmem:[#allocation2 + $0x48] sm:$0x30] }
 0x19c   :  { %518 = vst [vmem:[#allocation2 + $0x28] sm:$0xff] %v501_v63  ;;  %v694_v12 = vld [vmem:[#allocation2 + $0x48] sm:$0xc]  ;;  %v674_v14 = vrot.slane %v666_v11, 2  ;;  %v550_v47 = vld [vmem:[#allocation2 + $0x18] sm:$0xc] }
 0x19d   :  { %v679_v9 = vadd.f32 %v671_v3, %v659_v7  ;;  %v707_v10 = vadd.f32 %v699_v4, %v687_v8  ;;  %v702_v15 = vrot.slane %v694_v12, 6  ;;  %v606_v51 = vld [vmem:[#allocation2 + $0x18] sm:$0xc0]  ;;  %v548_v61 = vld [vmem:[#allocation2] sm:$0xc] }
 0x19e   :  { %v454_v2 = vpop.f32.mrf.mxu2  ;;  %v682_v19 = vadd.f32 %v674_v14, %v662_v16  ;;  %v519_v1 = vld [vmem:[#allocation2 + $0x30] sm:$0x3]  ;;  %v604_v7 = vld [vmem:[#allocation2] sm:$0xc0]  ;;  %v635_v8 = vld [vmem:[#allocation2 + $0x50] sm:$0xc0] }
 0x19f   :  { %v455_v5 = vadd.f32 %v454_v2, %v308_v53  ;;  %v477_v6 = vpop.f32.mrf.mxu3  ;;  %683 = vst [vmem:[#allocation3 + $0x18] sm:$0xc] %v679_v9  ;;  %v710_v20 = vadd.f32 %v702_v15, %v690_v18  ;;  %v576_v2 = vld [vmem:[#allocation2] sm:$0x30]  ;;  %v638_v11 = vld [vmem:[#allocation2 + $0x48] sm:$0xc0] }
 0x1a0   :  { %v478_v13 = vadd.f32 %v477_v6, %v309_v54  ;;  %711 = vst [vmem:[#allocation3 + $0x18] sm:$0x30] %v707_v10  ;;  %v664_v21 = vld [vmem:[#allocation2 + $0x68] sm:$0x30]  ;;  %v692_v23 = vld [vmem:[#allocation2 + $0x68] sm:$0xc] }
 0x1a1   :  { %516 = vst [vmem:[#allocation2 + $0x70] sm:$0xff] %v455_v5  ;;  %v672_v22 = vrot.slane %v664_v21, 2  ;;  %v700_v37 = vrot.slane %v692_v23, 6  ;;  %v665_v27 = vld [vmem:[#allocation2 + $0x8] sm:$0x30] }
 0x1a2   :  { %517 = vst [vmem:[#allocation2 + $0x78] sm:$0xff] %v478_v13  ;;  %v673_v30 = vrot.slane %v665_v27, 2  ;;  %v693_v31 = vld [vmem:[#allocation2 + $0x8] sm:$0xc]  ;;  %v523_v36 = vld [vmem:[#allocation2 + $0x60] sm:$0xc0] }
 0x1a3   :  { %686 = vst [vmem:[#allocation3 + $0x30] sm:$0xc] %v682_v19  ;;  %v680_v26 = vadd.f32 %v672_v22, %v660_v24  ;;  %v708_v29 = vadd.f32 %v700_v37, %v688_v25  ;;  %v701_v33 = vrot.slane %v693_v31, 6  ;;  %v551_v38 = vld [vmem:[#allocation2 + $0x60] sm:$0x30]  ;;  %v531_v52 = vrot.slane %v523_v36, 6 }
 0x1a4   :  { %714 = vst [vmem:[#allocation3 + $0x30] sm:$0x30] %v710_v20  ;;  %v681_v35 = vadd.f32 %v673_v30, %v661_v28  ;;  %v559_v41 = vrot.slane %v551_v38, 2  ;;  %v579_v42 = vld [vmem:[#allocation2 + $0x60] sm:$0xc] }
 0x1a5   :  { %684 = vst [vmem:[#allocation3 + $0x8] sm:$0xc] %v680_v26  ;;  %v709_v40 = vadd.f32 %v701_v33, %v689_v32  ;;  %v607_v43 = vld [vmem:[#allocation2 + $0x60] sm:$0x3]  ;;  %v587_v45 = vrot.slane %v579_v42, 6  ;;  %v539_v21 = vadd.f32 %v531_v52, %v519_v1  ;;  %v643_v33 = vrot.slane %v635_v8, 6 }
 0x1a6   :  { %712 = vst [vmem:[#allocation3 + $0x8] sm:$0x30] %v708_v29  ;;  %v615_v46 = vrot.slane %v607_v43, 2  ;;  %v567_v48 = vadd.f32 %v559_v41, %v547_v34  ;;  %v554_v49 = vld [vmem:[#allocation2 + $0x28] sm:$0x30] }
 0x1a7   :  { %685 = vst [vmem:[#allocation3 + $0x38] sm:$0xc] %v681_v35  ;;  %v595_v53 = vadd.f32 %v587_v45, %v575_v39  ;;  %v562_v55 = vrot.slane %v554_v49, 2  ;;  %v582_v56 = vld [vmem:[#allocation2 + $0x28] sm:$0xc] }
 0x1a8   :  { %713 = vst [vmem:[#allocation3 + $0x38] sm:$0x30] %v709_v40  ;;  %v623_v54 = vadd.f32 %v615_v46, %v603_v44  ;;  %v610_v57 = vld [vmem:[#allocation2 + $0x28] sm:$0x3]  ;;  %v526_v58 = vld [vmem:[#allocation2 + $0x28] sm:$0xc0] }
 0x1a9   :  { %571 = vst [vmem:[#allocation3 + $0x28] sm:$0xc] %v567_v48  ;;  %v590_v59 = vrot.slane %v582_v56, 6  ;;  %v618_v60 = vrot.slane %v610_v57, 2  ;;  %v570_v62 = vadd.f32 %v562_v55, %v550_v47  ;;  %v524_v63 = vld [vmem:[#allocation2 + $0x70] sm:$0xc0] }
 0x1aa   :  { %599 = vst [vmem:[#allocation3 + $0x28] sm:$0x30] %v595_v53  ;;  %v552_v0 = vld [vmem:[#allocation2 + $0x70] sm:$0x30]  ;;  %v580_v6 = vld [vmem:[#allocation2 + $0x70] sm:$0xc] }
 0x1ab   :  { %627 = vst [vmem:[#allocation3 + $0x28] sm:$0xc0] %v623_v54  ;;  %v598_v3 = vadd.f32 %v590_v59, %v578_v50  ;;  %v626_v4 = vadd.f32 %v618_v60, %v606_v51  ;;  %v560_v5 = vrot.slane %v552_v0, 2  ;;  %v588_v9 = vrot.slane %v580_v6, 6  ;;  %v608_v10 = vld [vmem:[#allocation2 + $0x70] sm:$0x3]  ;;  %v828_v59 = vpop.f32.mrf.mxu1 }
 0x1ac   :  { %574 = vst [vmem:[#allocation3 + $0x20] sm:$0xc] %v570_v62  ;;  %v616_v13 = vrot.slane %v608_v10, 2  ;;  %v525_v14 = vld [vmem:[#allocation2 + $0x78] sm:$0xc0]  ;;  %v534_v18 = vrot.slane %v526_v58, 6 }
 0x1ad   :  { %602 = vst [vmem:[#allocation3 + $0x20] sm:$0x30] %v598_v3  ;;  %v568_v12 = vadd.f32 %v560_v5, %v548_v61  ;;  %v549_v15 = vld [vmem:[#allocation2 + $0x58] sm:$0xc]  ;;  %v636_v16 = vld [vmem:[#allocation2 + $0x68] sm:$0xc0]  ;;  %v596_v19 = vadd.f32 %v588_v9, %v576_v2 }
 0x1ae   :  { %630 = vst [vmem:[#allocation3 + $0x20] sm:$0xc0] %v626_v4  ;;  %v553_v20 = vld [vmem:[#allocation2 + $0x78] sm:$0x30]  ;;  %v522_v22 = vld [vmem:[#allocation2 + $0x18] sm:$0x3]  ;;  %v624_v37 = vadd.f32 %v616_v13, %v604_v7  ;;  %v888_v7 = vpop.f32.mrf.mxu0  ;;  %v848_v10 = vpop.f32.mrf.mxu2 }
 0x1af   :  { %v577_v23 = vld [vmem:[#allocation2 + $0x58] sm:$0x30]  ;;  %v532_v24 = vrot.slane %v524_v63, 6  ;;  %572 = vst [vmem:[#allocation3] sm:$0xc] %v568_v12  ;;  %v561_v25 = vrot.slane %v553_v20, 2  ;;  %v542_v42 = vadd.f32 %v534_v18, %v522_v22 }
 0x1b0   :  { %v581_v26 = vld [vmem:[#allocation2 + $0x78] sm:$0xc]  ;;  %v520_v27 = vld [vmem:[#allocation2] sm:$0x3]  ;;  %v605_v28 = vld [vmem:[#allocation2 + $0x58] sm:$0xc0] }
 0x1b1   :  { %600 = vst [vmem:[#allocation3] sm:$0x30] %v596_v19  ;;  %v533_v29 = vrot.slane %v525_v14, 6  ;;  %v589_v30 = vrot.slane %v581_v26, 6  ;;  %v609_v31 = vld [vmem:[#allocation2 + $0x78] sm:$0x3]  ;;  %v569_v35 = vadd.f32 %v561_v25, %v549_v15  ;;  %v540_v47 = vadd.f32 %v532_v24, %v520_v27  ;;  %v868_v27 = vpop.f32.mrf.mxu3 }
 0x1b2   :  { %v521_v32 = vld [vmem:[#allocation2 + $0x58] sm:$0x3]  ;;  %v637_v34 = vld [vmem:[#allocation2 + $0x8] sm:$0xc0]  ;;  %628 = vst [vmem:[#allocation3] sm:$0xc0] %v624_v37 }
 0x1b3   :  { %v617_v36 = vrot.slane %v609_v31, 2  ;;  %v631_v38 = vld [vmem:[#allocation2 + $0x40] sm:$0x3]  ;;  %v719_v39 = vld [vmem:[#allocation2 + $0x50] sm:$0x3]  ;;  %v646_v40 = vrot.slane %v638_v11, 6  ;;  %v597_v41 = vadd.f32 %v589_v30, %v577_v23  ;;  %v541_v50 = vadd.f32 %v533_v29, %v521_v32 }
 0x1b4   :  { %543 = vst [vmem:[#allocation3 + $0x28] sm:$0x3] %v539_v21  ;;  %v634_v43 = vld [vmem:[#allocation2 + $0x38] sm:$0x3]  ;;  %v722_v44 = vld [vmem:[#allocation2 + $0x48] sm:$0x3]  ;;  %v651_v53 = vadd.f32 %v643_v33, %v631_v38 }
 0x1b5   :  { %v644_v45 = vrot.slane %v636_v16, 6  ;;  %v625_v46 = vadd.f32 %v617_v36, %v605_v28  ;;  %573 = vst [vmem:[#allocation3 + $0x10] sm:$0xc] %v569_v35  ;;  %v720_v48 = vld [vmem:[#allocation2 + $0x68] sm:$0x3]  ;;  %v645_v49 = vrot.slane %v637_v34, 6  ;;  %v654_v56 = vadd.f32 %v646_v40, %v634_v43 }
 0x1b6   :  { %601 = vst [vmem:[#allocation3 + $0x10] sm:$0x30] %v597_v41  ;;  %v727_v51 = vrot.slane %v719_v39, 2  ;;  %v721_v52 = vld [vmem:[#allocation2 + $0x8] sm:$0x3]  ;;  %v730_v55 = vrot.slane %v722_v44, 2 }
 0x1b7   :  { %629 = vst [vmem:[#allocation3 + $0x10] sm:$0xc0] %v625_v46  ;;  %v632_v54 = vld [vmem:[#allocation2 + $0x20] sm:$0x3]  ;;  %v633_v57 = vld [vmem:[#allocation2 + $0x10] sm:$0x3] }
 0x1b8   :  { %546 = vst [vmem:[#allocation3 + $0x20] sm:$0x3] %v542_v42  ;;  %v728_v58 = vrot.slane %v720_v48, 2  ;;  %v652_v60 = vadd.f32 %v644_v45, %v632_v54  ;;  %v715_v61 = vld [vmem:[#allocation2 + $0x40] sm:$0xc0]  ;;  %v729_v62 = vrot.slane %v721_v52, 2  ;;  %v653_v63 = vadd.f32 %v645_v49, %v633_v57 }
 0x1b9   :  { %544 = vst [vmem:[#allocation3] sm:$0x3] %v540_v47  ;;  %v718_v0 = vld [vmem:[#allocation2 + $0x38] sm:$0xc0]  ;;  %v735_v2 = vadd.f32 %v727_v51, %v715_v61  ;;  %v716_v3 = vld [vmem:[#allocation2 + $0x20] sm:$0xc0] }
 0x1ba   :  { %545 = vst [vmem:[#allocation3 + $0x10] sm:$0x3] %v541_v50  ;;  %v738_v5 = vadd.f32 %v730_v55, %v718_v0  ;;  %v717_v6 = vld [vmem:[#allocation2 + $0x10] sm:$0xc0]  ;;  %v736_v8 = vadd.f32 %v728_v58, %v716_v3  ;;  %v6177_v0 = vld [vmem:[#allocation15 + $0x1e0] sm:$0xff]  ;;  %v6185_v3 = vld [vmem:[#allocation15 + $0x1f8] sm:$0xff] }
 0x1bb   :  { %v743_v1 = vld [vmem:[#allocation3 + $0x28] sm:$0x3]  ;;  %655 = vst [vmem:[#allocation3 + $0x18] sm:$0x3] %v651_v53  ;;  %v737_v11 = vadd.f32 %v729_v62, %v717_v6  ;;  %1261 = vmatpush.msra.mxu1 %v6177_v0  ;;  %1321 = vmatpush.msrb.mxu0 %v6185_v3  ;;  %v6193_v6 = vld [vmem:[#allocation15 + $0x1d0] sm:$0xff] }
 0x1bc   :  { %v891_v4 = vadd.f32 %v828_v59, %v743_v1  ;;  %658 = vst [vmem:[#allocation3 + $0x30] sm:$0x3] %v654_v56  ;;  %v6179_v1 = vld [vmem:[#allocation15 + $0x1e8] sm:$0xff] }
 0x1bd   :  { %656 = vst [vmem:[#allocation3 + $0x8] sm:$0x3] %v652_v60  ;;  %1281 = vmatpush.msra.mxu2 %v6179_v1 }
 0x1be   :  { %v5280_v9 = vmul.f32 -1.442695, %v891_v4  ;;  %657 = vst [vmem:[#allocation3 + $0x38] sm:$0x3] %v653_v63  ;;  %v6189_v4 = vld [vmem:[#allocation15 + $0x1c0] sm:$0xff] }
 0x1bf   :  { %v746_v12 = vld [vmem:[#allocation3 + $0x20] sm:$0x3]  ;;  %739 = vst [vmem:[#allocation3 + $0x18] sm:$0xc0] %v735_v2  ;;  %v6181_v2 = vld [vmem:[#allocation15 + $0x1f0] sm:$0xff]  ;;  %1262 = vmatpush.msra.mxu1 %v6189_v4 }
 0x1c0   :  { %5350 = vpow2.f32 %v5280_v9  ;;  %v894_v13 = vadd.f32 %v888_v7, %v746_v12  ;;  %v744_v14 = vld [vmem:[#allocation3] sm:$0x3]  ;;  %742 = vst [vmem:[#allocation3 + $0x30] sm:$0xc0] %v738_v5  ;;  %1301 = vmatpush.msra.mxu3 %v6181_v2  ;;  %v6191_v5 = vld [vmem:[#allocation15 + $0x1c8] sm:$0xff]  ;;  %v6197_v7 = vld [vmem:[#allocation15 + $0x1d8] sm:$0xff] }
 0x1c1   :  { %v892_v15 = vadd.f32 %v848_v10, %v744_v14  ;;  %740 = vst [vmem:[#allocation3 + $0x8] sm:$0xc0] %v736_v8  ;;  %v745_v26 = vld [vmem:[#allocation3 + $0x10] sm:$0x3]  ;;  %1282 = vmatpush.msra.mxu2 %v6191_v5  ;;  %1322 = vmatpush.msrb.mxu0 %v6197_v7  ;;  %v6201_v8 = vld [vmem:[#allocation15 + $0x1a0] sm:$0xff]  ;;  %v6203_v9 = vld [vmem:[#allocation15 + $0x1a8] sm:$0xff] }
 0x1c2   :  { %v5282_v16 = vmul.f32 -1.442695, %v894_v13  ;;  %741 = vst [vmem:[#allocation3 + $0x38] sm:$0xc0] %v737_v11  ;;  %v893_v31 = vadd.f32 %v868_v27, %v745_v26  ;;  %1302 = vmatpush.msra.mxu3 %v6193_v6  ;;  %v6205_v10 = vld [vmem:[#allocation15 + $0x1b0] sm:$0xff]  ;;  %1263 = vmatpush.msra.mxu1 %v6201_v8  ;;  %v6209_v12 = vld [vmem:[#allocation15 + $0x1b8] sm:$0xff] }
 0x1c3   :  { %v5281_v18 = vmul.f32 -1.442695, %v892_v15  ;;  %8184 = vst [vmem:[#allocation31_spill] sm:$0xff] %v6185_v3  ;;  %1283 = vmatpush.msra.mxu2 %v6203_v9  ;;  %1323 = vmatpush.msrb.mxu0 %v6209_v12  ;;  %v6213_v15 = vld [vmem:[#allocation15 + $0x180] sm:$0xff]  ;;  %v6233_v27 = vld [vmem:[#allocation15 + $0x178] sm:$0xff] }
 0x1c4   :  { %5352 = vpow2.f32 %v5282_v16  ;;  %8185 = vst [vmem:[#allocation32_spill] sm:$0xff] %v6191_v5  ;;  %1303 = vmatpush.msra.mxu3 %v6205_v10  ;;  %v6215_v16 = vld [vmem:[#allocation15 + $0x188] sm:$0xff]  ;;  %1264 = vmatpush.msra.mxu1 %v6213_v15 }
 0x1c5   :  { %5354 = vpow2.f32 %v5281_v18  ;;  %8186 = vst [vmem:[#allocation33_spill] sm:$0xff] %v6193_v6  ;;  %v6217_v18 = vld [vmem:[#allocation15 + $0x190] sm:$0xff]  ;;  %1284 = vmatpush.msra.mxu2 %v6215_v16 }
 0x1c6   :  { %v5351_v19 = vpop.eup %5350  ;;  %8187 = vst [vmem:[#allocation34_spill] sm:$0xff] %v6197_v7  ;;  %1304 = vmatpush.msra.mxu3 %v6217_v18 }
 0x1c7   :  { %v898_v20 = vadd.f32 1.0, %v5351_v19  ;;  %v959_v19 = vld [vmem:[#allocation3 + $0x28] sm:$0xc] }
 0x1c9   :  { %5356 = vrcp.f32 %v898_v20  ;;  %v910_v36 = vand.u32 2147483648, %v898_v20  ;;  %vm904_vm3 = vweird.f32 %v898_v20  ;;  %v908_v39 = vand.u32 2147483647, %v898_v20 }
 0x1ca   :  { %v5353_v21 = vpop.eup %5352 }
 0x1cb   :  { %v5355_v22 = vpop.eup %5354  ;;  %v937_v23 = vadd.f32 1.0, %v5353_v21  ;;  %v911_v45 = vor.u32 1.1754944e-38, %v910_v36  ;;  %vm909_vm7 = vcmp.eq.f32.partialorder %v908_v39, 8.507059e+37  ;;  %v6249_v36 = vld [vmem:[#allocation15 + $0x120] sm:$0xff]  ;;  %v6253_v39 = vld [vmem:[#allocation15 + $0x130] sm:$0xff] }
 0x1cc   :  { %v917_v24 = vadd.f32 1.0, %v5355_v22  ;;  %v6221_v22 = vld [vmem:[#allocation15 + $0x198] sm:$0xff] }
 0x1cd   :  { %5358 = vrcp.f32 %v937_v23  ;;  %v949_v57 = vand.u32 2147483648, %v937_v23  ;;  %vm943_vm11 = vweird.f32 %v937_v23  ;;  %v947_v58 = vand.u32 2147483647, %v937_v23  ;;  %1324 = vmatpush.msrb.mxu0 %v6221_v22 }
 0x1ce   :  { %5360 = vrcp.f32 %v917_v24  ;;  %v929_v40 = vand.u32 2147483648, %v917_v24  ;;  %v927_v43 = vand.u32 2147483647, %v917_v24  ;;  %vm923_vm6 = vweird.f32 %v917_v24 }
 0x1cf   :  { %v5357_v37 = vpop.eup %5356  ;;  %5362 = vtanh.f32 %v893_v31  ;;  %v950_v60 = vor.u32 1.1754944e-38, %v949_v57  ;;  %vm948_vm13 = vcmp.eq.f32.partialorder %v947_v58, 8.507059e+37  ;;  %1325 = vmatpush.msrb.mxu0 %v6233_v27  ;;  %v6241_v31 = vld [vmem:[#allocation15 + $0x150] sm:$0xff]  ;;  %v6291_v57 = vld [vmem:[#allocation15 + $0xd8] sm:$0xff]  ;;  %v6293_v58 = vld [vmem:[#allocation15 + $0xa0] sm:$0xff] }
 0x1d0   :  { %v900_v25 = vmul.f32 %v5357_v37, %v898_v20  ;;  %vm905_vm2 = vweird.f32 %v5357_v37  ;;  %v930_v47 = vor.u32 1.1754944e-38, %v929_v40  ;;  %vm928_vm9 = vcmp.eq.f32.partialorder %v927_v43, 8.507059e+37  ;;  %v962_v20 = vld [vmem:[#allocation3 + $0x20] sm:$0xc] }
 0x1d1   :  { %vm906_vm4 = vmor %vm904_vm3, %vm905_vm2  ;;  %v960_v40 = vld [vmem:[#allocation3] sm:$0xc] }
 0x1d2   :  { %v901_v28 = vsub.f32 1.0, %v900_v25  ;;  %v6229_v25 = vld [vmem:[#allocation15 + $0x170] sm:$0xff]  ;;  %v6261_v43 = vld [vmem:[#allocation15 + $0x100] sm:$0xff] }
 0x1d3   :  { %v5359_v29 = vpop.eup %5358  ;;  %1305 = vmatpush.msra.mxu3 %v6229_v25 }
 0x1d4   :  { %v5361_v30 = vpop.eup %5360  ;;  %v902_v32 = vmul.f32 %v5357_v37, %v901_v28  ;;  %v939_v34 = vmul.f32 %v5359_v29, %v937_v23  ;;  %vm944_vm10 = vweird.f32 %v5359_v29 }
 0x1d5   :  { %v919_v33 = vmul.f32 %v5361_v30, %v917_v24  ;;  %vm924_vm5 = vweird.f32 %v5361_v30  ;;  %v5363_v50 = vpop.eup %5362  ;;  %vm945_vm12 = vmor %vm943_vm11, %vm944_vm10  ;;  %v6225_v24 = vld [vmem:[#allocation15 + $0x160] sm:$0xff]  ;;  %1306 = vmatpush.msra.mxu3 %v6241_v31 }
 0x1d6   :  { %v903_v35 = vadd.f32 %v5357_v37, %v902_v32  ;;  %v940_v44 = vsub.f32 1.0, %v939_v34  ;;  %vm925_vm8 = vmor %vm923_vm6, %vm924_vm5  ;;  %1265 = vmatpush.msra.mxu1 %v6225_v24  ;;  %v6245_v34 = vld [vmem:[#allocation15 + $0x158] sm:$0xff] }
 0x1d7   :  { %v920_v38 = vsub.f32 1.0, %v919_v33  ;;  %1326 = vmatpush.msrb.mxu0 %v6245_v34  ;;  %1307 = vmatpush.msra.mxu3 %v6253_v39 }
 0x1d8   :  { %v907_v42 = vsel %vm906_vm4, %v5357_v37, %v903_v35  ;;  %v941_v51 = vmul.f32 %v5359_v29, %v940_v44  ;;  %v6227_v37 = vld [vmem:[#allocation15 + $0x168] sm:$0xff] }
 0x1d9   :  { %v921_v41 = vmul.f32 %v5361_v30, %v920_v38  ;;  %v912_v48 = vsel %vm909_vm7, %v911_v45, %v907_v42  ;;  %1285 = vmatpush.msra.mxu2 %v6227_v37  ;;  %v6251_v38 = vld [vmem:[#allocation15 + $0x128] sm:$0xff]  ;;  %v6265_v45 = vld [vmem:[#allocation15 + $0x110] sm:$0xff] }
 0x1da   :  { %v954_v54 = vmul.f32 %v5363_v50, %v912_v48  ;;  %v942_v56 = vadd.f32 %v5359_v29, %v941_v51  ;;  %v6263_v44 = vld [vmem:[#allocation15 + $0x108] sm:$0xff]  ;;  %1308 = vmatpush.msra.mxu3 %v6265_v45  ;;  %v6273_v48 = vld [vmem:[#allocation15 + $0xe0] sm:$0xff]  ;;  %v6277_v50 = vld [vmem:[#allocation15 + $0xf0] sm:$0xff] }
 0x1db   :  { %v922_v46 = vadd.f32 %v5361_v30, %v921_v41  ;;  %v6257_v41 = vld [vmem:[#allocation15 + $0x138] sm:$0xff] }
 0x1dc   :  { %v946_v59 = vsel %vm945_vm12, %v5359_v29, %v942_v56  ;;  %v6237_v29 = vld [vmem:[#allocation15 + $0x140] sm:$0xff]  ;;  %1327 = vmatpush.msrb.mxu0 %v6257_v41  ;;  %v6281_v51 = vld [vmem:[#allocation15 + $0xf8] sm:$0xff]  ;;  %1309 = vmatpush.msra.mxu3 %v6277_v50  ;;  %v6289_v56 = vld [vmem:[#allocation15 + $0xd0] sm:$0xff] }
 0x1dd   :  { %v926_v49 = vsel %vm925_vm8, %v5361_v30, %v922_v46  ;;  %v951_v62 = vsel %vm948_vm13, %v950_v60, %v946_v59  ;;  %v6239_v30 = vld [vmem:[#allocation15 + $0x148] sm:$0xff]  ;;  %1266 = vmatpush.msra.mxu1 %v6237_v29  ;;  %v6269_v46 = vld [vmem:[#allocation15 + $0x118] sm:$0xff] }
 0x1de   :  { %v931_v52 = vsel %vm928_vm9, %v930_v47, %v926_v49  ;;  %1286 = vmatpush.msra.mxu2 %v6239_v30  ;;  %1328 = vmatpush.msrb.mxu0 %v6269_v46  ;;  %v6275_v49 = vld [vmem:[#allocation15 + $0xe8] sm:$0xff] }
 0x1df   :  { %v953_v53 = vmul.f32 0.0, %v931_v52  ;;  %1267 = vmatpush.msra.mxu1 %v6249_v36  ;;  %v6283_v52 = vld [vmem:[#allocation15 + $0xc0] sm:$0xff]  ;;  %1310 = vmatpush.msra.mxu3 %v6289_v56 }
 0x1e0   :  { %1287 = vmatpush.msra.mxu2 %v6251_v38  ;;  %1329 = vmatpush.msrb.mxu0 %v6281_v51 }
 0x1e1   :  { %v6174_v55 = vadd.f32 %v954_v54, %v953_v53  ;;  %1268 = vmatpush.msra.mxu1 %v6261_v43  ;;  %v6285_v53 = vld [vmem:[#allocation15 + $0xc8] sm:$0xff] }
 0x1e2   :  { %1288 = vmatpush.msra.mxu2 %v6263_v44  ;;  %1330 = vmatpush.msrb.mxu0 %v6291_v57 }
 0x1e3   :  { %5364 = vtanh.f32 %v6174_v55  ;;  %1269 = vmatpush.msra.mxu1 %v6273_v48 }
 0x1e4   :  { %1289 = vmatpush.msra.mxu2 %v6275_v49 }
 0x1e5   :  { %1270 = vmatpush.msra.mxu1 %v6283_v52 }
 0x1e6   :  { %1290 = vmatpush.msra.mxu2 %v6285_v53 }
 0x1e7   :  { %1271 = vmatpush.msra.mxu1 %v6293_v58 }
 0x1e9   :  { %v5365_v61 = vpop.eup %5364 }
 0x1ea   :  { %v957_v63 = vmul.f32 %v5365_v61, %v951_v62  ;;  %v6299_v61 = vld [vmem:[#allocation15 + $0xa8] sm:$0xff]  ;;  %v6301_v62 = vld [vmem:[#allocation15 + $0xb0] sm:$0xff] }
 0x1eb   :  { %1291 = vmatpush.msra.mxu2 %v6299_v61  ;;  %1311 = vmatpush.msra.mxu3 %v6301_v62 }
 0x1ec   :  { %958 = vst [vmem:[#allocation4] sm:$0x3] %v957_v63  ;;  %1043 = vmatmul.f32.vlgmr.msrb.gmra.mxu1 %v957_v63  ;;  %1063 = vmatmul.f32.vlgmr.msrb.gmra.mxu2 %v957_v63 }
 0x1ed   :  { %1083 = vmatmul.f32.vlgmr.msrb.gmra.mxu3 %v957_v63  ;;  %1103 = vmatmul.f32.vlgmr.msra.gmra.mxu0 %v957_v63  ;;  %v6303_v63 = vld [vmem:[#allocation15 + $0xb8] sm:$0xff] }
 0x1ee   :  { %1331 = vmatpush.msrb.mxu0 %v6303_v63 }
 0x269   :  { %v1044_v11 = vpop.f32.mrf.mxu1 }
 0x26a   :  { %v1111_v13 = vrot.slane %v1044_v11, 6  ;;  %v1104_v14 = vpop.f32.mrf.mxu0  ;;  %v6307_v11 = vld [vmem:[#allocation15 + $0x80] sm:$0xff] }
 0x26b   :  { %v1114_v21 = vrot.slane %v1104_v14, 6  ;;  %v6314_v14 = vld [vmem:[#allocation15 + $0x90] sm:$0xff]  ;;  %1272 = vmatpush.msra.mxu1 %v6307_v11 }
 0x26c   :  { %v1119_v23 = vadd.f32 %v1111_v13, %v959_v19  ;;  %v6309_v13 = vld [vmem:[#allocation15 + $0x88] sm:$0xff]  ;;  %8189 = vst [vmem:[#allocation36_spill] sm:$0xff] %v6314_v14  ;;  %v6316_v19 = vld [vmem:[#allocation15 + $0x98] sm:$0xff]  ;;  %1312 = vmatpush.msra.mxu3 %v6314_v14 }
 0x26d   :  { %v1122_v26 = vadd.f32 %v1114_v21, %v962_v20  ;;  %8188 = vst [vmem:[#allocation35_spill] sm:$0xff] %v6309_v13  ;;  %v6322_v21 = vld [vmem:[#allocation15 + $0x60] sm:$0xff]  ;;  %1292 = vmatpush.msra.mxu2 %v6309_v13  ;;  %1332 = vmatpush.msrb.mxu0 %v6316_v19 }
 0x26e   :  { %v5283_v28 = vmul.f32 -1.442695, %v1119_v23  ;;  %8190 = vst [vmem:[#allocation37_spill] sm:$0xff] %v6316_v19  ;;  %v6324_v23 = vld [vmem:[#allocation15 + $0x68] sm:$0xff]  ;;  %1273 = vmatpush.msra.mxu1 %v6322_v21 }
 0x26f   :  { %v5285_v32 = vmul.f32 -1.442695, %v1122_v26  ;;  %v1064_v33 = vpop.f32.mrf.mxu2  ;;  %8191 = vst [vmem:[#allocation38_spill] sm:$0xff] %v6322_v21  ;;  %v6328_v26 = vld [vmem:[#allocation15 + $0x70] sm:$0xff]  ;;  %1293 = vmatpush.msra.mxu2 %v6324_v23  ;;  %v6360_v21 = vld [vmem:[#allocation15 + $0x38] sm:$0xff]  ;;  %v6368_v19 = vld [vmem:[#allocation15 + $0x8] sm:$0xff] }
 0x270   :  { %5366 = vpow2.f32 %v5283_v28  ;;  %v1112_v35 = vrot.slane %v1064_v33, 6  ;;  %8192 = vst [vmem:[#allocation39_spill] sm:$0xff] %v6324_v23  ;;  %v6330_v28 = vld [vmem:[#allocation15 + $0x78] sm:$0xff]  ;;  %v6334_v33 = vld [vmem:[#allocation15 + $0x40] sm:$0xff]  ;;  %1313 = vmatpush.msra.mxu3 %v6328_v26  ;;  %v6358_v23 = vld [vmem:[#allocation15 + $0x30] sm:$0xff] }
 0x271   :  { %5368 = vpow2.f32 %v5285_v32  ;;  %8193 = vst [vmem:[#allocation40_spill] sm:$0xff] %v6328_v26  ;;  %1333 = vmatpush.msrb.mxu0 %v6330_v28  ;;  %1274 = vmatpush.msra.mxu1 %v6334_v33 }
 0x272   :  { %v1120_v42 = vadd.f32 %v1112_v35, %v960_v40  ;;  %8194 = vst [vmem:[#allocation41_spill] sm:$0xff] %v6330_v28  ;;  %v6336_v35 = vld [vmem:[#allocation15 + $0x48] sm:$0xff]  ;;  %v6366_v28 = vld [vmem:[#allocation15] sm:$0xff] }
 0x273   :  { %8195 = vst [vmem:[#allocation42_spill] sm:$0xff] %v6334_v33  ;;  %1294 = vmatpush.msra.mxu2 %v6336_v35  ;;  %v6374_v33 = vld [vmem:[#allocation15 + $0x18] sm:$0xff] }
 0x274   :  { %v5284_v47 = vmul.f32 -1.442695, %v1120_v42  ;;  %8196 = vst [vmem:[#allocation43_spill] sm:$0xff] %v6336_v35  ;;  %v6342_v42 = vld [vmem:[#allocation15 + $0x50] sm:$0xff] }
 0x275   :  { %8197 = vst [vmem:[#allocation44_spill] sm:$0xff] %v6342_v42  ;;  %1314 = vmatpush.msra.mxu3 %v6342_v42  ;;  %1295 = vmatpush.msra.mxu2 %v6351_v17  ;;  %v6372_v35 = vld [vmem:[#allocation15 + $0x10] sm:$0xff] }
 0x276   :  { %v5367_v54 = vpop.eup %5366  ;;  %5370 = vpow2.f32 %v5284_v47  ;;  %v6344_v47 = vld [vmem:[#allocation15 + $0x58] sm:$0xff]  ;;  %8201 = vst [vmem:[#allocation48_spill] sm:$0xff] %v6366_v28 }
 0x277   :  { %v5369_v59 = vpop.eup %5368  ;;  %v6295_v60 = vadd.f32 1.0, %v5367_v54  ;;  %8198 = vst [vmem:[#allocation45_spill] sm:$0xff] %v6344_v47  ;;  %v1084_v54 = vpop.f32.mrf.mxu3  ;;  %1334 = vmatpush.msrb.mxu0 %v6344_v47  ;;  %1315 = vmatpush.msra.mxu3 %v6358_v23 }
 0x278   :  { %v6318_v20 = vadd.f32 1.0, %v5369_v59  ;;  %v6349_v59 = vld [vmem:[#allocation15 + $0x20] sm:$0xff]  ;;  %v1113_v14 = vrot.slane %v1084_v54, 6  ;;  %8202 = vst [vmem:[#allocation49_spill] sm:$0xff] %v6374_v33  ;;  %1296 = vmatpush.msra.mxu2 %v6368_v19  ;;  %v961_v54 = vld [vmem:[#allocation3 + $0x10] sm:$0xc] }
 0x279   :  { %5372 = vrcp.f32 %v6295_v60  ;;  %8199 = vst [vmem:[#allocation46_spill] sm:$0xff] %v6349_v59  ;;  %1275 = vmatpush.msra.mxu1 %v6349_v59  ;;  %1335 = vmatpush.msrb.mxu0 %v6360_v21  ;;  %vm1132_vm15 = vweird.f32 %v6295_v60 }
 0x27a   :  { %5374 = vrcp.f32 %v6318_v20  ;;  %1316 = vmatpush.msra.mxu3 %v6372_v35  ;;  %v1121_v42 = vadd.f32 %v1113_v14, %v961_v54  ;;  %1515 = vmatpush.msrb.mxu2 %v6179_v1  ;;  %vm1171_vm7 = vweird.f32 %v6318_v20 }
 0x27b   :  { %1276 = vmatpush.msra.mxu1 %v6366_v28  ;;  %1336 = vmatpush.msrb.mxu0 %v6374_v33  ;;  %v1138_v33 = vand.u32 2147483648, %v6295_v60 }
 0x27c   :  { %v5371_v32 = vpop.eup %5370  ;;  %1535 = vmatpush.msrb.mxu3 %v6181_v2  ;;  %1516 = vmatpush.msrb.mxu2 %v6191_v5 }
 0x27d   :  { %v6338_v40 = vadd.f32 1.0, %v5371_v32  ;;  %1495 = vmatpush.msrb.mxu1 %v6177_v0  ;;  %1555 = vmatpush.msra.mxu0 %v6185_v3  ;;  %v1139_v5 = vor.u32 1.1754944e-38, %v1138_v33  ;;  %v1182_v33 = vrot.slane %v6174_v55, 6 }
 0x27e   :  { %1536 = vmatpush.msrb.mxu3 %v6193_v6  ;;  %1517 = vmatpush.msrb.mxu2 %v6203_v9 }
 0x27f   :  { %v6353_v32 = vpop.eup %5372  ;;  %5376 = vrcp.f32 %v6338_v40  ;;  %1496 = vmatpush.msrb.mxu1 %v6189_v4  ;;  %1556 = vmatpush.msra.mxu0 %v6197_v7  ;;  %v1157_v54 = vand.u32 2147483648, %v6338_v40  ;;  %v1155_v6 = vand.u32 2147483647, %v6338_v40  ;;  %vm1151_vm2 = vweird.f32 %v6338_v40 }
 0x280   :  { %v1128_v26 = vmul.f32 %v6353_v32, %v6295_v60  ;;  %v6380_v47 = vpop.eup %5374  ;;  %vm1133_vm14 = vweird.f32 %v6353_v32  ;;  %5378 = vtanh.f32 %v1121_v42  ;;  %1537 = vmatpush.msrb.mxu3 %v6205_v10  ;;  %1518 = vmatpush.msrb.mxu2 %v6215_v16 }
 0x281   :  { %vm6402_vm0 = vmor %vm1132_vm15, %vm1133_vm14  ;;  %1497 = vmatpush.msrb.mxu1 %v6201_v8  ;;  %1557 = vmatpush.msra.mxu0 %v6209_v12  ;;  %v1158_v3 = vor.u32 1.1754944e-38, %v1157_v54  ;;  %vm1156_vm5 = vcmp.eq.f32.partialorder %v1155_v6, 8.507059e+37  ;;  %vm1172_vm6 = vweird.f32 %v6380_v47  ;;  %v1177_v6 = vand.u32 2147483648, %v6318_v20 }
 0x282   :  { %v1129_v13 = vsub.f32 1.0, %v1128_v26  ;;  %1538 = vmatpush.msrb.mxu3 %v6217_v18  ;;  %1519 = vmatpush.msrb.mxu2 %v6227_v37  ;;  %vm1173_vm8 = vmor %vm1171_vm7, %vm1172_vm6 }
 0x283   :  { %1498 = vmatpush.msrb.mxu1 %v6213_v15  ;;  %1558 = vmatpush.msra.mxu0 %v6221_v22 }
 0x284   :  { %v1130_v59 = vmul.f32 %v6353_v32, %v1129_v13  ;;  %v1167_v13 = vmul.f32 %v6380_v47, %v6318_v20  ;;  %1539 = vmatpush.msrb.mxu3 %v6229_v25  ;;  %1520 = vmatpush.msrb.mxu2 %v6239_v30 }
 0x285   :  { %v5377_v17 = vpop.eup %5376  ;;  %1499 = vmatpush.msrb.mxu1 %v6225_v24  ;;  %1559 = vmatpush.msra.mxu0 %v6233_v27 }
 0x286   :  { %v1147_v26 = vmul.f32 %v5377_v17, %v6338_v40  ;;  %v1131_v28 = vadd.f32 %v6353_v32, %v1130_v59  ;;  %v1136_v59 = vand.u32 2147483647, %v6295_v60  ;;  %vm1152_vm1 = vweird.f32 %v5377_v17  ;;  %v5379_v40 = vpop.eup %5378  ;;  %1540 = vmatpush.msrb.mxu3 %v6241_v31  ;;  %1521 = vmatpush.msrb.mxu2 %v6251_v38 }
 0x287   :  { %v1168_v7 = vsub.f32 1.0, %v1167_v13  ;;  %vm1153_vm4 = vmor %vm1151_vm2, %vm1152_vm1  ;;  %1500 = vmatpush.msrb.mxu1 %v6237_v29  ;;  %1560 = vmatpush.msra.mxu0 %v6245_v34 }
 0x288   :  { %v1148_v14 = vsub.f32 1.0, %v1147_v26  ;;  %v1135_v60 = vsel %vm6402_vm0, %v6353_v32, %v1131_v28  ;;  %vm1137_vm3 = vcmp.eq.f32.partialorder %v1136_v59, 8.507059e+37  ;;  %1541 = vmatpush.msrb.mxu3 %v6253_v39  ;;  %1522 = vmatpush.msrb.mxu2 %v6263_v44 }
 0x289   :  { %v1140_v28 = vsel %vm1137_vm3, %v1139_v5, %v1135_v60  ;;  %1501 = vmatpush.msrb.mxu1 %v6249_v36  ;;  %1561 = vmatpush.msra.mxu0 %v6257_v41 }
 0x28a   :  { %v1149_v26 = vmul.f32 %v5377_v17, %v1148_v14  ;;  %v1169_v14 = vmul.f32 %v6380_v47, %v1168_v7  ;;  %v1185_v59 = vmul.f32 %v5379_v40, %v1140_v28  ;;  %1542 = vmatpush.msrb.mxu3 %v6265_v45  ;;  %v1175_v7 = vand.u32 2147483647, %v6318_v20  ;;  %1523 = vmatpush.msrb.mxu2 %v6275_v49  ;;  %v8208_v28 = vld [vmem:[#allocation37_spill] sm:$0xff]  ;;  %v8210_v40 = vld [vmem:[#allocation39_spill] sm:$0xff] }
 0x28b   :  { %1502 = vmatpush.msrb.mxu1 %v6261_v43  ;;  %1562 = vmatpush.msra.mxu0 %v6269_v46 }
 0x28c   :  { %v1150_v42 = vadd.f32 %v5377_v17, %v1149_v26  ;;  %v1170_v55 = vadd.f32 %v6380_v47, %v1169_v14  ;;  %1543 = vmatpush.msrb.mxu3 %v6277_v50  ;;  %1524 = vmatpush.msrb.mxu2 %v6285_v53  ;;  %v1178_v26 = vor.u32 1.1754944e-38, %v1177_v6  ;;  %vm1176_vm9 = vcmp.eq.f32.partialorder %v1175_v7, 8.507059e+37  ;;  %v8212_v14 = vld [vmem:[#allocation41_spill] sm:$0xff]  ;;  %v8217_v7 = vld [vmem:[#allocation46_spill] sm:$0xff] }
 0x28d   :  { %1503 = vmatpush.msrb.mxu1 %v6273_v48  ;;  %1563 = vmatpush.msra.mxu0 %v6281_v51  ;;  %v8216_v6 = vld [vmem:[#allocation45_spill] sm:$0xff] }
 0x28e   :  { %v1154_v32 = vsel %vm1153_vm4, %v5377_v17, %v1150_v42  ;;  %v1174_v54 = vsel %vm1173_vm8, %v6380_v47, %v1170_v55  ;;  %1544 = vmatpush.msrb.mxu3 %v6289_v56  ;;  %1525 = vmatpush.msrb.mxu2 %v6299_v61  ;;  %v8206_v42 = vld [vmem:[#allocation35_spill] sm:$0xff]  ;;  %v8215_v55 = vld [vmem:[#allocation44_spill] sm:$0xff] }
 0x28f   :  { %v1159_v13 = vsel %vm1156_vm5, %v1158_v3, %v1154_v32  ;;  %1504 = vmatpush.msrb.mxu1 %v6283_v52  ;;  %1564 = vmatpush.msra.mxu0 %v6291_v57  ;;  %v1179_v60 = vsel %vm1176_vm9, %v1178_v26, %v1174_v54  ;;  %v8207_v3 = vld [vmem:[#allocation36_spill] sm:$0xff]  ;;  %v8209_v32 = vld [vmem:[#allocation38_spill] sm:$0xff]  ;;  %v8218_v54 = vld [vmem:[#allocation47_spill] sm:$0xff] }
 0x290   :  { %v1184_v5 = vmul.f32 %v1182_v33, %v1159_v13  ;;  %1545 = vmatpush.msrb.mxu3 %v6301_v62  ;;  %1526 = vmatpush.msrb.mxu2 %v8206_v42  ;;  %v8211_v13 = vld [vmem:[#allocation40_spill] sm:$0xff] }
 0x291   :  { %1505 = vmatpush.msrb.mxu1 %v6293_v58  ;;  %1565 = vmatpush.msra.mxu0 %v6303_v63  ;;  %v8219_v26 = vld [vmem:[#allocation48_spill] sm:$0xff] }
 0x292   :  { %v6431_v17 = vadd.f32 %v1185_v59, %v1184_v5  ;;  %1546 = vmatpush.msrb.mxu3 %v8207_v3  ;;  %1527 = vmatpush.msrb.mxu2 %v8210_v40  ;;  %v8213_v5 = vld [vmem:[#allocation42_spill] sm:$0xff]  ;;  %v8214_v59 = vld [vmem:[#allocation43_spill] sm:$0xff] }
 0x293   :  { %1506 = vmatpush.msrb.mxu1 %v6307_v11  ;;  %1566 = vmatpush.msra.mxu0 %v8208_v28 }
 0x294   :  { %8205 = vst [vmem:[#allocation50_spill] sm:$0xff] %v6431_v17  ;;  %5380 = vtanh.f32 %v6431_v17  ;;  %1547 = vmatpush.msrb.mxu3 %v8211_v13  ;;  %1528 = vmatpush.msrb.mxu2 %v8214_v59  ;;  %v8224_v17 = vld [vmem:[#allocation34_spill] sm:$0xff] }
 0x295   :  { %1507 = vmatpush.msrb.mxu1 %v8209_v32  ;;  %1567 = vmatpush.msra.mxu0 %v8212_v14 }
 0x296   :  { %1548 = vmatpush.msrb.mxu3 %v8215_v55  ;;  %1529 = vmatpush.msrb.mxu2 %v8218_v54 }
 0x297   :  { %1508 = vmatpush.msrb.mxu1 %v8213_v5  ;;  %1568 = vmatpush.msra.mxu0 %v8216_v6 }
 0x298   :  { %1549 = vmatpush.msrb.mxu3 %v6358_v23  ;;  %1530 = vmatpush.msrb.mxu2 %v6368_v19 }
 0x299   :  { %1509 = vmatpush.msrb.mxu1 %v8217_v7  ;;  %1569 = vmatpush.msra.mxu0 %v6360_v21 }
 0x29a   :  { %v5381_v20 = vpop.eup %5380  ;;  %1550 = vmatpush.msrb.mxu3 %v6372_v35 }
 0x29b   :  { %v1188_v47 = vmul.f32 %v5381_v20, %v1179_v60  ;;  %1510 = vmatpush.msrb.mxu1 %v8219_v26  ;;  %v8220_v20 = vld [vmem:[#allocation49_spill] sm:$0xff]  ;;  %v8221_v60 = vld [vmem:[#allocation31_spill] sm:$0xff] }
 0x29c   :  { %1570 = vmatpush.msra.mxu0 %v8220_v20 }
 0x29d   :  { %1189 = vst [vmem:[#allocation4] sm:$0xc] %v1188_v47  ;;  %v1259_v33 = vrot.slane %v1188_v47, 2  ;;  %v8222_v47 = vld [vmem:[#allocation32_spill] sm:$0xff] }
 0x29f   :  { %1277 = vmatmul.f32.vlgmr.msra.gmra.mxu1 %v1259_v33  ;;  %1297 = vmatmul.f32.vlgmr.msra.gmra.mxu2 %v1259_v33 }
 0x2a0   :  { %1317 = vmatmul.f32.vlgmr.msra.gmra.mxu3 %v1259_v33  ;;  %1337 = vmatmul.f32.vlgmr.msrb.gmra.mxu0 %v1259_v33  ;;  %v8223_v33 = vld [vmem:[#allocation33_spill] sm:$0xff] }
 0x2a1   :  { %1729 = vmatpush.msra.mxu1 %v6177_v0  ;;  %1749 = vmatpush.msra.mxu2 %v6179_v1 }
 0x2a2   :  { %1769 = vmatpush.msra.mxu3 %v6181_v2  ;;  %1789 = vmatpush.msrb.mxu0 %v8221_v60 }
 0x2a3   :  { %1730 = vmatpush.msra.mxu1 %v6189_v4  ;;  %1750 = vmatpush.msra.mxu2 %v8222_v47  ;;  %v1190_v4 = vld [vmem:[#allocation3 + $0x28] sm:$0x30] }
 0x2a4   :  { %1770 = vmatpush.msra.mxu3 %v8223_v33  ;;  %1790 = vmatpush.msrb.mxu0 %v8224_v17 }
 0x2a5   :  { %1731 = vmatpush.msra.mxu1 %v6201_v8  ;;  %1751 = vmatpush.msra.mxu2 %v6203_v9 }
 0x2a6   :  { %1771 = vmatpush.msra.mxu3 %v6205_v10  ;;  %1791 = vmatpush.msrb.mxu0 %v6209_v12  ;;  %v1193_v10 = vld [vmem:[#allocation3 + $0x20] sm:$0x30] }
 0x2a7   :  { %1732 = vmatpush.msra.mxu1 %v6213_v15  ;;  %1752 = vmatpush.msra.mxu2 %v6215_v16 }
 0x2a8   :  { %1772 = vmatpush.msra.mxu3 %v6217_v18  ;;  %1792 = vmatpush.msrb.mxu0 %v6221_v22 }
 0x2a9   :  { %1733 = vmatpush.msra.mxu1 %v6225_v24  ;;  %1753 = vmatpush.msra.mxu2 %v6227_v37  ;;  %v1191_v24 = vld [vmem:[#allocation3] sm:$0x30] }
 0x2aa   :  { %1773 = vmatpush.msra.mxu3 %v6229_v25  ;;  %1793 = vmatpush.msrb.mxu0 %v6233_v27 }
 0x2ab   :  { %1734 = vmatpush.msra.mxu1 %v6237_v29  ;;  %1754 = vmatpush.msra.mxu2 %v6239_v30 }
 0x2ac   :  { %1774 = vmatpush.msra.mxu3 %v6241_v31  ;;  %1794 = vmatpush.msrb.mxu0 %v6245_v34 }
 0x2ad   :  { %1735 = vmatpush.msra.mxu1 %v6249_v36  ;;  %1755 = vmatpush.msra.mxu2 %v6251_v38 }
 0x2ae   :  { %1775 = vmatpush.msra.mxu3 %v6253_v39  ;;  %1795 = vmatpush.msrb.mxu0 %v6257_v41 }
 0x2af   :  { %1736 = vmatpush.msra.mxu1 %v6261_v43  ;;  %1756 = vmatpush.msra.mxu2 %v6263_v44 }
 0x2b0   :  { %1776 = vmatpush.msra.mxu3 %v6265_v45  ;;  %1796 = vmatpush.msrb.mxu0 %v6269_v46  ;;  %v1192_v46 = vld [vmem:[#allocation3 + $0x10] sm:$0x30] }
 0x2b1   :  { %1737 = vmatpush.msra.mxu1 %v6273_v48  ;;  %1757 = vmatpush.msra.mxu2 %v6275_v49 }
 0x2b2   :  { %1777 = vmatpush.msra.mxu3 %v6277_v50  ;;  %1797 = vmatpush.msrb.mxu0 %v6281_v51 }
 0x2b3   :  { %1738 = vmatpush.msra.mxu1 %v6283_v52  ;;  %1758 = vmatpush.msra.mxu2 %v6285_v53 }
 0x2b4   :  { %1778 = vmatpush.msra.mxu3 %v6289_v56  ;;  %1798 = vmatpush.msrb.mxu0 %v6291_v57 }
 0x2b5   :  { %1739 = vmatpush.msra.mxu1 %v6293_v58  ;;  %1759 = vmatpush.msra.mxu2 %v6299_v61 }
 0x2b6   :  { %1779 = vmatpush.msra.mxu3 %v6301_v62  ;;  %1799 = vmatpush.msrb.mxu0 %v6303_v63 }
 0x2b7   :  { %1740 = vmatpush.msra.mxu1 %v6307_v11  ;;  %1760 = vmatpush.msra.mxu2 %v8206_v42  ;;  %v8225_v42 = vld [vmem:[#allocation50_spill] sm:$0xff] }
 0x2b8   :  { %1780 = vmatpush.msra.mxu3 %v8207_v3  ;;  %1800 = vmatpush.msrb.mxu0 %v8208_v28  ;;  %v1416_v3 = vrot.slane %v8225_v42, 6 }
 0x2b9   :  { %1741 = vmatpush.msra.mxu1 %v8209_v32  ;;  %1761 = vmatpush.msra.mxu2 %v8210_v40 }
 0x2ba   :  { %1781 = vmatpush.msra.mxu3 %v8211_v13  ;;  %1801 = vmatpush.msrb.mxu0 %v8212_v14 }
 0x2bb   :  { %1742 = vmatpush.msra.mxu1 %v8213_v5  ;;  %1762 = vmatpush.msra.mxu2 %v8214_v59 }
 0x2bc   :  { %1782 = vmatpush.msra.mxu3 %v8215_v55  ;;  %1802 = vmatpush.msrb.mxu0 %v8216_v6 }
 0x2bd   :  { %1743 = vmatpush.msra.mxu1 %v8217_v7  ;;  %1763 = vmatpush.msra.mxu2 %v8218_v54 }
 0x2be   :  { %1783 = vmatpush.msra.mxu3 %v6358_v23  ;;  %1803 = vmatpush.msrb.mxu0 %v6360_v21 }
 0x2bf   :  { %1744 = vmatpush.msra.mxu1 %v8219_v26  ;;  %1764 = vmatpush.msra.mxu2 %v6368_v19 }
 0x2c0   :  { %1784 = vmatpush.msra.mxu3 %v6372_v35  ;;  %1804 = vmatpush.msrb.mxu0 %v8220_v20 }
 0x31c   :  { %v1278_v0 = vpop.f32.mrf.mxu1 }
 0x31d   :  { %v1345_v1 = vrot.slane %v1278_v0, 4  ;;  %v1338_v2 = vpop.f32.mrf.mxu0 }
 0x31e   :  { %v1348_v8 = vrot.slane %v1338_v2, 4 }
 0x31f   :  { %v1353_v9 = vadd.f32 %v1345_v1, %v1190_v4  ;;  %v1424_v4 = vld [vmem:[#allocation3 + $0x28] sm:$0xc0] }
 0x320   :  { %v1356_v12 = vadd.f32 %v1348_v8, %v1193_v10  ;;  %v1427_v10 = vld [vmem:[#allocation3 + $0x20] sm:$0xc0] }
 0x321   :  { %v5286_v15 = vmul.f32 -1.442695, %v1353_v9 }
 0x322   :  { %v5288_v16 = vmul.f32 -1.442695, %v1356_v12  ;;  %v1298_v18 = vpop.f32.mrf.mxu2 }
 0x323   :  { %5382 = vpow2.f32 %v5286_v15  ;;  %v1346_v22 = vrot.slane %v1298_v18, 4  ;;  %v1318_v38 = vpop.f32.mrf.mxu3 }
 0x324   :  { %5384 = vpow2.f32 %v5288_v16  ;;  %v1347_v43 = vrot.slane %v1318_v38, 4 }
 0x325   :  { %v1354_v37 = vadd.f32 %v1346_v22, %v1191_v24  ;;  %v1425_v24 = vld [vmem:[#allocation3] sm:$0xc0] }
 0x326   :  { %v1355_v50 = vadd.f32 %v1347_v43, %v1192_v46  ;;  %v1426_v46 = vld [vmem:[#allocation3 + $0x10] sm:$0xc0] }
 0x327   :  { %v5287_v25 = vmul.f32 -1.442695, %v1354_v37 }
 0x329   :  { %v5383_v27 = vpop.eup %5382  ;;  %5386 = vpow2.f32 %v5287_v25 }
 0x32a   :  { %v5385_v29 = vpop.eup %5384  ;;  %v1360_v30 = vadd.f32 1.0, %v5383_v27 }
 0x32b   :  { %v1399_v31 = vadd.f32 1.0, %v5385_v29 }
 0x32c   :  { %5388 = vrcp.f32 %v1360_v30  ;;  %v1372_v56 = vand.u32 2147483648, %v1360_v30  ;;  %vm1366_vm11 = vweird.f32 %v1360_v30  ;;  %v1370_v58 = vand.u32 2147483647, %v1360_v30 }
 0x32d   :  { %5390 = vrcp.f32 %v1399_v31  ;;  %v1411_v6 = vand.u32 2147483648, %v1399_v31  ;;  %vm1405_vm3 = vweird.f32 %v1399_v31  ;;  %v1409_v7 = vand.u32 2147483647, %v1399_v31 }
 0x32e   :  { %v1373_v21 = vor.u32 1.1754944e-38, %v1372_v56  ;;  %vm1371_vm15 = vcmp.eq.f32.partialorder %v1370_v58, 8.507059e+37 }
 0x32f   :  { %v5387_v34 = vpop.eup %5386  ;;  %v1412_v26 = vor.u32 1.1754944e-38, %v1411_v6  ;;  %vm1410_vm5 = vcmp.eq.f32.partialorder %v1409_v7, 8.507059e+37 }
 0x330   :  { %v1379_v36 = vadd.f32 1.0, %v5387_v34 }
 0x332   :  { %v5389_v39 = vpop.eup %5388  ;;  %5392 = vrcp.f32 %v1379_v36  ;;  %v1391_v61 = vand.u32 2147483648, %v1379_v36  ;;  %v1389_v11 = vand.u32 2147483647, %v1379_v36  ;;  %vm1385_vm14 = vweird.f32 %v1379_v36 }
 0x333   :  { %v1362_v41 = vmul.f32 %v5389_v39, %v1360_v30  ;;  %v5391_v45 = vpop.eup %5390  ;;  %vm1367_vm10 = vweird.f32 %v5389_v39  ;;  %5394 = vtanh.f32 %v1355_v50 }
 0x334   :  { %v1401_v53 = vmul.f32 %v5391_v45, %v1399_v31  ;;  %vm1368_vm12 = vmor %vm1366_vm11, %vm1367_vm10  ;;  %v1392_v35 = vor.u32 1.1754944e-38, %v1391_v61  ;;  %vm1390_vm1 = vcmp.eq.f32.partialorder %v1389_v11, 8.507059e+37  ;;  %vm1406_vm2 = vweird.f32 %v5391_v45 }
 0x335   :  { %v1363_v44 = vsub.f32 1.0, %v1362_v41  ;;  %vm1407_vm4 = vmor %vm1405_vm3, %vm1406_vm2 }
 0x336   :  { %v1402_v19 = vsub.f32 1.0, %v1401_v53 }
 0x337   :  { %v1364_v48 = vmul.f32 %v5389_v39, %v1363_v44 }
 0x338   :  { %v5393_v49 = vpop.eup %5392  ;;  %v1403_v13 = vmul.f32 %v5391_v45, %v1402_v19 }
 0x339   :  { %v1381_v51 = vmul.f32 %v5393_v49, %v1379_v36  ;;  %v1365_v52 = vadd.f32 %v5389_v39, %v1364_v48  ;;  %vm1386_vm13 = vweird.f32 %v5393_v49  ;;  %v5395_v32 = vpop.eup %5394 }
 0x33a   :  { %vm1387_vm0 = vmor %vm1385_vm14, %vm1386_vm13  ;;  %v1404_v55 = vadd.f32 %v5391_v45, %v1403_v13 }
 0x33b   :  { %v1382_v57 = vsub.f32 1.0, %v1381_v51  ;;  %v1369_v63 = vsel %vm1368_vm12, %v5389_v39, %v1365_v52 }
 0x33c   :  { %v1374_v17 = vsel %vm1371_vm15, %v1373_v21, %v1369_v63  ;;  %v1408_v54 = vsel %vm1407_vm4, %v5391_v45, %v1404_v55 }
 0x33d   :  { %v1383_v62 = vmul.f32 %v5393_v49, %v1382_v57  ;;  %v1419_v5 = vmul.f32 %v5395_v32, %v1374_v17  ;;  %v1413_v60 = vsel %vm1410_vm5, %v1412_v26, %v1408_v54 }
 0x33f   :  { %v1384_v23 = vadd.f32 %v5393_v49, %v1383_v62 }
 0x341   :  { %v1388_v28 = vsel %vm1387_vm0, %v5393_v49, %v1384_v23 }
 0x342   :  { %v1393_v40 = vsel %vm1390_vm1, %v1392_v35, %v1388_v28 }
 0x343   :  { %v1418_v14 = vmul.f32 %v1416_v3, %v1393_v40 }
 0x345   :  { %v6543_v59 = vadd.f32 %v1419_v5, %v1418_v14 }
 0x347   :  { %5396 = vtanh.f32 %v6543_v59  ;;  %v1650_v42 = vrot.slane %v6543_v59, 6 }
 0x34d   :  { %v5397_v20 = vpop.eup %5396 }
 0x34e   :  { %v1422_v47 = vmul.f32 %v5397_v20, %v1413_v60 }
 0x350   :  { %1423 = vst [vmem:[#allocation4] sm:$0x30] %v1422_v47  ;;  %v1493_v33 = vrot.slane %v1422_v47, 4 }
 0x352   :  { %1511 = vmatmul.f32.vlgmr.msrb.gmra.mxu1 %v1493_v33  ;;  %1531 = vmatmul.f32.vlgmr.msrb.gmra.mxu2 %v1493_v33 }
 0x353   :  { %1551 = vmatmul.f32.vlgmr.msrb.gmra.mxu3 %v1493_v33  ;;  %1571 = vmatmul.f32.vlgmr.msra.gmra.mxu0 %v1493_v33  ;;  %v1658_v33 = vld [vmem:[#allocation3 + $0x18] sm:$0x3] }
 0x3cf   :  { %v1512_v0 = vpop.f32.mrf.mxu1 }
 0x3d0   :  { %v1579_v1 = vrot.slane %v1512_v0, 2  ;;  %v1572_v2 = vpop.f32.mrf.mxu0 }
 0x3d1   :  { %v1582_v8 = vrot.slane %v1572_v2, 2  ;;  %v1661_v2 = vld [vmem:[#allocation3 + $0x30] sm:$0x3] }
 0x3d2   :  { %v1587_v9 = vadd.f32 %v1579_v1, %v1424_v4 }
 0x3d3   :  { %v1590_v12 = vadd.f32 %v1582_v8, %v1427_v10  ;;  %v6550_v10 = vld [vmem:[#allocation15 + $0x1e0] sm:$0xff] }
 0x3d4   :  { %v5289_v15 = vmul.f32 -1.442695, %v1587_v9  ;;  %1948 = vmatpush.msrb.mxu1 %v6550_v10 }
 0x3d5   :  { %v5291_v16 = vmul.f32 -1.442695, %v1590_v12  ;;  %v1532_v18 = vpop.f32.mrf.mxu2  ;;  %v6552_v12 = vld [vmem:[#allocation15 + $0x1e8] sm:$0xff] }
 0x3d6   :  { %5398 = vpow2.f32 %v5289_v15  ;;  %v1580_v22 = vrot.slane %v1532_v18, 2  ;;  %v1552_v38 = vpop.f32.mrf.mxu3  ;;  %v6554_v15 = vld [vmem:[#allocation15 + $0x1f0] sm:$0xff]  ;;  %1968 = vmatpush.msrb.mxu2 %v6552_v12  ;;  %v6558_v18 = vld [vmem:[#allocation15 + $0x1f8] sm:$0xff] }
 0x3d7   :  { %5400 = vpow2.f32 %v5291_v16  ;;  %v1581_v43 = vrot.slane %v1552_v38, 2  ;;  %1988 = vmatpush.msrb.mxu3 %v6554_v15  ;;  %2008 = vmatpush.msra.mxu0 %v6558_v18  ;;  %v6582_v38 = vld [vmem:[#allocation15 + $0x1b8] sm:$0xff] }
 0x3d8   :  { %v1588_v37 = vadd.f32 %v1580_v22, %v1425_v24  ;;  %v6562_v22 = vld [vmem:[#allocation15 + $0x1c0] sm:$0xff]  ;;  %v6564_v24 = vld [vmem:[#allocation15 + $0x1c8] sm:$0xff] }
 0x3d9   :  { %v1589_v50 = vadd.f32 %v1581_v43, %v1426_v46  ;;  %1949 = vmatpush.msrb.mxu1 %v6562_v22  ;;  %1969 = vmatpush.msrb.mxu2 %v6564_v24  ;;  %v6588_v43 = vld [vmem:[#allocation15 + $0x188] sm:$0xff]  ;;  %v6596_v46 = vld [vmem:[#allocation15 + $0x160] sm:$0xff] }
 0x3da   :  { %v5290_v25 = vmul.f32 -1.442695, %v1588_v37  ;;  %v6566_v37 = vld [vmem:[#allocation15 + $0x1d0] sm:$0xff] }
 0x3db   :  { %1989 = vmatpush.msrb.mxu3 %v6566_v37 }
 0x3dc   :  { %v5399_v27 = vpop.eup %5398  ;;  %5402 = vpow2.f32 %v5290_v25  ;;  %v1659_v25 = vld [vmem:[#allocation3 + $0x8] sm:$0x3] }
 0x3dd   :  { %v5401_v29 = vpop.eup %5400  ;;  %v1594_v30 = vadd.f32 1.0, %v5399_v27 }
 0x3de   :  { %v1633_v31 = vadd.f32 1.0, %v5401_v29  ;;  %v6570_v29 = vld [vmem:[#allocation15 + $0x1d8] sm:$0xff] }
 0x3df   :  { %5404 = vrcp.f32 %v1594_v30  ;;  %v1606_v56 = vand.u32 2147483648, %v1594_v30  ;;  %vm1600_vm7 = vweird.f32 %v1594_v30  ;;  %v1604_v58 = vand.u32 2147483647, %v1594_v30  ;;  %2009 = vmatpush.msra.mxu0 %v6570_v29 }
 0x3e0   :  { %5406 = vrcp.f32 %v1633_v31  ;;  %v1645_v6 = vand.u32 2147483648, %v1633_v31  ;;  %vm1639_vm15 = vweird.f32 %v1633_v31  ;;  %v1643_v7 = vand.u32 2147483647, %v1633_v31 }
 0x3e1   :  { %v1607_v21 = vor.u32 1.1754944e-38, %v1606_v56  ;;  %vm1605_vm11 = vcmp.eq.f32.partialorder %v1604_v58, 8.507059e+37  ;;  %2010 = vmatpush.msra.mxu0 %v6582_v38  ;;  %v6614_v58 = vld [vmem:[#allocation15 + $0x150] sm:$0xff] }
 0x3e2   :  { %v5403_v34 = vpop.eup %5402  ;;  %v1646_v26 = vor.u32 1.1754944e-38, %v1645_v6  ;;  %vm1644_vm1 = vcmp.eq.f32.partialorder %v1643_v7, 8.507059e+37  ;;  %v6664_v6 = vld [vmem:[#allocation15 + $0xc8] sm:$0xff] }
 0x3e3   :  { %v1613_v36 = vadd.f32 1.0, %v5403_v34  ;;  %v6576_v34 = vld [vmem:[#allocation15 + $0x1a8] sm:$0xff] }
 0x3e4   :  { %1970 = vmatpush.msrb.mxu2 %v6576_v34 }
 0x3e5   :  { %v5405_v39 = vpop.eup %5404  ;;  %5408 = vrcp.f32 %v1613_v36  ;;  %v1625_v61 = vand.u32 2147483648, %v1613_v36  ;;  %v1623_v11 = vand.u32 2147483647, %v1613_v36  ;;  %vm1619_vm10 = vweird.f32 %v1613_v36 }
 0x3e6   :  { %v1596_v41 = vmul.f32 %v5405_v39, %v1594_v30  ;;  %v5407_v45 = vpop.eup %5406  ;;  %vm1601_vm6 = vweird.f32 %v5405_v39  ;;  %5410 = vtanh.f32 %v1589_v50  ;;  %1971 = vmatpush.msrb.mxu2 %v6588_v43  ;;  %v6602_v50 = vld [vmem:[#allocation15 + $0x170] sm:$0xff] }
 0x3e7   :  { %v1635_v53 = vmul.f32 %v5407_v45, %v1633_v31  ;;  %vm1602_vm8 = vmor %vm1600_vm7, %vm1601_vm6  ;;  %v1626_v35 = vor.u32 1.1754944e-38, %v1625_v61  ;;  %vm1624_vm13 = vcmp.eq.f32.partialorder %v1623_v11, 8.507059e+37  ;;  %vm1640_vm14 = vweird.f32 %v5407_v45  ;;  %v6574_v31 = vld [vmem:[#allocation15 + $0x1a0] sm:$0xff]  ;;  %v6616_v61 = vld [vmem:[#allocation15 + $0x158] sm:$0xff] }
 0x3e8   :  { %v1597_v44 = vsub.f32 1.0, %v1596_v41  ;;  %vm1641_vm0 = vmor %vm1639_vm15, %vm1640_vm14  ;;  %1950 = vmatpush.msrb.mxu1 %v6574_v31  ;;  %v6586_v41 = vld [vmem:[#allocation15 + $0x180] sm:$0xff]  ;;  %v6627_v11 = vld [vmem:[#allocation15 + $0x130] sm:$0xff] }
 0x3e9   :  { %v1636_v19 = vsub.f32 1.0, %v1635_v53 }
 0x3ea   :  { %v1598_v48 = vmul.f32 %v5405_v39, %v1597_v44  ;;  %v6590_v44 = vld [vmem:[#allocation15 + $0x190] sm:$0xff]  ;;  %1951 = vmatpush.msrb.mxu1 %v6586_v41 }
 0x3eb   :  { %v5409_v49 = vpop.eup %5408  ;;  %v1637_v40 = vmul.f32 %v5407_v45, %v1636_v19  ;;  %v6629_v19 = vld [vmem:[#allocation15 + $0x138] sm:$0xff] }
 0x3ec   :  { %v1615_v51 = vmul.f32 %v5409_v49, %v1613_v36  ;;  %v1599_v52 = vadd.f32 %v5405_v39, %v1598_v48  ;;  %vm1620_vm9 = vweird.f32 %v5409_v49  ;;  %v5411_v28 = vpop.eup %5410  ;;  %v6578_v36 = vld [vmem:[#allocation15 + $0x1b0] sm:$0xff]  ;;  %v6598_v48 = vld [vmem:[#allocation15 + $0x168] sm:$0xff]  ;;  %1952 = vmatpush.msrb.mxu1 %v6596_v46 }
 0x3ed   :  { %vm1621_vm12 = vmor %vm1619_vm10, %vm1620_vm9  ;;  %v1638_v55 = vadd.f32 %v5407_v45, %v1637_v40  ;;  %1990 = vmatpush.msrb.mxu3 %v6578_v36  ;;  %1972 = vmatpush.msrb.mxu2 %v6598_v48 }
 0x3ee   :  { %v1616_v57 = vsub.f32 1.0, %v1615_v51  ;;  %v1603_v63 = vsel %vm1602_vm8, %v5405_v39, %v1599_v52  ;;  %v6604_v51 = vld [vmem:[#allocation15 + $0x178] sm:$0xff]  ;;  %v6606_v52 = vld [vmem:[#allocation15 + $0x140] sm:$0xff] }
 0x3ef   :  { %v1608_v17 = vsel %vm1605_vm11, %v1607_v21, %v1603_v63  ;;  %v1642_v54 = vsel %vm1641_vm0, %v5407_v45, %v1638_v55  ;;  %v6594_v45 = vld [vmem:[#allocation15 + $0x198] sm:$0xff]  ;;  %1991 = vmatpush.msrb.mxu3 %v6590_v44  ;;  %v6622_v63 = vld [vmem:[#allocation15 + $0x128] sm:$0xff]  ;;  %1953 = vmatpush.msrb.mxu1 %v6606_v52  ;;  %v6662_v55 = vld [vmem:[#allocation15 + $0xc0] sm:$0xff] }
 0x3f0   :  { %v1617_v62 = vmul.f32 %v5409_v49, %v1616_v57  ;;  %v1653_v14 = vmul.f32 %v5411_v28, %v1608_v17  ;;  %v1647_v20 = vsel %vm1644_vm1, %v1646_v26, %v1642_v54  ;;  %2011 = vmatpush.msra.mxu0 %v6594_v45  ;;  %v6612_v57 = vld [vmem:[#allocation15 + $0x148] sm:$0xff]  ;;  %v6641_v17 = vld [vmem:[#allocation15 + $0x110] sm:$0xff]  ;;  %v6647_v28 = vld [vmem:[#allocation15 + $0xe0] sm:$0xff] }
 0x3f1   :  { %1992 = vmatpush.msrb.mxu3 %v6602_v50  ;;  %1973 = vmatpush.msrb.mxu2 %v6612_v57  ;;  %v6671_v54 = vld [vmem:[#allocation15 + $0xd0] sm:$0xff]  ;;  %v6673_v26 = vld [vmem:[#allocation15 + $0xd8] sm:$0xff] }
 0x3f2   :  { %v1618_v23 = vadd.f32 %v5409_v49, %v1617_v62  ;;  %2012 = vmatpush.msra.mxu0 %v6604_v51  ;;  %v6620_v62 = vld [vmem:[#allocation15 + $0x120] sm:$0xff]  ;;  %8226 = vst [vmem:[#allocation35_spill] sm:$0xff] %v6671_v54 }
 0x3f3   :  { %1993 = vmatpush.msrb.mxu3 %v6614_v58  ;;  %1954 = vmatpush.msrb.mxu1 %v6620_v62  ;;  %8227 = vst [vmem:[#allocation36_spill] sm:$0xff] %v6673_v26 }
 0x3f4   :  { %v1622_v3 = vsel %vm1621_vm12, %v5409_v49, %v1618_v23  ;;  %2013 = vmatpush.msra.mxu0 %v6616_v61  ;;  %v6635_v23 = vld [vmem:[#allocation15 + $0x100] sm:$0xff]  ;;  %1974 = vmatpush.msrb.mxu2 %v6622_v63 }
 0x3f5   :  { %v1627_v32 = vsel %vm1624_vm13, %v1626_v35, %v1622_v3  ;;  %v6637_v35 = vld [vmem:[#allocation15 + $0x108] sm:$0xff]  ;;  %1994 = vmatpush.msrb.mxu3 %v6627_v11  ;;  %1955 = vmatpush.msrb.mxu1 %v6635_v23 }
 0x3f6   :  { %v1652_v13 = vmul.f32 %v1650_v42, %v1627_v32  ;;  %v6643_v42 = vld [vmem:[#allocation15 + $0x118] sm:$0xff]  ;;  %2014 = vmatpush.msra.mxu0 %v6629_v19  ;;  %v6649_v32 = vld [vmem:[#allocation15 + $0xe8] sm:$0xff]  ;;  %1975 = vmatpush.msrb.mxu2 %v6637_v35 }
 0x3f7   :  { %1995 = vmatpush.msrb.mxu3 %v6641_v17  ;;  %1956 = vmatpush.msrb.mxu1 %v6647_v28 }
 0x3f8   :  { %v6547_v5 = vadd.f32 %v1653_v14, %v1652_v13  ;;  %v6655_v13 = vld [vmem:[#allocation15 + $0xf0] sm:$0xff]  ;;  %v6657_v14 = vld [vmem:[#allocation15 + $0xf8] sm:$0xff]  ;;  %2015 = vmatpush.msra.mxu0 %v6643_v42  ;;  %1976 = vmatpush.msrb.mxu2 %v6649_v32 }
 0x3f9   :  { %1996 = vmatpush.msrb.mxu3 %v6655_v13  ;;  %1957 = vmatpush.msrb.mxu1 %v6662_v55 }
 0x3fa   :  { %5412 = vtanh.f32 %v6547_v5  ;;  %2016 = vmatpush.msra.mxu0 %v6657_v14  ;;  %1977 = vmatpush.msrb.mxu2 %v6664_v6 }
 0x3fb   :  { %1997 = vmatpush.msrb.mxu3 %v6671_v54 }
 0x3fc   :  { %2017 = vmatpush.msra.mxu0 %v6673_v26 }
 0x400   :  { %v5413_v59 = vpop.eup %5412 }
 0x401   :  { %v1656_v60 = vmul.f32 %v5413_v59, %v1647_v20  ;;  %v6679_v20 = vld [vmem:[#allocation15 + $0xa0] sm:$0xff] }
 0x402   :  { %8228 = vst [vmem:[#allocation37_spill] sm:$0xff] %v6679_v20  ;;  %1958 = vmatpush.msrb.mxu1 %v6679_v20  ;;  %v6743_v20 = vld [vmem:[#allocation15 + $0x28] sm:$0xff] }
 0x403   :  { %1657 = vst [vmem:[#allocation4] sm:$0xc0] %v1656_v60  ;;  %v1727_v47 = vrot.slane %v1656_v60, 6  ;;  %v6681_v60 = vld [vmem:[#allocation15 + $0xa8] sm:$0xff] }
 0x404   :  { %8229 = vst [vmem:[#allocation38_spill] sm:$0xff] %v6681_v60  ;;  %1978 = vmatpush.msrb.mxu2 %v6681_v60  ;;  %v6741_v60 = vld [vmem:[#allocation15 + $0x20] sm:$0xff] }
 0x405   :  { %1745 = vmatmul.f32.vlgmr.msra.gmra.mxu1 %v1727_v47  ;;  %1765 = vmatmul.f32.vlgmr.msra.gmra.mxu2 %v1727_v47 }
 0x406   :  { %1785 = vmatmul.f32.vlgmr.msra.gmra.mxu3 %v1727_v47  ;;  %1805 = vmatmul.f32.vlgmr.msrb.gmra.mxu0 %v1727_v47  ;;  %v6685_v47 = vld [vmem:[#allocation15 + $0xb0] sm:$0xff] }
 0x407   :  { %8230 = vst [vmem:[#allocation39_spill] sm:$0xff] %v6685_v47  ;;  %1998 = vmatpush.msrb.mxu3 %v6685_v47  ;;  %v6735_v47 = vld [vmem:[#allocation15 + $0x58] sm:$0xff] }
 0x482   :  { %v1746_v0 = vpop.f32.mrf.mxu1 }
 0x483   :  { %v1809_v1 = vadd.f32 %v1746_v0, %v1658_v33  ;;  %v1806_v4 = vpop.f32.mrf.mxu0  ;;  %v6687_v33 = vld [vmem:[#allocation15 + $0xb8] sm:$0xff] }
 0x484   :  { %v1812_v8 = vadd.f32 %v1806_v4, %v1661_v2  ;;  %8231 = vst [vmem:[#allocation40_spill] sm:$0xff] %v6687_v33  ;;  %v6691_v2 = vld [vmem:[#allocation15 + $0x80] sm:$0xff]  ;;  %v6693_v4 = vld [vmem:[#allocation15 + $0x88] sm:$0xff]  ;;  %2018 = vmatpush.msra.mxu0 %v6687_v33 }
 0x485   :  { %v5292_v9 = vmul.f32 -1.442695, %v1809_v1  ;;  %8232 = vst [vmem:[#allocation41_spill] sm:$0xff] %v6691_v2  ;;  %1959 = vmatpush.msrb.mxu1 %v6691_v2  ;;  %1979 = vmatpush.msrb.mxu2 %v6693_v4 }
 0x486   :  { %v5294_v16 = vmul.f32 -1.442695, %v1812_v8  ;;  %8233 = vst [vmem:[#allocation42_spill] sm:$0xff] %v6693_v4  ;;  %v6697_v8 = vld [vmem:[#allocation15 + $0x90] sm:$0xff] }
 0x487   :  { %5414 = vpow2.f32 %v5292_v9  ;;  %8234 = vst [vmem:[#allocation43_spill] sm:$0xff] %v6697_v8  ;;  %v6699_v9 = vld [vmem:[#allocation15 + $0x98] sm:$0xff]  ;;  %1999 = vmatpush.msrb.mxu3 %v6697_v8 }
 0x488   :  { %5416 = vpow2.f32 %v5294_v16  ;;  %v1766_v27 = vpop.f32.mrf.mxu2  ;;  %8235 = vst [vmem:[#allocation44_spill] sm:$0xff] %v6699_v9  ;;  %2019 = vmatpush.msra.mxu0 %v6699_v9 }
 0x489   :  { %v1810_v30 = vadd.f32 %v1766_v27, %v1659_v25  ;;  %v1786_v1 = vpop.f32.mrf.mxu3  ;;  %v1660_v25 = vld [vmem:[#allocation3 + $0x38] sm:$0x3] }
 0x48b   :  { %v5293_v39 = vmul.f32 -1.442695, %v1810_v30  ;;  %v6706_v30 = vld [vmem:[#allocation15 + $0x60] sm:$0xff] }
 0x48c   :  { %8236 = vst [vmem:[#allocation45_spill] sm:$0xff] %v6706_v30  ;;  %1960 = vmatpush.msrb.mxu1 %v6706_v30 }
 0x48d   :  { %v5415_v49 = vpop.eup %5414  ;;  %5418 = vpow2.f32 %v5293_v39  ;;  %v6708_v39 = vld [vmem:[#allocation15 + $0x68] sm:$0xff] }
 0x48e   :  { %v5417_v53 = vpop.eup %5416  ;;  %v6608_v56 = vadd.f32 1.0, %v5415_v49  ;;  %8237 = vst [vmem:[#allocation46_spill] sm:$0xff] %v6708_v39  ;;  %1980 = vmatpush.msrb.mxu2 %v6708_v39  ;;  %v6774_v39 = vld [vmem:[#allocation15 + $0x18] sm:$0xff] }
 0x48f   :  { %v6631_v21 = vadd.f32 1.0, %v5417_v53  ;;  %v1811_v53 = vadd.f32 %v1786_v1, %v1660_v25  ;;  %v6724_v1 = vld [vmem:[#allocation15 + $0x40] sm:$0xff]  ;;  %v6726_v25 = vld [vmem:[#allocation15 + $0x48] sm:$0xff] }
 0x490   :  { %5420 = vrcp.f32 %v6608_v56  ;;  %8240 = vst [vmem:[#allocation49_spill] sm:$0xff] %v6724_v1  ;;  %v1828_v2 = vand.u32 2147483648, %v6608_v56  ;;  %vm1822_vm3 = vweird.f32 %v6608_v56  ;;  %v1826_v9 = vand.u32 2147483647, %v6608_v56  ;;  %1961 = vmatpush.msrb.mxu1 %v6724_v1  ;;  %1981 = vmatpush.msrb.mxu2 %v6726_v25 }
 0x491   :  { %5422 = vrcp.f32 %v6631_v21  ;;  %8241 = vst [vmem:[#allocation31_spill] sm:$0xff] %v6726_v25  ;;  %v6768_v25 = vld [vmem:[#allocation15 + $0x8] sm:$0xff]  ;;  %vm1861_vm11 = vweird.f32 %v6631_v21 }
 0x492   :  { %v1829_v54 = vor.u32 1.1754944e-38, %v1828_v2  ;;  %1962 = vmatpush.msrb.mxu1 %v6741_v60  ;;  %1982 = vmatpush.msrb.mxu2 %v6743_v20  ;;  %vm1827_vm7 = vcmp.eq.f32.partialorder %v1826_v9, 8.507059e+37 }
 0x493   :  { %v5419_v3 = vpop.eup %5418 }
 0x494   :  { %v6651_v40 = vadd.f32 1.0, %v5419_v3  ;;  %v6714_v3 = vld [vmem:[#allocation15 + $0x70] sm:$0xff]  ;;  %1983 = vmatpush.msrb.mxu2 %v6768_v25 }
 0x495   :  { %8238 = vst [vmem:[#allocation47_spill] sm:$0xff] %v6714_v3  ;;  %2000 = vmatpush.msrb.mxu3 %v6714_v3 }
 0x496   :  { %v6666_v7 = vpop.eup %5420  ;;  %5424 = vrcp.f32 %v6651_v40  ;;  %v1847_v30 = vand.u32 2147483648, %v6651_v40  ;;  %v1845_v26 = vand.u32 2147483647, %v6651_v40  ;;  %vm1841_vm6 = vweird.f32 %v6651_v40  ;;  %2202 = vmatpush.msra.mxu2 %v6552_v12 }
 0x497   :  { %v1818_v59 = vmul.f32 %v6666_v7, %v6608_v56  ;;  %v6701_v16 = vpop.eup %5422  ;;  %vm1823_vm2 = vweird.f32 %v6666_v7  ;;  %5426 = vtanh.f32 %v1811_v53  ;;  %v6754_v56 = vld [vmem:[#allocation15 + $0x30] sm:$0xff]  ;;  %v6766_v53 = vld [vmem:[#allocation15] sm:$0xff] }
 0x498   :  { %v1857_v4 = vmul.f32 %v6701_v16, %v6631_v21  ;;  %vm6748_vm4 = vmor %vm1822_vm3, %vm1823_vm2  ;;  %1963 = vmatpush.msrb.mxu1 %v6766_v53  ;;  %vm1846_vm9 = vcmp.eq.f32.partialorder %v1845_v26, 8.507059e+37  ;;  %2203 = vmatpush.msra.mxu2 %v6564_v24  ;;  %vm1862_vm10 = vweird.f32 %v6701_v16 }
 0x499   :  { %v1819_v0 = vsub.f32 1.0, %v1818_v59  ;;  %v6716_v59 = vld [vmem:[#allocation15 + $0x78] sm:$0xff]  ;;  %vm1863_vm12 = vmor %vm1861_vm11, %vm1862_vm10 }
 0x49a   :  { %8239 = vst [vmem:[#allocation48_spill] sm:$0xff] %v6716_v59  ;;  %2020 = vmatpush.msra.mxu0 %v6716_v59  ;;  %v1858_v1 = vsub.f32 1.0, %v1857_v4  ;;  %2182 = vmatpush.msra.mxu1 %v6550_v10 }
 0x49b   :  { %v1820_v27 = vmul.f32 %v6666_v7, %v1819_v0  ;;  %2204 = vmatpush.msra.mxu2 %v6576_v34 }
 0x49c   :  { %v6710_v49 = vpop.eup %5424  ;;  %2021 = vmatpush.msra.mxu0 %v6735_v47  ;;  %2183 = vmatpush.msra.mxu1 %v6562_v22 }
 0x49d   :  { %v1837_v0 = vmul.f32 %v6710_v49, %v6651_v40  ;;  %v1821_v33 = vadd.f32 %v6666_v7, %v1820_v27  ;;  %v6733_v27 = vld [vmem:[#allocation15 + $0x50] sm:$0xff]  ;;  %vm1842_vm5 = vweird.f32 %v6710_v49  ;;  %v1872_v40 = vrot.slane %v6547_v5, 6  ;;  %v5427_v9 = vpop.eup %5426  ;;  %2205 = vmatpush.msra.mxu2 %v6588_v43 }
 0x49e   :  { %2001 = vmatpush.msrb.mxu3 %v6733_v27  ;;  %vm1843_vm8 = vmor %vm1841_vm6, %vm1842_vm5  ;;  %2184 = vmatpush.msra.mxu1 %v6574_v31 }
 0x49f   :  { %v1838_v8 = vsub.f32 1.0, %v1837_v0  ;;  %v6756_v0 = vld [vmem:[#allocation15 + $0x38] sm:$0xff]  ;;  %v1825_v3 = vsel %vm6748_vm4, %v6666_v7, %v1821_v33  ;;  %v1848_v33 = vor.u32 1.1754944e-38, %v1847_v30  ;;  %2206 = vmatpush.msra.mxu2 %v6598_v48 }
 0x4a0   :  { %8244 = vst [vmem:[#allocation32_spill] sm:$0xff] %v6756_v0  ;;  %2002 = vmatpush.msrb.mxu3 %v6754_v56  ;;  %2022 = vmatpush.msra.mxu0 %v6756_v0  ;;  %v1830_v2 = vsel %vm1827_vm7, %v1829_v54, %v1825_v3  ;;  %v1865_v3 = vand.u32 2147483647, %v6631_v21 }
 0x4a1   :  { %v1839_v59 = vmul.f32 %v6710_v49, %v1838_v8  ;;  %v6772_v8 = vld [vmem:[#allocation15 + $0x10] sm:$0xff]  ;;  %v1875_v30 = vmul.f32 %v5427_v9, %v1830_v2  ;;  %2185 = vmatpush.msra.mxu1 %v6586_v41  ;;  %2207 = vmatpush.msra.mxu2 %v6612_v57  ;;  %v8250_v9 = vld [vmem:[#allocation39_spill] sm:$0xff] }
 0x4a2   :  { %2003 = vmatpush.msrb.mxu3 %v6772_v8  ;;  %2023 = vmatpush.msra.mxu0 %v6774_v39  ;;  %vm1866_vm13 = vcmp.eq.f32.partialorder %v1865_v3, 8.507059e+37  ;;  %v8247_v2 = vld [vmem:[#allocation36_spill] sm:$0xff]  ;;  %v8256_v3 = vld [vmem:[#allocation45_spill] sm:$0xff] }
 0x4a3   :  { %v1840_v7 = vadd.f32 %v6710_v49, %v1839_v59  ;;  %v1859_v59 = vmul.f32 %v6701_v16, %v1858_v1  ;;  %2186 = vmatpush.msra.mxu1 %v6596_v46  ;;  %2208 = vmatpush.msra.mxu2 %v6622_v63 }
 0x4a4   :  { %2222 = vmatpush.msra.mxu3 %v6554_v15  ;;  %2242 = vmatpush.msrb.mxu0 %v6558_v18 }
 0x4a5   :  { %v1844_v4 = vsel %vm1843_vm8, %v6710_v49, %v1840_v7  ;;  %v1860_v26 = vadd.f32 %v6701_v16, %v1859_v59  ;;  %v1867_v49 = vand.u32 2147483648, %v6631_v21  ;;  %2187 = vmatpush.msra.mxu1 %v6606_v52  ;;  %2209 = vmatpush.msra.mxu2 %v6637_v35  ;;  %v8251_v59 = vld [vmem:[#allocation40_spill] sm:$0xff] }
 0x4a6   :  { %v1849_v0 = vsel %vm1846_vm9, %v1848_v33, %v1844_v4  ;;  %2223 = vmatpush.msra.mxu3 %v6566_v37  ;;  %2243 = vmatpush.msrb.mxu0 %v6570_v29  ;;  %v8246_v33 = vld [vmem:[#allocation35_spill] sm:$0xff]  ;;  %v8248_v4 = vld [vmem:[#allocation37_spill] sm:$0xff] }
 0x4a7   :  { %v1874_v54 = vmul.f32 %v1872_v40, %v1849_v0  ;;  %v1864_v1 = vsel %vm1863_vm12, %v6701_v16, %v1860_v26  ;;  %v1868_v0 = vor.u32 1.1754944e-38, %v1867_v49  ;;  %2188 = vmatpush.msra.mxu1 %v6620_v62  ;;  %2210 = vmatpush.msra.mxu2 %v6649_v32  ;;  %v8249_v40 = vld [vmem:[#allocation38_spill] sm:$0xff]  ;;  %v8254_v26 = vld [vmem:[#allocation43_spill] sm:$0xff]  ;;  %v8255_v49 = vld [vmem:[#allocation44_spill] sm:$0xff] }
 0x4a8   :  { %2224 = vmatpush.msra.mxu3 %v6578_v36  ;;  %2244 = vmatpush.msrb.mxu0 %v6582_v38 }
 0x4a9   :  { %v6795_v5 = vadd.f32 %v1875_v30, %v1874_v54  ;;  %v1869_v7 = vsel %vm1866_vm13, %v1868_v0, %v1864_v1  ;;  %2189 = vmatpush.msra.mxu1 %v6635_v23  ;;  %2211 = vmatpush.msra.mxu2 %v6664_v6  ;;  %v8252_v54 = vld [vmem:[#allocation41_spill] sm:$0xff]  ;;  %v8253_v30 = vld [vmem:[#allocation42_spill] sm:$0xff]  ;;  %v8258_v0 = vld [vmem:[#allocation47_spill] sm:$0xff] }
 0x4aa   :  { %2225 = vmatpush.msra.mxu3 %v6590_v44  ;;  %2245 = vmatpush.msrb.mxu0 %v6594_v45  ;;  %v8257_v1 = vld [vmem:[#allocation46_spill] sm:$0xff] }
 0x4ab   :  { %8245 = vst [vmem:[#allocation33_spill] sm:$0xff] %v6795_v5  ;;  %5428 = vtanh.f32 %v6795_v5  ;;  %2190 = vmatpush.msra.mxu1 %v6647_v28  ;;  %2212 = vmatpush.msra.mxu2 %v8249_v40  ;;  %v8262_v5 = vld [vmem:[#allocation32_spill] sm:$0xff] }
 0x4ac   :  { %2226 = vmatpush.msra.mxu3 %v6602_v50  ;;  %2246 = vmatpush.msrb.mxu0 %v6604_v51 }
 0x4ad   :  { %2191 = vmatpush.msra.mxu1 %v6662_v55  ;;  %2213 = vmatpush.msra.mxu2 %v8253_v30 }
 0x4ae   :  { %2227 = vmatpush.msra.mxu3 %v6614_v58  ;;  %2247 = vmatpush.msrb.mxu0 %v6616_v61 }
 0x4af   :  { %2192 = vmatpush.msra.mxu1 %v8248_v4  ;;  %2214 = vmatpush.msra.mxu2 %v8257_v1 }
 0x4b0   :  { %2228 = vmatpush.msra.mxu3 %v6627_v11  ;;  %2248 = vmatpush.msrb.mxu0 %v6629_v19 }
 0x4b1   :  { %v5429_v21 = vpop.eup %5428  ;;  %2193 = vmatpush.msra.mxu1 %v8252_v54 }
 0x4b2   :  { %v1878_v16 = vmul.f32 %v5429_v21, %v1869_v7  ;;  %2229 = vmatpush.msra.mxu3 %v6641_v17  ;;  %2249 = vmatpush.msrb.mxu0 %v6643_v42  ;;  %v8259_v21 = vld [vmem:[#allocation48_spill] sm:$0xff]  ;;  %v8260_v7 = vld [vmem:[#allocation49_spill] sm:$0xff] }
 0x4b3   :  { %2194 = vmatpush.msra.mxu1 %v8256_v3 }
 0x4b4   :  { %1879 = vst [vmem:[#allocation4 + $0x8] sm:$0x3] %v1878_v16  ;;  %1964 = vmatmul.f32.vlgmr.msrb.gmra.mxu1 %v1878_v16  ;;  %1984 = vmatmul.f32.vlgmr.msrb.gmra.mxu2 %v1878_v16 }
 0x4b5   :  { %2004 = vmatmul.f32.vlgmr.msrb.gmra.mxu3 %v1878_v16  ;;  %2024 = vmatmul.f32.vlgmr.msra.gmra.mxu0 %v1878_v16  ;;  %v8261_v16 = vld [vmem:[#allocation31_spill] sm:$0xff] }
 0x4b6   :  { %2230 = vmatpush.msra.mxu3 %v6655_v13  ;;  %2250 = vmatpush.msrb.mxu0 %v6657_v14 }
 0x4b7   :  { %2195 = vmatpush.msra.mxu1 %v8260_v7  ;;  %2215 = vmatpush.msra.mxu2 %v8261_v16 }
 0x4b8   :  { %2231 = vmatpush.msra.mxu3 %v8246_v33  ;;  %2251 = vmatpush.msrb.mxu0 %v8247_v2 }
 0x4b9   :  { %2196 = vmatpush.msra.mxu1 %v6741_v60  ;;  %2216 = vmatpush.msra.mxu2 %v6743_v20 }
 0x4ba   :  { %2232 = vmatpush.msra.mxu3 %v8250_v9  ;;  %2252 = vmatpush.msrb.mxu0 %v8251_v59 }
 0x4bb   :  { %2197 = vmatpush.msra.mxu1 %v6766_v53  ;;  %2217 = vmatpush.msra.mxu2 %v6768_v25 }
 0x4bc   :  { %2233 = vmatpush.msra.mxu3 %v8254_v26  ;;  %2253 = vmatpush.msrb.mxu0 %v8255_v49 }
 0x4bd   :  { %2416 = vmatpush.msrb.mxu1 %v6550_v10  ;;  %2436 = vmatpush.msrb.mxu2 %v6552_v12 }
 0x4be   :  { %2234 = vmatpush.msra.mxu3 %v8258_v0  ;;  %2254 = vmatpush.msrb.mxu0 %v8259_v21 }
 0x4bf   :  { %2417 = vmatpush.msrb.mxu1 %v6562_v22  ;;  %2437 = vmatpush.msrb.mxu2 %v6564_v24 }
 0x4c0   :  { %2235 = vmatpush.msra.mxu3 %v6733_v27  ;;  %2255 = vmatpush.msrb.mxu0 %v6735_v47 }
 0x4c1   :  { %2418 = vmatpush.msrb.mxu1 %v6574_v31  ;;  %2438 = vmatpush.msrb.mxu2 %v6576_v34 }
 0x4c2   :  { %2236 = vmatpush.msra.mxu3 %v6754_v56  ;;  %2256 = vmatpush.msrb.mxu0 %v8262_v5 }
 0x4c3   :  { %2419 = vmatpush.msrb.mxu1 %v6586_v41  ;;  %2439 = vmatpush.msrb.mxu2 %v6588_v43  ;;  %v1881_v41 = vld [vmem:[#allocation3 + $0x8] sm:$0xc] }
 0x4c4   :  { %2237 = vmatpush.msra.mxu3 %v6772_v8  ;;  %2257 = vmatpush.msrb.mxu0 %v6774_v39 }
 0x4c5   :  { %2420 = vmatpush.msrb.mxu1 %v6596_v46  ;;  %2440 = vmatpush.msrb.mxu2 %v6598_v48 }
 0x4c6   :  { %2456 = vmatpush.msrb.mxu3 %v6554_v15  ;;  %2476 = vmatpush.msra.mxu0 %v6558_v18  ;;  %v1880_v18 = vld [vmem:[#allocation3 + $0x18] sm:$0xc] }
 0x4c7   :  { %2421 = vmatpush.msrb.mxu1 %v6606_v52  ;;  %2441 = vmatpush.msrb.mxu2 %v6612_v57 }
 0x4c8   :  { %2457 = vmatpush.msrb.mxu3 %v6566_v37  ;;  %2477 = vmatpush.msra.mxu0 %v6570_v29  ;;  %v1883_v37 = vld [vmem:[#allocation3 + $0x30] sm:$0xc] }
 0x4c9   :  { %2422 = vmatpush.msrb.mxu1 %v6620_v62  ;;  %2442 = vmatpush.msrb.mxu2 %v6622_v63 }
 0x4ca   :  { %2458 = vmatpush.msrb.mxu3 %v6578_v36  ;;  %2478 = vmatpush.msra.mxu0 %v6582_v38 }
 0x4cb   :  { %2423 = vmatpush.msrb.mxu1 %v6635_v23  ;;  %2443 = vmatpush.msrb.mxu2 %v6637_v35 }
 0x4cc   :  { %2459 = vmatpush.msrb.mxu3 %v6590_v44  ;;  %2479 = vmatpush.msra.mxu0 %v6594_v45 }
 0x4cd   :  { %2424 = vmatpush.msrb.mxu1 %v6647_v28  ;;  %2444 = vmatpush.msrb.mxu2 %v6649_v32 }
 0x4ce   :  { %2460 = vmatpush.msrb.mxu3 %v6602_v50  ;;  %2480 = vmatpush.msra.mxu0 %v6604_v51 }
 0x4cf   :  { %2425 = vmatpush.msrb.mxu1 %v6662_v55  ;;  %2445 = vmatpush.msrb.mxu2 %v6664_v6 }
 0x4d0   :  { %2461 = vmatpush.msrb.mxu3 %v6614_v58  ;;  %2481 = vmatpush.msra.mxu0 %v6616_v61 }
 0x4d1   :  { %2426 = vmatpush.msrb.mxu1 %v8248_v4  ;;  %2446 = vmatpush.msrb.mxu2 %v8249_v40 }
 0x4d2   :  { %2462 = vmatpush.msrb.mxu3 %v6627_v11  ;;  %2482 = vmatpush.msra.mxu0 %v6629_v19  ;;  %v1882_v19 = vld [vmem:[#allocation3 + $0x38] sm:$0xc] }
 0x4d3   :  { %2427 = vmatpush.msrb.mxu1 %v8252_v54  ;;  %2447 = vmatpush.msrb.mxu2 %v8253_v30 }
 0x4d4   :  { %2463 = vmatpush.msrb.mxu3 %v6641_v17  ;;  %2483 = vmatpush.msra.mxu0 %v6643_v42 }
 0x4d5   :  { %2428 = vmatpush.msrb.mxu1 %v8256_v3  ;;  %2448 = vmatpush.msrb.mxu2 %v8257_v1 }
 0x4d6   :  { %2464 = vmatpush.msrb.mxu3 %v6655_v13  ;;  %2484 = vmatpush.msra.mxu0 %v6657_v14 }
 0x4d7   :  { %2429 = vmatpush.msrb.mxu1 %v8260_v7  ;;  %2449 = vmatpush.msrb.mxu2 %v8261_v16 }
 0x4d8   :  { %2465 = vmatpush.msrb.mxu3 %v8246_v33  ;;  %2485 = vmatpush.msra.mxu0 %v8247_v2 }
 0x4d9   :  { %2430 = vmatpush.msrb.mxu1 %v6741_v60  ;;  %2450 = vmatpush.msrb.mxu2 %v6743_v20 }
 0x4da   :  { %2466 = vmatpush.msrb.mxu3 %v8250_v9  ;;  %2486 = vmatpush.msra.mxu0 %v8251_v59 }
 0x4db   :  { %2431 = vmatpush.msrb.mxu1 %v6766_v53  ;;  %2451 = vmatpush.msrb.mxu2 %v6768_v25 }
 0x4dc   :  { %2467 = vmatpush.msrb.mxu3 %v8254_v26  ;;  %2487 = vmatpush.msra.mxu0 %v8255_v49 }
 0x4de   :  { %2468 = vmatpush.msrb.mxu3 %v8258_v0  ;;  %2488 = vmatpush.msra.mxu0 %v8259_v21 }
 0x4e0   :  { %2469 = vmatpush.msrb.mxu3 %v6733_v27  ;;  %2489 = vmatpush.msra.mxu0 %v6735_v47 }
 0x4e2   :  { %2470 = vmatpush.msrb.mxu3 %v6754_v56  ;;  %2490 = vmatpush.msra.mxu0 %v8262_v5 }
 0x4e4   :  { %2471 = vmatpush.msrb.mxu3 %v6772_v8  ;;  %2491 = vmatpush.msra.mxu0 %v6774_v39  ;;  %v8263_v39 = vld [vmem:[#allocation33_spill] sm:$0xff] }
 0x4e5   :  { %v2103_v5 = vrot.slane %v8263_v39, 6 }
 0x531   :  { %v1965_v10 = vpop.f32.mrf.mxu1 }
 0x532   :  { %v2032_v12 = vrot.slane %v1965_v10, 6  ;;  %v2025_v15 = vpop.f32.mrf.mxu0 }
 0x533   :  { %v2035_v22 = vrot.slane %v2025_v15, 6 }
 0x534   :  { %v2040_v24 = vadd.f32 %v2032_v12, %v1880_v18  ;;  %v2111_v18 = vld [vmem:[#allocation3 + $0x18] sm:$0x30] }
 0x535   :  { %v2043_v29 = vadd.f32 %v2035_v22, %v1883_v37  ;;  %v2114_v37 = vld [vmem:[#allocation3 + $0x30] sm:$0x30] }
 0x536   :  { %v5295_v31 = vmul.f32 -1.442695, %v2040_v24 }
 0x537   :  { %v5297_v34 = vmul.f32 -1.442695, %v2043_v29  ;;  %v1985_v36 = vpop.f32.mrf.mxu2 }
 0x538   :  { %5430 = vpow2.f32 %v5295_v31  ;;  %v2033_v38 = vrot.slane %v1985_v36, 6  ;;  %v2005_v57 = vpop.f32.mrf.mxu3 }
 0x539   :  { %5432 = vpow2.f32 %v5297_v34  ;;  %v2034_v62 = vrot.slane %v2005_v57, 6 }
 0x53a   :  { %v2041_v43 = vadd.f32 %v2033_v38, %v1881_v41  ;;  %v2112_v41 = vld [vmem:[#allocation3 + $0x8] sm:$0x30] }
 0x53b   :  { %v2042_v17 = vadd.f32 %v2034_v62, %v1882_v19  ;;  %v2113_v19 = vld [vmem:[#allocation3 + $0x38] sm:$0x30] }
 0x53c   :  { %v5296_v44 = vmul.f32 -1.442695, %v2041_v43 }
 0x53e   :  { %v5431_v45 = vpop.eup %5430  ;;  %5434 = vpow2.f32 %v5296_v44 }
 0x53f   :  { %v5433_v46 = vpop.eup %5432  ;;  %v2047_v48 = vadd.f32 1.0, %v5431_v45 }
 0x540   :  { %v2086_v50 = vadd.f32 1.0, %v5433_v46 }
 0x541   :  { %5436 = vrcp.f32 %v2047_v48  ;;  %v2059_v13 = vand.u32 2147483648, %v2047_v48  ;;  %vm2053_vm15 = vweird.f32 %v2047_v48  ;;  %v2057_v55 = vand.u32 2147483647, %v2047_v48 }
 0x542   :  { %5438 = vrcp.f32 %v2086_v50  ;;  %v2098_v26 = vand.u32 2147483648, %v2086_v50  ;;  %vm2092_vm7 = vweird.f32 %v2086_v50  ;;  %v2096_v49 = vand.u32 2147483647, %v2086_v50 }
 0x543   :  { %v2060_v27 = vor.u32 1.1754944e-38, %v2059_v13  ;;  %vm2058_vm3 = vcmp.eq.f32.partialorder %v2057_v55, 8.507059e+37 }
 0x544   :  { %v5435_v51 = vpop.eup %5434  ;;  %v2099_v1 = vor.u32 1.1754944e-38, %v2098_v26  ;;  %vm2097_vm9 = vcmp.eq.f32.partialorder %v2096_v49, 8.507059e+37 }
 0x545   :  { %v2066_v52 = vadd.f32 1.0, %v5435_v51 }
 0x547   :  { %v5437_v58 = vpop.eup %5436  ;;  %5440 = vrcp.f32 %v2066_v52  ;;  %v2078_v6 = vand.u32 2147483648, %v2066_v52  ;;  %v2076_v47 = vand.u32 2147483647, %v2066_v52  ;;  %vm2072_vm2 = vweird.f32 %v2066_v52 }
 0x548   :  { %v2049_v61 = vmul.f32 %v5437_v58, %v2047_v48  ;;  %v5439_v11 = vpop.eup %5438  ;;  %vm2054_vm14 = vweird.f32 %v5437_v58  ;;  %5442 = vtanh.f32 %v2042_v17 }
 0x549   :  { %v2088_v32 = vmul.f32 %v5439_v11, %v2086_v50  ;;  %vm2055_vm0 = vmor %vm2053_vm15, %vm2054_vm14  ;;  %v2079_v53 = vor.u32 1.1754944e-38, %v2078_v6  ;;  %vm2077_vm5 = vcmp.eq.f32.partialorder %v2076_v47, 8.507059e+37  ;;  %vm2093_vm6 = vweird.f32 %v5439_v11 }
 0x54a   :  { %v2050_v63 = vsub.f32 1.0, %v2049_v61  ;;  %vm2094_vm8 = vmor %vm2092_vm7, %vm2093_vm6 }
 0x54b   :  { %v2089_v25 = vsub.f32 1.0, %v2088_v32 }
 0x54c   :  { %v2051_v23 = vmul.f32 %v5437_v58, %v2050_v63 }
 0x54d   :  { %v5441_v35 = vpop.eup %5440  ;;  %v2090_v40 = vmul.f32 %v5439_v11, %v2089_v25 }
 0x54e   :  { %v2068_v42 = vmul.f32 %v5441_v35, %v2066_v52  ;;  %v2052_v28 = vadd.f32 %v5437_v58, %v2051_v23  ;;  %vm2073_vm1 = vweird.f32 %v5441_v35  ;;  %v5443_v2 = vpop.eup %5442 }
 0x54f   :  { %vm2074_vm4 = vmor %vm2072_vm2, %vm2073_vm1  ;;  %v2091_v30 = vadd.f32 %v5439_v11, %v2090_v40 }
 0x550   :  { %v2069_v14 = vsub.f32 1.0, %v2068_v42  ;;  %v2056_v60 = vsel %vm2055_vm0, %v5437_v58, %v2052_v28 }
 0x551   :  { %v2061_v8 = vsel %vm2058_vm3, %v2060_v27, %v2056_v60  ;;  %v2095_v3 = vsel %vm2094_vm8, %v5439_v11, %v2091_v30 }
 0x552   :  { %v2070_v20 = vmul.f32 %v5441_v35, %v2069_v14  ;;  %v2106_v59 = vmul.f32 %v5443_v2, %v2061_v8  ;;  %v2100_v21 = vsel %vm2097_vm9, %v2099_v1, %v2095_v3 }
 0x554   :  { %v2071_v56 = vadd.f32 %v5441_v35, %v2070_v20 }
 0x556   :  { %v2075_v33 = vsel %vm2074_vm4, %v5441_v35, %v2071_v56 }
 0x557   :  { %v2080_v4 = vsel %vm2077_vm5, %v2079_v53, %v2075_v33 }
 0x558   :  { %v2105_v9 = vmul.f32 %v2103_v5, %v2080_v4 }
 0x55a   :  { %v6927_v54 = vadd.f32 %v2106_v59, %v2105_v9 }
 0x55c   :  { %5444 = vtanh.f32 %v6927_v54  ;;  %v2337_v39 = vrot.slane %v6927_v54, 6 }
 0x562   :  { %v5445_v0 = vpop.eup %5444 }
 0x563   :  { %v2109_v7 = vmul.f32 %v5445_v0, %v2100_v21 }
 0x565   :  { %2110 = vst [vmem:[#allocation4 + $0x8] sm:$0xc] %v2109_v7  ;;  %v2180_v16 = vrot.slane %v2109_v7, 2 }
 0x567   :  { %2198 = vmatmul.f32.vlgmr.msra.gmra.mxu1 %v2180_v16  ;;  %2218 = vmatmul.f32.vlgmr.msra.gmra.mxu2 %v2180_v16 }
 0x568   :  { %2238 = vmatmul.f32.vlgmr.msra.gmra.mxu3 %v2180_v16  ;;  %2258 = vmatmul.f32.vlgmr.msrb.gmra.mxu0 %v2180_v16 }
 0x5e4   :  { %v2199_v10 = vpop.f32.mrf.mxu1 }
 0x5e5   :  { %v2266_v12 = vrot.slane %v2199_v10, 4  ;;  %v2259_v15 = vpop.f32.mrf.mxu0 }
 0x5e6   :  { %v2269_v22 = vrot.slane %v2259_v15, 4  ;;  %v2345_v15 = vld [vmem:[#allocation3 + $0x18] sm:$0xc0] }
 0x5e7   :  { %v2274_v24 = vadd.f32 %v2266_v12, %v2111_v18 }
 0x5e8   :  { %v2277_v29 = vadd.f32 %v2269_v22, %v2114_v37 }
 0x5e9   :  { %v5298_v31 = vmul.f32 -1.442695, %v2274_v24  ;;  %v2348_v24 = vld [vmem:[#allocation3 + $0x30] sm:$0xc0] }
 0x5ea   :  { %v5300_v34 = vmul.f32 -1.442695, %v2277_v29  ;;  %v2219_v36 = vpop.f32.mrf.mxu2 }
 0x5eb   :  { %5446 = vpow2.f32 %v5298_v31  ;;  %v2267_v38 = vrot.slane %v2219_v36, 4  ;;  %v2239_v57 = vpop.f32.mrf.mxu3 }
 0x5ec   :  { %5448 = vpow2.f32 %v5300_v34  ;;  %v2268_v62 = vrot.slane %v2239_v57, 4 }
 0x5ed   :  { %v2275_v43 = vadd.f32 %v2267_v38, %v2112_v41  ;;  %v2346_v38 = vld [vmem:[#allocation3 + $0x8] sm:$0xc0] }
 0x5ee   :  { %v2276_v17 = vadd.f32 %v2268_v62, %v2113_v19 }
 0x5ef   :  { %v5299_v44 = vmul.f32 -1.442695, %v2275_v43 }
 0x5f1   :  { %v5447_v45 = vpop.eup %5446  ;;  %5450 = vpow2.f32 %v5299_v44 }
 0x5f2   :  { %v5449_v46 = vpop.eup %5448  ;;  %v2281_v48 = vadd.f32 1.0, %v5447_v45 }
 0x5f3   :  { %v2320_v50 = vadd.f32 1.0, %v5449_v46 }
 0x5f4   :  { %5452 = vrcp.f32 %v2281_v48  ;;  %v2293_v13 = vand.u32 2147483648, %v2281_v48  ;;  %vm2287_vm11 = vweird.f32 %v2281_v48  ;;  %v2291_v55 = vand.u32 2147483647, %v2281_v48 }
 0x5f5   :  { %5454 = vrcp.f32 %v2320_v50  ;;  %v2332_v26 = vand.u32 2147483648, %v2320_v50  ;;  %vm2326_vm3 = vweird.f32 %v2320_v50  ;;  %v2330_v49 = vand.u32 2147483647, %v2320_v50 }
 0x5f6   :  { %v2294_v27 = vor.u32 1.1754944e-38, %v2293_v13  ;;  %vm2292_vm15 = vcmp.eq.f32.partialorder %v2291_v55, 8.507059e+37 }
 0x5f7   :  { %v5451_v51 = vpop.eup %5450  ;;  %v2333_v1 = vor.u32 1.1754944e-38, %v2332_v26  ;;  %vm2331_vm5 = vcmp.eq.f32.partialorder %v2330_v49, 8.507059e+37 }
 0x5f8   :  { %v2300_v52 = vadd.f32 1.0, %v5451_v51 }
 0x5fa   :  { %v5453_v58 = vpop.eup %5452  ;;  %5456 = vrcp.f32 %v2300_v52  ;;  %v2312_v6 = vand.u32 2147483648, %v2300_v52  ;;  %v2310_v47 = vand.u32 2147483647, %v2300_v52  ;;  %vm2306_vm14 = vweird.f32 %v2300_v52 }
 0x5fb   :  { %v2283_v61 = vmul.f32 %v5453_v58, %v2281_v48  ;;  %v5455_v11 = vpop.eup %5454  ;;  %vm2288_vm10 = vweird.f32 %v5453_v58  ;;  %5458 = vtanh.f32 %v2276_v17 }
 0x5fc   :  { %v2322_v32 = vmul.f32 %v5455_v11, %v2320_v50  ;;  %vm2289_vm12 = vmor %vm2287_vm11, %vm2288_vm10  ;;  %v2313_v53 = vor.u32 1.1754944e-38, %v2312_v6  ;;  %vm2311_vm1 = vcmp.eq.f32.partialorder %v2310_v47, 8.507059e+37  ;;  %vm2327_vm2 = vweird.f32 %v5455_v11 }
 0x5fd   :  { %v2284_v63 = vsub.f32 1.0, %v2283_v61  ;;  %vm2328_vm4 = vmor %vm2326_vm3, %vm2327_vm2 }
 0x5fe   :  { %v2323_v25 = vsub.f32 1.0, %v2322_v32 }
 0x5ff   :  { %v2285_v23 = vmul.f32 %v5453_v58, %v2284_v63 }
 0x600   :  { %v5457_v35 = vpop.eup %5456  ;;  %v2324_v4 = vmul.f32 %v5455_v11, %v2323_v25 }
 0x601   :  { %v2302_v42 = vmul.f32 %v5457_v35, %v2300_v52  ;;  %v2286_v28 = vadd.f32 %v5453_v58, %v2285_v23  ;;  %vm2307_vm13 = vweird.f32 %v5457_v35  ;;  %v5459_v33 = vpop.eup %5458 }
 0x602   :  { %vm2308_vm0 = vmor %vm2306_vm14, %vm2307_vm13  ;;  %v2325_v30 = vadd.f32 %v5455_v11, %v2324_v4 }
 0x603   :  { %v2303_v14 = vsub.f32 1.0, %v2302_v42  ;;  %v2290_v60 = vsel %vm2289_vm12, %v5453_v58, %v2286_v28 }
 0x604   :  { %v2295_v8 = vsel %vm2292_vm15, %v2294_v27, %v2290_v60  ;;  %v2329_v3 = vsel %vm2328_vm4, %v5455_v11, %v2325_v30  ;;  %v2347_v11 = vld [vmem:[#allocation3 + $0x38] sm:$0xc0] }
 0x605   :  { %v2304_v20 = vmul.f32 %v5457_v35, %v2303_v14  ;;  %v2340_v9 = vmul.f32 %v5459_v33, %v2295_v8  ;;  %v2334_v0 = vsel %vm2331_vm5, %v2333_v1, %v2329_v3 }
 0x607   :  { %v2305_v56 = vadd.f32 %v5457_v35, %v2304_v20 }
 0x609   :  { %v2309_v5 = vsel %vm2308_vm0, %v5457_v35, %v2305_v56 }
 0x60a   :  { %v2314_v2 = vsel %vm2311_vm1, %v2313_v53, %v2309_v5 }
 0x60b   :  { %v2339_v40 = vmul.f32 %v2337_v39, %v2314_v2 }
 0x60d   :  { %v6931_v59 = vadd.f32 %v2340_v9, %v2339_v40 }
 0x60f   :  { %5460 = vtanh.f32 %v6931_v59  ;;  %v2571_v8 = vrot.slane %v6931_v59, 6 }
 0x615   :  { %v5461_v54 = vpop.eup %5460 }
 0x616   :  { %v2343_v21 = vmul.f32 %v5461_v54, %v2334_v0 }
 0x618   :  { %2344 = vst [vmem:[#allocation4 + $0x8] sm:$0x30] %v2343_v21  ;;  %v2414_v7 = vrot.slane %v2343_v21, 4 }
 0x61a   :  { %2432 = vmatmul.f32.vlgmr.msrb.gmra.mxu1 %v2414_v7  ;;  %2452 = vmatmul.f32.vlgmr.msrb.gmra.mxu2 %v2414_v7 }
 0x61b   :  { %2472 = vmatmul.f32.vlgmr.msrb.gmra.mxu3 %v2414_v7  ;;  %2492 = vmatmul.f32.vlgmr.msra.gmra.mxu0 %v2414_v7 }
 0x697   :  { %v2433_v16 = vpop.f32.mrf.mxu1 }
 0x698   :  { %v2500_v10 = vrot.slane %v2433_v16, 2  ;;  %v2493_v12 = vpop.f32.mrf.mxu0 }
 0x699   :  { %v2503_v18 = vrot.slane %v2493_v12, 2 }
 0x69a   :  { %v2508_v22 = vadd.f32 %v2500_v10, %v2345_v15 }
 0x69b   :  { %v2511_v37 = vadd.f32 %v2503_v18, %v2348_v24 }
 0x69c   :  { %v5301_v29 = vmul.f32 -1.442695, %v2508_v22 }
 0x69d   :  { %v5303_v31 = vmul.f32 -1.442695, %v2511_v37  ;;  %v2453_v34 = vpop.f32.mrf.mxu2 }
 0x69e   :  { %5462 = vpow2.f32 %v5301_v29  ;;  %v2501_v36 = vrot.slane %v2453_v34, 2  ;;  %v2473_v52 = vpop.f32.mrf.mxu3 }
 0x69f   :  { %5464 = vpow2.f32 %v5303_v31  ;;  %v2502_v61 = vrot.slane %v2473_v52, 2 }
 0x6a0   :  { %v2509_v41 = vadd.f32 %v2501_v36, %v2346_v38 }
 0x6a1   :  { %v2510_v35 = vadd.f32 %v2502_v61, %v2347_v11 }
 0x6a2   :  { %v5302_v43 = vmul.f32 -1.442695, %v2509_v41 }
 0x6a4   :  { %v5463_v44 = vpop.eup %5462  ;;  %5466 = vpow2.f32 %v5302_v43 }
 0x6a5   :  { %v5465_v45 = vpop.eup %5464  ;;  %v2515_v46 = vadd.f32 1.0, %v5463_v44 }
 0x6a6   :  { %v2554_v48 = vadd.f32 1.0, %v5465_v45 }
 0x6a7   :  { %5468 = vrcp.f32 %v2515_v46  ;;  %v2527_v32 = vand.u32 2147483648, %v2515_v46  ;;  %vm2521_vm7 = vweird.f32 %v2515_v46  ;;  %v2525_v14 = vand.u32 2147483647, %v2515_v46 }
 0x6a8   :  { %5470 = vrcp.f32 %v2554_v48  ;;  %v2566_v26 = vand.u32 2147483648, %v2554_v48  ;;  %vm2560_vm15 = vweird.f32 %v2554_v48  ;;  %v2564_v49 = vand.u32 2147483647, %v2554_v48 }
 0x6a9   :  { %v2528_v25 = vor.u32 1.1754944e-38, %v2527_v32  ;;  %vm2526_vm11 = vcmp.eq.f32.partialorder %v2525_v14, 8.507059e+37 }
 0x6aa   :  { %v5467_v50 = vpop.eup %5466  ;;  %v2567_v1 = vor.u32 1.1754944e-38, %v2566_v26  ;;  %vm2565_vm1 = vcmp.eq.f32.partialorder %v2564_v49, 8.507059e+37 }
 0x6ab   :  { %v2534_v51 = vadd.f32 1.0, %v5467_v50 }
 0x6ad   :  { %v5469_v57 = vpop.eup %5468  ;;  %5472 = vrcp.f32 %v2534_v51  ;;  %v2546_v55 = vand.u32 2147483648, %v2534_v51  ;;  %v2544_v60 = vand.u32 2147483647, %v2534_v51  ;;  %vm2540_vm10 = vweird.f32 %v2534_v51 }
 0x6ae   :  { %v2517_v58 = vmul.f32 %v5469_v57, %v2515_v46  ;;  %v5471_v63 = vpop.eup %5470  ;;  %vm2522_vm6 = vweird.f32 %v5469_v57  ;;  %5474 = vtanh.f32 %v2510_v35 }
 0x6af   :  { %v2556_v28 = vmul.f32 %v5471_v63, %v2554_v48  ;;  %vm2523_vm8 = vmor %vm2521_vm7, %vm2522_vm6  ;;  %v2547_v56 = vor.u32 1.1754944e-38, %v2546_v55  ;;  %vm2545_vm13 = vcmp.eq.f32.partialorder %v2544_v60, 8.507059e+37  ;;  %vm2561_vm14 = vweird.f32 %v5471_v63 }
 0x6b0   :  { %v2518_v62 = vsub.f32 1.0, %v2517_v58  ;;  %vm2562_vm0 = vmor %vm2560_vm15, %vm2561_vm14 }
 0x6b1   :  { %v2557_v47 = vsub.f32 1.0, %v2556_v28 }
 0x6b2   :  { %v2519_v19 = vmul.f32 %v5469_v57, %v2518_v62 }
 0x6b3   :  { %v5473_v23 = vpop.eup %5472  ;;  %v2558_v33 = vmul.f32 %v5471_v63, %v2557_v47 }
 0x6b4   :  { %v2536_v17 = vmul.f32 %v5473_v23, %v2534_v51  ;;  %v2520_v42 = vadd.f32 %v5469_v57, %v2519_v19  ;;  %vm2541_vm9 = vweird.f32 %v5473_v23  ;;  %v5475_v5 = vpop.eup %5474 }
 0x6b5   :  { %vm2542_vm12 = vmor %vm2540_vm10, %vm2541_vm9  ;;  %v2559_v30 = vadd.f32 %v5471_v63, %v2558_v33 }
 0x6b6   :  { %v2537_v13 = vsub.f32 1.0, %v2536_v17  ;;  %v2524_v20 = vsel %vm2523_vm8, %v5469_v57, %v2520_v42 }
 0x6b7   :  { %v2529_v53 = vsel %vm2526_vm11, %v2528_v25, %v2524_v20  ;;  %v2563_v3 = vsel %vm2562_vm0, %v5471_v63, %v2559_v30 }
 0x6b8   :  { %v2538_v6 = vmul.f32 %v5473_v23, %v2537_v13  ;;  %v2574_v40 = vmul.f32 %v5475_v5, %v2529_v53  ;;  %v2568_v59 = vsel %vm2565_vm1, %v2567_v1, %v2563_v3 }
 0x6ba   :  { %v2539_v27 = vadd.f32 %v5473_v23, %v2538_v6 }
 0x6bc   :  { %v2543_v39 = vsel %vm2542_vm12, %v5473_v23, %v2539_v27 }
 0x6bd   :  { %v2548_v2 = vsel %vm2545_vm13, %v2547_v56, %v2543_v39 }
 0x6be   :  { %v2573_v4 = vmul.f32 %v2571_v8, %v2548_v2 }
 0x6c0   :  { %v2575_v9 = vadd.f32 %v2574_v40, %v2573_v4 }
 0x6c2   :  { %5476 = vtanh.f32 %v2575_v9 }
 0x6c8   :  { %v5477_v54 = vpop.eup %5476 }
 0x6c9   :  { %v2577_v0 = vmul.f32 %v5477_v54, %v2568_v59 }
 0x6cb   :  { %2578 = vst [vmem:[#allocation4 + $0x8] sm:$0xc0] %v2577_v0 }
 0x6cc   :  { %5787 = dma.done.wait [#allocation9], 16384 }
 0x6cd   :  { %5788 = vsyncadd [#allocation9], 4294950912 }
 0x6ce   :  { %5789 = dma.done.wait [#allocation9 + $0x1], 8192 }
 0x6cf   :  { %5790 = vsyncadd [#allocation9 + $0x1], 4294959104  ;;  %v2708_v21 = vld [vmem:[#allocation6 + $0x3c0] sm:$0xff]  ;;  %v2709_v7 = vld [vmem:[#allocation6 + $0x3c8] sm:$0xff] }
 0x6d0   :  { %v2710_v16 = vld [vmem:[#allocation6 + $0x3d0] sm:$0xff]  ;;  %2734 = vmatpush.msra.mxu1 %v2708_v21  ;;  %2757 = vmatpush.msra.mxu2 %v2709_v7  ;;  %v2711_v10 = vld [vmem:[#allocation6 + $0x3d8] sm:$0xff]  ;;  %v2700_v12 = vld [vmem:[#allocation6 + $0x380] sm:$0xff] }
 0x6d1   :  { %v2701_v15 = vld [vmem:[#allocation6 + $0x388] sm:$0xff]  ;;  %2780 = vmatpush.msra.mxu3 %v2710_v16  ;;  %2803 = vmatpush.msrb.mxu0 %v2711_v10  ;;  %v2702_v18 = vld [vmem:[#allocation6 + $0x390] sm:$0xff]  ;;  %v2703_v22 = vld [vmem:[#allocation6 + $0x398] sm:$0xff] }
 0x6d2   :  { %v2692_v24 = vld [vmem:[#allocation6 + $0x340] sm:$0xff]  ;;  %2735 = vmatpush.msra.mxu1 %v2700_v12  ;;  %2758 = vmatpush.msra.mxu2 %v2701_v15  ;;  %v2693_v37 = vld [vmem:[#allocation6 + $0x348] sm:$0xff]  ;;  %v2694_v29 = vld [vmem:[#allocation6 + $0x350] sm:$0xff] }
 0x6d3   :  { %v2695_v31 = vld [vmem:[#allocation6 + $0x358] sm:$0xff]  ;;  %2781 = vmatpush.msra.mxu3 %v2702_v18  ;;  %2804 = vmatpush.msrb.mxu0 %v2703_v22  ;;  %v2684_v34 = vld [vmem:[#allocation6 + $0x300] sm:$0xff]  ;;  %v2685_v36 = vld [vmem:[#allocation6 + $0x308] sm:$0xff] }
 0x6d4   :  { %2736 = vmatpush.msra.mxu1 %v2692_v24  ;;  %2759 = vmatpush.msra.mxu2 %v2693_v37  ;;  %v2686_v38 = vld [vmem:[#allocation6 + $0x310] sm:$0xff]  ;;  %v2687_v41 = vld [vmem:[#allocation6 + $0x318] sm:$0xff]  ;;  %v2676_v43 = vld [vmem:[#allocation6 + $0x2c0] sm:$0xff] }
 0x6d5   :  { %2782 = vmatpush.msra.mxu3 %v2694_v29  ;;  %2805 = vmatpush.msrb.mxu0 %v2695_v31  ;;  %v2677_v44 = vld [vmem:[#allocation6 + $0x2c8] sm:$0xff]  ;;  %v2678_v45 = vld [vmem:[#allocation6 + $0x2d0] sm:$0xff]  ;;  %v2679_v46 = vld [vmem:[#allocation6 + $0x2d8] sm:$0xff] }
 0x6d6   :  { %2737 = vmatpush.msra.mxu1 %v2684_v34  ;;  %2760 = vmatpush.msra.mxu2 %v2685_v36  ;;  %v2668_v48 = vld [vmem:[#allocation6 + $0x280] sm:$0xff]  ;;  %v2669_v50 = vld [vmem:[#allocation6 + $0x288] sm:$0xff]  ;;  %v2670_v51 = vld [vmem:[#allocation6 + $0x290] sm:$0xff] }
 0x6d7   :  { %2783 = vmatpush.msra.mxu3 %v2686_v38  ;;  %2806 = vmatpush.msrb.mxu0 %v2687_v41  ;;  %v2671_v52 = vld [vmem:[#allocation6 + $0x298] sm:$0xff]  ;;  %v2660_v57 = vld [vmem:[#allocation6 + $0x240] sm:$0xff]  ;;  %v2661_v58 = vld [vmem:[#allocation6 + $0x248] sm:$0xff] }
 0x6d8   :  { %2738 = vmatpush.msra.mxu1 %v2676_v43  ;;  %2761 = vmatpush.msra.mxu2 %v2677_v44  ;;  %v2662_v61 = vld [vmem:[#allocation6 + $0x250] sm:$0xff]  ;;  %v2663_v62 = vld [vmem:[#allocation6 + $0x258] sm:$0xff]  ;;  %v2652_v63 = vld [vmem:[#allocation6 + $0x200] sm:$0xff] }
 0x6d9   :  { %2784 = vmatpush.msra.mxu3 %v2678_v45  ;;  %2807 = vmatpush.msrb.mxu0 %v2679_v46  ;;  %v2653_v11 = vld [vmem:[#allocation6 + $0x208] sm:$0xff]  ;;  %v2654_v19 = vld [vmem:[#allocation6 + $0x210] sm:$0xff]  ;;  %v2655_v23 = vld [vmem:[#allocation6 + $0x218] sm:$0xff] }
 0x6da   :  { %2739 = vmatpush.msra.mxu1 %v2668_v48  ;;  %2762 = vmatpush.msra.mxu2 %v2669_v50  ;;  %v2644_v35 = vld [vmem:[#allocation6 + $0x1c0] sm:$0xff]  ;;  %v2645_v17 = vld [vmem:[#allocation6 + $0x1c8] sm:$0xff]  ;;  %v2646_v42 = vld [vmem:[#allocation6 + $0x1d0] sm:$0xff] }
 0x6db   :  { %2785 = vmatpush.msra.mxu3 %v2670_v51  ;;  %2808 = vmatpush.msrb.mxu0 %v2671_v52  ;;  %v2647_v28 = vld [vmem:[#allocation6 + $0x1d8] sm:$0xff]  ;;  %v2636_v32 = vld [vmem:[#allocation6 + $0x180] sm:$0xff]  ;;  %v2637_v13 = vld [vmem:[#allocation6 + $0x188] sm:$0xff] }
 0x6dc   :  { %2740 = vmatpush.msra.mxu1 %v2660_v57  ;;  %2763 = vmatpush.msra.mxu2 %v2661_v58  ;;  %v2638_v14 = vld [vmem:[#allocation6 + $0x190] sm:$0xff]  ;;  %v2639_v55 = vld [vmem:[#allocation6 + $0x198] sm:$0xff]  ;;  %v2628_v6 = vld [vmem:[#allocation6 + $0x140] sm:$0xff] }
 0x6dd   :  { %2786 = vmatpush.msra.mxu3 %v2662_v61  ;;  %2809 = vmatpush.msrb.mxu0 %v2663_v62  ;;  %v2629_v20 = vld [vmem:[#allocation6 + $0x148] sm:$0xff]  ;;  %v2630_v60 = vld [vmem:[#allocation6 + $0x150] sm:$0xff]  ;;  %v2631_v47 = vld [vmem:[#allocation6 + $0x158] sm:$0xff] }
 0x6de   :  { %2741 = vmatpush.msra.mxu1 %v2652_v63  ;;  %2764 = vmatpush.msra.mxu2 %v2653_v11  ;;  %v2620_v25 = vld [vmem:[#allocation6 + $0x100] sm:$0xff]  ;;  %v2621_v27 = vld [vmem:[#allocation6 + $0x108] sm:$0xff]  ;;  %v2622_v56 = vld [vmem:[#allocation6 + $0x110] sm:$0xff] }
 0x6df   :  { %2787 = vmatpush.msra.mxu3 %v2654_v19  ;;  %2810 = vmatpush.msrb.mxu0 %v2655_v23  ;;  %v2623_v53 = vld [vmem:[#allocation6 + $0x118] sm:$0xff]  ;;  %v2612_v8 = vld [vmem:[#allocation6 + $0xc0] sm:$0xff]  ;;  %v2613_v39 = vld [vmem:[#allocation6 + $0xc8] sm:$0xff] }
 0x6e0   :  { %2742 = vmatpush.msra.mxu1 %v2644_v35  ;;  %2765 = vmatpush.msra.mxu2 %v2645_v17  ;;  %v2614_v5 = vld [vmem:[#allocation6 + $0xd0] sm:$0xff]  ;;  %v2615_v33 = vld [vmem:[#allocation6 + $0xd8] sm:$0xff]  ;;  %v2604_v2 = vld [vmem:[#allocation6 + $0x80] sm:$0xff] }
 0x6e1   :  { %2788 = vmatpush.msra.mxu3 %v2646_v42  ;;  %2811 = vmatpush.msrb.mxu0 %v2647_v28  ;;  %v2605_v4 = vld [vmem:[#allocation6 + $0x88] sm:$0xff]  ;;  %v2606_v40 = vld [vmem:[#allocation6 + $0x90] sm:$0xff]  ;;  %v2607_v9 = vld [vmem:[#allocation6 + $0x98] sm:$0xff] }
 0x6e2   :  { %2743 = vmatpush.msra.mxu1 %v2636_v32  ;;  %2766 = vmatpush.msra.mxu2 %v2637_v13  ;;  %v2596_v30 = vld [vmem:[#allocation6 + $0x40] sm:$0xff]  ;;  %v2597_v26 = vld [vmem:[#allocation6 + $0x48] sm:$0xff]  ;;  %v2598_v49 = vld [vmem:[#allocation6 + $0x50] sm:$0xff] }
 0x6e3   :  { %2789 = vmatpush.msra.mxu3 %v2638_v14  ;;  %2812 = vmatpush.msrb.mxu0 %v2639_v55  ;;  %v2599_v3 = vld [vmem:[#allocation6 + $0x58] sm:$0xff]  ;;  %v2588_v1 = vld [vmem:[#allocation6] sm:$0xff]  ;;  %v2589_v54 = vld [vmem:[#allocation6 + $0x8] sm:$0xff] }
 0x6e4   :  { %2744 = vmatpush.msra.mxu1 %v2628_v6  ;;  %2767 = vmatpush.msra.mxu2 %v2629_v20  ;;  %v2590_v59 = vld [vmem:[#allocation6 + $0x10] sm:$0xff]  ;;  %v2591_v0 = vld [vmem:[#allocation6 + $0x18] sm:$0xff]  ;;  %v2712_v21 = vld [vmem:[#allocation6 + $0x3e0] sm:$0xff] }
 0x6e5   :  { %2790 = vmatpush.msra.mxu3 %v2630_v60  ;;  %2813 = vmatpush.msrb.mxu0 %v2631_v47  ;;  %v2713_v7 = vld [vmem:[#allocation6 + $0x3e8] sm:$0xff]  ;;  %v2714_v16 = vld [vmem:[#allocation6 + $0x3f0] sm:$0xff]  ;;  %v2715_v10 = vld [vmem:[#allocation6 + $0x3f8] sm:$0xff] }
 0x6e6   :  { %2745 = vmatpush.msra.mxu1 %v2620_v25  ;;  %2768 = vmatpush.msra.mxu2 %v2621_v27  ;;  %v2704_v12 = vld [vmem:[#allocation6 + $0x3a0] sm:$0xff]  ;;  %v2705_v15 = vld [vmem:[#allocation6 + $0x3a8] sm:$0xff]  ;;  %v2706_v18 = vld [vmem:[#allocation6 + $0x3b0] sm:$0xff] }
 0x6e7   :  { %2791 = vmatpush.msra.mxu3 %v2622_v56  ;;  %2814 = vmatpush.msrb.mxu0 %v2623_v53  ;;  %v2707_v22 = vld [vmem:[#allocation6 + $0x3b8] sm:$0xff]  ;;  %v2696_v24 = vld [vmem:[#allocation6 + $0x360] sm:$0xff]  ;;  %v2697_v37 = vld [vmem:[#allocation6 + $0x368] sm:$0xff] }
 0x6e8   :  { %2746 = vmatpush.msra.mxu1 %v2612_v8  ;;  %2769 = vmatpush.msra.mxu2 %v2613_v39  ;;  %v2698_v29 = vld [vmem:[#allocation6 + $0x370] sm:$0xff]  ;;  %v2699_v31 = vld [vmem:[#allocation6 + $0x378] sm:$0xff]  ;;  %v2688_v34 = vld [vmem:[#allocation6 + $0x320] sm:$0xff] }
 0x6e9   :  { %2792 = vmatpush.msra.mxu3 %v2614_v5  ;;  %2815 = vmatpush.msrb.mxu0 %v2615_v33  ;;  %v2689_v36 = vld [vmem:[#allocation6 + $0x328] sm:$0xff]  ;;  %v2690_v38 = vld [vmem:[#allocation6 + $0x330] sm:$0xff]  ;;  %v2691_v41 = vld [vmem:[#allocation6 + $0x338] sm:$0xff] }
 0x6ea   :  { %2747 = vmatpush.msra.mxu1 %v2604_v2  ;;  %2770 = vmatpush.msra.mxu2 %v2605_v4  ;;  %v2680_v43 = vld [vmem:[#allocation6 + $0x2e0] sm:$0xff]  ;;  %v2681_v44 = vld [vmem:[#allocation6 + $0x2e8] sm:$0xff]  ;;  %v2682_v45 = vld [vmem:[#allocation6 + $0x2f0] sm:$0xff] }
 0x6eb   :  { %2793 = vmatpush.msra.mxu3 %v2606_v40  ;;  %2816 = vmatpush.msrb.mxu0 %v2607_v9  ;;  %v2683_v46 = vld [vmem:[#allocation6 + $0x2f8] sm:$0xff]  ;;  %v2672_v48 = vld [vmem:[#allocation6 + $0x2a0] sm:$0xff]  ;;  %v2673_v50 = vld [vmem:[#allocation6 + $0x2a8] sm:$0xff] }
 0x6ec   :  { %2748 = vmatpush.msra.mxu1 %v2596_v30  ;;  %2771 = vmatpush.msra.mxu2 %v2597_v26  ;;  %v2674_v51 = vld [vmem:[#allocation6 + $0x2b0] sm:$0xff]  ;;  %v2675_v52 = vld [vmem:[#allocation6 + $0x2b8] sm:$0xff]  ;;  %v2664_v57 = vld [vmem:[#allocation6 + $0x260] sm:$0xff] }
 0x6ed   :  { %2794 = vmatpush.msra.mxu3 %v2598_v49  ;;  %2817 = vmatpush.msrb.mxu0 %v2599_v3  ;;  %v2665_v58 = vld [vmem:[#allocation6 + $0x268] sm:$0xff]  ;;  %v2666_v61 = vld [vmem:[#allocation6 + $0x270] sm:$0xff]  ;;  %v2667_v62 = vld [vmem:[#allocation6 + $0x278] sm:$0xff] }
 0x6ee   :  { %2749 = vmatpush.msra.mxu1 %v2588_v1  ;;  %2772 = vmatpush.msra.mxu2 %v2589_v54  ;;  %v2656_v63 = vld [vmem:[#allocation6 + $0x220] sm:$0xff]  ;;  %v2657_v11 = vld [vmem:[#allocation6 + $0x228] sm:$0xff]  ;;  %v2658_v19 = vld [vmem:[#allocation6 + $0x230] sm:$0xff] }
 0x6ef   :  { %2795 = vmatpush.msra.mxu3 %v2590_v59  ;;  %2818 = vmatpush.msrb.mxu0 %v2591_v0  ;;  %v2659_v23 = vld [vmem:[#allocation6 + $0x238] sm:$0xff]  ;;  %v6944_v35 = vld [vmem:[#allocation4] sm:$0xff]  ;;  %v2649_v42 = vld [vmem:[#allocation6 + $0x1e8] sm:$0xff] }
 0x6f0   :  { %2826 = vmatpush.msrb.mxu1 %v2712_v21  ;;  %2849 = vmatpush.msrb.mxu2 %v2713_v7  ;;  %v2648_v17 = vld [vmem:[#allocation6 + $0x1e0] sm:$0xff]  ;;  %v2650_v28 = vld [vmem:[#allocation6 + $0x1f0] sm:$0xff]  ;;  %v2651_v32 = vld [vmem:[#allocation6 + $0x1f8] sm:$0xff] }
 0x6f1   :  { %2872 = vmatpush.msrb.mxu3 %v2714_v16  ;;  %2895 = vmatpush.msra.mxu0 %v2715_v10  ;;  %v2640_v13 = vld [vmem:[#allocation6 + $0x1a0] sm:$0xff]  ;;  %v2641_v14 = vld [vmem:[#allocation6 + $0x1a8] sm:$0xff]  ;;  %v2642_v55 = vld [vmem:[#allocation6 + $0x1b0] sm:$0xff] }
 0x6f2   :  { %2827 = vmatpush.msrb.mxu1 %v2704_v12  ;;  %2850 = vmatpush.msrb.mxu2 %v2705_v15  ;;  %v2643_v6 = vld [vmem:[#allocation6 + $0x1b8] sm:$0xff]  ;;  %v2632_v20 = vld [vmem:[#allocation6 + $0x160] sm:$0xff]  ;;  %v2633_v60 = vld [vmem:[#allocation6 + $0x168] sm:$0xff] }
 0x6f3   :  { %2873 = vmatpush.msrb.mxu3 %v2706_v18  ;;  %2896 = vmatpush.msra.mxu0 %v2707_v22  ;;  %v2634_v47 = vld [vmem:[#allocation6 + $0x170] sm:$0xff]  ;;  %v2635_v25 = vld [vmem:[#allocation6 + $0x178] sm:$0xff]  ;;  %v2624_v27 = vld [vmem:[#allocation6 + $0x120] sm:$0xff] }
 0x6f4   :  { %2828 = vmatpush.msrb.mxu1 %v2696_v24  ;;  %2851 = vmatpush.msrb.mxu2 %v2697_v37  ;;  %v2625_v56 = vld [vmem:[#allocation6 + $0x128] sm:$0xff]  ;;  %v2626_v53 = vld [vmem:[#allocation6 + $0x130] sm:$0xff]  ;;  %v2627_v8 = vld [vmem:[#allocation6 + $0x138] sm:$0xff] }
 0x6f5   :  { %2874 = vmatpush.msrb.mxu3 %v2698_v29  ;;  %2897 = vmatpush.msra.mxu0 %v2699_v31  ;;  %v6950_v39 = vld [vmem:[#allocation4 + $0x8] sm:$0xff]  ;;  %v2616_v5 = vld [vmem:[#allocation6 + $0xe0] sm:$0xff]  ;;  %v2618_v2 = vld [vmem:[#allocation6 + $0xf0] sm:$0xff] }
 0x6f6   :  { %2829 = vmatpush.msrb.mxu1 %v2688_v34  ;;  %2852 = vmatpush.msrb.mxu2 %v2689_v36  ;;  %v2617_v33 = vld [vmem:[#allocation6 + $0xe8] sm:$0xff]  ;;  %v2619_v4 = vld [vmem:[#allocation6 + $0xf8] sm:$0xff]  ;;  %v2608_v40 = vld [vmem:[#allocation6 + $0xa0] sm:$0xff] }
 0x6f7   :  { %2875 = vmatpush.msrb.mxu3 %v2690_v38  ;;  %2898 = vmatpush.msra.mxu0 %v2691_v41  ;;  %v2609_v9 = vld [vmem:[#allocation6 + $0xa8] sm:$0xff]  ;;  %v2610_v30 = vld [vmem:[#allocation6 + $0xb0] sm:$0xff]  ;;  %v2611_v26 = vld [vmem:[#allocation6 + $0xb8] sm:$0xff] }
 0x6f8   :  { %2830 = vmatpush.msrb.mxu1 %v2680_v43  ;;  %2853 = vmatpush.msrb.mxu2 %v2681_v44  ;;  %v2600_v49 = vld [vmem:[#allocation6 + $0x60] sm:$0xff]  ;;  %v2601_v3 = vld [vmem:[#allocation6 + $0x68] sm:$0xff]  ;;  %v2602_v1 = vld [vmem:[#allocation6 + $0x70] sm:$0xff] }
 0x6f9   :  { %2876 = vmatpush.msrb.mxu3 %v2682_v45  ;;  %2899 = vmatpush.msra.mxu0 %v2683_v46  ;;  %v2603_v54 = vld [vmem:[#allocation6 + $0x78] sm:$0xff]  ;;  %v2592_v59 = vld [vmem:[#allocation6 + $0x20] sm:$0xff]  ;;  %v2593_v0 = vld [vmem:[#allocation6 + $0x28] sm:$0xff] }
 0x6fa   :  { %2831 = vmatpush.msrb.mxu1 %v2672_v48  ;;  %2854 = vmatpush.msrb.mxu2 %v2673_v50  ;;  %v2594_v21 = vld [vmem:[#allocation6 + $0x30] sm:$0xff]  ;;  %v2595_v7 = vld [vmem:[#allocation6 + $0x38] sm:$0xff]  ;;  %v6956_v16 = vld [vmem:[#allocation7 + $0x1e0] sm:$0xff] }
 0x6fb   :  { %2877 = vmatpush.msrb.mxu3 %v2674_v51  ;;  %2900 = vmatpush.msra.mxu0 %v2675_v52  ;;  %v6958_v10 = vld [vmem:[#allocation7 + $0x1e8] sm:$0xff]  ;;  %v6962_v12 = vld [vmem:[#allocation7 + $0x1f0] sm:$0xff]  ;;  %v6964_v15 = vld [vmem:[#allocation7 + $0x1f8] sm:$0xff] }
 0x6fc   :  { %2832 = vmatpush.msrb.mxu1 %v2664_v57  ;;  %2855 = vmatpush.msrb.mxu2 %v2665_v58  ;;  %v6968_v18 = vld [vmem:[#allocation7 + $0x1c0] sm:$0xff]  ;;  %v6970_v22 = vld [vmem:[#allocation7 + $0x1c8] sm:$0xff]  ;;  %v6974_v24 = vld [vmem:[#allocation7 + $0x1d0] sm:$0xff] }
 0x6fd   :  { %2878 = vmatpush.msrb.mxu3 %v2666_v61  ;;  %2901 = vmatpush.msra.mxu0 %v2667_v62  ;;  %v6976_v37 = vld [vmem:[#allocation7 + $0x1d8] sm:$0xff]  ;;  %v6980_v29 = vld [vmem:[#allocation7 + $0x1a0] sm:$0xff]  ;;  %v6982_v31 = vld [vmem:[#allocation7 + $0x1a8] sm:$0xff] }
 0x6fe   :  { %2833 = vmatpush.msrb.mxu1 %v2656_v63  ;;  %2856 = vmatpush.msrb.mxu2 %v2657_v11  ;;  %v6986_v34 = vld [vmem:[#allocation7 + $0x1b0] sm:$0xff]  ;;  %v6988_v36 = vld [vmem:[#allocation7 + $0x1b8] sm:$0xff]  ;;  %v6992_v38 = vld [vmem:[#allocation7 + $0x180] sm:$0xff] }
 0x6ff   :  { %2879 = vmatpush.msrb.mxu3 %v2658_v19  ;;  %2902 = vmatpush.msra.mxu0 %v2659_v23  ;;  %v6994_v41 = vld [vmem:[#allocation7 + $0x188] sm:$0xff]  ;;  %v6998_v43 = vld [vmem:[#allocation7 + $0x190] sm:$0xff]  ;;  %v7000_v44 = vld [vmem:[#allocation7 + $0x198] sm:$0xff] }
 0x700   :  { %2750 = vmatmul.f32.vlgmr.msra.gmra.mxu1 %v6944_v35  ;;  %2773 = vmatmul.f32.vlgmr.msra.gmra.mxu2 %v6944_v35  ;;  %v7008_v45 = vld [vmem:[#allocation7 + $0x160] sm:$0xff]  ;;  %v7010_v46 = vld [vmem:[#allocation7 + $0x168] sm:$0xff]  ;;  %v7014_v48 = vld [vmem:[#allocation7 + $0x170] sm:$0xff] }
 0x701   :  { %2796 = vmatmul.f32.vlgmr.msra.gmra.mxu3 %v6944_v35  ;;  %2819 = vmatmul.f32.vlgmr.msrb.gmra.mxu0 %v6944_v35  ;;  %v7016_v50 = vld [vmem:[#allocation7 + $0x178] sm:$0xff]  ;;  %v7020_v51 = vld [vmem:[#allocation7 + $0x140] sm:$0xff]  ;;  %v7022_v52 = vld [vmem:[#allocation7 + $0x148] sm:$0xff] }
 0x702   :  { %2834 = vmatpush.msrb.mxu1 %v2648_v17  ;;  %2857 = vmatpush.msrb.mxu2 %v2649_v42  ;;  %v7026_v57 = vld [vmem:[#allocation7 + $0x150] sm:$0xff]  ;;  %v7028_v58 = vld [vmem:[#allocation7 + $0x158] sm:$0xff]  ;;  %v7032_v61 = vld [vmem:[#allocation7 + $0x120] sm:$0xff] }
 0x703   :  { %2880 = vmatpush.msrb.mxu3 %v2650_v28  ;;  %2903 = vmatpush.msra.mxu0 %v2651_v32  ;;  %v7034_v62 = vld [vmem:[#allocation7 + $0x128] sm:$0xff]  ;;  %v7038_v63 = vld [vmem:[#allocation7 + $0x130] sm:$0xff]  ;;  %v7040_v11 = vld [vmem:[#allocation7 + $0x138] sm:$0xff] }
 0x704   :  { %2835 = vmatpush.msrb.mxu1 %v2640_v13  ;;  %2858 = vmatpush.msrb.mxu2 %v2641_v14  ;;  %v7044_v19 = vld [vmem:[#allocation7 + $0x100] sm:$0xff]  ;;  %v7046_v23 = vld [vmem:[#allocation7 + $0x108] sm:$0xff]  ;;  %v7052_v17 = vld [vmem:[#allocation7 + $0x118] sm:$0xff] }
 0x705   :  { %2881 = vmatpush.msrb.mxu3 %v2642_v55  ;;  %2904 = vmatpush.msra.mxu0 %v2643_v6  ;;  %v7056_v42 = vld [vmem:[#allocation7 + $0xe0] sm:$0xff]  ;;  %v7058_v28 = vld [vmem:[#allocation7 + $0xe8] sm:$0xff]  ;;  %v7062_v32 = vld [vmem:[#allocation7 + $0xf0] sm:$0xff] }
 0x706   :  { %2836 = vmatpush.msrb.mxu1 %v2632_v20  ;;  %2859 = vmatpush.msrb.mxu2 %v2633_v60  ;;  %v7064_v13 = vld [vmem:[#allocation7 + $0xf8] sm:$0xff]  ;;  %v7068_v14 = vld [vmem:[#allocation7 + $0xc0] sm:$0xff]  ;;  %v7070_v55 = vld [vmem:[#allocation7 + $0xc8] sm:$0xff] }
 0x707   :  { %2882 = vmatpush.msrb.mxu3 %v2634_v47  ;;  %2905 = vmatpush.msra.mxu0 %v2635_v25  ;;  %v7074_v6 = vld [vmem:[#allocation7 + $0xd0] sm:$0xff]  ;;  %v7076_v20 = vld [vmem:[#allocation7 + $0xd8] sm:$0xff]  ;;  %v7080_v60 = vld [vmem:[#allocation7 + $0xa0] sm:$0xff] }
 0x708   :  { %2837 = vmatpush.msrb.mxu1 %v2624_v27  ;;  %2860 = vmatpush.msrb.mxu2 %v2625_v56  ;;  %v7082_v47 = vld [vmem:[#allocation7 + $0xa8] sm:$0xff]  ;;  %v7086_v25 = vld [vmem:[#allocation7 + $0xb0] sm:$0xff]  ;;  %v7088_v27 = vld [vmem:[#allocation7 + $0xb8] sm:$0xff] }
 0x709   :  { %2883 = vmatpush.msrb.mxu3 %v2626_v53  ;;  %2906 = vmatpush.msra.mxu0 %v2627_v8  ;;  %v7092_v56 = vld [vmem:[#allocation7 + $0x80] sm:$0xff]  ;;  %v7094_v53 = vld [vmem:[#allocation7 + $0x88] sm:$0xff]  ;;  %v7098_v8 = vld [vmem:[#allocation7 + $0x90] sm:$0xff] }
 0x70a   :  { %2753 = vmatmul.f32.gmra.mxu1 %v6950_v39  ;;  %2776 = vmatmul.f32.gmra.mxu2 %v6950_v39 }
 0x70b   :  { %2799 = vmatmul.f32.gmra.mxu3 %v6950_v39  ;;  %2822 = vmatmul.f32.gmra.mxu0 %v6950_v39 }
 0x70c   :  { %2838 = vmatpush.msrb.mxu1 %v2616_v5  ;;  %2861 = vmatpush.msrb.mxu2 %v2617_v33  ;;  %v7104_v5 = vld [vmem:[#allocation7 + $0x60] sm:$0xff]  ;;  %v7106_v33 = vld [vmem:[#allocation7 + $0x68] sm:$0xff] }
 0x70d   :  { %2884 = vmatpush.msrb.mxu3 %v2618_v2  ;;  %2907 = vmatpush.msra.mxu0 %v2619_v4  ;;  %v7110_v2 = vld [vmem:[#allocation7 + $0x70] sm:$0xff]  ;;  %v7112_v4 = vld [vmem:[#allocation7 + $0x78] sm:$0xff] }
 0x70e   :  { %2839 = vmatpush.msrb.mxu1 %v2608_v40  ;;  %2862 = vmatpush.msrb.mxu2 %v2609_v9  ;;  %v7116_v40 = vld [vmem:[#allocation7 + $0x40] sm:$0xff]  ;;  %v7118_v9 = vld [vmem:[#allocation7 + $0x48] sm:$0xff] }
 0x70f   :  { %2885 = vmatpush.msrb.mxu3 %v2610_v30  ;;  %2908 = vmatpush.msra.mxu0 %v2611_v26  ;;  %v7122_v30 = vld [vmem:[#allocation7 + $0x50] sm:$0xff]  ;;  %v7124_v26 = vld [vmem:[#allocation7 + $0x58] sm:$0xff] }
 0x710   :  { %2840 = vmatpush.msrb.mxu1 %v2600_v49  ;;  %2863 = vmatpush.msrb.mxu2 %v2601_v3  ;;  %8264 = vst [vmem:[#allocation34_spill] sm:$0xff] %v7124_v26  ;;  %v7128_v49 = vld [vmem:[#allocation7 + $0x20] sm:$0xff]  ;;  %v7130_v3 = vld [vmem:[#allocation7 + $0x28] sm:$0xff] }
 0x711   :  { %2886 = vmatpush.msrb.mxu3 %v2602_v1  ;;  %2909 = vmatpush.msra.mxu0 %v2603_v54  ;;  %v7134_v1 = vld [vmem:[#allocation7 + $0x30] sm:$0xff]  ;;  %v7136_v54 = vld [vmem:[#allocation7 + $0x38] sm:$0xff] }
 0x712   :  { %2841 = vmatpush.msrb.mxu1 %v2592_v59  ;;  %2864 = vmatpush.msrb.mxu2 %v2593_v0  ;;  %v7140_v59 = vld [vmem:[#allocation7] sm:$0xff]  ;;  %v7142_v0 = vld [vmem:[#allocation7 + $0x8] sm:$0xff] }
 0x713   :  { %2887 = vmatpush.msrb.mxu3 %v2594_v21  ;;  %2910 = vmatpush.msra.mxu0 %v2595_v7  ;;  %v7146_v21 = vld [vmem:[#allocation7 + $0x10] sm:$0xff]  ;;  %v7148_v7 = vld [vmem:[#allocation7 + $0x18] sm:$0xff] }
 0x714   :  { %2842 = vmatmul.f32.vlgmr.msrb.gmra.mxu1 %v6944_v35  ;;  %2865 = vmatmul.f32.vlgmr.msrb.gmra.mxu2 %v6944_v35 }
 0x715   :  { %2888 = vmatmul.f32.vlgmr.msrb.gmra.mxu3 %v6944_v35  ;;  %2911 = vmatmul.f32.vlgmr.msra.gmra.mxu0 %v6944_v35  ;;  %v7050_v35 = vld [vmem:[#allocation7 + $0x110] sm:$0xff] }
 0x716   :  { %3226 = vmatpush.msra.mxu1 %v6956_v16  ;;  %3246 = vmatpush.msra.mxu2 %v6958_v10 }
 0x717   :  { %3266 = vmatpush.msra.mxu3 %v6962_v12  ;;  %3286 = vmatpush.msrb.mxu0 %v6964_v15 }
 0x718   :  { %3227 = vmatpush.msra.mxu1 %v6968_v18  ;;  %3247 = vmatpush.msra.mxu2 %v6970_v22 }
 0x719   :  { %3267 = vmatpush.msra.mxu3 %v6974_v24  ;;  %3287 = vmatpush.msrb.mxu0 %v6976_v37 }
 0x71a   :  { %3228 = vmatpush.msra.mxu1 %v6980_v29  ;;  %3248 = vmatpush.msra.mxu2 %v6982_v31 }
 0x71b   :  { %3268 = vmatpush.msra.mxu3 %v6986_v34  ;;  %3288 = vmatpush.msrb.mxu0 %v6988_v36 }
 0x71c   :  { %3229 = vmatpush.msra.mxu1 %v6992_v38  ;;  %3249 = vmatpush.msra.mxu2 %v6994_v41 }
 0x71d   :  { %3269 = vmatpush.msra.mxu3 %v6998_v43  ;;  %3289 = vmatpush.msrb.mxu0 %v7000_v44 }
 0x71e   :  { %2845 = vmatmul.f32.gmra.mxu1 %v6950_v39  ;;  %2868 = vmatmul.f32.gmra.mxu2 %v6950_v39 }
 0x71f   :  { %2891 = vmatmul.f32.gmra.mxu3 %v6950_v39  ;;  %2914 = vmatmul.f32.gmra.mxu0 %v6950_v39  ;;  %v7100_v39 = vld [vmem:[#allocation7 + $0x98] sm:$0xff] }
 0x720   :  { %3230 = vmatpush.msra.mxu1 %v7008_v45  ;;  %3250 = vmatpush.msra.mxu2 %v7010_v46 }
 0x721   :  { %3270 = vmatpush.msra.mxu3 %v7014_v48  ;;  %3290 = vmatpush.msrb.mxu0 %v7016_v50 }
 0x722   :  { %3231 = vmatpush.msra.mxu1 %v7020_v51  ;;  %3251 = vmatpush.msra.mxu2 %v7022_v52 }
 0x723   :  { %3271 = vmatpush.msra.mxu3 %v7026_v57  ;;  %3291 = vmatpush.msrb.mxu0 %v7028_v58 }
 0x724   :  { %3232 = vmatpush.msra.mxu1 %v7032_v61  ;;  %3252 = vmatpush.msra.mxu2 %v7034_v62 }
 0x725   :  { %3272 = vmatpush.msra.mxu3 %v7038_v63  ;;  %3292 = vmatpush.msrb.mxu0 %v7040_v11 }
 0x726   :  { %3233 = vmatpush.msra.mxu1 %v7044_v19  ;;  %3253 = vmatpush.msra.mxu2 %v7046_v23 }
 0x727   :  { %3273 = vmatpush.msra.mxu3 %v7050_v35  ;;  %3293 = vmatpush.msrb.mxu0 %v7052_v17 }
 0x728   :  { %3234 = vmatpush.msra.mxu1 %v7056_v42  ;;  %3254 = vmatpush.msra.mxu2 %v7058_v28 }
 0x729   :  { %3274 = vmatpush.msra.mxu3 %v7062_v32  ;;  %3294 = vmatpush.msrb.mxu0 %v7064_v13 }
 0x72a   :  { %3235 = vmatpush.msra.mxu1 %v7068_v14  ;;  %3255 = vmatpush.msra.mxu2 %v7070_v55 }
 0x72b   :  { %3275 = vmatpush.msra.mxu3 %v7074_v6  ;;  %3295 = vmatpush.msrb.mxu0 %v7076_v20 }
 0x72c   :  { %3236 = vmatpush.msra.mxu1 %v7080_v60  ;;  %3256 = vmatpush.msra.mxu2 %v7082_v47 }
 0x72d   :  { %3276 = vmatpush.msra.mxu3 %v7086_v25  ;;  %3296 = vmatpush.msrb.mxu0 %v7088_v27 }
 0x72e   :  { %3237 = vmatpush.msra.mxu1 %v7092_v56  ;;  %3257 = vmatpush.msra.mxu2 %v7094_v53 }
 0x72f   :  { %3277 = vmatpush.msra.mxu3 %v7098_v8  ;;  %3297 = vmatpush.msrb.mxu0 %v7100_v39 }
 0x730   :  { %3238 = vmatpush.msra.mxu1 %v7104_v5  ;;  %3258 = vmatpush.msra.mxu2 %v7106_v33 }
 0x731   :  { %3278 = vmatpush.msra.mxu3 %v7110_v2  ;;  %3298 = vmatpush.msrb.mxu0 %v7112_v4 }
 0x732   :  { %3239 = vmatpush.msra.mxu1 %v7116_v40  ;;  %3259 = vmatpush.msra.mxu2 %v7118_v9 }
 0x733   :  { %3279 = vmatpush.msra.mxu3 %v7122_v30  ;;  %3299 = vmatpush.msrb.mxu0 %v7124_v26  ;;  %v8265_v26 = vmov 0.0  }
 0x734   :  { %3240 = vmatpush.msra.mxu1 %v7128_v49  ;;  %3260 = vmatpush.msra.mxu2 %v7130_v3 }
 0x735   :  { %3280 = vmatpush.msra.mxu3 %v7134_v1  ;;  %3300 = vmatpush.msrb.mxu0 %v7136_v54 }
 0x736   :  { %3241 = vmatpush.msra.mxu1 %v7140_v59  ;;  %3261 = vmatpush.msra.mxu2 %v7142_v0 }
 0x737   :  { %3281 = vmatpush.msra.mxu3 %v7146_v21  ;;  %3301 = vmatpush.msrb.mxu0 %v7148_v7 }
 0x738   :  { %3242 = vmatmul.f32.vlgmr.msra.gmra.mxu1 %v8265_v26  ;;  %3262 = vmatmul.f32.vlgmr.msra.gmra.mxu2 %v8265_v26 }
 0x739   :  { %3282 = vmatmul.f32.vlgmr.msra.gmra.mxu3 %v8265_v26  ;;  %3302 = vmatmul.f32.vlgmr.msrb.gmra.mxu0 %v8265_v26 }
 0x73a   :  { %3442 = vmatpush.msrb.mxu1 %v6956_v16  ;;  %3462 = vmatpush.msrb.mxu2 %v6958_v10  ;;  %v8266_v16 = vld [vmem:[#allocation34_spill] sm:$0xff] }
 0x73b   :  { %3482 = vmatpush.msrb.mxu3 %v6962_v12  ;;  %3502 = vmatpush.msra.mxu0 %v6964_v15  ;;  %v7227_v10 = vld [vmem:[%s8031_s6] sm:$0xff] }
 0x73c   :  { %3443 = vmatpush.msrb.mxu1 %v6968_v18  ;;  %3463 = vmatpush.msrb.mxu2 %v6970_v22  ;;  %v2718_v12 = vperm.slane %v7227_v10, 0  ;;  %v2721_v15 = vperm.slane %v7227_v10, 3 }
 0x73d   :  { %3483 = vmatpush.msrb.mxu3 %v6974_v24  ;;  %3503 = vmatpush.msra.mxu0 %v6976_v37 }
 0x73e   :  { %3444 = vmatpush.msrb.mxu1 %v6980_v29  ;;  %3464 = vmatpush.msrb.mxu2 %v6982_v31  ;;  %v2719_v29 = vperm.slane %v7227_v10, 1  ;;  %v2720_v31 = vperm.slane %v7227_v10, 2 }
 0x73f   :  { %3484 = vmatpush.msrb.mxu3 %v6986_v34  ;;  %3504 = vmatpush.msra.mxu0 %v6988_v36 }
 0x740   :  { %3445 = vmatpush.msrb.mxu1 %v6992_v38  ;;  %3465 = vmatpush.msrb.mxu2 %v6994_v41 }
 0x741   :  { %3485 = vmatpush.msrb.mxu3 %v6998_v43  ;;  %3505 = vmatpush.msra.mxu0 %v7000_v44 }
 0x742   :  { %3446 = vmatpush.msrb.mxu1 %v7008_v45  ;;  %3466 = vmatpush.msrb.mxu2 %v7010_v46 }
 0x743   :  { %3486 = vmatpush.msrb.mxu3 %v7014_v48  ;;  %3506 = vmatpush.msra.mxu0 %v7016_v50  ;;  %v2722_v50 = vperm.slane %v7227_v10, 4 }
 0x744   :  { %3447 = vmatpush.msrb.mxu1 %v7020_v51  ;;  %3467 = vmatpush.msrb.mxu2 %v7022_v52  ;;  %v2725_v52 = vperm.slane %v7227_v10, 7 }
 0x745   :  { %3487 = vmatpush.msrb.mxu3 %v7026_v57  ;;  %3507 = vmatpush.msra.mxu0 %v7028_v58 }
 0x746   :  { %3448 = vmatpush.msrb.mxu1 %v7032_v61  ;;  %3468 = vmatpush.msrb.mxu2 %v7034_v62 }
 0x747   :  { %3488 = vmatpush.msrb.mxu3 %v7038_v63  ;;  %3508 = vmatpush.msra.mxu0 %v7040_v11 }
 0x748   :  { %3449 = vmatpush.msrb.mxu1 %v7044_v19  ;;  %3469 = vmatpush.msrb.mxu2 %v7046_v23  ;;  %v2723_v19 = vperm.slane %v7227_v10, 5 }
 0x749   :  { %3489 = vmatpush.msrb.mxu3 %v7050_v35  ;;  %3509 = vmatpush.msra.mxu0 %v7052_v17  ;;  %v2724_v17 = vperm.slane %v7227_v10, 6 }
 0x74a   :  { %3450 = vmatpush.msrb.mxu1 %v7056_v42  ;;  %3470 = vmatpush.msrb.mxu2 %v7058_v28 }
 0x74b   :  { %3490 = vmatpush.msrb.mxu3 %v7062_v32  ;;  %3510 = vmatpush.msra.mxu0 %v7064_v13 }
 0x74c   :  { %3451 = vmatpush.msrb.mxu1 %v7068_v14  ;;  %3471 = vmatpush.msrb.mxu2 %v7070_v55 }
 0x74d   :  { %3491 = vmatpush.msrb.mxu3 %v7074_v6  ;;  %3511 = vmatpush.msra.mxu0 %v7076_v20 }
 0x74e   :  { %3452 = vmatpush.msrb.mxu1 %v7080_v60  ;;  %3472 = vmatpush.msrb.mxu2 %v7082_v47 }
 0x74f   :  { %3492 = vmatpush.msrb.mxu3 %v7086_v25  ;;  %3512 = vmatpush.msra.mxu0 %v7088_v27 }
 0x750   :  { %3453 = vmatpush.msrb.mxu1 %v7092_v56  ;;  %3473 = vmatpush.msrb.mxu2 %v7094_v53 }
 0x751   :  { %3493 = vmatpush.msrb.mxu3 %v7098_v8  ;;  %3513 = vmatpush.msra.mxu0 %v7100_v39 }
 0x752   :  { %3454 = vmatpush.msrb.mxu1 %v7104_v5  ;;  %3474 = vmatpush.msrb.mxu2 %v7106_v33 }
 0x753   :  { %3494 = vmatpush.msrb.mxu3 %v7110_v2  ;;  %3514 = vmatpush.msra.mxu0 %v7112_v4 }
 0x754   :  { %3455 = vmatpush.msrb.mxu1 %v7116_v40  ;;  %3475 = vmatpush.msrb.mxu2 %v7118_v9 }
 0x755   :  { %3495 = vmatpush.msrb.mxu3 %v7122_v30  ;;  %3515 = vmatpush.msra.mxu0 %v8266_v16 }
 0x756   :  { %3456 = vmatpush.msrb.mxu1 %v7128_v49  ;;  %3476 = vmatpush.msrb.mxu2 %v7130_v3 }
 0x757   :  { %3496 = vmatpush.msrb.mxu3 %v7134_v1  ;;  %3516 = vmatpush.msra.mxu0 %v7136_v54 }
 0x758   :  { %3457 = vmatpush.msrb.mxu1 %v7140_v59  ;;  %3477 = vmatpush.msrb.mxu2 %v7142_v0 }
 0x759   :  { %3497 = vmatpush.msrb.mxu3 %v7146_v21  ;;  %3517 = vmatpush.msra.mxu0 %v7148_v7 }
 0x77d   :  { %v2751_v18 = vpop.f32.mrf.mxu1 }
 0x77e   :  { %v2752_v22 = vadd.f32 %v2751_v18, %v2718_v12  ;;  %v2820_v24 = vpop.f32.mrf.mxu0 }
 0x77f   :  { %v2821_v37 = vadd.f32 %v2820_v24, %v2721_v15 }
 0x780   :  { %2918 = vst [vmem:[#allocation2 + $0x30] sm:$0xff] %v2752_v22 }
 0x781   :  { %2921 = vst [vmem:[#allocation2 + $0x18] sm:$0xff] %v2821_v37 }
 0x783   :  { %v2774_v34 = vpop.f32.mrf.mxu2 }
 0x784   :  { %v2775_v36 = vadd.f32 %v2774_v34, %v2719_v29  ;;  %v2797_v38 = vpop.f32.mrf.mxu3 }
 0x785   :  { %v2798_v41 = vadd.f32 %v2797_v38, %v2720_v31 }
 0x786   :  { %2919 = vst [vmem:[#allocation2] sm:$0xff] %v2775_v36 }
 0x787   :  { %v2754_v43 = vpop.f32.mrf.mxu1  ;;  %2920 = vst [vmem:[#allocation2 + $0x58] sm:$0xff] %v2798_v41 }
 0x788   :  { %v2755_v44 = vadd.f32 %v2754_v43, %v2718_v12  ;;  %v2823_v45 = vpop.f32.mrf.mxu0 }
 0x789   :  { %v2824_v46 = vadd.f32 %v2823_v45, %v2721_v15 }
 0x78a   :  { %2926 = vst [vmem:[#allocation2 + $0x40] sm:$0xff] %v2755_v44 }
 0x78b   :  { %2929 = vst [vmem:[#allocation2 + $0x38] sm:$0xff] %v2824_v46 }
 0x78d   :  { %v2777_v48 = vpop.f32.mrf.mxu2 }
 0x78e   :  { %v2800_v51 = vpop.f32.mrf.mxu3  ;;  %v2778_v57 = vadd.f32 %v2777_v48, %v2719_v29 }
 0x78f   :  { %v2801_v58 = vadd.f32 %v2800_v51, %v2720_v31 }
 0x790   :  { %2927 = vst [vmem:[#allocation2 + $0x20] sm:$0xff] %v2778_v57 }
 0x791   :  { %v2843_v61 = vpop.f32.mrf.mxu1  ;;  %2928 = vst [vmem:[#allocation2 + $0x10] sm:$0xff] %v2801_v58  ;;  %v3074_v32 = vld [vmem:[#allocation2 + $0x40] sm:$0xc]  ;;  %v3102_v13 = vld [vmem:[#allocation2 + $0x40] sm:$0x30] }
 0x792   :  { %v2844_v62 = vadd.f32 %v2843_v61, %v2722_v50  ;;  %v2912_v63 = vpop.f32.mrf.mxu0  ;;  %v3077_v14 = vld [vmem:[#allocation2 + $0x38] sm:$0xc]  ;;  %v3105_v20 = vld [vmem:[#allocation2 + $0x38] sm:$0x30]  ;;  %v3130_v8 = vld [vmem:[#allocation2 + $0x40] sm:$0xc0] }
 0x793   :  { %v2913_v11 = vadd.f32 %v2912_v63, %v2725_v52  ;;  %v3049_v61 = vld [vmem:[#allocation2 + $0x38] sm:$0x3] }
 0x794   :  { %2922 = vst [vmem:[#allocation2 + $0x50] sm:$0xff] %v2844_v62 }
 0x795   :  { %2925 = vst [vmem:[#allocation2 + $0x48] sm:$0xff] %v2913_v11  ;;  %v3046_v11 = vld [vmem:[#allocation2 + $0x40] sm:$0x3] }
 0x797   :  { %v2866_v23 = vpop.f32.mrf.mxu2  ;;  %v3075_v4 = vld [vmem:[#allocation2 + $0x20] sm:$0xc]  ;;  %v3103_v40 = vld [vmem:[#allocation2 + $0x20] sm:$0x30] }
 0x798   :  { %v2867_v35 = vadd.f32 %v2866_v23, %v2723_v19  ;;  %v2889_v42 = vpop.f32.mrf.mxu3  ;;  %v3076_v49 = vld [vmem:[#allocation2 + $0x10] sm:$0xc]  ;;  %v3104_v0 = vld [vmem:[#allocation2 + $0x10] sm:$0x30]  ;;  %v3132_v7 = vld [vmem:[#allocation2 + $0x10] sm:$0xc0] }
 0x799   :  { %v2890_v28 = vadd.f32 %v2889_v42, %v2724_v17 }
 0x79a   :  { %2923 = vst [vmem:[#allocation2 + $0x68] sm:$0xff] %v2867_v35  ;;  %v3047_v35 = vld [vmem:[#allocation2 + $0x20] sm:$0x3] }
 0x79b   :  { %v3078_v55 = vld [vmem:[#allocation2 + $0x50] sm:$0x30]  ;;  %v3106_v6 = vld [vmem:[#allocation2 + $0x50] sm:$0xc]  ;;  %2924 = vst [vmem:[#allocation2 + $0x8] sm:$0xff] %v2890_v28  ;;  %v2846_v37 = vpop.f32.mrf.mxu1 }
 0x79c   :  { %v3086_v60 = vrot.slane %v3078_v55, 2  ;;  %v3114_v47 = vrot.slane %v3106_v6, 6  ;;  %v3134_v25 = vld [vmem:[#allocation2 + $0x50] sm:$0x3]  ;;  %v3081_v56 = vld [vmem:[#allocation2 + $0x48] sm:$0x30]  ;;  %v2915_v34 = vpop.f32.mrf.mxu0  ;;  %v2847_v46 = vadd.f32 %v2846_v37, %v2722_v50 }
 0x79d   :  { %v3142_v27 = vrot.slane %v3134_v25, 2  ;;  %v3109_v53 = vld [vmem:[#allocation2 + $0x48] sm:$0xc]  ;;  %v3089_v33 = vrot.slane %v3081_v56, 2  ;;  %v3050_v21 = vld [vmem:[#allocation2 + $0x50] sm:$0xc0]  ;;  %v2916_v58 = vadd.f32 %v2915_v34, %v2725_v52 }
 0x79e   :  { %v3094_v39 = vadd.f32 %v3086_v60, %v3074_v32  ;;  %v3122_v5 = vadd.f32 %v3114_v47, %v3102_v13  ;;  %v3117_v2 = vrot.slane %v3109_v53, 6  ;;  %v3053_v16 = vld [vmem:[#allocation2 + $0x48] sm:$0xc0]  ;;  %v3058_v44 = vrot.slane %v3050_v21, 6  ;;  %2930 = vst [vmem:[#allocation2 + $0x60] sm:$0xff] %v2847_v46 }
 0x79f   :  { %v3150_v9 = vadd.f32 %v3142_v27, %v3130_v8  ;;  %v3097_v3 = vadd.f32 %v3089_v33, %v3077_v14  ;;  %v3061_v51 = vrot.slane %v3053_v16, 6  ;;  %2933 = vst [vmem:[#allocation2 + $0x28] sm:$0xff] %v2916_v58  ;;  %v2962_v52 = vld [vmem:[#allocation2 + $0x30] sm:$0xc]  ;;  %v2990_v32 = vld [vmem:[#allocation2 + $0x30] sm:$0x30] }
 0x7a0   :  { %3098 = vst [vmem:[#allocation3 + $0x18] sm:$0xc] %v3094_v39  ;;  %v3125_v1 = vadd.f32 %v3117_v2, %v3105_v20  ;;  %v3066_v50 = vadd.f32 %v3058_v44, %v3046_v11  ;;  %v3018_v14 = vld [vmem:[#allocation2 + $0x30] sm:$0xc0]  ;;  %v2993_v47 = vld [vmem:[#allocation2 + $0x18] sm:$0x30] }
 0x7a1   :  { %v3079_v30 = vld [vmem:[#allocation2 + $0x68] sm:$0x30]  ;;  %v3107_v26 = vld [vmem:[#allocation2 + $0x68] sm:$0xc]  ;;  %3126 = vst [vmem:[#allocation3 + $0x18] sm:$0x30] %v3122_v5  ;;  %v2869_v43 = vpop.f32.mrf.mxu2  ;;  %v3069_v42 = vadd.f32 %v3061_v51, %v3049_v61 }
 0x7a2   :  { %v3087_v54 = vrot.slane %v3079_v30, 2  ;;  %v3115_v59 = vrot.slane %v3107_v26, 6  ;;  %3154 = vst [vmem:[#allocation3 + $0x18] sm:$0xc0] %v3150_v9  ;;  %v3080_v18 = vld [vmem:[#allocation2 + $0x8] sm:$0x30]  ;;  %v2892_v48 = vpop.f32.mrf.mxu3  ;;  %v2870_v63 = vadd.f32 %v2869_v43, %v2723_v19 }
 0x7a3   :  { %3101 = vst [vmem:[#allocation3 + $0x30] sm:$0xc] %v3097_v3  ;;  %v3088_v22 = vrot.slane %v3080_v18, 2  ;;  %v3108_v24 = vld [vmem:[#allocation2 + $0x8] sm:$0xc]  ;;  %v2893_v23 = vadd.f32 %v2892_v48, %v2724_v17 }
 0x7a4   :  { %v3095_v12 = vadd.f32 %v3087_v54, %v3075_v4  ;;  %v3123_v15 = vadd.f32 %v3115_v59, %v3103_v40  ;;  %3129 = vst [vmem:[#allocation3 + $0x30] sm:$0x30] %v3125_v1  ;;  %v3116_v29 = vrot.slane %v3108_v24, 6  ;;  %v3136_v31 = vld [vmem:[#allocation2 + $0x8] sm:$0x3] }
 0x7a5   :  { %v3051_v36 = vld [vmem:[#allocation2 + $0x68] sm:$0xc0]  ;;  %v3096_v38 = vadd.f32 %v3088_v22, %v3076_v49  ;;  %v3144_v41 = vrot.slane %v3136_v31, 2  ;;  %2931 = vst [vmem:[#allocation2 + $0x70] sm:$0xff] %v2870_v63  ;;  %v2966_v13 = vld [vmem:[#allocation2 + $0x60] sm:$0x30] }
 0x7a6   :  { %3099 = vst [vmem:[#allocation3 + $0x8] sm:$0xc] %v3095_v12  ;;  %v3124_v45 = vadd.f32 %v3116_v29, %v3104_v0  ;;  %v3059_v62 = vrot.slane %v3051_v36, 6  ;;  %v2994_v19 = vld [vmem:[#allocation2 + $0x60] sm:$0xc]  ;;  %v2974_v55 = vrot.slane %v2966_v13, 2 }
 0x7a7   :  { %3127 = vst [vmem:[#allocation3 + $0x8] sm:$0x30] %v3123_v15  ;;  %v3152_v57 = vadd.f32 %v3144_v41, %v3132_v7  ;;  %v3002_v6 = vrot.slane %v2994_v19, 6  ;;  %v3022_v10 = vld [vmem:[#allocation2 + $0x60] sm:$0x3] }
 0x7a8   :  { %3100 = vst [vmem:[#allocation3 + $0x38] sm:$0xc] %v3096_v38  ;;  %v3067_v28 = vadd.f32 %v3059_v62, %v3047_v35  ;;  %v2965_v17 = vld [vmem:[#allocation2 + $0x18] sm:$0xc]  ;;  %v3030_v20 = vrot.slane %v3022_v10, 2  ;;  %v2982_v27 = vadd.f32 %v2974_v55, %v2962_v52 }
 0x7a9   :  { %3128 = vst [vmem:[#allocation3 + $0x38] sm:$0x30] %v3124_v45  ;;  %v2969_v60 = vld [vmem:[#allocation2 + $0x28] sm:$0x30]  ;;  %v3021_v25 = vld [vmem:[#allocation2 + $0x18] sm:$0xc0]  ;;  %v3010_v56 = vadd.f32 %v3002_v6, %v2990_v32 }
 0x7aa   :  { %3156 = vst [vmem:[#allocation3 + $0x38] sm:$0xc0] %v3152_v57  ;;  %v2977_v53 = vrot.slane %v2969_v60, 2  ;;  %v2997_v8 = vld [vmem:[#allocation2 + $0x28] sm:$0xc]  ;;  %v3038_v2 = vadd.f32 %v3030_v20, %v3018_v14 }
 0x7ab   :  { %2932 = vst [vmem:[#allocation2 + $0x78] sm:$0xff] %v2893_v23  ;;  %v3025_v39 = vld [vmem:[#allocation2 + $0x28] sm:$0x3]  ;;  %v2963_v5 = vld [vmem:[#allocation2] sm:$0xc]  ;;  %v3005_v4 = vrot.slane %v2997_v8, 6 }
 0x7ac   :  { %3070 = vst [vmem:[#allocation3 + $0x18] sm:$0x3] %v3066_v50  ;;  %v2938_v33 = vld [vmem:[#allocation2 + $0x60] sm:$0xc0]  ;;  %v3033_v40 = vrot.slane %v3025_v39, 2  ;;  %v2985_v49 = vadd.f32 %v2977_v53, %v2965_v17 }
 0x7ad   :  { %3073 = vst [vmem:[#allocation3 + $0x30] sm:$0x3] %v3069_v42  ;;  %v2967_v9 = vld [vmem:[#allocation2 + $0x70] sm:$0x30]  ;;  %v2991_v30 = vld [vmem:[#allocation2] sm:$0x30]  ;;  %v3013_v59 = vadd.f32 %v3005_v4, %v2993_v47 }
 0x7ae   :  { %3071 = vst [vmem:[#allocation3 + $0x8] sm:$0x3] %v3067_v28  ;;  %v2941_v26 = vld [vmem:[#allocation2 + $0x28] sm:$0xc0]  ;;  %v2975_v3 = vrot.slane %v2967_v9, 2  ;;  %v3041_v0 = vadd.f32 %v3033_v40, %v3021_v25  ;;  %v2946_v34 = vrot.slane %v2938_v33, 6 }
 0x7af   :  { %2986 = vst [vmem:[#allocation3 + $0x28] sm:$0xc] %v2982_v27  ;;  %v2995_v1 = vld [vmem:[#allocation2 + $0x70] sm:$0xc]  ;;  %v3019_v54 = vld [vmem:[#allocation2] sm:$0xc0] }
 0x7b0   :  { %3014 = vst [vmem:[#allocation3 + $0x28] sm:$0x30] %v3010_v56  ;;  %v3003_v21 = vrot.slane %v2995_v1, 6  ;;  %v3023_v7 = vld [vmem:[#allocation2 + $0x70] sm:$0x3]  ;;  %v2983_v12 = vadd.f32 %v2975_v3, %v2963_v5  ;;  %v2949_v45 = vrot.slane %v2941_v26, 6 }
 0x7b1   :  { %3042 = vst [vmem:[#allocation3 + $0x28] sm:$0xc0] %v3038_v2  ;;  %v2939_v16 = vld [vmem:[#allocation2 + $0x70] sm:$0xc0]  ;;  %v3031_v15 = vrot.slane %v3023_v7, 2 }
 0x7b2   :  { %v2964_v18 = vld [vmem:[#allocation2 + $0x58] sm:$0xc]  ;;  %v3052_v22 = vld [vmem:[#allocation2 + $0x8] sm:$0xc0]  ;;  %2989 = vst [vmem:[#allocation3 + $0x20] sm:$0xc] %v2985_v49  ;;  %v3011_v24 = vadd.f32 %v3003_v21, %v2991_v30 }
 0x7b3   :  { %v2940_v37 = vld [vmem:[#allocation2 + $0x78] sm:$0xc0]  ;;  %v2968_v29 = vld [vmem:[#allocation2 + $0x78] sm:$0x30]  ;;  %3017 = vst [vmem:[#allocation3 + $0x20] sm:$0x30] %v3013_v59  ;;  %v3039_v36 = vadd.f32 %v3031_v15, %v3019_v54 }
 0x7b4   :  { %v2992_v31 = vld [vmem:[#allocation2 + $0x58] sm:$0x30]  ;;  %v2976_v38 = vrot.slane %v2968_v29, 2  ;;  %v2996_v41 = vld [vmem:[#allocation2 + $0x78] sm:$0xc]  ;;  %v2947_v58 = vrot.slane %v2939_v16, 6 }
 0x7b5   :  { %v2934_v43 = vld [vmem:[#allocation2 + $0x30] sm:$0x3]  ;;  %v3020_v44 = vld [vmem:[#allocation2 + $0x58] sm:$0xc0]  ;;  %3045 = vst [vmem:[#allocation3 + $0x20] sm:$0xc0] %v3041_v0  ;;  %v3243_v25 = vpop.f32.mrf.mxu1 }
 0x7b6   :  { %v3004_v46 = vrot.slane %v2996_v41, 6  ;;  %v3024_v48 = vld [vmem:[#allocation2 + $0x78] sm:$0x3]  ;;  %v3137_v57 = vld [vmem:[#allocation2 + $0x48] sm:$0x3]  ;;  %v2984_v61 = vadd.f32 %v2976_v38, %v2964_v18  ;;  %v2948_v23 = vrot.slane %v2940_v37, 6  ;;  %v2954_v52 = vadd.f32 %v2946_v34, %v2934_v43  ;;  %v3303_v27 = vpop.f32.mrf.mxu0 }
 0x7b7   :  { %v2937_v51 = vld [vmem:[#allocation2 + $0x18] sm:$0x3]  ;;  %2987 = vst [vmem:[#allocation3] sm:$0xc] %v2983_v12  ;;  %v3032_v62 = vrot.slane %v3024_v48, 2  ;;  %v3060_v42 = vrot.slane %v3052_v22, 6 }
 0x7b8   :  { %v2935_v63 = vld [vmem:[#allocation2] sm:$0x3]  ;;  %v3135_v11 = vld [vmem:[#allocation2 + $0x68] sm:$0x3]  ;;  %3015 = vst [vmem:[#allocation3] sm:$0x30] %v3011_v24  ;;  %v3012_v50 = vadd.f32 %v3004_v46, %v2992_v31  ;;  %v2957_v19 = vadd.f32 %v2949_v45, %v2937_v51 }
 0x7b9   :  { %v2936_v35 = vld [vmem:[#allocation2 + $0x58] sm:$0x3]  ;;  %3043 = vst [vmem:[#allocation3] sm:$0xc0] %v3039_v36  ;;  %v3040_v28 = vadd.f32 %v3032_v62, %v3020_v44  ;;  %v3048_v32 = vld [vmem:[#allocation2 + $0x10] sm:$0x3]  ;;  %v2955_v6 = vadd.f32 %v2947_v58, %v2935_v63 }
 0x7ba   :  { %v3145_v13 = vrot.slane %v3137_v57, 2  ;;  %2988 = vst [vmem:[#allocation3 + $0x10] sm:$0xc] %v2984_v61  ;;  %v3133_v14 = vld [vmem:[#allocation2 + $0x38] sm:$0xc0]  ;;  %v3143_v55 = vrot.slane %v3135_v11, 2  ;;  %v2956_v10 = vadd.f32 %v2948_v23, %v2936_v35  ;;  %v3068_v17 = vadd.f32 %v3060_v42, %v3048_v32 }
 0x7bb   :  { %3016 = vst [vmem:[#allocation3 + $0x10] sm:$0x30] %v3012_v50  ;;  %v3131_v20 = vld [vmem:[#allocation2 + $0x20] sm:$0xc0]  ;;  %v3263_v53 = vpop.f32.mrf.mxu2 }
 0x7bc   :  { %3044 = vst [vmem:[#allocation3 + $0x10] sm:$0xc0] %v3040_v28  ;;  %v3153_v60 = vadd.f32 %v3145_v13, %v3133_v14  ;;  %v3151_v47 = vadd.f32 %v3143_v55, %v3131_v20  ;;  %v3283_v0 = vpop.f32.mrf.mxu3  ;;  %v7256_v55 = vld [vmem:[#allocation7 + $0x1e0] sm:$0xff] }
 0x7bd   :  { %2958 = vst [vmem:[#allocation3 + $0x28] sm:$0x3] %v2954_v52  ;;  %3676 = vmatpush.msra.mxu1 %v7256_v55  ;;  %v7268_v20 = vld [vmem:[#allocation7 + $0x1c0] sm:$0xff] }
 0x7be   :  { %2961 = vst [vmem:[#allocation3 + $0x20] sm:$0x3] %v2957_v19 }
 0x7bf   :  { %2959 = vst [vmem:[#allocation3] sm:$0x3] %v2955_v6  ;;  %v7258_v6 = vld [vmem:[#allocation7 + $0x1e8] sm:$0xff]  ;;  %3677 = vmatpush.msra.mxu1 %v7268_v20 }
 0x7c0   :  { %2960 = vst [vmem:[#allocation3 + $0x10] sm:$0x3] %v2956_v10  ;;  %v7260_v10 = vld [vmem:[#allocation7 + $0x1f0] sm:$0xff]  ;;  %3696 = vmatpush.msra.mxu2 %v7258_v6 }
 0x7c1   :  { %3072 = vst [vmem:[#allocation3 + $0x38] sm:$0x3] %v3068_v17  ;;  %v7264_v17 = vld [vmem:[#allocation7 + $0x1f8] sm:$0xff]  ;;  %3716 = vmatpush.msra.mxu3 %v7260_v10 }
 0x7c2   :  { %3157 = vst [vmem:[#allocation3 + $0x30] sm:$0xc0] %v3153_v60  ;;  %3736 = vmatpush.msrb.mxu0 %v7264_v17  ;;  %v7270_v60 = vld [vmem:[#allocation7 + $0x1c8] sm:$0xff] }
 0x7c3   :  { %3155 = vst [vmem:[#allocation3 + $0x8] sm:$0xc0] %v3151_v47  ;;  %v7272_v47 = vld [vmem:[#allocation7 + $0x1d0] sm:$0xff]  ;;  %3697 = vmatpush.msra.mxu2 %v7270_v60 }
 0x7c4   :  { %v3158_v56 = vld [vmem:[#allocation3 + $0x28] sm:$0x3]  ;;  %8267 = vst [vmem:[#allocation50_spill] sm:$0xff] %v7258_v6  ;;  %3717 = vmatpush.msra.mxu3 %v7272_v47 }
 0x7c5   :  { %v3306_v8 = vadd.f32 %v3243_v25, %v3158_v56  ;;  %v3161_v39 = vld [vmem:[#allocation3 + $0x20] sm:$0x3]  ;;  %8268 = vst [vmem:[#allocation35_spill] sm:$0xff] %v7260_v10 }
 0x7c6   :  { %v3309_v5 = vadd.f32 %v3303_v27, %v3161_v39  ;;  %v3159_v33 = vld [vmem:[#allocation3] sm:$0x3]  ;;  %8269 = vst [vmem:[#allocation36_spill] sm:$0xff] %v7264_v17  ;;  %v7276_v27 = vld [vmem:[#allocation7 + $0x1d8] sm:$0xff]  ;;  %v7282_v39 = vld [vmem:[#allocation7 + $0x1a8] sm:$0xff] }
 0x7c7   :  { %v5304_v2 = vmul.f32 -1.442695, %v3306_v8  ;;  %v3307_v4 = vadd.f32 %v3263_v53, %v3159_v33  ;;  %v3160_v59 = vld [vmem:[#allocation3 + $0x10] sm:$0x3]  ;;  %3737 = vmatpush.msrb.mxu0 %v7276_v27  ;;  %v7280_v8 = vld [vmem:[#allocation7 + $0x1a0] sm:$0xff]  ;;  %3698 = vmatpush.msra.mxu2 %v7282_v39 }
 0x7c8   :  { %v5306_v40 = vmul.f32 -1.442695, %v3309_v5  ;;  %v3308_v15 = vadd.f32 %v3283_v0, %v3160_v59  ;;  %v7284_v5 = vld [vmem:[#allocation7 + $0x1b0] sm:$0xff]  ;;  %v3374_v33 = vld [vmem:[#allocation3 + $0x28] sm:$0xc]  ;;  %3678 = vmatpush.msra.mxu1 %v7280_v8  ;;  %v7304_v59 = vld [vmem:[#allocation7 + $0x160] sm:$0xff] }
 0x7c9   :  { %5478 = vpow2.f32 %v5304_v2  ;;  %v5305_v9 = vmul.f32 -1.442695, %v3307_v4  ;;  %v3377_v2 = vld [vmem:[#allocation3 + $0x20] sm:$0xc]  ;;  %3718 = vmatpush.msra.mxu3 %v7284_v5  ;;  %v7306_v0 = vld [vmem:[#allocation7 + $0x168] sm:$0xff] }
 0x7ca   :  { %5480 = vpow2.f32 %v5306_v40  ;;  %v7288_v40 = vld [vmem:[#allocation7 + $0x1b8] sm:$0xff] }
 0x7cb   :  { %5482 = vpow2.f32 %v5305_v9  ;;  %3738 = vmatpush.msrb.mxu0 %v7288_v40 }
 0x7cf   :  { %v5479_v30 = vpop.eup %5478 }
 0x7d0   :  { %v5481_v26 = vpop.eup %5480  ;;  %v3313_v49 = vadd.f32 1.0, %v5479_v30  ;;  %v7292_v30 = vld [vmem:[#allocation7 + $0x180] sm:$0xff] }
 0x7d1   :  { %v5483_v3 = vpop.eup %5482  ;;  %v3352_v1 = vadd.f32 1.0, %v5481_v26  ;;  %v7294_v26 = vld [vmem:[#allocation7 + $0x188] sm:$0xff]  ;;  %3679 = vmatpush.msra.mxu1 %v7292_v30 }
 0x7d2   :  { %5484 = vrcp.f32 %v3313_v49  ;;  %v3332_v54 = vadd.f32 1.0, %v5483_v3  ;;  %v3325_v37 = vand.u32 2147483648, %v3313_v49  ;;  %v3323_v34 = vand.u32 2147483647, %v3313_v49  ;;  %3699 = vmatpush.msra.mxu2 %v7294_v26 }
 0x7d3   :  { %5486 = vrcp.f32 %v3352_v1  ;;  %vm3319_vm3 = vweird.f32 %v3313_v49  ;;  %v3364_v42 = vand.u32 2147483648, %v3352_v1  ;;  %vm3358_vm11 = vweird.f32 %v3352_v1  ;;  %3680 = vmatpush.msra.mxu1 %v7304_v59 }
 0x7d4   :  { %5488 = vrcp.f32 %v3332_v54  ;;  %v3344_v36 = vand.u32 2147483648, %v3332_v54  ;;  %v3342_v43 = vand.u32 2147483647, %v3332_v54  ;;  %v3326_v45 = vor.u32 1.1754944e-38, %v3325_v37  ;;  %3700 = vmatpush.msra.mxu2 %v7306_v0  ;;  %v3375_v37 = vld [vmem:[#allocation3] sm:$0xc] }
 0x7d5   :  { %5490 = vtanh.f32 %v3308_v15  ;;  %vm3338_vm6 = vweird.f32 %v3332_v54  ;;  %vm3324_vm7 = vcmp.eq.f32.partialorder %v3323_v34, 8.507059e+37  ;;  %v3362_v28 = vand.u32 2147483647, %v3352_v1  ;;  %v7328_v34 = vld [vmem:[#allocation7 + $0x120] sm:$0xff] }
 0x7d6   :  { %v3345_v51 = vor.u32 1.1754944e-38, %v3344_v36  ;;  %vm3343_vm9 = vcmp.eq.f32.partialorder %v3342_v43, 8.507059e+37  ;;  %v3365_v32 = vor.u32 1.1754944e-38, %v3364_v42  ;;  %v7330_v36 = vld [vmem:[#allocation7 + $0x128] sm:$0xff]  ;;  %v7368_v42 = vld [vmem:[#allocation7 + $0xd0] sm:$0xff] }
 0x7d7   :  { %vm3363_vm13 = vcmp.eq.f32.partialorder %v3362_v28, 8.507059e+37  ;;  %v7370_v28 = vld [vmem:[#allocation7 + $0xd8] sm:$0xff] }
 0x7d8   :  { %v5485_v21 = vpop.eup %5484 }
 0x7d9   :  { %v5487_v7 = vpop.eup %5486  ;;  %v3315_v16 = vmul.f32 %v5485_v21, %v3313_v49  ;;  %vm3320_vm2 = vweird.f32 %v5485_v21  ;;  %v7296_v49 = vld [vmem:[#allocation7 + $0x190] sm:$0xff] }
 0x7da   :  { %v5489_v12 = vpop.eup %5488  ;;  %v3354_v24 = vmul.f32 %v5487_v7, %v3352_v1  ;;  %vm3321_vm5 = vmor %vm3319_vm3, %vm3320_vm2  ;;  %vm3359_vm10 = vweird.f32 %v5487_v7  ;;  %v7300_v1 = vld [vmem:[#allocation7 + $0x198] sm:$0xff]  ;;  %3719 = vmatpush.msra.mxu3 %v7296_v49 }
 0x7db   :  { %v3316_v18 = vsub.f32 1.0, %v3315_v16  ;;  %v3334_v22 = vmul.f32 %v5489_v12, %v3332_v54  ;;  %vm3339_vm4 = vweird.f32 %v5489_v12  ;;  %v5491_v61 = vpop.eup %5490  ;;  %vm3360_vm12 = vmor %vm3358_vm11, %vm3359_vm10  ;;  %3739 = vmatpush.msrb.mxu0 %v7300_v1 }
 0x7dc   :  { %v3355_v44 = vsub.f32 1.0, %v3354_v24  ;;  %vm3340_vm8 = vmor %vm3338_vm6, %vm3339_vm4  ;;  %v7320_v24 = vld [vmem:[#allocation7 + $0x150] sm:$0xff] }
 0x7dd   :  { %v3335_v29 = vsub.f32 1.0, %v3334_v22  ;;  %v3317_v31 = vmul.f32 %v5485_v21, %v3316_v18  ;;  %v7316_v18 = vld [vmem:[#allocation7 + $0x140] sm:$0xff]  ;;  %v7318_v22 = vld [vmem:[#allocation7 + $0x148] sm:$0xff] }
 0x7de   :  { %v3356_v62 = vmul.f32 %v5487_v7, %v3355_v44  ;;  %3681 = vmatpush.msra.mxu1 %v7316_v18  ;;  %3701 = vmatpush.msra.mxu2 %v7318_v22  ;;  %v7340_v44 = vld [vmem:[#allocation7 + $0x100] sm:$0xff] }
 0x7df   :  { %v3336_v38 = vmul.f32 %v5489_v12, %v3335_v29  ;;  %v3318_v41 = vadd.f32 %v5485_v21, %v3317_v31  ;;  %v7324_v29 = vld [vmem:[#allocation7 + $0x158] sm:$0xff] }
 0x7e0   :  { %v3357_v35 = vadd.f32 %v5487_v7, %v3356_v62  ;;  %3682 = vmatpush.msra.mxu1 %v7328_v34  ;;  %3702 = vmatpush.msra.mxu2 %v7330_v36  ;;  %v7358_v62 = vld [vmem:[#allocation7 + $0xf8] sm:$0xff] }
 0x7e1   :  { %v3322_v46 = vsel %vm3321_vm5, %v5485_v21, %v3318_v41  ;;  %v3337_v48 = vadd.f32 %v5489_v12, %v3336_v38  ;;  %v7308_v21 = vld [vmem:[#allocation7 + $0x170] sm:$0xff]  ;;  %v7336_v41 = vld [vmem:[#allocation7 + $0x138] sm:$0xff] }
 0x7e2   :  { %v3327_v57 = vsel %vm3324_vm7, %v3326_v45, %v3322_v46  ;;  %v3361_v52 = vsel %vm3360_vm12, %v5487_v7, %v3357_v35  ;;  %3720 = vmatpush.msra.mxu3 %v7308_v21  ;;  %v7332_v38 = vld [vmem:[#allocation7 + $0x130] sm:$0xff]  ;;  %v7342_v45 = vld [vmem:[#allocation7 + $0x108] sm:$0xff]  ;;  %3683 = vmatpush.msra.mxu1 %v7340_v44 }
 0x7e3   :  { %v3341_v58 = vsel %vm3340_vm8, %v5489_v12, %v3337_v48  ;;  %v3369_v23 = vmul.f32 %v5491_v61, %v3327_v57  ;;  %v3366_v19 = vsel %vm3363_vm13, %v3365_v32, %v3361_v52  ;;  %v7312_v12 = vld [vmem:[#allocation7 + $0x178] sm:$0xff]  ;;  %v7344_v46 = vld [vmem:[#allocation7 + $0x110] sm:$0xff]  ;;  %3703 = vmatpush.msra.mxu2 %v7342_v45  ;;  %v7352_v57 = vld [vmem:[#allocation7 + $0xe8] sm:$0xff] }
 0x7e4   :  { %v3346_v63 = vsel %vm3343_vm9, %v3345_v51, %v3341_v58  ;;  %3740 = vmatpush.msrb.mxu0 %v7312_v12  ;;  %3721 = vmatpush.msra.mxu3 %v7320_v24  ;;  %v7348_v48 = vld [vmem:[#allocation7 + $0x118] sm:$0xff]  ;;  %v7350_v51 = vld [vmem:[#allocation7 + $0xe0] sm:$0xff]  ;;  %v7356_v61 = vld [vmem:[#allocation7 + $0xf0] sm:$0xff] }
 0x7e5   :  { %v3368_v11 = vmul.f32 0.0, %v3346_v63  ;;  %v7360_v63 = vld [vmem:[#allocation7 + $0xc0] sm:$0xff]  ;;  %3684 = vmatpush.msra.mxu1 %v7350_v51  ;;  %3704 = vmatpush.msra.mxu2 %v7352_v57  ;;  %v7366_v35 = vld [vmem:[#allocation7 + $0xc8] sm:$0xff] }
 0x7e6   :  { %3741 = vmatpush.msrb.mxu0 %v7324_v29  ;;  %3722 = vmatpush.msra.mxu3 %v7332_v38  ;;  %v7374_v52 = vld [vmem:[#allocation7 + $0xa0] sm:$0xff]  ;;  %v7376_v32 = vld [vmem:[#allocation7 + $0xa8] sm:$0xff] }
 0x7e7   :  { %v7253_v50 = vadd.f32 %v3369_v23, %v3368_v11  ;;  %3685 = vmatpush.msra.mxu1 %v7360_v63  ;;  %3705 = vmatpush.msra.mxu2 %v7366_v35 }
 0x7e8   :  { %3742 = vmatpush.msrb.mxu0 %v7336_v41  ;;  %3723 = vmatpush.msra.mxu3 %v7344_v46 }
 0x7e9   :  { %5492 = vtanh.f32 %v7253_v50  ;;  %3686 = vmatpush.msra.mxu1 %v7374_v52  ;;  %3706 = vmatpush.msra.mxu2 %v7376_v32 }
 0x7ea   :  { %3743 = vmatpush.msrb.mxu0 %v7348_v48  ;;  %3724 = vmatpush.msra.mxu3 %v7356_v61 }
 0x7ec   :  { %3744 = vmatpush.msrb.mxu0 %v7358_v62  ;;  %3725 = vmatpush.msra.mxu3 %v7368_v42 }
 0x7ee   :  { %3745 = vmatpush.msrb.mxu0 %v7370_v28 }
 0x7ef   :  { %v5493_v13 = vpop.eup %5492 }
 0x7f0   :  { %v3372_v14 = vmul.f32 %v5493_v13, %v3366_v19  ;;  %v7381_v13 = vld [vmem:[#allocation7 + $0xb0] sm:$0xff]  ;;  %v7383_v19 = vld [vmem:[#allocation7 + $0xb8] sm:$0xff] }
 0x7f1   :  { %3726 = vmatpush.msra.mxu3 %v7381_v13  ;;  %3746 = vmatpush.msrb.mxu0 %v7383_v19 }
 0x7f2   :  { %3373 = vst [vmem:[#allocation4] sm:$0x3] %v3372_v14  ;;  %3458 = vmatmul.f32.vlgmr.msrb.gmra.mxu1 %v3372_v14  ;;  %3478 = vmatmul.f32.vlgmr.msrb.gmra.mxu2 %v3372_v14 }
 0x7f3   :  { %3498 = vmatmul.f32.vlgmr.msrb.gmra.mxu3 %v3372_v14  ;;  %3518 = vmatmul.f32.vlgmr.msra.gmra.mxu0 %v3372_v14 }
 0x86f   :  { %v3459_v25 = vpop.f32.mrf.mxu1 }
 0x870   :  { %v3526_v56 = vrot.slane %v3459_v25, 6  ;;  %v3519_v53 = vpop.f32.mrf.mxu0  ;;  %v7389_v25 = vld [vmem:[#allocation7 + $0x80] sm:$0xff] }
 0x871   :  { %v3529_v4 = vrot.slane %v3519_v53, 6  ;;  %8270 = vst [vmem:[#allocation37_spill] sm:$0xff] %v7389_v25  ;;  %v7395_v53 = vld [vmem:[#allocation7 + $0x90] sm:$0xff]  ;;  %3687 = vmatpush.msra.mxu1 %v7389_v25 }
 0x872   :  { %v3534_v9 = vadd.f32 %v3526_v56, %v3374_v33  ;;  %v7391_v56 = vld [vmem:[#allocation7 + $0x88] sm:$0xff]  ;;  %8272 = vst [vmem:[#allocation39_spill] sm:$0xff] %v7395_v53  ;;  %v7397_v33 = vld [vmem:[#allocation7 + $0x98] sm:$0xff]  ;;  %3727 = vmatpush.msra.mxu3 %v7395_v53  ;;  %v3376_v25 = vld [vmem:[#allocation3 + $0x10] sm:$0xc] }
 0x873   :  { %v3537_v3 = vadd.f32 %v3529_v4, %v3377_v2  ;;  %8271 = vst [vmem:[#allocation38_spill] sm:$0xff] %v7391_v56  ;;  %v7401_v4 = vld [vmem:[#allocation7 + $0x60] sm:$0xff]  ;;  %3707 = vmatpush.msra.mxu2 %v7391_v56  ;;  %3747 = vmatpush.msrb.mxu0 %v7397_v33 }
 0x874   :  { %v5307_v54 = vmul.f32 -1.442695, %v3534_v9  ;;  %8273 = vst [vmem:[#allocation40_spill] sm:$0xff] %v7397_v33  ;;  %v7403_v9 = vld [vmem:[#allocation7 + $0x68] sm:$0xff]  ;;  %3688 = vmatpush.msra.mxu1 %v7401_v4 }
 0x875   :  { %v5309_v7 = vmul.f32 -1.442695, %v3537_v3  ;;  %v3479_v16 = vpop.f32.mrf.mxu2  ;;  %8274 = vst [vmem:[#allocation41_spill] sm:$0xff] %v7401_v4  ;;  %3708 = vmatpush.msra.mxu2 %v7403_v9  ;;  %v7435_v33 = vld [vmem:[#allocation7 + $0x28] sm:$0xff]  ;;  %v7441_v4 = vld [vmem:[#allocation7 + $0x38] sm:$0xff] }
 0x876   :  { %5494 = vpow2.f32 %v5307_v54  ;;  %v3527_v15 = vrot.slane %v3479_v16, 6  ;;  %8275 = vst [vmem:[#allocation42_spill] sm:$0xff] %v7403_v9  ;;  %v7409_v54 = vld [vmem:[#allocation7 + $0x70] sm:$0xff]  ;;  %v3499_v16 = vpop.f32.mrf.mxu3 }
 0x877   :  { %5496 = vpow2.f32 %v5309_v7  ;;  %8276 = vst [vmem:[#allocation43_spill] sm:$0xff] %v7409_v54  ;;  %v7411_v7 = vld [vmem:[#allocation7 + $0x78] sm:$0xff]  ;;  %3728 = vmatpush.msra.mxu3 %v7409_v54  ;;  %v3528_v53 = vrot.slane %v3499_v16, 6  ;;  %v7439_v9 = vld [vmem:[#allocation7 + $0x30] sm:$0xff]  ;;  %v7445_v54 = vld [vmem:[#allocation7] sm:$0xff] }
 0x878   :  { %v3535_v31 = vadd.f32 %v3527_v15, %v3375_v37  ;;  %8277 = vst [vmem:[#allocation44_spill] sm:$0xff] %v7411_v7  ;;  %v7416_v15 = vld [vmem:[#allocation7 + $0x40] sm:$0xff]  ;;  %v7418_v37 = vld [vmem:[#allocation7 + $0x48] sm:$0xff]  ;;  %3748 = vmatpush.msrb.mxu0 %v7411_v7  ;;  %v7451_v16 = vld [vmem:[#allocation7 + $0x10] sm:$0xff] }
 0x879   :  { %8278 = vst [vmem:[#allocation45_spill] sm:$0xff] %v7416_v15  ;;  %3689 = vmatpush.msra.mxu1 %v7416_v15  ;;  %3709 = vmatpush.msra.mxu2 %v7418_v37  ;;  %v7447_v7 = vld [vmem:[#allocation7 + $0x8] sm:$0xff] }
 0x87a   :  { %v5308_v43 = vmul.f32 -1.442695, %v3535_v31  ;;  %8279 = vst [vmem:[#allocation46_spill] sm:$0xff] %v7418_v37  ;;  %v7453_v37 = vld [vmem:[#allocation7 + $0x18] sm:$0xff] }
 0x87b   :  { %8283 = vst [vmem:[#allocation31_spill] sm:$0xff] %v7435_v33  ;;  %3710 = vmatpush.msra.mxu2 %v7435_v33 }
 0x87c   :  { %v5495_v58 = vpop.eup %5494  ;;  %5498 = vpow2.f32 %v5308_v43  ;;  %v7425_v43 = vld [vmem:[#allocation7 + $0x50] sm:$0xff]  ;;  %8284 = vst [vmem:[#allocation32_spill] sm:$0xff] %v7441_v4 }
 0x87d   :  { %v5497_v11 = vpop.eup %5496  ;;  %v7362_v23 = vadd.f32 1.0, %v5495_v58  ;;  %8280 = vst [vmem:[#allocation47_spill] sm:$0xff] %v7425_v43  ;;  %v7427_v58 = vld [vmem:[#allocation7 + $0x58] sm:$0xff]  ;;  %3729 = vmatpush.msra.mxu3 %v7425_v43  ;;  %v3536_v43 = vadd.f32 %v3528_v53, %v3376_v25  ;;  %3711 = vmatpush.msra.mxu2 %v7447_v7 }
 0x87e   :  { %v7385_v14 = vadd.f32 1.0, %v5497_v11  ;;  %8281 = vst [vmem:[#allocation48_spill] sm:$0xff] %v7427_v58  ;;  %3749 = vmatpush.msrb.mxu0 %v7427_v58 }
 0x87f   :  { %5500 = vrcp.f32 %v7362_v23  ;;  %8285 = vst [vmem:[#allocation33_spill] sm:$0xff] %v7453_v37  ;;  %3730 = vmatpush.msra.mxu3 %v7439_v9  ;;  %3930 = vmatpush.msrb.mxu2 %v7258_v6  ;;  %vm3547_vm15 = vweird.f32 %v7362_v23  ;;  %v3551_v53 = vand.u32 2147483647, %v7362_v23 }
 0x880   :  { %5502 = vrcp.f32 %v7385_v14  ;;  %3750 = vmatpush.msrb.mxu0 %v7441_v4  ;;  %v3553_v4 = vand.u32 2147483648, %v7362_v23  ;;  %vm3586_vm7 = vweird.f32 %v7385_v14 }
 0x881   :  { %3731 = vmatpush.msra.mxu3 %v7451_v16  ;;  %3931 = vmatpush.msrb.mxu2 %v7270_v60  ;;  %vm3552_vm3 = vcmp.eq.f32.partialorder %v3551_v53, 8.507059e+37 }
 0x882   :  { %v5499_v2 = vpop.eup %5498  ;;  %3751 = vmatpush.msrb.mxu0 %v7453_v37  ;;  %v3554_v6 = vor.u32 1.1754944e-38, %v3553_v4  ;;  %v3597_v4 = vrot.slane %v7253_v50, 6 }
 0x883   :  { %v7405_v3 = vadd.f32 1.0, %v5499_v2  ;;  %v7433_v2 = vld [vmem:[#allocation7 + $0x20] sm:$0xff]  ;;  %3950 = vmatpush.msrb.mxu3 %v7260_v10  ;;  %3932 = vmatpush.msrb.mxu2 %v7282_v39 }
 0x884   :  { %8282 = vst [vmem:[#allocation49_spill] sm:$0xff] %v7433_v2  ;;  %3690 = vmatpush.msra.mxu1 %v7433_v2  ;;  %3970 = vmatpush.msra.mxu0 %v7264_v17 }
 0x885   :  { %v7420_v31 = vpop.eup %5500  ;;  %5504 = vrcp.f32 %v7405_v3  ;;  %v3570_v10 = vand.u32 2147483647, %v7405_v3  ;;  %3951 = vmatpush.msrb.mxu3 %v7272_v47  ;;  %vm3566_vm2 = vweird.f32 %v7405_v3  ;;  %3933 = vmatpush.msrb.mxu2 %v7294_v26 }
 0x886   :  { %v3543_v11 = vmul.f32 %v7420_v31, %v7362_v23  ;;  %v7455_v15 = vpop.eup %5502  ;;  %3691 = vmatpush.msra.mxu1 %v7445_v54  ;;  %vm3548_vm14 = vweird.f32 %v7420_v31  ;;  %5506 = vtanh.f32 %v3536_v43  ;;  %3971 = vmatpush.msra.mxu0 %v7276_v27 }
 0x887   :  { %vm7477_vm0 = vmor %vm3547_vm15, %vm3548_vm14  ;;  %3952 = vmatpush.msrb.mxu3 %v7284_v5  ;;  %vm3571_vm5 = vcmp.eq.f32.partialorder %v3570_v10, 8.507059e+37  ;;  %3934 = vmatpush.msrb.mxu2 %v7306_v0  ;;  %vm3587_vm6 = vweird.f32 %v7455_v15 }
 0x888   :  { %v3544_v56 = vsub.f32 1.0, %v3543_v11  ;;  %3910 = vmatpush.msrb.mxu1 %v7256_v55  ;;  %3972 = vmatpush.msra.mxu0 %v7288_v40  ;;  %vm3588_vm8 = vmor %vm3586_vm7, %vm3587_vm6 }
 0x889   :  { %3953 = vmatpush.msrb.mxu3 %v7296_v49  ;;  %3935 = vmatpush.msrb.mxu2 %v7318_v22 }
 0x88a   :  { %v3545_v11 = vmul.f32 %v7420_v31, %v3544_v56  ;;  %v3582_v56 = vmul.f32 %v7455_v15, %v7385_v14  ;;  %3911 = vmatpush.msrb.mxu1 %v7268_v20  ;;  %3973 = vmatpush.msra.mxu0 %v7300_v1 }
 0x88b   :  { %v5505_v58 = vpop.eup %5504  ;;  %3954 = vmatpush.msrb.mxu3 %v7308_v21  ;;  %3936 = vmatpush.msrb.mxu2 %v7330_v36 }
 0x88c   :  { %v3562_v33 = vmul.f32 %v5505_v58, %v7405_v3  ;;  %v3546_v2 = vadd.f32 %v7420_v31, %v3545_v11  ;;  %v3572_v11 = vand.u32 2147483648, %v7405_v3  ;;  %vm3567_vm1 = vweird.f32 %v5505_v58  ;;  %3912 = vmatpush.msrb.mxu1 %v7280_v8  ;;  %v5507_v3 = vpop.eup %5506  ;;  %3974 = vmatpush.msra.mxu0 %v7312_v12 }
 0x88d   :  { %v3583_v17 = vsub.f32 1.0, %v3582_v56  ;;  %vm3568_vm4 = vmor %vm3566_vm2, %vm3567_vm1  ;;  %3955 = vmatpush.msrb.mxu3 %v7320_v24  ;;  %3937 = vmatpush.msrb.mxu2 %v7342_v45 }
 0x88e   :  { %v3563_v25 = vsub.f32 1.0, %v3562_v33  ;;  %v3550_v23 = vsel %vm7477_vm0, %v7420_v31, %v3546_v2  ;;  %v3573_v37 = vor.u32 1.1754944e-38, %v3572_v11  ;;  %3913 = vmatpush.msrb.mxu1 %v7292_v30  ;;  %3975 = vmatpush.msra.mxu0 %v7324_v29 }
 0x88f   :  { %v3555_v31 = vsel %vm3552_vm3, %v3554_v6, %v3550_v23  ;;  %3956 = vmatpush.msrb.mxu3 %v7332_v38  ;;  %3938 = vmatpush.msrb.mxu2 %v7352_v57 }
 0x890   :  { %v3564_v33 = vmul.f32 %v5505_v58, %v3563_v25  ;;  %v3584_v25 = vmul.f32 %v7455_v15, %v3583_v17  ;;  %3914 = vmatpush.msrb.mxu1 %v7304_v59  ;;  %v3600_v53 = vmul.f32 %v5507_v3, %v3555_v31  ;;  %v3592_v17 = vand.u32 2147483648, %v7385_v14  ;;  %3976 = vmatpush.msra.mxu0 %v7336_v41  ;;  %v8290_v31 = vld [vmem:[#allocation38_spill] sm:$0xff]  ;;  %v8293_v3 = vld [vmem:[#allocation41_spill] sm:$0xff] }
 0x891   :  { %3957 = vmatpush.msrb.mxu3 %v7344_v46  ;;  %3939 = vmatpush.msrb.mxu2 %v7366_v35 }
 0x892   :  { %v3565_v43 = vadd.f32 %v5505_v58, %v3564_v33  ;;  %3915 = vmatpush.msrb.mxu1 %v7316_v18  ;;  %v3585_v10 = vadd.f32 %v7455_v15, %v3584_v25  ;;  %3977 = vmatpush.msra.mxu0 %v7348_v48  ;;  %v3593_v33 = vor.u32 1.1754944e-38, %v3592_v17  ;;  %v8295_v25 = vld [vmem:[#allocation43_spill] sm:$0xff] }
 0x893   :  { %3958 = vmatpush.msrb.mxu3 %v7356_v61  ;;  %3940 = vmatpush.msrb.mxu2 %v7376_v32  ;;  %v8299_v17 = vld [vmem:[#allocation47_spill] sm:$0xff] }
 0x894   :  { %v3569_v2 = vsel %vm3568_vm4, %v5505_v58, %v3565_v43  ;;  %3916 = vmatpush.msrb.mxu1 %v7328_v34  ;;  %v3590_v58 = vand.u32 2147483647, %v7385_v14  ;;  %v3589_v11 = vsel %vm3588_vm8, %v7455_v15, %v3585_v10  ;;  %3978 = vmatpush.msra.mxu0 %v7358_v62  ;;  %v8298_v10 = vld [vmem:[#allocation46_spill] sm:$0xff] }
 0x895   :  { %v3574_v56 = vsel %vm3571_vm5, %v3573_v37, %v3569_v2  ;;  %3959 = vmatpush.msrb.mxu3 %v7368_v42  ;;  %v8289_v37 = vld [vmem:[#allocation37_spill] sm:$0xff]  ;;  %3941 = vmatpush.msrb.mxu2 %v8290_v31  ;;  %v8292_v2 = vld [vmem:[#allocation40_spill] sm:$0xff] }
 0x896   :  { %v3599_v6 = vmul.f32 %v3597_v4, %v3574_v56  ;;  %3917 = vmatpush.msrb.mxu1 %v7340_v44  ;;  %vm3591_vm9 = vcmp.eq.f32.partialorder %v3590_v58, 8.507059e+37  ;;  %3979 = vmatpush.msra.mxu0 %v7370_v28  ;;  %v8291_v4 = vld [vmem:[#allocation39_spill] sm:$0xff]  ;;  %v8294_v56 = vld [vmem:[#allocation42_spill] sm:$0xff]  ;;  %v8300_v58 = vld [vmem:[#allocation48_spill] sm:$0xff] }
 0x897   :  { %v3594_v23 = vsel %vm3591_vm9, %v3593_v33, %v3589_v11  ;;  %3960 = vmatpush.msrb.mxu3 %v7381_v13  ;;  %3942 = vmatpush.msrb.mxu2 %v8294_v56  ;;  %v8301_v11 = vld [vmem:[#allocation49_spill] sm:$0xff]  ;;  %v8302_v33 = vld [vmem:[#allocation31_spill] sm:$0xff] }
 0x898   :  { %v7506_v50 = vadd.f32 %v3600_v53, %v3599_v6  ;;  %3918 = vmatpush.msrb.mxu1 %v7350_v51  ;;  %3980 = vmatpush.msra.mxu0 %v7383_v19  ;;  %v8296_v6 = vld [vmem:[#allocation44_spill] sm:$0xff]  ;;  %v8297_v53 = vld [vmem:[#allocation45_spill] sm:$0xff] }
 0x899   :  { %3961 = vmatpush.msrb.mxu3 %v8291_v4  ;;  %3943 = vmatpush.msrb.mxu2 %v8298_v10 }
 0x89a   :  { %8288 = vst [vmem:[#allocation34_spill] sm:$0xff] %v7506_v50  ;;  %5508 = vtanh.f32 %v7506_v50  ;;  %3919 = vmatpush.msrb.mxu1 %v7360_v63  ;;  %3981 = vmatpush.msra.mxu0 %v8292_v2  ;;  %v8307_v50 = vld [vmem:[#allocation36_spill] sm:$0xff] }
 0x89b   :  { %3962 = vmatpush.msrb.mxu3 %v8295_v25  ;;  %3944 = vmatpush.msrb.mxu2 %v8302_v33 }
 0x89c   :  { %3920 = vmatpush.msrb.mxu1 %v7374_v52  ;;  %3982 = vmatpush.msra.mxu0 %v8296_v6 }
 0x89d   :  { %3963 = vmatpush.msrb.mxu3 %v8299_v17  ;;  %3945 = vmatpush.msrb.mxu2 %v7447_v7 }
 0x89e   :  { %3921 = vmatpush.msrb.mxu1 %v8289_v37  ;;  %3983 = vmatpush.msra.mxu0 %v8300_v58 }
 0x89f   :  { %3964 = vmatpush.msrb.mxu3 %v7439_v9 }
 0x8a0   :  { %v5509_v14 = vpop.eup %5508  ;;  %3922 = vmatpush.msrb.mxu1 %v8293_v3 }
 0x8a1   :  { %v3603_v15 = vmul.f32 %v5509_v14, %v3594_v23  ;;  %v8303_v14 = vld [vmem:[#allocation32_spill] sm:$0xff]  ;;  %3965 = vmatpush.msrb.mxu3 %v7451_v16  ;;  %v8304_v23 = vld [vmem:[#allocation33_spill] sm:$0xff] }
 0x8a2   :  { %3923 = vmatpush.msrb.mxu1 %v8297_v53  ;;  %3984 = vmatpush.msra.mxu0 %v8303_v14 }
 0x8a3   :  { %3604 = vst [vmem:[#allocation4] sm:$0xc] %v3603_v15  ;;  %v3674_v43 = vrot.slane %v3603_v15, 2  ;;  %v8305_v15 = vld [vmem:[#allocation50_spill] sm:$0xff] }
 0x8a4   :  { %3924 = vmatpush.msrb.mxu1 %v8301_v11  ;;  %3985 = vmatpush.msra.mxu0 %v8304_v23 }
 0x8a5   :  { %3692 = vmatmul.f32.vlgmr.msra.gmra.mxu1 %v3674_v43  ;;  %3712 = vmatmul.f32.vlgmr.msra.gmra.mxu2 %v3674_v43 }
 0x8a6   :  { %3732 = vmatmul.f32.vlgmr.msra.gmra.mxu3 %v3674_v43  ;;  %3752 = vmatmul.f32.vlgmr.msrb.gmra.mxu0 %v3674_v43  ;;  %v8306_v43 = vld [vmem:[#allocation35_spill] sm:$0xff] }
 0x8a7   :  { %3925 = vmatpush.msrb.mxu1 %v7445_v54  ;;  %4164 = vmatpush.msra.mxu2 %v8305_v15 }
 0x8a8   :  { %4184 = vmatpush.msra.mxu3 %v8306_v43  ;;  %4204 = vmatpush.msrb.mxu0 %v8307_v50 }
 0x8a9   :  { %4144 = vmatpush.msra.mxu1 %v7256_v55  ;;  %4165 = vmatpush.msra.mxu2 %v7270_v60 }
 0x8aa   :  { %4185 = vmatpush.msra.mxu3 %v7272_v47  ;;  %4205 = vmatpush.msrb.mxu0 %v7276_v27  ;;  %v3605_v47 = vld [vmem:[#allocation3 + $0x28] sm:$0x30] }
 0x8ab   :  { %4145 = vmatpush.msra.mxu1 %v7268_v20  ;;  %4166 = vmatpush.msra.mxu2 %v7282_v39  ;;  %v3608_v39 = vld [vmem:[#allocation3 + $0x20] sm:$0x30] }
 0x8ac   :  { %4186 = vmatpush.msra.mxu3 %v7284_v5  ;;  %4206 = vmatpush.msrb.mxu0 %v7288_v40 }
 0x8ad   :  { %4146 = vmatpush.msra.mxu1 %v7280_v8  ;;  %4167 = vmatpush.msra.mxu2 %v7294_v26 }
 0x8ae   :  { %4187 = vmatpush.msra.mxu3 %v7296_v49  ;;  %4207 = vmatpush.msrb.mxu0 %v7300_v1  ;;  %v3606_v1 = vld [vmem:[#allocation3] sm:$0x30] }
 0x8af   :  { %4147 = vmatpush.msra.mxu1 %v7292_v30  ;;  %4168 = vmatpush.msra.mxu2 %v7306_v0 }
 0x8b0   :  { %4188 = vmatpush.msra.mxu3 %v7308_v21  ;;  %4208 = vmatpush.msrb.mxu0 %v7312_v12 }
 0x8b1   :  { %4148 = vmatpush.msra.mxu1 %v7304_v59  ;;  %4169 = vmatpush.msra.mxu2 %v7318_v22 }
 0x8b2   :  { %4189 = vmatpush.msra.mxu3 %v7320_v24  ;;  %4209 = vmatpush.msrb.mxu0 %v7324_v29 }
 0x8b3   :  { %4149 = vmatpush.msra.mxu1 %v7316_v18  ;;  %4170 = vmatpush.msra.mxu2 %v7330_v36 }
 0x8b4   :  { %4190 = vmatpush.msra.mxu3 %v7332_v38  ;;  %4210 = vmatpush.msrb.mxu0 %v7336_v41 }
 0x8b5   :  { %4150 = vmatpush.msra.mxu1 %v7328_v34  ;;  %4171 = vmatpush.msra.mxu2 %v7342_v45 }
 0x8b6   :  { %4191 = vmatpush.msra.mxu3 %v7344_v46  ;;  %4211 = vmatpush.msrb.mxu0 %v7348_v48  ;;  %v3607_v46 = vld [vmem:[#allocation3 + $0x10] sm:$0x30] }
 0x8b7   :  { %4151 = vmatpush.msra.mxu1 %v7340_v44  ;;  %4172 = vmatpush.msra.mxu2 %v7352_v57 }
 0x8b8   :  { %4192 = vmatpush.msra.mxu3 %v7356_v61  ;;  %4212 = vmatpush.msrb.mxu0 %v7358_v62 }
 0x8b9   :  { %4152 = vmatpush.msra.mxu1 %v7350_v51  ;;  %4173 = vmatpush.msra.mxu2 %v7366_v35 }
 0x8ba   :  { %4193 = vmatpush.msra.mxu3 %v7368_v42  ;;  %4213 = vmatpush.msrb.mxu0 %v7370_v28 }
 0x8bb   :  { %4153 = vmatpush.msra.mxu1 %v7360_v63  ;;  %4174 = vmatpush.msra.mxu2 %v7376_v32 }
 0x8bc   :  { %4194 = vmatpush.msra.mxu3 %v7381_v13  ;;  %4214 = vmatpush.msrb.mxu0 %v7383_v19 }
 0x8bd   :  { %4154 = vmatpush.msra.mxu1 %v7374_v52  ;;  %4175 = vmatpush.msra.mxu2 %v8290_v31 }
 0x8be   :  { %4195 = vmatpush.msra.mxu3 %v8291_v4  ;;  %4215 = vmatpush.msrb.mxu0 %v8292_v2 }
 0x8bf   :  { %4155 = vmatpush.msra.mxu1 %v8289_v37  ;;  %4176 = vmatpush.msra.mxu2 %v8294_v56  ;;  %v8308_v37 = vld [vmem:[#allocation34_spill] sm:$0xff] }
 0x8c0   :  { %4196 = vmatpush.msra.mxu3 %v8295_v25  ;;  %4216 = vmatpush.msrb.mxu0 %v8296_v6  ;;  %v3831_v31 = vrot.slane %v8308_v37, 6 }
 0x8c1   :  { %4156 = vmatpush.msra.mxu1 %v8293_v3  ;;  %4177 = vmatpush.msra.mxu2 %v8298_v10 }
 0x8c2   :  { %4197 = vmatpush.msra.mxu3 %v8299_v17  ;;  %4217 = vmatpush.msrb.mxu0 %v8300_v58 }
 0x8c3   :  { %4157 = vmatpush.msra.mxu1 %v8297_v53  ;;  %4178 = vmatpush.msra.mxu2 %v8302_v33 }
 0x8c4   :  { %4198 = vmatpush.msra.mxu3 %v7439_v9  ;;  %4218 = vmatpush.msrb.mxu0 %v8303_v14 }
 0x8c5   :  { %4158 = vmatpush.msra.mxu1 %v8301_v11  ;;  %4179 = vmatpush.msra.mxu2 %v7447_v7 }
 0x8c6   :  { %4199 = vmatpush.msra.mxu3 %v7451_v16  ;;  %4219 = vmatpush.msrb.mxu0 %v8304_v23 }
 0x8c7   :  { %4159 = vmatpush.msra.mxu1 %v7445_v54 }
 0x922   :  { %v3693_v55 = vpop.f32.mrf.mxu1 }
 0x923   :  { %v3760_v20 = vrot.slane %v3693_v55, 4  ;;  %v3753_v60 = vpop.f32.mrf.mxu0 }
 0x924   :  { %v3763_v27 = vrot.slane %v3753_v60, 4 }
 0x925   :  { %v3768_v8 = vadd.f32 %v3760_v20, %v3605_v47  ;;  %v3839_v47 = vld [vmem:[#allocation3 + $0x28] sm:$0xc0] }
 0x926   :  { %v3771_v5 = vadd.f32 %v3763_v27, %v3608_v39  ;;  %v3842_v39 = vld [vmem:[#allocation3 + $0x20] sm:$0xc0] }
 0x927   :  { %v5310_v40 = vmul.f32 -1.442695, %v3768_v8 }
 0x928   :  { %v5312_v30 = vmul.f32 -1.442695, %v3771_v5  ;;  %v3713_v26 = vpop.f32.mrf.mxu2 }
 0x929   :  { %5510 = vpow2.f32 %v5310_v40  ;;  %v3761_v49 = vrot.slane %v3713_v26, 4  ;;  %v3733_v34 = vpop.f32.mrf.mxu3 }
 0x92a   :  { %5512 = vpow2.f32 %v5312_v30  ;;  %v3762_v41 = vrot.slane %v3733_v34, 4 }
 0x92b   :  { %v3769_v59 = vadd.f32 %v3761_v49, %v3606_v1  ;;  %v3840_v1 = vld [vmem:[#allocation3] sm:$0xc0] }
 0x92c   :  { %v3770_v57 = vadd.f32 %v3762_v41, %v3607_v46  ;;  %v3841_v46 = vld [vmem:[#allocation3 + $0x10] sm:$0xc0] }
 0x92d   :  { %v5311_v0 = vmul.f32 -1.442695, %v3769_v59 }
 0x92f   :  { %v5511_v21 = vpop.eup %5510  ;;  %5514 = vpow2.f32 %v5311_v0 }
 0x930   :  { %v5513_v12 = vpop.eup %5512  ;;  %v3775_v18 = vadd.f32 1.0, %v5511_v21 }
 0x931   :  { %v3814_v22 = vadd.f32 1.0, %v5513_v12 }
 0x932   :  { %5516 = vrcp.f32 %v3775_v18  ;;  %v3787_v35 = vand.u32 2147483648, %v3775_v18  ;;  %vm3781_vm11 = vweird.f32 %v3775_v18  ;;  %v3785_v28 = vand.u32 2147483647, %v3775_v18 }
 0x933   :  { %5518 = vrcp.f32 %v3814_v22  ;;  %v3826_v17 = vand.u32 2147483648, %v3814_v22  ;;  %vm3820_vm3 = vweird.f32 %v3814_v22  ;;  %v3824_v58 = vand.u32 2147483647, %v3814_v22 }
 0x934   :  { %v3788_v54 = vor.u32 1.1754944e-38, %v3787_v35  ;;  %vm3786_vm15 = vcmp.eq.f32.partialorder %v3785_v28, 8.507059e+37 }
 0x935   :  { %v5515_v24 = vpop.eup %5514  ;;  %v3827_v33 = vor.u32 1.1754944e-38, %v3826_v17  ;;  %vm3825_vm5 = vcmp.eq.f32.partialorder %v3824_v58, 8.507059e+37 }
 0x936   :  { %v3794_v29 = vadd.f32 1.0, %v5515_v24 }
 0x938   :  { %v5517_v36 = vpop.eup %5516  ;;  %5520 = vrcp.f32 %v3794_v29  ;;  %v3806_v52 = vand.u32 2147483648, %v3794_v29  ;;  %v3804_v19 = vand.u32 2147483647, %v3794_v29  ;;  %vm3800_vm14 = vweird.f32 %v3794_v29 }
 0x939   :  { %v3777_v38 = vmul.f32 %v5517_v36, %v3775_v18  ;;  %v5519_v45 = vpop.eup %5518  ;;  %vm3782_vm10 = vweird.f32 %v5517_v36  ;;  %5522 = vtanh.f32 %v3770_v57 }
 0x93a   :  { %v3816_v63 = vmul.f32 %v5519_v45, %v3814_v22  ;;  %vm3783_vm12 = vmor %vm3781_vm11, %vm3782_vm10  ;;  %v3807_v16 = vor.u32 1.1754944e-38, %v3806_v52  ;;  %vm3805_vm1 = vcmp.eq.f32.partialorder %v3804_v19, 8.507059e+37  ;;  %vm3821_vm2 = vweird.f32 %v5519_v45 }
 0x93b   :  { %v3778_v44 = vsub.f32 1.0, %v3777_v38  ;;  %vm3822_vm4 = vmor %vm3820_vm3, %vm3821_vm2 }
 0x93c   :  { %v3817_v9 = vsub.f32 1.0, %v3816_v63 }
 0x93d   :  { %v3779_v48 = vmul.f32 %v5517_v36, %v3778_v44 }
 0x93e   :  { %v5521_v51 = vpop.eup %5520  ;;  %v3818_v56 = vmul.f32 %v5519_v45, %v3817_v9 }
 0x93f   :  { %v3796_v61 = vmul.f32 %v5521_v51, %v3794_v29  ;;  %v3780_v62 = vadd.f32 %v5517_v36, %v3779_v48  ;;  %vm3801_vm13 = vweird.f32 %v5521_v51  ;;  %v5523_v2 = vpop.eup %5522 }
 0x940   :  { %vm3802_vm0 = vmor %vm3800_vm14, %vm3801_vm13  ;;  %v3819_v10 = vadd.f32 %v5519_v45, %v3818_v56 }
 0x941   :  { %v3797_v42 = vsub.f32 1.0, %v3796_v61  ;;  %v3784_v13 = vsel %vm3783_vm12, %v5517_v36, %v3780_v62 }
 0x942   :  { %v3789_v50 = vsel %vm3786_vm15, %v3788_v54, %v3784_v13  ;;  %v3823_v11 = vsel %vm3822_vm4, %v5519_v45, %v3819_v10 }
 0x943   :  { %v3798_v32 = vmul.f32 %v5521_v51, %v3797_v42  ;;  %v3834_v6 = vmul.f32 %v5523_v2, %v3789_v50  ;;  %v3828_v23 = vsel %vm3825_vm5, %v3827_v33, %v3823_v11 }
 0x945   :  { %v3799_v7 = vadd.f32 %v5521_v51, %v3798_v32 }
 0x947   :  { %v3803_v4 = vsel %vm3802_vm0, %v5521_v51, %v3799_v7 }
 0x948   :  { %v3808_v3 = vsel %vm3805_vm1, %v3807_v16, %v3803_v4 }
 0x949   :  { %v3833_v25 = vmul.f32 %v3831_v31, %v3808_v3 }
 0x94b   :  { %v7622_v53 = vadd.f32 %v3834_v6, %v3833_v25 }
 0x94d   :  { %5524 = vtanh.f32 %v7622_v53  ;;  %v4065_v37 = vrot.slane %v7622_v53, 6 }
 0x953   :  { %v5525_v14 = vpop.eup %5524 }
 0x954   :  { %v3837_v15 = vmul.f32 %v5525_v14, %v3828_v23 }
 0x956   :  { %3838 = vst [vmem:[#allocation4] sm:$0x30] %v3837_v15  ;;  %v3908_v43 = vrot.slane %v3837_v15, 4 }
 0x958   :  { %3926 = vmatmul.f32.vlgmr.msrb.gmra.mxu1 %v3908_v43  ;;  %3946 = vmatmul.f32.vlgmr.msrb.gmra.mxu2 %v3908_v43 }
 0x959   :  { %3966 = vmatmul.f32.vlgmr.msrb.gmra.mxu3 %v3908_v43  ;;  %3986 = vmatmul.f32.vlgmr.msra.gmra.mxu0 %v3908_v43  ;;  %v7629_v43 = vld [vmem:[#allocation7 + $0x1e0] sm:$0xff] }
 0x95a   :  { %4363 = vmatpush.msrb.mxu1 %v7629_v43 }
 0x9d5   :  { %v3927_v55 = vpop.f32.mrf.mxu1 }
 0x9d6   :  { %v3994_v20 = vrot.slane %v3927_v55, 2  ;;  %v3987_v60 = vpop.f32.mrf.mxu0  ;;  %v7631_v55 = vld [vmem:[#allocation7 + $0x1e8] sm:$0xff] }
 0x9d7   :  { %v3997_v27 = vrot.slane %v3987_v60, 2  ;;  %4383 = vmatpush.msrb.mxu2 %v7631_v55  ;;  %v7637_v60 = vld [vmem:[#allocation7 + $0x1f8] sm:$0xff] }
 0x9d8   :  { %v4002_v8 = vadd.f32 %v3994_v20, %v3839_v47  ;;  %v7633_v20 = vld [vmem:[#allocation7 + $0x1f0] sm:$0xff]  ;;  %8309 = vst [vmem:[#allocation37_spill] sm:$0xff] %v7637_v60  ;;  %4423 = vmatpush.msra.mxu0 %v7637_v60  ;;  %v7641_v47 = vld [vmem:[#allocation7 + $0x1c0] sm:$0xff] }
 0x9d9   :  { %v4005_v5 = vadd.f32 %v3997_v27, %v3842_v39  ;;  %4403 = vmatpush.msrb.mxu3 %v7633_v20  ;;  %v7643_v27 = vld [vmem:[#allocation7 + $0x1c8] sm:$0xff]  ;;  %4364 = vmatpush.msrb.mxu1 %v7641_v47  ;;  %v7649_v39 = vld [vmem:[#allocation7 + $0x1d8] sm:$0xff] }
 0x9da   :  { %v5313_v40 = vmul.f32 -1.442695, %v4002_v8  ;;  %8310 = vst [vmem:[#allocation38_spill] sm:$0xff] %v7643_v27  ;;  %v7645_v8 = vld [vmem:[#allocation7 + $0x1d0] sm:$0xff]  ;;  %4384 = vmatpush.msrb.mxu2 %v7643_v27  ;;  %4424 = vmatpush.msra.mxu0 %v7649_v39 }
 0x9db   :  { %v5315_v30 = vmul.f32 -1.442695, %v4005_v5  ;;  %v3947_v26 = vpop.f32.mrf.mxu2  ;;  %8311 = vst [vmem:[#allocation39_spill] sm:$0xff] %v7645_v8  ;;  %4404 = vmatpush.msrb.mxu3 %v7645_v8  ;;  %v7653_v5 = vld [vmem:[#allocation7 + $0x1a0] sm:$0xff] }
 0x9dc   :  { %5526 = vpow2.f32 %v5313_v40  ;;  %v3995_v49 = vrot.slane %v3947_v26, 2  ;;  %v3967_v34 = vpop.f32.mrf.mxu3  ;;  %8312 = vst [vmem:[#allocation40_spill] sm:$0xff] %v7649_v39  ;;  %v7655_v40 = vld [vmem:[#allocation7 + $0x1a8] sm:$0xff]  ;;  %4365 = vmatpush.msrb.mxu1 %v7653_v5  ;;  %v7661_v26 = vld [vmem:[#allocation7 + $0x1b8] sm:$0xff] }
 0x9dd   :  { %5528 = vpow2.f32 %v5315_v30  ;;  %v3996_v41 = vrot.slane %v3967_v34, 2  ;;  %v7657_v30 = vld [vmem:[#allocation7 + $0x1b0] sm:$0xff]  ;;  %4385 = vmatpush.msrb.mxu2 %v7655_v40  ;;  %4425 = vmatpush.msra.mxu0 %v7661_v26  ;;  %v7679_v34 = vld [vmem:[#allocation7 + $0x168] sm:$0xff] }
 0x9de   :  { %v4003_v59 = vadd.f32 %v3995_v49, %v3840_v1  ;;  %4405 = vmatpush.msrb.mxu3 %v7657_v30  ;;  %v7665_v49 = vld [vmem:[#allocation7 + $0x180] sm:$0xff]  ;;  %v7667_v1 = vld [vmem:[#allocation7 + $0x188] sm:$0xff] }
 0x9df   :  { %v4004_v57 = vadd.f32 %v3996_v41, %v3841_v46  ;;  %4366 = vmatpush.msrb.mxu1 %v7665_v49  ;;  %4386 = vmatpush.msrb.mxu2 %v7667_v1  ;;  %v7685_v41 = vld [vmem:[#allocation7 + $0x178] sm:$0xff]  ;;  %v7691_v46 = vld [vmem:[#allocation7 + $0x148] sm:$0xff] }
 0x9e0   :  { %v5314_v0 = vmul.f32 -1.442695, %v4003_v59  ;;  %v7669_v59 = vld [vmem:[#allocation7 + $0x190] sm:$0xff] }
 0x9e1   :  { %4406 = vmatpush.msrb.mxu3 %v7669_v59  ;;  %4387 = vmatpush.msrb.mxu2 %v7679_v34 }
 0x9e2   :  { %v5527_v21 = vpop.eup %5526  ;;  %5530 = vpow2.f32 %v5314_v0  ;;  %v4073_v0 = vld [vmem:[#allocation3 + $0x18] sm:$0x3] }
 0x9e3   :  { %v5529_v12 = vpop.eup %5528  ;;  %v4009_v18 = vadd.f32 1.0, %v5527_v21  ;;  %4388 = vmatpush.msrb.mxu2 %v7691_v46 }
 0x9e4   :  { %v4048_v22 = vadd.f32 1.0, %v5529_v12  ;;  %v4076_v12 = vld [vmem:[#allocation3 + $0x30] sm:$0x3] }
 0x9e5   :  { %5532 = vrcp.f32 %v4009_v18  ;;  %v4021_v35 = vand.u32 2147483648, %v4009_v18  ;;  %vm4015_vm7 = vweird.f32 %v4009_v18  ;;  %v4019_v28 = vand.u32 2147483647, %v4009_v18 }
 0x9e6   :  { %5534 = vrcp.f32 %v4048_v22  ;;  %v4060_v17 = vand.u32 2147483648, %v4048_v22  ;;  %vm4054_vm15 = vweird.f32 %v4048_v22  ;;  %v4058_v58 = vand.u32 2147483647, %v4048_v22 }
 0x9e7   :  { %v4022_v54 = vor.u32 1.1754944e-38, %v4021_v35  ;;  %vm4020_vm11 = vcmp.eq.f32.partialorder %v4019_v28, 8.507059e+37  ;;  %v4074_v35 = vld [vmem:[#allocation3 + $0x8] sm:$0x3]  ;;  %v7709_v28 = vld [vmem:[#allocation7 + $0x138] sm:$0xff] }
 0x9e8   :  { %v5531_v24 = vpop.eup %5530  ;;  %v4061_v33 = vor.u32 1.1754944e-38, %v4060_v17  ;;  %vm4059_vm1 = vcmp.eq.f32.partialorder %v4058_v58, 8.507059e+37  ;;  %v7751_v58 = vld [vmem:[#allocation7 + $0xa8] sm:$0xff] }
 0x9e9   :  { %v4028_v29 = vadd.f32 1.0, %v5531_v24 }
 0x9eb   :  { %v5533_v36 = vpop.eup %5532  ;;  %5536 = vrcp.f32 %v4028_v29  ;;  %v4040_v52 = vand.u32 2147483648, %v4028_v29  ;;  %v4038_v19 = vand.u32 2147483647, %v4028_v29  ;;  %vm4034_vm10 = vweird.f32 %v4028_v29 }
 0x9ec   :  { %v4011_v38 = vmul.f32 %v5533_v36, %v4009_v18  ;;  %v5535_v45 = vpop.eup %5534  ;;  %vm4016_vm6 = vweird.f32 %v5533_v36  ;;  %5538 = vtanh.f32 %v4004_v57  ;;  %v7673_v18 = vld [vmem:[#allocation7 + $0x198] sm:$0xff] }
 0x9ed   :  { %v4050_v63 = vmul.f32 %v5535_v45, %v4048_v22  ;;  %vm4017_vm8 = vmor %vm4015_vm7, %vm4016_vm6  ;;  %v4041_v16 = vor.u32 1.1754944e-38, %v4040_v52  ;;  %vm4039_vm13 = vcmp.eq.f32.partialorder %v4038_v19, 8.507059e+37  ;;  %vm4055_vm14 = vweird.f32 %v5535_v45  ;;  %4426 = vmatpush.msra.mxu0 %v7673_v18  ;;  %v7697_v57 = vld [vmem:[#allocation7 + $0x158] sm:$0xff]  ;;  %v7717_v19 = vld [vmem:[#allocation7 + $0x110] sm:$0xff] }
 0x9ee   :  { %v4012_v44 = vsub.f32 1.0, %v4011_v38  ;;  %vm4056_vm0 = vmor %vm4054_vm15, %vm4055_vm14  ;;  %vm4996_vm14 = vcmask 523264  }
 0x9ef   :  { %v4051_v9 = vsub.f32 1.0, %v4050_v63  ;;  %4427 = vmatpush.msra.mxu0 %v7685_v41  ;;  %v7705_v63 = vld [vmem:[#allocation7 + $0x130] sm:$0xff] }
 0x9f0   :  { %v4013_v48 = vmul.f32 %v5533_v36, %v4012_v44 }
 0x9f1   :  { %v5537_v51 = vpop.eup %5536  ;;  %v4052_v3 = vmul.f32 %v5535_v45, %v4051_v9  ;;  %4428 = vmatpush.msra.mxu0 %v7697_v57  ;;  %v7721_v9 = vld [vmem:[#allocation7 + $0x118] sm:$0xff] }
 0x9f2   :  { %v4030_v61 = vmul.f32 %v5537_v51, %v4028_v29  ;;  %v4014_v62 = vadd.f32 %v5533_v36, %v4013_v48  ;;  %vm4035_vm9 = vweird.f32 %v5537_v51  ;;  %v5539_v4 = vpop.eup %5538  ;;  %v7677_v29 = vld [vmem:[#allocation7 + $0x160] sm:$0xff]  ;;  %v7693_v48 = vld [vmem:[#allocation7 + $0x150] sm:$0xff] }
 0x9f3   :  { %vm4036_vm12 = vmor %vm4034_vm10, %vm4035_vm9  ;;  %v4053_v10 = vadd.f32 %v5535_v45, %v4052_v3  ;;  %4367 = vmatpush.msrb.mxu1 %v7677_v29  ;;  %4429 = vmatpush.msra.mxu0 %v7709_v28  ;;  %v7741_v3 = vld [vmem:[#allocation7 + $0xd0] sm:$0xff] }
 0x9f4   :  { %v4031_v42 = vsub.f32 1.0, %v4030_v61  ;;  %v4018_v13 = vsel %vm4017_vm8, %v5533_v36, %v4014_v62  ;;  %v7681_v36 = vld [vmem:[#allocation7 + $0x170] sm:$0xff]  ;;  %v7701_v61 = vld [vmem:[#allocation7 + $0x120] sm:$0xff]  ;;  %v7703_v62 = vld [vmem:[#allocation7 + $0x128] sm:$0xff] }
 0x9f5   :  { %v4023_v50 = vsel %vm4020_vm11, %v4022_v54, %v4018_v13  ;;  %v4057_v11 = vsel %vm4056_vm0, %v5535_v45, %v4053_v10  ;;  %4407 = vmatpush.msrb.mxu3 %v7681_v36  ;;  %v7689_v45 = vld [vmem:[#allocation7 + $0x140] sm:$0xff]  ;;  %4389 = vmatpush.msrb.mxu2 %v7703_v62  ;;  %v7715_v13 = vld [vmem:[#allocation7 + $0x108] sm:$0xff] }
 0x9f6   :  { %v4032_v32 = vmul.f32 %v5537_v51, %v4031_v42  ;;  %v4068_v25 = vmul.f32 %v5539_v4, %v4023_v50  ;;  %v4062_v14 = vsel %vm4059_vm1, %v4061_v33, %v4057_v11  ;;  %4368 = vmatpush.msrb.mxu1 %v7689_v45  ;;  %4430 = vmatpush.msra.mxu0 %v7721_v9  ;;  %v7729_v50 = vld [vmem:[#allocation7 + $0xf0] sm:$0xff]  ;;  %v7737_v4 = vld [vmem:[#allocation7 + $0xc8] sm:$0xff]  ;;  %v7755_v33 = vld [vmem:[#allocation7 + $0xb8] sm:$0xff] }
 0x9f7   :  { %4408 = vmatpush.msrb.mxu3 %v7693_v48  ;;  %4390 = vmatpush.msrb.mxu2 %v7715_v13  ;;  %v7753_v11 = vld [vmem:[#allocation7 + $0xb0] sm:$0xff] }
 0x9f8   :  { %v4033_v7 = vadd.f32 %v5537_v51, %v4032_v32  ;;  %4369 = vmatpush.msrb.mxu1 %v7701_v61  ;;  %v7713_v32 = vld [vmem:[#allocation7 + $0x100] sm:$0xff] }
 0x9f9   :  { %4409 = vmatpush.msrb.mxu3 %v7705_v63 }
 0x9fa   :  { %v4037_v31 = vsel %vm4036_vm12, %v5537_v51, %v4033_v7  ;;  %4370 = vmatpush.msrb.mxu1 %v7713_v32  ;;  %v7725_v7 = vld [vmem:[#allocation7 + $0xe0] sm:$0xff] }
 0x9fb   :  { %v4042_v2 = vsel %vm4039_vm13, %v4041_v16, %v4037_v31  ;;  %4410 = vmatpush.msrb.mxu3 %v7717_v19  ;;  %v7727_v16 = vld [vmem:[#allocation7 + $0xe8] sm:$0xff]  ;;  %v7735_v31 = vld [vmem:[#allocation7 + $0xc0] sm:$0xff] }
 0x9fc   :  { %v4067_v56 = vmul.f32 %v4065_v37, %v4042_v2  ;;  %4371 = vmatpush.msrb.mxu1 %v7725_v7  ;;  %4391 = vmatpush.msrb.mxu2 %v7727_v16  ;;  %v7733_v37 = vld [vmem:[#allocation7 + $0xf8] sm:$0xff] }
 0x9fd   :  { %4411 = vmatpush.msrb.mxu3 %v7729_v50  ;;  %4431 = vmatpush.msra.mxu0 %v7733_v37 }
 0x9fe   :  { %v7626_v6 = vadd.f32 %v4068_v25, %v4067_v56  ;;  %v7743_v56 = vld [vmem:[#allocation7 + $0xd8] sm:$0xff]  ;;  %v7745_v25 = vld [vmem:[#allocation7 + $0xa0] sm:$0xff]  ;;  %4372 = vmatpush.msrb.mxu1 %v7735_v31  ;;  %4392 = vmatpush.msrb.mxu2 %v7737_v4 }
 0x9ff   :  { %4412 = vmatpush.msrb.mxu3 %v7741_v3  ;;  %4432 = vmatpush.msra.mxu0 %v7743_v56 }
 0xa00   :  { %5540 = vtanh.f32 %v7626_v6  ;;  %4373 = vmatpush.msrb.mxu1 %v7745_v25  ;;  %4393 = vmatpush.msrb.mxu2 %v7751_v58 }
 0xa01   :  { %4413 = vmatpush.msrb.mxu3 %v7753_v11  ;;  %4433 = vmatpush.msra.mxu0 %v7755_v33 }
 0xa06   :  { %v5541_v53 = vpop.eup %5540 }
 0xa07   :  { %v4071_v23 = vmul.f32 %v5541_v53, %v4062_v14  ;;  %v7759_v53 = vld [vmem:[#allocation7 + $0x80] sm:$0xff]  ;;  %v7761_v14 = vld [vmem:[#allocation7 + $0x88] sm:$0xff] }
 0xa08   :  { %4374 = vmatpush.msrb.mxu1 %v7759_v53  ;;  %4394 = vmatpush.msrb.mxu2 %v7761_v14 }
 0xa09   :  { %4072 = vst [vmem:[#allocation4] sm:$0xc0] %v4071_v23  ;;  %v4142_v15 = vrot.slane %v4071_v23, 6  ;;  %v7766_v23 = vld [vmem:[#allocation7 + $0x90] sm:$0xff] }
 0xa0a   :  { %8313 = vst [vmem:[#allocation41_spill] sm:$0xff] %v7766_v23  ;;  %4414 = vmatpush.msrb.mxu3 %v7766_v23 }
 0xa0b   :  { %4160 = vmatmul.f32.vlgmr.msra.gmra.mxu1 %v4142_v15  ;;  %4180 = vmatmul.f32.vlgmr.msra.gmra.mxu2 %v4142_v15 }
 0xa0c   :  { %4200 = vmatmul.f32.vlgmr.msra.gmra.mxu3 %v4142_v15  ;;  %4220 = vmatmul.f32.vlgmr.msrb.gmra.mxu0 %v4142_v15  ;;  %v7768_v15 = vld [vmem:[#allocation7 + $0x98] sm:$0xff] }
 0xa0d   :  { %8314 = vst [vmem:[#allocation42_spill] sm:$0xff] %v7768_v15  ;;  %4434 = vmatpush.msra.mxu0 %v7768_v15 }
 0xa88   :  { %v4161_v21 = vpop.f32.mrf.mxu1 }
 0xa89   :  { %v4224_v22 = vadd.f32 %v4161_v21, %v4073_v0  ;;  %v4221_v24 = vpop.f32.mrf.mxu0  ;;  %v7774_v21 = vld [vmem:[#allocation7 + $0x60] sm:$0xff] }
 0xa8a   :  { %v4227_v38 = vadd.f32 %v4221_v24, %v4076_v12  ;;  %8315 = vst [vmem:[#allocation43_spill] sm:$0xff] %v7774_v21  ;;  %v7776_v12 = vld [vmem:[#allocation7 + $0x68] sm:$0xff]  ;;  %v7782_v24 = vld [vmem:[#allocation7 + $0x78] sm:$0xff]  ;;  %4375 = vmatpush.msrb.mxu1 %v7774_v21 }
 0xa8b   :  { %v5316_v44 = vmul.f32 -1.442695, %v4224_v22  ;;  %8316 = vst [vmem:[#allocation44_spill] sm:$0xff] %v7776_v12  ;;  %v7780_v22 = vld [vmem:[#allocation7 + $0x70] sm:$0xff]  ;;  %4395 = vmatpush.msrb.mxu2 %v7776_v12  ;;  %4435 = vmatpush.msra.mxu0 %v7782_v24  ;;  %v7812_v12 = vld [vmem:[#allocation7 + $0x38] sm:$0xff]  ;;  %v7820_v21 = vld [vmem:[#allocation7 + $0x8] sm:$0xff] }
 0xa8c   :  { %v5318_v51 = vmul.f32 -1.442695, %v4227_v38  ;;  %8317 = vst [vmem:[#allocation45_spill] sm:$0xff] %v7780_v22  ;;  %4415 = vmatpush.msrb.mxu3 %v7780_v22 }
 0xa8d   :  { %5542 = vpow2.f32 %v5316_v44  ;;  %8318 = vst [vmem:[#allocation46_spill] sm:$0xff] %v7782_v24  ;;  %v7786_v44 = vld [vmem:[#allocation7 + $0x40] sm:$0xff] }
 0xa8e   :  { %5544 = vpow2.f32 %v5318_v51  ;;  %v4181_v42 = vpop.f32.mrf.mxu2  ;;  %8319 = vst [vmem:[#allocation47_spill] sm:$0xff] %v7786_v44  ;;  %v7788_v51 = vld [vmem:[#allocation7 + $0x48] sm:$0xff]  ;;  %4376 = vmatpush.msrb.mxu1 %v7786_v44  ;;  %v7818_v24 = vld [vmem:[#allocation7] sm:$0xff]  ;;  %v7826_v44 = vld [vmem:[#allocation7 + $0x18] sm:$0xff] }
 0xa8f   :  { %v4225_v52 = vadd.f32 %v4181_v42, %v4074_v35  ;;  %8320 = vst [vmem:[#allocation48_spill] sm:$0xff] %v7788_v51  ;;  %v7794_v42 = vld [vmem:[#allocation7 + $0x50] sm:$0xff]  ;;  %4396 = vmatpush.msrb.mxu2 %v7788_v51  ;;  %v4201_v23 = vpop.f32.mrf.mxu3 }
 0xa90   :  { %8321 = vst [vmem:[#allocation49_spill] sm:$0xff] %v7794_v42  ;;  %4416 = vmatpush.msrb.mxu3 %v7794_v42  ;;  %v7824_v51 = vld [vmem:[#allocation7 + $0x10] sm:$0xff]  ;;  %v4075_v42 = vld [vmem:[#allocation3 + $0x38] sm:$0x3] }
 0xa91   :  { %v5317_v54 = vmul.f32 -1.442695, %v4225_v52  ;;  %v7796_v52 = vld [vmem:[#allocation7 + $0x58] sm:$0xff]  ;;  %8326 = vst [vmem:[#allocation35_spill] sm:$0xff] %v7812_v12 }
 0xa92   :  { %8322 = vst [vmem:[#allocation31_spill] sm:$0xff] %v7796_v52  ;;  %4436 = vmatpush.msra.mxu0 %v7796_v52 }
 0xa93   :  { %v5543_v2 = vpop.eup %5542  ;;  %5546 = vpow2.f32 %v5317_v54  ;;  %v7801_v54 = vld [vmem:[#allocation7 + $0x20] sm:$0xff]  ;;  %8327 = vst [vmem:[#allocation36_spill] sm:$0xff] %v7818_v24 }
 0xa94   :  { %v5545_v10 = vpop.eup %5544  ;;  %v7747_v17 = vadd.f32 1.0, %v5543_v2  ;;  %8323 = vst [vmem:[#allocation32_spill] sm:$0xff] %v7801_v54  ;;  %v7803_v2 = vld [vmem:[#allocation7 + $0x28] sm:$0xff]  ;;  %4377 = vmatpush.msrb.mxu1 %v7801_v54  ;;  %4437 = vmatpush.msra.mxu0 %v7812_v12 }
 0xa95   :  { %v7770_v0 = vadd.f32 1.0, %v5545_v10  ;;  %8324 = vst [vmem:[#allocation33_spill] sm:$0xff] %v7803_v2  ;;  %4397 = vmatpush.msrb.mxu2 %v7803_v2 }
 0xa96   :  { %5548 = vrcp.f32 %v7747_v17  ;;  %8328 = vst [vmem:[#allocation34_spill] sm:$0xff] %v7826_v44  ;;  %4378 = vmatpush.msrb.mxu1 %v7818_v24  ;;  %4438 = vmatpush.msra.mxu0 %v7826_v44  ;;  %v4243_v44 = vand.u32 2147483648, %v7747_v17  ;;  %vm4237_vm3 = vweird.f32 %v7747_v17 }
 0xa97   :  { %5550 = vrcp.f32 %v7770_v0  ;;  %4398 = vmatpush.msrb.mxu2 %v7820_v21  ;;  %vm4276_vm11 = vweird.f32 %v7770_v0 }
 0xa98   :  { %4597 = vmatpush.msra.mxu1 %v7629_v43  ;;  %4657 = vmatpush.msrb.mxu0 %v7637_v60 }
 0xa99   :  { %v5547_v38 = vpop.eup %5546  ;;  %4617 = vmatpush.msra.mxu2 %v7631_v55 }
 0xa9a   :  { %v7790_v35 = vadd.f32 1.0, %v5547_v38  ;;  %v7810_v38 = vld [vmem:[#allocation7 + $0x30] sm:$0xff]  ;;  %4598 = vmatpush.msra.mxu1 %v7641_v47  ;;  %4658 = vmatpush.msrb.mxu0 %v7649_v39 }
 0xa9b   :  { %8325 = vst [vmem:[#allocation50_spill] sm:$0xff] %v7810_v38  ;;  %4417 = vmatpush.msrb.mxu3 %v7810_v38  ;;  %4618 = vmatpush.msra.mxu2 %v7643_v27  ;;  %v4244_v27 = vor.u32 1.1754944e-38, %v4243_v44 }
 0xa9c   :  { %v7805_v10 = vpop.eup %5548  ;;  %5552 = vrcp.f32 %v7790_v35  ;;  %4599 = vmatpush.msra.mxu1 %v7653_v5  ;;  %4659 = vmatpush.msrb.mxu0 %v7661_v26  ;;  %vm4256_vm6 = vweird.f32 %v7790_v35 }
 0xa9d   :  { %v4233_v22 = vmul.f32 %v7805_v10, %v7747_v17  ;;  %v7832_v52 = vpop.eup %5550  ;;  %4418 = vmatpush.msrb.mxu3 %v7824_v51  ;;  %vm4238_vm2 = vweird.f32 %v7805_v10  ;;  %4619 = vmatpush.msra.mxu2 %v7655_v40 }
 0xa9e   :  { %vm7854_vm4 = vmor %vm4237_vm3, %vm4238_vm2  ;;  %4600 = vmatpush.msra.mxu1 %v7665_v49  ;;  %4660 = vmatpush.msrb.mxu0 %v7673_v18  ;;  %vm4277_vm10 = vweird.f32 %v7832_v52 }
 0xa9f   :  { %v4234_v15 = vsub.f32 1.0, %v4233_v22  ;;  %v4226_v22 = vadd.f32 %v4201_v23, %v4075_v42  ;;  %4637 = vmatpush.msra.mxu3 %v7633_v20  ;;  %v4241_v42 = vand.u32 2147483647, %v7747_v17  ;;  %4620 = vmatpush.msra.mxu2 %v7667_v1  ;;  %vm4278_vm12 = vmor %vm4276_vm11, %vm4277_vm10 }
 0xaa0   :  { %4601 = vmatpush.msra.mxu1 %v7677_v29  ;;  %4661 = vmatpush.msrb.mxu0 %v7685_v41 }
 0xaa1   :  { %v4235_v54 = vmul.f32 %v7805_v10, %v4234_v15  ;;  %v4272_v15 = vmul.f32 %v7832_v52, %v7770_v0  ;;  %4638 = vmatpush.msra.mxu3 %v7645_v8  ;;  %5554 = vtanh.f32 %v4226_v22  ;;  %v4260_v8 = vand.u32 2147483647, %v7790_v35  ;;  %4621 = vmatpush.msra.mxu2 %v7679_v34 }
 0xaa2   :  { %v5553_v2 = vpop.eup %5552  ;;  %vm4242_vm7 = vcmp.eq.f32.partialorder %v4241_v42, 8.507059e+37  ;;  %4602 = vmatpush.msra.mxu1 %v7689_v45  ;;  %4662 = vmatpush.msrb.mxu0 %v7697_v57 }
 0xaa3   :  { %v4252_v12 = vmul.f32 %v5553_v2, %v7790_v35  ;;  %v4236_v24 = vadd.f32 %v7805_v10, %v4235_v54  ;;  %v4262_v54 = vand.u32 2147483648, %v7790_v35  ;;  %vm4257_vm5 = vweird.f32 %v5553_v2  ;;  %4639 = vmatpush.msra.mxu3 %v7657_v30  ;;  %4622 = vmatpush.msra.mxu2 %v7691_v46 }
 0xaa4   :  { %v4273_v39 = vsub.f32 1.0, %v4272_v15  ;;  %vm4258_vm8 = vmor %vm4256_vm6, %vm4257_vm5  ;;  %vm4261_vm9 = vcmp.eq.f32.partialorder %v4260_v8, 8.507059e+37  ;;  %4603 = vmatpush.msra.mxu1 %v7701_v61  ;;  %4663 = vmatpush.msrb.mxu0 %v7709_v28 }
 0xaa5   :  { %v4253_v23 = vsub.f32 1.0, %v4252_v12  ;;  %v4240_v17 = vsel %vm7854_vm4, %v7805_v10, %v4236_v24  ;;  %4640 = vmatpush.msra.mxu3 %v7669_v59  ;;  %v4263_v60 = vor.u32 1.1754944e-38, %v4262_v54  ;;  %v4287_v10 = vrot.slane %v7626_v6, 6  ;;  %4623 = vmatpush.msra.mxu2 %v7703_v62 }
 0xaa6   :  { %v4245_v24 = vsel %vm4242_vm7, %v4244_v27, %v4240_v17  ;;  %v4274_v15 = vmul.f32 %v7832_v52, %v4273_v39  ;;  %4604 = vmatpush.msra.mxu1 %v7713_v32  ;;  %v4282_v39 = vand.u32 2147483648, %v7770_v0  ;;  %4664 = vmatpush.msrb.mxu0 %v7721_v9 }
 0xaa7   :  { %v4254_v12 = vmul.f32 %v5553_v2, %v4253_v23  ;;  %4641 = vmatpush.msra.mxu3 %v7681_v36  ;;  %v5555_v35 = vpop.eup %5554  ;;  %4624 = vmatpush.msra.mxu2 %v7715_v13 }
 0xaa8   :  { %v4290_v42 = vmul.f32 %v5555_v35, %v4245_v24  ;;  %v4275_v8 = vadd.f32 %v7832_v52, %v4274_v15  ;;  %4605 = vmatpush.msra.mxu1 %v7725_v7  ;;  %4665 = vmatpush.msrb.mxu0 %v7733_v37  ;;  %v8334_v24 = vld [vmem:[#allocation43_spill] sm:$0xff]  ;;  %v8337_v35 = vld [vmem:[#allocation46_spill] sm:$0xff] }
 0xaa9   :  { %v4255_v22 = vadd.f32 %v5553_v2, %v4254_v12  ;;  %4642 = vmatpush.msra.mxu3 %v7693_v48  ;;  %4625 = vmatpush.msra.mxu2 %v7727_v16  ;;  %v4283_v12 = vor.u32 1.1754944e-38, %v4282_v39  ;;  %v8338_v15 = vld [vmem:[#allocation47_spill] sm:$0xff]  ;;  %v8343_v39 = vld [vmem:[#allocation33_spill] sm:$0xff] }
 0xaaa   :  { %v4279_v54 = vsel %vm4278_vm12, %v7832_v52, %v4275_v8  ;;  %4606 = vmatpush.msra.mxu1 %v7735_v31  ;;  %4666 = vmatpush.msrb.mxu0 %v7743_v56  ;;  %v8342_v8 = vld [vmem:[#allocation32_spill] sm:$0xff] }
 0xaab   :  { %v4259_v44 = vsel %vm4258_vm8, %v5553_v2, %v4255_v22  ;;  %4643 = vmatpush.msra.mxu3 %v7705_v63  ;;  %v4280_v2 = vand.u32 2147483647, %v7770_v0  ;;  %4626 = vmatpush.msra.mxu2 %v7737_v4  ;;  %v8332_v22 = vld [vmem:[#allocation41_spill] sm:$0xff] }
 0xaac   :  { %v4264_v23 = vsel %vm4261_vm9, %v4263_v60, %v4259_v44  ;;  %4607 = vmatpush.msra.mxu1 %v7745_v25  ;;  %4667 = vmatpush.msrb.mxu0 %v7755_v33  ;;  %v8333_v60 = vld [vmem:[#allocation42_spill] sm:$0xff]  ;;  %v8335_v44 = vld [vmem:[#allocation44_spill] sm:$0xff] }
 0xaad   :  { %v4289_v27 = vmul.f32 %v4287_v10, %v4264_v23  ;;  %4644 = vmatpush.msra.mxu3 %v7717_v19  ;;  %vm4281_vm13 = vcmp.eq.f32.partialorder %v4280_v2, 8.507059e+37  ;;  %4627 = vmatpush.msra.mxu2 %v7751_v58  ;;  %v8336_v10 = vld [vmem:[#allocation45_spill] sm:$0xff]  ;;  %v8339_v23 = vld [vmem:[#allocation48_spill] sm:$0xff]  ;;  %v5019_v2 = vld [vmem:[#allocation4 + $0x6] sm:$0x3] }
 0xaae   :  { %v4284_v17 = vsel %vm4281_vm13, %v4283_v12, %v4279_v54  ;;  %4608 = vmatpush.msra.mxu1 %v7759_v53  ;;  %4668 = vmatpush.msrb.mxu0 %v8333_v60  ;;  %v8344_v54 = vld [vmem:[#allocation35_spill] sm:$0xff] }
 0xaaf   :  { %v7883_v6 = vadd.f32 %v4290_v42, %v4289_v27  ;;  %4645 = vmatpush.msra.mxu3 %v7729_v50  ;;  %4628 = vmatpush.msra.mxu2 %v7761_v14  ;;  %v8340_v27 = vld [vmem:[#allocation49_spill] sm:$0xff]  ;;  %v8341_v42 = vld [vmem:[#allocation31_spill] sm:$0xff] }
 0xab0   :  { %4609 = vmatpush.msra.mxu1 %v8334_v24  ;;  %4669 = vmatpush.msrb.mxu0 %v8337_v35 }
 0xab1   :  { %8331 = vst [vmem:[#allocation51_spill] sm:$0xff] %v7883_v6  ;;  %5556 = vtanh.f32 %v7883_v6  ;;  %4646 = vmatpush.msra.mxu3 %v7741_v3  ;;  %4629 = vmatpush.msra.mxu2 %v8335_v44 }
 0xab2   :  { %4610 = vmatpush.msra.mxu1 %v8338_v15  ;;  %4670 = vmatpush.msrb.mxu0 %v8341_v42 }
 0xab3   :  { %4647 = vmatpush.msra.mxu3 %v7753_v11  ;;  %4630 = vmatpush.msra.mxu2 %v8339_v23 }
 0xab4   :  { %4611 = vmatpush.msra.mxu1 %v8342_v8  ;;  %4671 = vmatpush.msrb.mxu0 %v8344_v54  ;;  %v8346_v8 = vld [vmem:[#allocation34_spill] sm:$0xff] }
 0xab5   :  { %4648 = vmatpush.msra.mxu3 %v8332_v22  ;;  %4631 = vmatpush.msra.mxu2 %v8343_v39 }
 0xab6   :  { %4672 = vmatpush.msrb.mxu0 %v8346_v8 }
 0xab7   :  { %v5557_v0 = vpop.eup %5556  ;;  %4649 = vmatpush.msra.mxu3 %v8336_v10  ;;  %4632 = vmatpush.msra.mxu2 %v7820_v21 }
 0xab8   :  { %v4293_v52 = vmul.f32 %v5557_v0, %v4284_v17  ;;  %v5028_v17 = vld [vmem:[#allocation4 + $0x6] sm:$0x3] }
 0xab9   :  { %4650 = vmatpush.msra.mxu3 %v8340_v27 }
 0xaba   :  { %4294 = vst [vmem:[#allocation4 + $0x8] sm:$0x3] %v4293_v52  ;;  %4379 = vmatmul.f32.vlgmr.msrb.gmra.mxu1 %v4293_v52  ;;  %4399 = vmatmul.f32.vlgmr.msrb.gmra.mxu2 %v4293_v52 }
 0xabb   :  { %4419 = vmatmul.f32.vlgmr.msrb.gmra.mxu3 %v4293_v52  ;;  %4439 = vmatmul.f32.vlgmr.msra.gmra.mxu0 %v4293_v52  ;;  %v8345_v52 = vld [vmem:[#allocation36_spill] sm:$0xff] }
 0xabc   :  { %4651 = vmatpush.msra.mxu3 %v7810_v38  ;;  %4612 = vmatpush.msra.mxu1 %v8345_v52  ;;  %v8347_v52 = vld [vmem:[#allocation37_spill] sm:$0xff] }
 0xabd   :  { %4851 = vmatpush.msrb.mxu2 %v7631_v55  ;;  %4891 = vmatpush.msra.mxu0 %v8347_v52  ;;  %v8352_v55 = vld [vmem:[#allocation32_spill] sm:$0xff] }
 0xabe   :  { %4652 = vmatpush.msra.mxu3 %v7824_v51  ;;  %4831 = vmatpush.msrb.mxu1 %v7629_v43  ;;  %v8351_v43 = vld [vmem:[#allocation31_spill] sm:$0xff] }
 0xac0   :  { %4871 = vmatpush.msrb.mxu3 %v7633_v20  ;;  %4832 = vmatpush.msrb.mxu1 %v7641_v47  ;;  %v8353_v20 = vld [vmem:[#allocation33_spill] sm:$0xff]  ;;  %v8354_v47 = vld [vmem:[#allocation50_spill] sm:$0xff] }
 0xac1   :  { %v5020_v12 = vld [vmem:[#allocation4 + $0x8] sm:$0x3] }
 0xac2   :  { %v5027_v0 = vld [vmem:[#allocation4 + $0x8] sm:$0x3]  ;;  %v5021_v6 = vsel %vm4996_vm14, %v5019_v2, %v5020_v12  ;;  %v8348_v2 = vld [vmem:[#allocation38_spill] sm:$0xff]  ;;  %4833 = vmatpush.msrb.mxu1 %v7653_v5  ;;  %v8355_v5 = vld [vmem:[#allocation36_spill] sm:$0xff] }
 0xac3   :  { %v5029_v42 = vsel %vm4996_vm14, %v5027_v0, %v5028_v17  ;;  %5025 = vst [vmem:[#allocation5 + $0x3] sm:$0x1] %v5021_v6  ;;  %v5023_v39 = vrot.slane %v5021_v6, 1  ;;  %4852 = vmatpush.msrb.mxu2 %v8348_v2  ;;  %v8349_v12 = vld [vmem:[#allocation39_spill] sm:$0xff]  ;;  %v8350_v0 = vld [vmem:[#allocation40_spill] sm:$0xff] }
 0xac4   :  { %v5031_v38 = vrot.slane %v5029_v42, 1  ;;  %5033 = vst [vmem:[#allocation5 + $0x4] sm:$0x1] %v5029_v42  ;;  %4872 = vmatpush.msrb.mxu3 %v8349_v12  ;;  %4892 = vmatpush.msra.mxu0 %v8350_v0 }
 0xac5   :  { %5026 = vst [vmem:[#allocation5 + $0xb] sm:$0x1] %v5023_v39  ;;  %4853 = vmatpush.msrb.mxu2 %v7655_v40  ;;  %4834 = vmatpush.msrb.mxu1 %v7665_v49  ;;  %v4295_v49 = vld [vmem:[#allocation3 + $0x18] sm:$0xc] }
 0xac6   :  { %5034 = vst [vmem:[#allocation5 + $0xc] sm:$0x1] %v5031_v38  ;;  %4873 = vmatpush.msrb.mxu3 %v7657_v30  ;;  %4893 = vmatpush.msra.mxu0 %v7661_v26 }
 0xac7   :  { %4854 = vmatpush.msrb.mxu2 %v7667_v1  ;;  %4835 = vmatpush.msrb.mxu1 %v7677_v29 }
 0xac8   :  { %4874 = vmatpush.msrb.mxu3 %v7669_v59  ;;  %4894 = vmatpush.msra.mxu0 %v7673_v18  ;;  %v4298_v18 = vld [vmem:[#allocation3 + $0x30] sm:$0xc] }
 0xac9   :  { %4855 = vmatpush.msrb.mxu2 %v7679_v34  ;;  %4836 = vmatpush.msrb.mxu1 %v7689_v45 }
 0xaca   :  { %4875 = vmatpush.msrb.mxu3 %v7681_v36  ;;  %4895 = vmatpush.msra.mxu0 %v7685_v41 }
 0xacb   :  { %4856 = vmatpush.msrb.mxu2 %v7691_v46  ;;  %4837 = vmatpush.msrb.mxu1 %v7701_v61  ;;  %v4296_v46 = vld [vmem:[#allocation3 + $0x8] sm:$0xc] }
 0xacc   :  { %4876 = vmatpush.msrb.mxu3 %v7693_v48  ;;  %4896 = vmatpush.msra.mxu0 %v7697_v57 }
 0xacd   :  { %4857 = vmatpush.msrb.mxu2 %v7703_v62  ;;  %4838 = vmatpush.msrb.mxu1 %v7713_v32 }
 0xace   :  { %4877 = vmatpush.msrb.mxu3 %v7705_v63  ;;  %4897 = vmatpush.msra.mxu0 %v7709_v28 }
 0xacf   :  { %4858 = vmatpush.msrb.mxu2 %v7715_v13  ;;  %4839 = vmatpush.msrb.mxu1 %v7725_v7 }
 0xad0   :  { %4878 = vmatpush.msrb.mxu3 %v7717_v19  ;;  %4898 = vmatpush.msra.mxu0 %v7721_v9 }
 0xad1   :  { %4859 = vmatpush.msrb.mxu2 %v7727_v16  ;;  %4840 = vmatpush.msrb.mxu1 %v7735_v31  ;;  %v4297_v31 = vld [vmem:[#allocation3 + $0x38] sm:$0xc] }
 0xad2   :  { %4879 = vmatpush.msrb.mxu3 %v7729_v50  ;;  %4899 = vmatpush.msra.mxu0 %v7733_v37 }
 0xad3   :  { %4860 = vmatpush.msrb.mxu2 %v7737_v4  ;;  %4841 = vmatpush.msrb.mxu1 %v7745_v25 }
 0xad4   :  { %4880 = vmatpush.msrb.mxu3 %v7741_v3  ;;  %4900 = vmatpush.msra.mxu0 %v7743_v56 }
 0xad5   :  { %4861 = vmatpush.msrb.mxu2 %v7751_v58  ;;  %4842 = vmatpush.msrb.mxu1 %v7759_v53 }
 0xad6   :  { %4881 = vmatpush.msrb.mxu3 %v7753_v11  ;;  %4901 = vmatpush.msra.mxu0 %v7755_v33 }
 0xad7   :  { %4862 = vmatpush.msrb.mxu2 %v7761_v14  ;;  %4843 = vmatpush.msrb.mxu1 %v8334_v24 }
 0xad8   :  { %4882 = vmatpush.msrb.mxu3 %v8332_v22  ;;  %4902 = vmatpush.msra.mxu0 %v8333_v60 }
 0xad9   :  { %4863 = vmatpush.msrb.mxu2 %v8335_v44  ;;  %4844 = vmatpush.msrb.mxu1 %v8338_v15 }
 0xada   :  { %4883 = vmatpush.msrb.mxu3 %v8336_v10  ;;  %4903 = vmatpush.msra.mxu0 %v8337_v35  ;;  %v8356_v35 = vld [vmem:[#allocation51_spill] sm:$0xff] }
 0xadb   :  { %4864 = vmatpush.msrb.mxu2 %v8339_v23  ;;  %4845 = vmatpush.msrb.mxu1 %v8352_v55  ;;  %v4518_v15 = vrot.slane %v8356_v35, 6 }
 0xadc   :  { %4884 = vmatpush.msrb.mxu3 %v8340_v27  ;;  %4904 = vmatpush.msra.mxu0 %v8351_v43 }
 0xadd   :  { %4865 = vmatpush.msrb.mxu2 %v8353_v20  ;;  %4846 = vmatpush.msrb.mxu1 %v8355_v5 }
 0xade   :  { %4885 = vmatpush.msrb.mxu3 %v8354_v47  ;;  %4905 = vmatpush.msra.mxu0 %v8344_v54 }
 0xadf   :  { %4866 = vmatpush.msrb.mxu2 %v7820_v21 }
 0xae0   :  { %4886 = vmatpush.msrb.mxu3 %v7824_v51  ;;  %4906 = vmatpush.msra.mxu0 %v8346_v8 }
 0xb37   :  { %v4380_v40 = vpop.f32.mrf.mxu1 }
 0xb38   :  { %v4447_v30 = vrot.slane %v4380_v40, 6  ;;  %v4440_v26 = vpop.f32.mrf.mxu0  ;;  %v5011_v40 = vld [vmem:[#allocation4 + $0x4] sm:$0x3] }
 0xb39   :  { %v4450_v1 = vrot.slane %v4440_v26, 6 }
 0xb3a   :  { %v4455_v59 = vadd.f32 %v4447_v30, %v4295_v49  ;;  %v5036_v49 = vld [vmem:[#allocation4 + $0x4] sm:$0x3] }
 0xb3b   :  { %v4458_v29 = vadd.f32 %v4450_v1, %v4298_v18 }
 0xb3c   :  { %v5319_v34 = vmul.f32 -1.442695, %v4455_v59 }
 0xb3d   :  { %v5321_v36 = vmul.f32 -1.442695, %v4458_v29  ;;  %v4400_v41 = vpop.f32.mrf.mxu2 }
 0xb3e   :  { %5558 = vpow2.f32 %v5319_v34  ;;  %v4448_v45 = vrot.slane %v4400_v41, 6  ;;  %v4420_v19 = vpop.f32.mrf.mxu3 }
 0xb3f   :  { %5560 = vpow2.f32 %v5321_v36  ;;  %v4449_v16 = vrot.slane %v4420_v19, 6 }
 0xb40   :  { %v4456_v48 = vadd.f32 %v4448_v45, %v4296_v46  ;;  %v4526_v45 = vld [vmem:[#allocation3 + $0x18] sm:$0x30] }
 0xb41   :  { %v4457_v56 = vadd.f32 %v4449_v16, %v4297_v31 }
 0xb42   :  { %v5320_v57 = vmul.f32 -1.442695, %v4456_v48 }
 0xb44   :  { %v5559_v61 = vpop.eup %5558  ;;  %5562 = vpow2.f32 %v5320_v57  ;;  %v4529_v57 = vld [vmem:[#allocation3 + $0x30] sm:$0x30] }
 0xb45   :  { %v5561_v62 = vpop.eup %5560  ;;  %v4462_v63 = vadd.f32 1.0, %v5559_v61 }
 0xb46   :  { %v4501_v28 = vadd.f32 1.0, %v5561_v62 }
 0xb47   :  { %5564 = vrcp.f32 %v4462_v63  ;;  %v4474_v33 = vand.u32 2147483648, %v4462_v63  ;;  %vm4468_vm0 = vweird.f32 %v4462_v63  ;;  %v4472_v14 = vand.u32 2147483647, %v4462_v63 }
 0xb48   :  { %5566 = vrcp.f32 %v4501_v28  ;;  %v4513_v2 = vand.u32 2147483648, %v4501_v28  ;;  %vm4507_vm8 = vweird.f32 %v4501_v28  ;;  %v4511_v12 = vand.u32 2147483647, %v4501_v28 }
 0xb49   :  { %v4475_v60 = vor.u32 1.1754944e-38, %v4474_v33  ;;  %vm4473_vm4 = vcmp.eq.f32.partialorder %v4472_v14, 8.507059e+37 }
 0xb4a   :  { %v5563_v32 = vpop.eup %5562  ;;  %v4514_v43 = vor.u32 1.1754944e-38, %v4513_v2  ;;  %vm4512_vm10 = vcmp.eq.f32.partialorder %v4511_v12, 8.507059e+37 }
 0xb4b   :  { %v4481_v13 = vadd.f32 1.0, %v5563_v32 }
 0xb4d   :  { %v5565_v9 = vpop.eup %5564  ;;  %5568 = vrcp.f32 %v4481_v13  ;;  %v4493_v21 = vand.u32 2147483648, %v4481_v13  ;;  %v4491_v6 = vand.u32 2147483647, %v4481_v13  ;;  %vm4487_vm3 = vweird.f32 %v4481_v13 }
 0xb4e   :  { %v4464_v7 = vmul.f32 %v5565_v9, %v4462_v63  ;;  %v5567_v37 = vpop.eup %5566  ;;  %vm4469_vm15 = vweird.f32 %v5565_v9  ;;  %5570 = vtanh.f32 %v4457_v56 }
 0xb4f   :  { %v4503_v11 = vmul.f32 %v5567_v37, %v4501_v28  ;;  %vm4470_vm1 = vmor %vm4468_vm0, %vm4469_vm15  ;;  %v4494_v44 = vor.u32 1.1754944e-38, %v4493_v21  ;;  %vm4492_vm6 = vcmp.eq.f32.partialorder %v4491_v6, 8.507059e+37  ;;  %vm4508_vm7 = vweird.f32 %v5567_v37 }
 0xb50   :  { %v4465_v50 = vsub.f32 1.0, %v4464_v7  ;;  %vm4509_vm9 = vmor %vm4507_vm8, %vm4508_vm7 }
 0xb51   :  { %v4504_v22 = vsub.f32 1.0, %v4503_v11 }
 0xb52   :  { %v4466_v4 = vmul.f32 %v5565_v9, %v4465_v50 }
 0xb53   :  { %v5569_v3 = vpop.eup %5568  ;;  %v4505_v8 = vmul.f32 %v5567_v37, %v4504_v22 }
 0xb54   :  { %v4483_v25 = vmul.f32 %v5569_v3, %v4481_v13  ;;  %v4467_v58 = vadd.f32 %v5565_v9, %v4466_v4  ;;  %vm4488_vm2 = vweird.f32 %v5569_v3  ;;  %v5571_v27 = vpop.eup %5570  ;;  %v4527_v13 = vld [vmem:[#allocation3 + $0x8] sm:$0x30] }
 0xb55   :  { %vm4489_vm5 = vmor %vm4487_vm3, %vm4488_vm2  ;;  %v4506_v52 = vadd.f32 %v5567_v37, %v4505_v8 }
 0xb56   :  { %v4484_v53 = vsub.f32 1.0, %v4483_v25  ;;  %v4471_v38 = vsel %vm4470_vm1, %v5565_v9, %v4467_v58 }
 0xb57   :  { %v4476_v10 = vsel %vm4473_vm4, %v4475_v60, %v4471_v38  ;;  %v4510_v0 = vsel %vm4509_vm9, %v5567_v37, %v4506_v52 }
 0xb58   :  { %v4485_v51 = vmul.f32 %v5569_v3, %v4484_v53  ;;  %v4521_v54 = vmul.f32 %v5571_v27, %v4476_v10  ;;  %v4515_v20 = vsel %vm4512_vm10, %v4514_v43, %v4510_v0  ;;  %v4528_v53 = vld [vmem:[#allocation3 + $0x38] sm:$0x30] }
 0xb5a   :  { %v4486_v24 = vadd.f32 %v5569_v3, %v4485_v51 }
 0xb5c   :  { %v4490_v23 = vsel %vm4489_vm5, %v5569_v3, %v4486_v24 }
 0xb5d   :  { %v4495_v42 = vsel %vm4492_vm6, %v4494_v44, %v4490_v23 }
 0xb5e   :  { %v4520_v39 = vmul.f32 %v4518_v15, %v4495_v42 }
 0xb60   :  { %v7997_v17 = vadd.f32 %v4521_v54, %v4520_v39 }
 0xb62   :  { %5572 = vtanh.f32 %v7997_v17  ;;  %v4752_v52 = vrot.slane %v7997_v17, 6 }
 0xb68   :  { %v5573_v55 = vpop.eup %5572 }
 0xb69   :  { %v4524_v47 = vmul.f32 %v5573_v55, %v4515_v20 }
 0xb6b   :  { %4525 = vst [vmem:[#allocation4 + $0x8] sm:$0xc] %v4524_v47  ;;  %v4595_v5 = vrot.slane %v4524_v47, 2 }
 0xb6d   :  { %4613 = vmatmul.f32.vlgmr.msra.gmra.mxu1 %v4595_v5  ;;  %4633 = vmatmul.f32.vlgmr.msra.gmra.mxu2 %v4595_v5 }
 0xb6e   :  { %4653 = vmatmul.f32.vlgmr.msra.gmra.mxu3 %v4595_v5  ;;  %4673 = vmatmul.f32.vlgmr.msrb.gmra.mxu0 %v4595_v5 }
 0xb72   :  { %v5012_v30 = vld [vmem:[#allocation4 + $0xa] sm:$0x3] }
 0xb73   :  { %v5035_v26 = vld [vmem:[#allocation4 + $0xa] sm:$0x3]  ;;  %v5013_v1 = vsel %vm4996_vm14, %v5011_v40, %v5012_v30 }
 0xb74   :  { %v5037_v59 = vsel %vm4996_vm14, %v5035_v26, %v5036_v49  ;;  %5017 = vst [vmem:[#allocation5 + $0x2] sm:$0x1] %v5013_v1  ;;  %v5015_v18 = vrot.slane %v5013_v1, 1 }
 0xb75   :  { %v5039_v29 = vrot.slane %v5037_v59, 1  ;;  %5041 = vst [vmem:[#allocation5 + $0x5] sm:$0x1] %v5037_v59 }
 0xb76   :  { %5018 = vst [vmem:[#allocation5 + $0xa] sm:$0x1] %v5015_v18 }
 0xb77   :  { %5042 = vst [vmem:[#allocation5 + $0xd] sm:$0x1] %v5039_v29  ;;  %v5003_v29 = vld [vmem:[#allocation4 + $0x2] sm:$0x3] }
 0xbea   :  { %v4614_v34 = vpop.f32.mrf.mxu1 }
 0xbeb   :  { %v4681_v36 = vrot.slane %v4614_v34, 4  ;;  %v4674_v41 = vpop.f32.mrf.mxu0 }
 0xbec   :  { %v4684_v46 = vrot.slane %v4674_v41, 4  ;;  %v5044_v41 = vld [vmem:[#allocation4 + $0x2] sm:$0x3] }
 0xbed   :  { %v4689_v48 = vadd.f32 %v4681_v36, %v4526_v45 }
 0xbee   :  { %v4692_v61 = vadd.f32 %v4684_v46, %v4529_v57 }
 0xbef   :  { %v5322_v62 = vmul.f32 -1.442695, %v4689_v48 }
 0xbf0   :  { %v5324_v63 = vmul.f32 -1.442695, %v4692_v61  ;;  %v4634_v28 = vpop.f32.mrf.mxu2 }
 0xbf1   :  { %5574 = vpow2.f32 %v5322_v62  ;;  %v4682_v32 = vrot.slane %v4634_v28, 4  ;;  %v4654_v3 = vpop.f32.mrf.mxu3  ;;  %v4760_v28 = vld [vmem:[#allocation3 + $0x18] sm:$0xc0] }
 0xbf2   :  { %5576 = vpow2.f32 %v5324_v63  ;;  %v4683_v58 = vrot.slane %v4654_v3, 4 }
 0xbf3   :  { %v4690_v19 = vadd.f32 %v4682_v32, %v4527_v13 }
 0xbf4   :  { %v4691_v51 = vadd.f32 %v4683_v58, %v4528_v53 }
 0xbf5   :  { %v5323_v9 = vmul.f32 -1.442695, %v4690_v19  ;;  %v4763_v19 = vld [vmem:[#allocation3 + $0x30] sm:$0xc0] }
 0xbf7   :  { %v5575_v7 = vpop.eup %5574  ;;  %5578 = vpow2.f32 %v5323_v9 }
 0xbf8   :  { %v5577_v16 = vpop.eup %5576  ;;  %v4696_v50 = vadd.f32 1.0, %v5575_v7 }
 0xbf9   :  { %v4735_v37 = vadd.f32 1.0, %v5577_v16 }
 0xbfa   :  { %5580 = vrcp.f32 %v4696_v50  ;;  %v4708_v60 = vand.u32 2147483648, %v4696_v50  ;;  %vm4702_vm12 = vweird.f32 %v4696_v50  ;;  %v4706_v44 = vand.u32 2147483647, %v4696_v50 }
 0xbfb   :  { %5582 = vrcp.f32 %v4735_v37  ;;  %v4747_v40 = vand.u32 2147483648, %v4735_v37  ;;  %vm4741_vm5 = vweird.f32 %v4735_v37  ;;  %v4745_v30 = vand.u32 2147483647, %v4735_v37 }
 0xbfc   :  { %v4709_v42 = vor.u32 1.1754944e-38, %v4708_v60  ;;  %vm4707_vm1 = vcmp.eq.f32.partialorder %v4706_v44, 8.507059e+37  ;;  %v4762_v60 = vld [vmem:[#allocation3 + $0x38] sm:$0xc0] }
 0xbfd   :  { %v5579_v31 = vpop.eup %5578  ;;  %v4748_v49 = vor.u32 1.1754944e-38, %v4747_v40  ;;  %vm4746_vm7 = vcmp.eq.f32.partialorder %v4745_v30, 8.507059e+37 }
 0xbfe   :  { %v4715_v4 = vadd.f32 1.0, %v5579_v31  ;;  %v4761_v31 = vld [vmem:[#allocation3 + $0x8] sm:$0xc0] }
 0xc00   :  { %v5581_v56 = vpop.eup %5580  ;;  %5584 = vrcp.f32 %v4715_v4  ;;  %v4727_v10 = vand.u32 2147483648, %v4715_v4  ;;  %v4725_v23 = vand.u32 2147483647, %v4715_v4  ;;  %vm4721_vm0 = vweird.f32 %v4715_v4 }
 0xc01   :  { %v4698_v25 = vmul.f32 %v5581_v56, %v4696_v50  ;;  %v5583_v33 = vpop.eup %5582  ;;  %vm4703_vm11 = vweird.f32 %v5581_v56  ;;  %5586 = vtanh.f32 %v4691_v51 }
 0xc02   :  { %v4737_v22 = vmul.f32 %v5583_v33, %v4735_v37  ;;  %vm4704_vm13 = vmor %vm4702_vm12, %vm4703_vm11  ;;  %v4728_v39 = vor.u32 1.1754944e-38, %v4727_v10  ;;  %vm4726_vm3 = vcmp.eq.f32.partialorder %v4725_v23, 8.507059e+37  ;;  %vm4742_vm4 = vweird.f32 %v5583_v33 }
 0xc03   :  { %v4699_v11 = vsub.f32 1.0, %v4698_v25  ;;  %vm4743_vm6 = vmor %vm4741_vm5, %vm4742_vm4  ;;  %vm5103_vm5 = vcmask 64512  }
 0xc04   :  { %v4738_v27 = vsub.f32 1.0, %v4737_v22 }
 0xc05   :  { %v4700_v14 = vmul.f32 %v5581_v56, %v4699_v11 }
 0xc06   :  { %v5585_v21 = vpop.eup %5584  ;;  %v4739_v43 = vmul.f32 %v5583_v33, %v4738_v27 }
 0xc07   :  { %v4717_v38 = vmul.f32 %v5585_v21, %v4715_v4  ;;  %v4701_v6 = vadd.f32 %v5581_v56, %v4700_v14  ;;  %vm4722_vm15 = vweird.f32 %v5585_v21  ;;  %v5587_v12 = vpop.eup %5586 }
 0xc08   :  { %vm4723_vm2 = vmor %vm4721_vm0, %vm4722_vm15  ;;  %v4740_v5 = vadd.f32 %v5583_v33, %v4739_v43 }
 0xc09   :  { %v4718_v24 = vsub.f32 1.0, %v4717_v38  ;;  %v4705_v15 = vsel %vm4704_vm13, %v5581_v56, %v4701_v6 }
 0xc0a   :  { %v4710_v54 = vsel %vm4707_vm1, %v4709_v42, %v4705_v15  ;;  %v4744_v26 = vsel %vm4743_vm6, %v5583_v33, %v4740_v5 }
 0xc0b   :  { %v4719_v35 = vmul.f32 %v5585_v21, %v4718_v24  ;;  %v4755_v20 = vmul.f32 %v5587_v12, %v4710_v54  ;;  %v4749_v1 = vsel %vm4746_vm7, %v4748_v49, %v4744_v26 }
 0xc0d   :  { %v4720_v8 = vadd.f32 %v5585_v21, %v4719_v35 }
 0xc0f   :  { %v4724_v2 = vsel %vm4723_vm2, %v5585_v21, %v4720_v8 }
 0xc10   :  { %v4729_v0 = vsel %vm4726_vm3, %v4728_v39, %v4724_v2 }
 0xc11   :  { %v4754_v55 = vmul.f32 %v4752_v52, %v4729_v0 }
 0xc13   :  { %v8003_v47 = vadd.f32 %v4755_v20, %v4754_v55 }
 0xc15   :  { %5588 = vtanh.f32 %v8003_v47  ;;  %v4986_v5 = vrot.slane %v8003_v47, 6 }
 0xc1b   :  { %v5589_v17 = vpop.eup %5588 }
 0xc1c   :  { %v4758_v59 = vmul.f32 %v5589_v17, %v4749_v1 }
 0xc1e   :  { %4759 = vst [vmem:[#allocation4 + $0x8] sm:$0x30] %v4758_v59  ;;  %v4829_v18 = vrot.slane %v4758_v59, 4 }
 0xc20   :  { %4847 = vmatmul.f32.vlgmr.msrb.gmra.mxu1 %v4829_v18  ;;  %4867 = vmatmul.f32.vlgmr.msrb.gmra.mxu2 %v4829_v18 }
 0xc21   :  { %4887 = vmatmul.f32.vlgmr.msrb.gmra.mxu3 %v4829_v18  ;;  %4907 = vmatmul.f32.vlgmr.msra.gmra.mxu0 %v4829_v18 }
 0xc25   :  { %v5004_v34 = vld [vmem:[#allocation4 + $0xc] sm:$0x3] }
 0xc26   :  { %v5043_v36 = vld [vmem:[#allocation4 + $0xc] sm:$0x3]  ;;  %v5005_v45 = vsel %vm4996_vm14, %v5003_v29, %v5004_v34 }
 0xc27   :  { %v5045_v46 = vsel %vm4996_vm14, %v5043_v36, %v5044_v41  ;;  %5009 = vst [vmem:[#allocation5 + $0x1] sm:$0x1] %v5005_v45  ;;  %v5007_v48 = vrot.slane %v5005_v45, 1 }
 0xc28   :  { %v5047_v57 = vrot.slane %v5045_v46, 1  ;;  %5049 = vst [vmem:[#allocation5 + $0x6] sm:$0x1] %v5045_v46 }
 0xc29   :  { %5010 = vst [vmem:[#allocation5 + $0x9] sm:$0x1] %v5007_v48  ;;  %v4994_v48 = vld [vmem:[#allocation4] sm:$0x3] }
 0xc2a   :  { %5050 = vst [vmem:[#allocation5 + $0xe] sm:$0x1] %v5047_v57 }
 0xc9d   :  { %v4848_v61 = vpop.f32.mrf.mxu1 }
 0xc9e   :  { %v4915_v62 = vrot.slane %v4848_v61, 2  ;;  %v4908_v63 = vpop.f32.mrf.mxu0 }
 0xc9f   :  { %v4918_v32 = vrot.slane %v4908_v63, 2 }
 0xca0   :  { %v4923_v13 = vadd.f32 %v4915_v62, %v4760_v28  ;;  %v5052_v62 = vld [vmem:[#allocation4] sm:$0x3] }
 0xca1   :  { %v4926_v9 = vadd.f32 %v4918_v32, %v4763_v19 }
 0xca2   :  { %v5325_v7 = vmul.f32 -1.442695, %v4923_v13 }
 0xca3   :  { %v5327_v16 = vmul.f32 -1.442695, %v4926_v9  ;;  %v4868_v50 = vpop.f32.mrf.mxu2 }
 0xca4   :  { %5590 = vpow2.f32 %v5325_v7  ;;  %v4916_v37 = vrot.slane %v4868_v50, 2  ;;  %v4888_v14 = vpop.f32.mrf.mxu3 }
 0xca5   :  { %5592 = vpow2.f32 %v5327_v16  ;;  %v4917_v38 = vrot.slane %v4888_v14, 2 }
 0xca6   :  { %v4924_v4 = vadd.f32 %v4916_v37, %v4761_v31 }
 0xca7   :  { %v4925_v10 = vadd.f32 %v4917_v38, %v4762_v60 }
 0xca8   :  { %v5326_v3 = vmul.f32 -1.442695, %v4924_v4 }
 0xcaa   :  { %v5591_v56 = vpop.eup %5590  ;;  %5594 = vpow2.f32 %v5326_v3 }
 0xcab   :  { %v5593_v25 = vpop.eup %5592  ;;  %v4930_v58 = vadd.f32 1.0, %v5591_v56 }
 0xcac   :  { %v4969_v11 = vadd.f32 1.0, %v5593_v25 }
 0xcad   :  { %5596 = vrcp.f32 %v4930_v58  ;;  %v4942_v27 = vand.u32 2147483648, %v4930_v58  ;;  %vm4936_vm9 = vweird.f32 %v4930_v58  ;;  %v4940_v8 = vand.u32 2147483647, %v4930_v58 }
 0xcae   :  { %5598 = vrcp.f32 %v4969_v11  ;;  %v4981_v29 = vand.u32 2147483648, %v4969_v11  ;;  %vm4975_vm2 = vweird.f32 %v4969_v11  ;;  %v4979_v34 = vand.u32 2147483647, %v4969_v11 }
 0xcaf   :  { %v4943_v0 = vor.u32 1.1754944e-38, %v4942_v27  ;;  %vm4941_vm13 = vcmp.eq.f32.partialorder %v4940_v8, 8.507059e+37 }
 0xcb0   :  { %v5595_v33 = vpop.eup %5594  ;;  %v4982_v41 = vor.u32 1.1754944e-38, %v4981_v29  ;;  %vm4980_vm4 = vcmp.eq.f32.partialorder %v4979_v34, 8.507059e+37 }
 0xcb1   :  { %v4949_v53 = vadd.f32 1.0, %v5595_v33 }
 0xcb3   :  { %v5597_v21 = vpop.eup %5596  ;;  %5600 = vrcp.f32 %v4949_v53  ;;  %v4961_v39 = vand.u32 2147483648, %v4949_v53  ;;  %v4959_v52 = vand.u32 2147483647, %v4949_v53  ;;  %vm4955_vm12 = vweird.f32 %v4949_v53 }
 0xcb4   :  { %v4932_v51 = vmul.f32 %v5597_v21, %v4930_v58  ;;  %v5599_v22 = vpop.eup %5598  ;;  %vm4937_vm8 = vweird.f32 %v5597_v21  ;;  %5602 = vtanh.f32 %v4925_v10 }
 0xcb5   :  { %v4971_v23 = vmul.f32 %v5599_v22, %v4969_v11  ;;  %vm4938_vm10 = vmor %vm4936_vm9, %vm4937_vm8  ;;  %v4962_v55 = vor.u32 1.1754944e-38, %v4961_v39  ;;  %vm4960_vm0 = vcmp.eq.f32.partialorder %v4959_v52, 8.507059e+37  ;;  %vm4976_vm1 = vweird.f32 %v5599_v22 }
 0xcb6   :  { %v4933_v6 = vsub.f32 1.0, %v4932_v51  ;;  %vm4977_vm3 = vmor %vm4975_vm2, %vm4976_vm1 }
 0xcb7   :  { %v4972_v12 = vsub.f32 1.0, %v4971_v23 }
 0xcb8   :  { %v4934_v24 = vmul.f32 %v5597_v21, %v4933_v6 }
 0xcb9   :  { %v5601_v44 = vpop.eup %5600  ;;  %v4973_v26 = vmul.f32 %v5599_v22, %v4972_v12 }
 0xcba   :  { %v4951_v35 = vmul.f32 %v5601_v44, %v4949_v53  ;;  %v4935_v15 = vadd.f32 %v5597_v21, %v4934_v24  ;;  %vm4956_vm11 = vweird.f32 %v5601_v44  ;;  %v5603_v30 = vpop.eup %5602 }
 0xcbb   :  { %vm4957_vm15 = vmor %vm4955_vm12, %vm4956_vm11  ;;  %v4974_v18 = vadd.f32 %v5599_v22, %v4973_v26 }
 0xcbc   :  { %v4952_v42 = vsub.f32 1.0, %v4951_v35  ;;  %v4939_v2 = vsel %vm4938_vm10, %v5597_v21, %v4935_v15 }
 0xcbd   :  { %v4944_v20 = vsel %vm4941_vm13, %v4943_v0, %v4939_v2  ;;  %v4978_v36 = vsel %vm4977_vm3, %v5599_v22, %v4974_v18 }
 0xcbe   :  { %v4953_v54 = vmul.f32 %v5601_v44, %v4952_v42  ;;  %v4989_v1 = vmul.f32 %v5603_v30, %v4944_v20  ;;  %v4983_v47 = vsel %vm4980_vm4, %v4982_v41, %v4978_v36 }
 0xcc0   :  { %v4954_v43 = vadd.f32 %v5601_v44, %v4953_v54 }
 0xcc2   :  { %v4958_v40 = vsel %vm4957_vm15, %v5601_v44, %v4954_v43 }
 0xcc3   :  { %v4963_v49 = vsel %vm4960_vm0, %v4962_v55, %v4958_v40 }
 0xcc4   :  { %v4988_v17 = vmul.f32 %v4986_v5, %v4963_v49 }
 0xcc6   :  { %v4990_v59 = vadd.f32 %v4989_v1, %v4988_v17 }
 0xcc8   :  { %5604 = vtanh.f32 %v4990_v59 }
 0xcce   :  { %v5605_v45 = vpop.eup %5604 }
 0xccf   :  { %v4992_v46 = vmul.f32 %v5605_v45, %v4983_v47 }
 0xcd1   :  { %4993 = vst [vmem:[#allocation4 + $0x8] sm:$0xc0] %v4992_v46 }
 0xcd8   :  { %v4995_v57 = vld [vmem:[#allocation4 + $0xe] sm:$0x3] }
 0xcd9   :  { %v5051_v61 = vld [vmem:[#allocation4 + $0xe] sm:$0x3]  ;;  %v4997_v63 = vsel %vm4996_vm14, %v4994_v48, %v4995_v57 }
 0xcda   :  { %v5053_v28 = vsel %vm4996_vm14, %v5051_v61, %v5052_v62  ;;  %5001 = vst [vmem:[#allocation5] sm:$0x1] %v4997_v63  ;;  %v4999_v32 = vrot.slane %v4997_v63, 1 }
 0xcdb   :  { %v5055_v13 = vrot.slane %v5053_v28, 1  ;;  %5057 = vst [vmem:[#allocation5 + $0x7] sm:$0x1] %v5053_v28 }
 0xcdc   :  { %5002 = vst [vmem:[#allocation5 + $0x8] sm:$0x1] %v4999_v32 }
 0xcdd   :  { %5058 = vst [vmem:[#allocation5 + $0xf] sm:$0x1] %v5055_v13 }
 0xce2   :  { %v5059_v19 = vld [vmem:[#allocation5] sm:$0xff] }
 0xce3   :  { %v5061_v9 = vmul.f32 0.088388346, %v5059_v19  ;;  %5078 = vmatpush.xpose.msra.mxu1 %v5059_v19 }
 0xce4   :  { %v5060_v7 = vld [vmem:[#allocation5 + $0x8] sm:$0xff] }
 0xce5   :  { %v5062_v16 = vmul.f32 0.088388346, %v5060_v7  ;;  %5098 = vmatpush.xpose.msra.mxu3 %v5060_v7 }
 0xce6   :  { %5079 = vmatmul.f32.vlgmr.msra.gmra.mxu1 %v5061_v9 }
 0xce7   :  { %5181 = vmatpush.msrb.mxu1 %v5060_v7 }
 0xce8   :  { %5099 = vmatmul.f32.vlgmr.msra.gmra.mxu3 %v5062_v16 }
 0xce9   :  { %5158 = vmatpush.msrb.mxu3 %v5059_v19 }
 0xd63   :  { %v5080_v50 = vpop.f32.mrf.mxu1 }
 0xd64   :  { %v5104_v37 = vsel %vm5103_vm5, %v5080_v50, -inf }
 0xd65   :  { %5105 = vmax.xlane.f32.xlu0 %v5104_v37 }
 0xd6b   :  { %v5100_v31 = vpop.f32.mrf.mxu3 }
 0xd6c   :  { %v5107_v4 = vsel %vm5103_vm5, %v5100_v31, -inf }
 0xd6d   :  { %5108 = vmax.xlane.f32.xlu0 %v5107_v4 }
 0xdd8   :  { %v5106_v3 = vpop.xlane.xlu0 %5105 }
 0xdd9   :  { %v5110_v56 = vsub.f32 %v5080_v50, %v5106_v3 }
 0xddb   :  { %v5112_v25 = vmul.f32 1.442695, %v5110_v56 }
 0xddd   :  { %5606 = vpow2.f32 %v5112_v25 }
 0xde0   :  { %v5109_v58 = vpop.xlane.xlu0 %5108 }
 0xde1   :  { %v5111_v11 = vsub.f32 %v5100_v31, %v5109_v58 }
 0xde3   :  { %v5607_v33 = vpop.eup %5606  ;;  %v5114_v53 = vmul.f32 1.442695, %v5111_v11 }
 0xde4   :  { %v5116_v14 = vsel %vm5103_vm5, %v5607_v33, 0.0 }
 0xde5   :  { %5608 = vpow2.f32 %v5114_v53  ;;  %5117 = vadd.xlane.f32.xlu1 %v5116_v14 }
 0xdeb   :  { %v5609_v21 = vpop.eup %5608 }
 0xdec   :  { %v5119_v51 = vsel %vm5103_vm5, %v5609_v21, 0.0 }
 0xded   :  { %5120 = vadd.xlane.f32.xlu1 %v5119_v51 }
 0xe58   :  { %v5118_v38 = vpop.xlane.xlu1 %5117 }
 0xe59   :  { %5610 = vrcp.f32 %v5118_v38 }
 0xe5f   :  { %v5611_v6 = vpop.eup %5610 }
 0xe60   :  { %v5124_v22 = vmul.f32 %v5611_v6, %v5607_v33  ;;  %v5121_v60 = vpop.xlane.xlu1 %5120 }
 0xe61   :  { %5612 = vrcp.f32 %v5121_v60 }
 0xe62   :  { %v5126_v24 = vsel %vm5103_vm5, %v5124_v22, 0.0 }
 0xe63   :  { %v5127_v44 = vrot.slane %v5126_v24, 4 }
 0xe65   :  { %v5128_v10 = vadd.f32 %v5127_v44, %v5126_v24 }
 0xe67   :  { %v5613_v35 = vpop.eup %5612  ;;  %v5129_v15 = vrot.slane %v5128_v10, 2 }
 0xe68   :  { %v5125_v23 = vmul.f32 %v5613_v35, %v5609_v21 }
 0xe69   :  { %v5130_v27 = vadd.f32 %v5129_v15, %v5128_v10 }
 0xe6a   :  { %v5133_v42 = vsel %vm5103_vm5, %v5125_v23, 0.0 }
 0xe6b   :  { %v5134_v8 = vrot.slane %v5133_v42, 4  ;;  %v5131_v39 = vrot.slane %v5130_v27, 1 }
 0xe6d   :  { %v5135_v54 = vadd.f32 %v5134_v8, %v5133_v42  ;;  %v5132_v52 = vadd.f32 %v5131_v39, %v5130_v27 }
 0xe6f   :  { %v5136_v2 = vrot.slane %v5135_v54, 2  ;;  %5328 = vmatmul.msk.f32.vlgmr.msrb.gmra.mxu3 %vm5103_vm5, %v5132_v52 }
 0xe71   :  { %v5137_v12 = vadd.f32 %v5136_v2, %v5135_v54 }
 0xe73   :  { %v5138_v0 = vrot.slane %v5137_v12, 1 }
 0xe75   :  { %v5139_v43 = vadd.f32 %v5138_v0, %v5137_v12 }
 0xe77   :  { %5329 = vmatmul.msk.f32.vlgmr.msrb.gmra.mxu1 %vm5103_vm5, %v5139_v43 }
 0xef2   :  { %v5160_v55 = vpop.f32.mrf.mxu3 }
 0xef4   :  { %v5183_v20 = vpop.f32.mrf.mxu1 }
 0xef5   :  { %5791 = dma.done.wait [#allocation9 + $0x2], 2048 }
 0xef6   :  { %5792 = vsyncadd [#allocation9 + $0x2], 4294965248  ;;  %v5206_v5 = vld [vmem:[#allocation8 + $0x78] sm:$0xff]  ;;  %v5205_v40 = vld [vmem:[#allocation8 + $0x70] sm:$0xff]  ;;  %v5213_v47 = vrot.slane %v5183_v20, 7  ;;  %vm5214_vm14 = vcmask 1041409  }
 0xef7   :  { %5217 = vmatpush.msra.mxu2 %v5206_v5  ;;  %v5204_v30 = vld [vmem:[#allocation8 + $0x68] sm:$0xff]  ;;  %v5203_v26 = vld [vmem:[#allocation8 + $0x60] sm:$0xff]  ;;  %v5202_v49 = vld [vmem:[#allocation8 + $0x58] sm:$0xff]  ;;  %s5810_s29 = smov [#allocation16]   ;;  %s5245_s12 = sshll.u32 %s8035_s10, 4  ;;  %s5246_s12 = int_to_ptr.hbm [resolvable:$true] %s5245_s12 }
 0xef8   :  { %v5201_v17 = vld [vmem:[#allocation8 + $0x50] sm:$0xff]  ;;  %v5200_v1 = vld [vmem:[#allocation8 + $0x48] sm:$0xff]  ;;  %v5199_v59 = vld [vmem:[#allocation8 + $0x40] sm:$0xff]  ;;  %v5215_v57 = vsel %vm5214_vm14, %v5213_v47, %v5160_v55  ;;  %s5243_s30 = sshll.u32 %s5810_s29, 4  ;;  %s5244_s30 = int_to_ptr.vmem [resolvable:$true] %s5243_s30 }
 0xef9   :  { %5218 = vmatpush.msra.mxu2 %v5205_v40  ;;  %v5198_v18 = vld [vmem:[#allocation8 + $0x38] sm:$0xff]  ;;  %v5197_v29 = vld [vmem:[#allocation8 + $0x30] sm:$0xff]  ;;  %v5196_v34 = vld [vmem:[#allocation8 + $0x28] sm:$0xff] }
 0xefa   :  { %v5195_v36 = vld [vmem:[#allocation8 + $0x20] sm:$0xff]  ;;  %v5194_v41 = vld [vmem:[#allocation8 + $0x18] sm:$0xff]  ;;  %v5193_v45 = vld [vmem:[#allocation8 + $0x10] sm:$0xff] }
 0xefb   :  { %5219 = vmatpush.msra.mxu2 %v5204_v30  ;;  %v5192_v46 = vld [vmem:[#allocation8 + $0x8] sm:$0xff]  ;;  %v5191_v48 = vld [vmem:[#allocation8] sm:$0xff] }
 0xefc   :  { %v5614_v61 = vld [vmem:[%s8034_s9] ss:$0 sm:$0xff] }
 0xefd   :  { %5220 = vmatpush.msra.mxu2 %v5203_v26 }
 0xeff   :  { %5221 = vmatpush.msra.mxu2 %v5202_v49 }
 0xf01   :  { %5222 = vmatpush.msra.mxu2 %v5201_v17 }
 0xf03   :  { %5223 = vmatpush.msra.mxu2 %v5200_v1 }
 0xf05   :  { %5224 = vmatpush.msra.mxu2 %v5199_v59 }
 0xf07   :  { %5225 = vmatpush.msra.mxu2 %v5198_v18 }
 0xf09   :  { %5226 = vmatpush.msra.mxu2 %v5197_v29 }
 0xf0b   :  { %5227 = vmatpush.msra.mxu2 %v5196_v34 }
 0xf0d   :  { %5228 = vmatpush.msra.mxu2 %v5195_v36 }
 0xf0f   :  { %5229 = vmatpush.msra.mxu2 %v5194_v41 }
 0xf11   :  { %5230 = vmatpush.msra.mxu2 %v5193_v45 }
 0xf13   :  { %5231 = vmatpush.msra.mxu2 %v5192_v46 }
 0xf15   :  { %5232 = vmatpush.msra.mxu2 %v5191_v48 }
 0xf16   :  { %5233 = vmatmul.f32.vlgmr.msra.gmra.mxu2 %v5215_v57 }
 0xf99   :  { %v5234_v62 = vpop.f32.mrf.mxu2 }
 0xf9a   :  { %v5235_v63 = vadd.f32 %v5614_v61, %v5234_v62 }
 0xf9c   :  { %5237 = vst [vmem:[#allocation16] sm:$0x3] %v5235_v63 }
 0xf9d   :  { %5248 = dma.vmem_to_hbm [thread:$0]  %s5244_s30, 32, %s5246_s12, [#allocation12]  }
 0xf9e   :  { %5793 = dma.done.wait [#allocation12], 32  }
 0xf9f   :  { %5794 = vsyncadd [#allocation12], 4294967264 }
 0xfa0   :  { %5253 = vsyncpa [#allocation11], 1 }
 0xfa1   :  { %5254 = vsyncpa [#allocation14], 1 }
 0xfa2   :  { %5255 = vsyncpa [#allocation12], 1 }
 0xfa3   :  { %5256 = vsyncmov [#allocation9] }
 0xfa6   :  { %s5257_s13 = vpop.sfrf %5256 }
 0xfa7   :  { %p5330_p0 = scmp.ne.s32.totalorder %s5257_s13, 0 }
 0xfa9   :  { %5261 = shalt.err (%p5330_p0)  }
 0xfaa   :  { %5263 = vsyncmov [#allocation9 + $0x1] }
 0xfad   :  { %s5264_s9 = vpop.sfrf %5263 }
 0xfae   :  { %p5331_p1 = scmp.ne.s32.totalorder %s5264_s9, 0 }
 0xfb0   :  { %5268 = shalt.err (%p5331_p1)  }
 0xfb1   :  { %5270 = vsyncmov [#allocation9 + $0x2] }
 0xfb4   :  { %s5271_s10 = vpop.sfrf %5270 }
 0xfb5   :  { %p5332_p2 = scmp.ne.s32.totalorder %s5271_s10, 0 }
 0xfb7   :  { %5275 = shalt.err (%p5332_p2)  }

</bundles_post_ra>
